<compile_context>
chip_gen: v6e
topology: v6e:2x2x1
jax: 0.10.0
libtpu: 0.0.40
codegen_flags: <defaults>
</compile_context>

<pallas_src>
import functools
import numpy as np
import jax
import jax.numpy as jnp
from jax.experimental import pallas as pl
from jax.experimental.pallas import tpu as pltpu

_VMEM_LIMIT = 32 * 1024 * 1024   # safe on v5e/v6e/v7x; tiles below use ~5 MiB


def _round_up(x, m):
    return ((x + m - 1) // m) * m


# ---------------------------------------------------------------------------
# Tiled GEMM (+bias, +activation) kernel — all convs / deconvs go through this
# ---------------------------------------------------------------------------
def _apply_act(y, act):
    if act == "sigmoid":
        return jax.nn.sigmoid(y)
    return y


def _mm_kernel(a_ref, b_ref, o_ref, acc_ref, *, act):
    @pl.when(pl.program_id(2) == 0)
    def _():
        acc_ref[...] = jnp.zeros_like(acc_ref)

    acc_ref[...] += jnp.dot(a_ref[...], b_ref[...],
                            preferred_element_type=jnp.float32)

    @pl.when(pl.program_id(2) == pl.num_programs(2) - 1)
    def _():
        o_ref[...] = _apply_act(acc_ref[...], act).astype(o_ref.dtype)


def _mm_bias_kernel(a_ref, b_ref, bias_ref, o_ref, acc_ref, *, act):
    @pl.when(pl.program_id(2) == 0)
    def _():
        acc_ref[...] = jnp.zeros_like(acc_ref)

    acc_ref[...] += jnp.dot(a_ref[...], b_ref[...],
                            preferred_element_type=jnp.float32)

    @pl.when(pl.program_id(2) == pl.num_programs(2) - 1)
    def _():
        o_ref[...] = _apply_act(acc_ref[...] + bias_ref[...],
                                act).astype(o_ref.dtype)


def matmul_fused(a, b, bias=None, act=None, tm_max=512, tn_max=256, tk_max=1152):
    """(M, K) @ (K, N) [+ bias] [+ activation] -> f32 (M, N).

    bf16 MXU operands, f32 accumulation, tiled / double-buffered via BlockSpecs.
    M/N/K are zero-padded up to tile multiples (zeros in K are harmless) and
    the result is sliced back.
    """
    M, K = a.shape
    K2, N = b.shape
    assert K == K2
    tm = min(tm_max, _round_up(M, 8))      # second-minor: multiple of 8
    tn = min(tn_max, _round_up(N, 128))    # minor: multiple of 128 (lane-dense)
    tk = min(tk_max, _round_up(K, 128))    # minor of A / second-minor of B
    Mp, Np, Kp = _round_up(M, tm), _round_up(N, tn), _round_up(K, tk)

    a_p = a if (Mp, Kp) == (M, K) else jnp.pad(a, ((0, Mp - M), (0, Kp - K)))
    b_p = b if (Kp, Np) == (K, N) else jnp.pad(b, ((0, Kp - K), (0, Np - N)))
    a_p = a_p.astype(jnp.bfloat16)
    b_p = b_p.astype(jnp.bfloat16)

    in_specs = [pl.BlockSpec((tm, tk), lambda i, j, k: (i, k)),
                pl.BlockSpec((tk, tn), lambda i, j, k: (k, j))]
    args = [a_p, b_p]
    if bias is not None:
        bias_p = bias.reshape(1, N).astype(jnp.float32)
        if Np != N:
            bias_p = jnp.pad(bias_p, ((0, 0), (0, Np - N)))
        in_specs.append(pl.BlockSpec((1, tn), lambda i, j, k: (0, j)))
        args.append(bias_p)
        kernel = functools.partial(_mm_bias_kernel, act=act)
    else:
        kernel = functools.partial(_mm_kernel, act=act)

    out = pl.pallas_call(
        kernel,
        out_shape=jax.ShapeDtypeStruct((Mp, Np), jnp.float32),
        grid=(Mp // tm, Np // tn, Kp // tk),
        in_specs=in_specs,
        out_specs=pl.BlockSpec((tm, tn), lambda i, j, k: (i, j)),
        scratch_shapes=[pltpu.VMEM((tm, tn), jnp.float32)],
        compiler_params=pltpu.CompilerParams(
            dimension_semantics=("parallel", "parallel", "arbitrary"),
            vmem_limit_bytes=_VMEM_LIMIT),
    )(*args)

    if (Mp, Np) != (M, N):
        out = out[:M, :N]
    return out


# ---------------------------------------------------------------------------
# Single-pass tiled InstanceNorm (+ReLU / +residual add) — VPU kernel
# ---------------------------------------------------------------------------
def _instnorm_kernel(x_ref, o_ref, *, relu, inv_hw):
    x = x_ref[...]                                   # (1, HW, c_tile) f32
    s = jnp.sum(x, axis=1, keepdims=True)
    ss = jnp.sum(x * x, axis=1, keepdims=True)
    mean = s * inv_hw
    var = jnp.maximum(ss * inv_hw - mean * mean, 0.0)
    y = (x - mean) * jax.lax.rsqrt(var + 1e-5)
    if relu:
        y = jnp.maximum(y, 0.0)
    o_ref[...] = y


def _instnorm_add_kernel(x_ref, res_ref, o_ref, *, inv_hw):
    x = x_ref[...]
    s = jnp.sum(x, axis=1, keepdims=True)
    ss = jnp.sum(x * x, axis=1, keepdims=True)
    mean = s * inv_hw
    var = jnp.maximum(ss * inv_hw - mean * mean, 0.0)
    y = (x - mean) * jax.lax.rsqrt(var + 1e-5)
    o_ref[...] = res_ref[...] + y


def instance_norm(x_nhwc, relu=False, residual=None):
    """InstanceNorm2d(eps=1e-5, affine=False, biased var) + ReLU / residual."""
    N, H, W, C = x_nhwc.shape
    HW = H * W
    ct = C if C <= 128 else 128          # lane dim must be mult of 128 or full
    assert C % ct == 0
    x3 = x_nhwc.reshape(N, HW, C).astype(jnp.float32)
    spec = pl.BlockSpec((1, HW, ct), lambda n, c: (n, 0, c))
    common = dict(
        out_shape=jax.ShapeDtypeStruct((N, HW, C), jnp.float32),
        grid=(N, C // ct),
        out_specs=spec,
        compiler_params=pltpu.CompilerParams(
            dimension_semantics=("parallel", "parallel"),
            vmem_limit_bytes=_VMEM_LIMIT),
    )
    if residual is None:
        out = pl.pallas_call(
            functools.partial(_instnorm_kernel, relu=relu, inv_hw=1.0 / HW),
            in_specs=[spec], **common)(x3)
    else:
        r3 = residual.reshape(N, HW, C).astype(jnp.float32)
        out = pl.pallas_call(
            functools.partial(_instnorm_add_kernel, inv_hw=1.0 / HW),
            in_specs=[spec, spec], **common)(x3, r3)
    return out.reshape(N, H, W, C)


# ---------------------------------------------------------------------------
# Conv glue (padding / patch extraction in JAX; GEMM in Pallas)
# ---------------------------------------------------------------------------
def conv2d(x_nhwc, w, b=None, stride=1, pad=0, pad_mode="constant", act=None):
    """w: PyTorch layout (C_out, C_in, kh, kw). bf16 im2col + Pallas GEMM."""
    if pad > 0:
        x_nhwc = jnp.pad(x_nhwc, ((0, 0), (pad, pad), (pad, pad), (0, 0)),
                         mode=pad_mode)
    x_nhwc = x_nhwc.astype(jnp.bfloat16)      # halves im2col HBM footprint
    N, H, W, C = x_nhwc.shape
    c_out, c_in, kh, kw = w.shape
    Ho = (H - kh) // stride + 1
    Wo = (W - kw) // stride + 1
    # TODO(synk): replace the materialized im2col below with a true
    # implicit-GEMM conv (halo-DMA input tiles + in-kernel tap loop) to remove
    # the kh*kw x HBM-traffic blow-up entirely.
    cols = [x_nhwc[:, i:i + stride * (Ho - 1) + 1:stride,
                   j:j + stride * (Wo - 1) + 1:stride, :]
            for i in range(kh) for j in range(kw)]
    patches = jnp.concatenate(cols, axis=-1).reshape(N * Ho * Wo, kh * kw * c_in)
    wmat = jnp.transpose(w, (2, 3, 1, 0)).reshape(kh * kw * c_in, c_out)
    out = matmul_fused(patches, wmat.astype(jnp.bfloat16), bias=b, act=act)
    return out.reshape(N, Ho, Wo, c_out)


def conv_transpose2d(x_nhwc, w_t, b=None):
    """PyTorch ConvTranspose2d(k=3, stride=2, padding=1, output_padding=1).
    w_t layout (C_in, C_out, 3, 3). Decomposed into 4 dense sub-kernel GEMMs
    on the UNdilated input, outputs interleaved by pixel shuffle."""
    N, H, W, C = x_nhwc.shape
    c_in, c_out, k, _ = w_t.shape
    assert k == 3 and c_in == C
    xp = jnp.pad(x_nhwc, ((0, 0), (0, 1), (0, 1), (0, 0))).astype(jnp.bfloat16)

    # out[2m + p]: parity p=0 uses x[m] with kernel index 1;
    #              parity p=1 uses x[m] with index 2 and x[m+1] with index 0.
    def _taps(p):
        return ((0, 1),) if p == 0 else ((0, 2), (1, 0))

    subs = []
    for ph in range(2):
        row = []
        for pw in range(2):
            cols, wparts = [], []
            for dh, r in _taps(ph):
                for dw, s in _taps(pw):
                    cols.append(xp[:, dh:dh + H, dw:dw + W, :])
                    wparts.append(w_t[:, :, r, s])            # (C_in, C_out)
            patches = jnp.concatenate(cols, axis=-1).reshape(
                N * H * W, len(cols) * c_in)
            wmat = jnp.concatenate(wparts, axis=0).astype(jnp.bfloat16)
            sub = matmul_fused(patches, wmat, bias=b)
            row.append(sub.reshape(N, H, W, c_out))
        subs.append(row)

    y = jnp.stack([jnp.stack(r, axis=0) for r in subs], axis=0)  # (2,2,N,H,W,Co)
    y = jnp.transpose(y, (2, 3, 0, 4, 1, 5)).reshape(N, 2 * H, 2 * W, c_out)
    return y


# ---------------------------------------------------------------------------
# Deterministic parameter init (PyTorch-style uniform bounds, fixed PRNG key)
# ---------------------------------------------------------------------------
def _conv_params(key, c_out, c_in, k):
    kw_, kb_ = jax.random.split(key)
    bound = 1.0 / np.sqrt(c_in * k * k)
    w = jax.random.uniform(kw_, (c_out, c_in, k, k), jnp.float32, -bound, bound)
    b = jax.random.uniform(kb_, (c_out,), jnp.float32, -bound, bound)
    return w, b


def _deconv_params(key, c_in, c_out, k):
    kw_, kb_ = jax.random.split(key)
    bound = 1.0 / np.sqrt(c_out * k * k)
    w = jax.random.uniform(kw_, (c_in, c_out, k, k), jnp.float32, -bound, bound)
    b = jax.random.uniform(kb_, (c_out,), jnp.float32, -bound, bound)
    return w, b


def init_generator_params(key, input_nc, output_nc, n_res=9):
    keys = jax.random.split(key, 6 + 2 * n_res)
    params = {}
    params["m0"] = _conv_params(keys[0], 64, input_nc, 7)
    params["m1_0"] = _conv_params(keys[1], 128, 64, 3)
    params["m1_1"] = _conv_params(keys[2], 256, 128, 3)
    params["res"] = []
    for i in range(n_res):
        w1, b1 = _conv_params(keys[3 + 2 * i], 256, 256, 3)
        w2, b2 = _conv_params(keys[4 + 2 * i], 256, 256, 3)
        params["res"].append((w1, b1, w2, b2))
    params["m3_0"] = _deconv_params(keys[3 + 2 * n_res], 256, 128, 3)
    params["m3_1"] = _deconv_params(keys[4 + 2 * n_res], 128, 64, 3)
    params["m4"] = _conv_params(keys[5 + 2 * n_res], output_nc, 64, 7)
    return params


# ---------------------------------------------------------------------------
# Generator forward (matches the PyTorch module semantics)
# ---------------------------------------------------------------------------
def generator_forward(x_nchw, params, n_res=9, use_sigmoid=True):
    h = jnp.transpose(x_nchw, (0, 2, 3, 1)).astype(jnp.float32)  # NCHW -> NHWC

    # model0: ReflectionPad(3) -> Conv7 -> InstanceNorm -> ReLU
    # (conv bias dropped: InstanceNorm(affine=False) cancels it exactly)
    w, _ = params["m0"]
    h = conv2d(h, w, b=None, stride=1, pad=3, pad_mode="reflect")
    h = instance_norm(h, relu=True)

    # model1: 2x [Conv3 s2 p1 -> InstanceNorm -> ReLU]
    for name in ("m1_0", "m1_1"):
        w, _ = params[name]
        h = conv2d(h, w, b=None, stride=2, pad=1)
        h = instance_norm(h, relu=True)

    # model2: residual blocks
    for (w1, _b1, w2, _b2) in params["res"][:n_res]:
        r = conv2d(h, w1, b=None, stride=1, pad=1, pad_mode="reflect")
        r = instance_norm(r, relu=True)
        r = conv2d(r, w2, b=None, stride=1, pad=1, pad_mode="reflect")
        h = instance_norm(r, residual=h)     # x + InstanceNorm(conv_block(x))

    # model3: 2x [ConvTranspose3 s2 p1 op1 -> InstanceNorm -> ReLU]
    for name in ("m3_0", "m3_1"):
        w, _ = params[name]
        h = conv_transpose2d(h, w, b=None)
        h = instance_norm(h, relu=True)

    # model4: ReflectionPad(3) -> Conv7 (+bias) -> Sigmoid (fused GEMM epilogue)
    w, b = params["m4"]
    h = conv2d(h, w, b=b, stride=1, pad=3, pad_mode="reflect",
               act="sigmoid" if use_sigmoid else None)

    return jnp.transpose(h, (0, 3, 1, 2))    # NHWC -> NCHW


if __name__ == "__main__":
    key = jax.random.PRNGKey(0)
    pkey, xkey = jax.random.split(key)

    input_nc, output_nc, n_res = 3, 1, 9
    params = init_generator_params(pkey, input_nc, output_nc, n_res=n_res)

    x = jax.random.normal(xkey, (2, input_nc, 16, 16), jnp.float32)  # NCHW

    fwd = jax.jit(functools.partial(generator_forward,
                                    n_res=n_res, use_sigmoid=True))
    out = fwd(x, params)
    jax.block_until_ready(out)

    assert out.shape == (2, output_nc, 16, 16), out.shape
    assert bool(jnp.all(jnp.isfinite(out)))
    assert bool(jnp.all((out >= 0.0) & (out <= 1.0)))  # sigmoid output range
    print("KERNEL_OK")
</pallas_src>

<mosaic_0001>
module attributes {stable_mosaic.version = 11 : i64} {
  func.func @_instnorm_kernel(%arg0: i32, %arg1: i32, %arg2: memref<1x256x64xf32, #tpu.memory_space<vmem>>, %arg3: memref<1x256x64xf32, #tpu.memory_space<vmem>>) attributes {dimension_semantics = [#tpu.dimension_semantics<parallel>, #tpu.dimension_semantics<parallel>], iteration_bounds = array<i64: 2, 1>, scalar_prefetch = 0 : i64, scratch_operands = 0 : i64, tpu.core_type = #tpu.core_type<tc>, window_params = [{transform_indices = @transform_0, window_bounds = array<i64: 1, 256, 64>}, {transform_indices = @transform_1, window_bounds = array<i64: 1, 256, 64>}]} {
    %c0 = arith.constant 0 : index
    %c0_0 = arith.constant 0 : index
    %c0_1 = arith.constant 0 : index
    %0 = vector.load %arg2[%c0, %c0_0, %c0_1] : memref<1x256x64xf32, #tpu.memory_space<vmem>>, vector<1x256x64xf32>
    %cst = arith.constant dense<0.000000e+00> : vector<1x64xf32>
    %1 = vector.multi_reduction <add>, %0, %cst [1] : vector<1x256x64xf32> to vector<1x64xf32>
    %2 = vector.shape_cast %1 : vector<1x64xf32> to vector<1x1x64xf32>
    %3 = arith.mulf %0, %0 : vector<1x256x64xf32>
    %cst_2 = arith.constant dense<0.000000e+00> : vector<1x64xf32>
    %4 = vector.multi_reduction <add>, %3, %cst_2 [1] : vector<1x256x64xf32> to vector<1x64xf32>
    %5 = vector.shape_cast %4 : vector<1x64xf32> to vector<1x1x64xf32>
    %cst_3 = arith.constant 3.906250e-03 : f32
    %6 = vector.broadcast %cst_3 : f32 to vector<1x1x64xf32>
    %7 = arith.mulf %2, %6 : vector<1x1x64xf32>
    %cst_4 = arith.constant 3.906250e-03 : f32
    %8 = vector.broadcast %cst_4 : f32 to vector<1x1x64xf32>
    %9 = arith.mulf %5, %8 : vector<1x1x64xf32>
    %10 = arith.mulf %7, %7 : vector<1x1x64xf32>
    %11 = arith.subf %9, %10 : vector<1x1x64xf32>
    %cst_5 = arith.constant 0.000000e+00 : f32
    %12 = vector.broadcast %cst_5 : f32 to vector<1x1x64xf32>
    %13 = arith.maximumf %11, %12 : vector<1x1x64xf32>
    %14 = vector.broadcast %7 : vector<1x1x64xf32> to vector<1x256x64xf32>
    %15 = arith.subf %0, %14 : vector<1x256x64xf32>
    %cst_6 = arith.constant 9.99999974E-6 : f32
    %16 = vector.broadcast %cst_6 : f32 to vector<1x1x64xf32>
    %17 = arith.addf %13, %16 : vector<1x1x64xf32>
    %18 = math.rsqrt %17 : vector<1x1x64xf32>
    %19 = vector.broadcast %18 : vector<1x1x64xf32> to vector<1x256x64xf32>
    %20 = arith.mulf %15, %19 : vector<1x256x64xf32>
    %cst_7 = arith.constant 0.000000e+00 : f32
    %21 = vector.broadcast %cst_7 : f32 to vector<1x256x64xf32>
    %22 = arith.maximumf %20, %21 : vector<1x256x64xf32>
    %c0_8 = arith.constant 0 : index
    %c0_9 = arith.constant 0 : index
    %c0_10 = arith.constant 0 : index
    %23 = vector.load %arg3[%c0_8, %c0_9, %c0_10] : memref<1x256x64xf32, #tpu.memory_space<vmem>>, vector<1x256x64xf32>
    tpu.vector_store %arg3[%c0_8, %c0_9, %c0_10], %22 {strides = array<i32>} : memref<1x256x64xf32, #tpu.memory_space<vmem>>, vector<1x256x64xf32>,
    return
  }
  func.func @transform_0(%arg0: i32, %arg1: i32) -> (i32, i32, i32) {
    %c0_i32 = arith.constant 0 : i32
    %c0_i32_0 = arith.constant 0 : i32
    return %arg0, %c0_i32, %arg1 : i32, i32, i32
  }
  func.func @transform_1(%arg0: i32, %arg1: i32) -> (i32, i32, i32) {
    %c0_i32 = arith.constant 0 : i32
    %c0_i32_0 = arith.constant 0 : i32
    return %arg0, %c0_i32, %arg1 : i32, i32, i32
  }
}

module attributes {stable_mosaic.version = 11 : i64} {
  func.func @_mm_kernel(%arg0: i32, %arg1: i32, %arg2: i32, %arg3: memref<512x256xbf16, #tpu.memory_space<vmem>>, %arg4: memref<256x128xbf16, #tpu.memory_space<vmem>>, %arg5: memref<512x128xf32, #tpu.memory_space<vmem>>, %arg6: memref<512x128xf32, #tpu.memory_space<vmem>>) attributes {dimension_semantics = [#tpu.dimension_semantics<parallel>, #tpu.dimension_semantics<parallel>, #tpu.dimension_semantics<arbitrary>], iteration_bounds = array<i64: 1, 1, 1>, scalar_prefetch = 0 : i64, scratch_operands = 1 : i64, tpu.core_type = #tpu.core_type<tc>, window_params = [{transform_indices = @transform_0, window_bounds = array<i64: 512, 256>}, {transform_indices = @transform_1, window_bounds = array<i64: 256, 128>}, {transform_indices = @transform_2, window_bounds = array<i64: 512, 128>}]} {
    %c0_i32 = arith.constant 0 : i32
    %0 = arith.cmpi eq, %arg2, %c0_i32 : i32
    %1 = arith.extui %0 : i1 to i32
    %c0_i32_0 = arith.constant 0 : i32
    %2 = arith.cmpi ne, %1, %c0_i32_0 : i32
    scf.if %2 {
      %cst_10 = arith.constant 0.000000e+00 : f32
      %12 = vector.broadcast %cst_10 : f32 to vector<512x128xf32>
      %c0_11 = arith.constant 0 : index
      %c0_12 = arith.constant 0 : index
      %13 = vector.load %arg6[%c0_11, %c0_12] : memref<512x128xf32, #tpu.memory_space<vmem>>, vector<512x128xf32>
      tpu.vector_store %arg6[%c0_11, %c0_12], %12 {strides = array<i32>} : memref<512x128xf32, #tpu.memory_space<vmem>>, vector<512x128xf32>,
    } else {
    }
    %c0 = arith.constant 0 : index
    %c0_1 = arith.constant 0 : index
    %3 = vector.load %arg6[%c0, %c0_1] : memref<512x128xf32, #tpu.memory_space<vmem>>, vector<512x128xf32>
    %c0_2 = arith.constant 0 : index
    %c0_3 = arith.constant 0 : index
    %4 = vector.load %arg3[%c0_2, %c0_3] : memref<512x256xbf16, #tpu.memory_space<vmem>>, vector<512x256xbf16>
    %c0_4 = arith.constant 0 : index
    %c0_5 = arith.constant 0 : index
    %5 = vector.load %arg4[%c0_4, %c0_5] : memref<256x128xbf16, #tpu.memory_space<vmem>>, vector<256x128xbf16>
    %cst = arith.constant dense<0.000000e+00> : vector<512x128xf32>
    %6 = tpu.matmul %4, %5, %cst {dimension_numbers = #tpu.dot_dimension_numbers<[1], [0], [0], [1], [0, 0, 1, 1], [], []>} : vector<512x256xbf16>, vector<256x128xbf16>, vector<512x128xf32> -> vector<512x128xf32>
    %7 = arith.addf %3, %6 : vector<512x128xf32>
    %c0_6 = arith.constant 0 : index
    %c0_7 = arith.constant 0 : index
    %8 = vector.load %arg6[%c0_6, %c0_7] : memref<512x128xf32, #tpu.memory_space<vmem>>, vector<512x128xf32>
    tpu.vector_store %arg6[%c0_6, %c0_7], %7 {strides = array<i32>} : memref<512x128xf32, #tpu.memory_space<vmem>>, vector<512x128xf32>,
    %c0_i32_8 = arith.constant 0 : i32
    %9 = arith.cmpi eq, %arg2, %c0_i32_8 : i32
    %10 = arith.extui %9 : i1 to i32
    %c0_i32_9 = arith.constant 0 : i32
    %11 = arith.cmpi ne, %10, %c0_i32_9 : i32
    scf.if %11 {
      %c0_10 = arith.constant 0 : index
      %c0_11 = arith.constant 0 : index
      %12 = vector.load %arg6[%c0_10, %c0_11] : memref<512x128xf32, #tpu.memory_space<vmem>>, vector<512x128xf32>
      %c0_12 = arith.constant 0 : index
      %c0_13 = arith.constant 0 : index
      %13 = vector.load %arg5[%c0_12, %c0_13] : memref<512x128xf32, #tpu.memory_space<vmem>>, vector<512x128xf32>
      tpu.vector_store %arg5[%c0_12, %c0_13], %12 {strides = array<i32>} : memref<512x128xf32, #tpu.memory_space<vmem>>, vector<512x128xf32>,
    } else {
    }
    return
  }
  func.func @transform_0(%arg0: i32, %arg1: i32, %arg2: i32) -> (i32, i32) {
    %c0_i32 = arith.constant 0 : i32
    return %arg0, %arg2 : i32, i32
  }
  func.func @transform_1(%arg0: i32, %arg1: i32, %arg2: i32) -> (i32, i32) {
    %c0_i32 = arith.constant 0 : i32
    return %arg2, %arg1 : i32, i32
  }
  func.func @transform_2(%arg0: i32, %arg1: i32, %arg2: i32) -> (i32, i32) {
    %c0_i32 = arith.constant 0 : i32
    return %arg0, %arg1 : i32, i32
  }
}

module attributes {stable_mosaic.version = 11 : i64} {
  func.func @_mm_kernel(%arg0: i32, %arg1: i32, %arg2: i32, %arg3: memref<128x640xbf16, #tpu.memory_space<vmem>>, %arg4: memref<640x128xbf16, #tpu.memory_space<vmem>>, %arg5: memref<128x128xf32, #tpu.memory_space<vmem>>, %arg6: memref<128x128xf32, #tpu.memory_space<vmem>>) attributes {dimension_semantics = [#tpu.dimension_semantics<parallel>, #tpu.dimension_semantics<parallel>, #tpu.dimension_semantics<arbitrary>], iteration_bounds = array<i64: 1, 1, 1>, scalar_prefetch = 0 : i64, scratch_operands = 1 : i64, tpu.core_type = #tpu.core_type<tc>, window_params = [{transform_indices = @transform_0, window_bounds = array<i64: 128, 640>}, {transform_indices = @transform_1, window_bounds = array<i64: 640, 128>}, {transform_indices = @transform_2, window_bounds = array<i64: 128, 128>}]} {
    %c0_i32 = arith.constant 0 : i32
    %0 = arith.cmpi eq, %arg2, %c0_i32 : i32
    %1 = arith.extui %0 : i1 to i32
    %c0_i32_0 = arith.constant 0 : i32
    %2 = arith.cmpi ne, %1, %c0_i32_0 : i32
    scf.if %2 {
      %cst_10 = arith.constant 0.000000e+00 : f32
      %12 = vector.broadcast %cst_10 : f32 to vector<128x128xf32>
      %c0_11 = arith.constant 0 : index
      %c0_12 = arith.constant 0 : index
      %13 = vector.load %arg6[%c0_11, %c0_12] : memref<128x128xf32, #tpu.memory_space<vmem>>, vector<128x128xf32>
      tpu.vector_store %arg6[%c0_11, %c0_12], %12 {strides = array<i32>} : memref<128x128xf32, #tpu.memory_space<vmem>>, vector<128x128xf32>,
    } else {
    }
    %c0 = arith.constant 0 : index
    %c0_1 = arith.constant 0 : index
    %3 = vector.load %arg6[%c0, %c0_1] : memref<128x128xf32, #tpu.memory_space<vmem>>, vector<128x128xf32>
    %c0_2 = arith.constant 0 : index
    %c0_3 = arith.constant 0 : index
    %4 = vector.load %arg3[%c0_2, %c0_3] : memref<128x640xbf16, #tpu.memory_space<vmem>>, vector<128x640xbf16>
    %c0_4 = arith.constant 0 : index
    %c0_5 = arith.constant 0 : index
    %5 = vector.load %arg4[%c0_4, %c0_5] : memref<640x128xbf16, #tpu.memory_space<vmem>>, vector<640x128xbf16>
    %cst = arith.constant dense<0.000000e+00> : vector<128x128xf32>
    %6 = tpu.matmul %4, %5, %cst {dimension_numbers = #tpu.dot_dimension_numbers<[1], [0], [0], [1], [0, 0, 1, 1], [], []>} : vector<128x640xbf16>, vector<640x128xbf16>, vector<128x128xf32> -> vector<128x128xf32>
    %7 = arith.addf %3, %6 : vector<128x128xf32>
    %c0_6 = arith.constant 0 : index
    %c0_7 = arith.constant 0 : index
    %8 = vector.load %arg6[%c0_6, %c0_7] : memref<128x128xf32, #tpu.memory_space<vmem>>, vector<128x128xf32>
    tpu.vector_store %arg6[%c0_6, %c0_7], %7 {strides = array<i32>} : memref<128x128xf32, #tpu.memory_space<vmem>>, vector<128x128xf32>,
    %c0_i32_8 = arith.constant 0 : i32
    %9 = arith.cmpi eq, %arg2, %c0_i32_8 : i32
    %10 = arith.extui %9 : i1 to i32
    %c0_i32_9 = arith.constant 0 : i32
    %11 = arith.cmpi ne, %10, %c0_i32_9 : i32
    scf.if %11 {
      %c0_10 = arith.constant 0 : index
      %c0_11 = arith.constant 0 : index
      %12 = vector.load %arg6[%c0_10, %c0_11] : memref<128x128xf32, #tpu.memory_space<vmem>>, vector<128x128xf32>
      %c0_12 = arith.constant 0 : index
      %c0_13 = arith.constant 0 : index
      %13 = vector.load %arg5[%c0_12, %c0_13] : memref<128x128xf32, #tpu.memory_space<vmem>>, vector<128x128xf32>
      tpu.vector_store %arg5[%c0_12, %c0_13], %12 {strides = array<i32>} : memref<128x128xf32, #tpu.memory_space<vmem>>, vector<128x128xf32>,
    } else {
    }
    return
  }
  func.func @transform_0(%arg0: i32, %arg1: i32, %arg2: i32) -> (i32, i32) {
    %c0_i32 = arith.constant 0 : i32
    return %arg0, %arg2 : i32, i32
  }
  func.func @transform_1(%arg0: i32, %arg1: i32, %arg2: i32) -> (i32, i32) {
    %c0_i32 = arith.constant 0 : i32
    return %arg2, %arg1 : i32, i32
  }
  func.func @transform_2(%arg0: i32, %arg1: i32, %arg2: i32) -> (i32, i32) {
    %c0_i32 = arith.constant 0 : i32
    return %arg0, %arg1 : i32, i32
  }
}

module attributes {stable_mosaic.version = 11 : i64} {
  func.func @_instnorm_kernel(%arg0: i32, %arg1: i32, %arg2: memref<1x64x128xf32, #tpu.memory_space<vmem>>, %arg3: memref<1x64x128xf32, #tpu.memory_space<vmem>>) attributes {dimension_semantics = [#tpu.dimension_semantics<parallel>, #tpu.dimension_semantics<parallel>], iteration_bounds = array<i64: 2, 1>, scalar_prefetch = 0 : i64, scratch_operands = 0 : i64, tpu.core_type = #tpu.core_type<tc>, window_params = [{transform_indices = @transform_0, window_bounds = array<i64: 1, 64, 128>}, {transform_indices = @transform_1, window_bounds = array<i64: 1, 64, 128>}]} {
    %c0 = arith.constant 0 : index
    %c0_0 = arith.constant 0 : index
    %c0_1 = arith.constant 0 : index
    %0 = vector.load %arg2[%c0, %c0_0, %c0_1] : memref<1x64x128xf32, #tpu.memory_space<vmem>>, vector<1x64x128xf32>
    %cst = arith.constant dense<0.000000e+00> : vector<1x128xf32>
    %1 = vector.multi_reduction <add>, %0, %cst [1] : vector<1x64x128xf32> to vector<1x128xf32>
    %2 = vector.shape_cast %1 : vector<1x128xf32> to vector<1x1x128xf32>
    %3 = arith.mulf %0, %0 : vector<1x64x128xf32>
    %cst_2 = arith.constant dense<0.000000e+00> : vector<1x128xf32>
    %4 = vector.multi_reduction <add>, %3, %cst_2 [1] : vector<1x64x128xf32> to vector<1x128xf32>
    %5 = vector.shape_cast %4 : vector<1x128xf32> to vector<1x1x128xf32>
    %cst_3 = arith.constant 1.562500e-02 : f32
    %6 = vector.broadcast %cst_3 : f32 to vector<1x1x128xf32>
    %7 = arith.mulf %2, %6 : vector<1x1x128xf32>
    %cst_4 = arith.constant 1.562500e-02 : f32
    %8 = vector.broadcast %cst_4 : f32 to vector<1x1x128xf32>
    %9 = arith.mulf %5, %8 : vector<1x1x128xf32>
    %10 = arith.mulf %7, %7 : vector<1x1x128xf32>
    %11 = arith.subf %9, %10 : vector<1x1x128xf32>
    %cst_5 = arith.constant 0.000000e+00 : f32
    %12 = vector.broadcast %cst_5 : f32 to vector<1x1x128xf32>
    %13 = arith.maximumf %11, %12 : vector<1x1x128xf32>
    %14 = vector.broadcast %7 : vector<1x1x128xf32> to vector<1x64x128xf32>
    %15 = arith.subf %0, %14 : vector<1x64x128xf32>
    %cst_6 = arith.constant 9.99999974E-6 : f32
    %16 = vector.broadcast %cst_6 : f32 to vector<1x1x128xf32>
    %17 = arith.addf %13, %16 : vector<1x1x128xf32>
    %18 = math.rsqrt %17 : vector<1x1x128xf32>
    %19 = vector.broadcast %18 : vector<1x1x128xf32> to vector<1x64x128xf32>
    %20 = arith.mulf %15, %19 : vector<1x64x128xf32>
    %cst_7 = arith.constant 0.000000e+00 : f32
    %21 = vector.broadcast %cst_7 : f32 to vector<1x64x128xf32>
    %22 = arith.maximumf %20, %21 : vector<1x64x128xf32>
    %c0_8 = arith.constant 0 : index
    %c0_9 = arith.constant 0 : index
    %c0_10 = arith.constant 0 : index
    %23 = vector.load %arg3[%c0_8, %c0_9, %c0_10] : memref<1x64x128xf32, #tpu.memory_space<vmem>>, vector<1x64x128xf32>
    tpu.vector_store %arg3[%c0_8, %c0_9, %c0_10], %22 {strides = array<i32>} : memref<1x64x128xf32, #tpu.memory_space<vmem>>, vector<1x64x128xf32>,
    return
  }
  func.func @transform_0(%arg0: i32, %arg1: i32) -> (i32, i32, i32) {
    %c0_i32 = arith.constant 0 : i32
    %c0_i32_0 = arith.constant 0 : i32
    return %arg0, %c0_i32, %arg1 : i32, i32, i32
  }
  func.func @transform_1(%arg0: i32, %arg1: i32) -> (i32, i32, i32) {
    %c0_i32 = arith.constant 0 : i32
    %c0_i32_0 = arith.constant 0 : i32
    return %arg0, %c0_i32, %arg1 : i32, i32, i32
  }
}

module attributes {stable_mosaic.version = 11 : i64} {
  func.func @_mm_kernel(%arg0: i32, %arg1: i32, %arg2: i32, %arg3: memref<32x1152xbf16, #tpu.memory_space<vmem>>, %arg4: memref<1152x256xbf16, #tpu.memory_space<vmem>>, %arg5: memref<32x256xf32, #tpu.memory_space<vmem>>, %arg6: memref<32x256xf32, #tpu.memory_space<vmem>>) attributes {dimension_semantics = [#tpu.dimension_semantics<parallel>, #tpu.dimension_semantics<parallel>, #tpu.dimension_semantics<arbitrary>], iteration_bounds = array<i64: 1, 1, 1>, scalar_prefetch = 0 : i64, scratch_operands = 1 : i64, tpu.core_type = #tpu.core_type<tc>, window_params = [{transform_indices = @transform_0, window_bounds = array<i64: 32, 1152>}, {transform_indices = @transform_1, window_bounds = array<i64: 1152, 256>}, {transform_indices = @transform_2, window_bounds = array<i64: 32, 256>}]} {
    %c0_i32 = arith.constant 0 : i32
    %0 = arith.cmpi eq, %arg2, %c0_i32 : i32
    %1 = arith.extui %0 : i1 to i32
    %c0_i32_0 = arith.constant 0 : i32
    %2 = arith.cmpi ne, %1, %c0_i32_0 : i32
    scf.if %2 {
      %cst_10 = arith.constant 0.000000e+00 : f32
      %12 = vector.broadcast %cst_10 : f32 to vector<32x256xf32>
      %c0_11 = arith.constant 0 : index
      %c0_12 = arith.constant 0 : index
      %13 = vector.load %arg6[%c0_11, %c0_12] : memref<32x256xf32, #tpu.memory_space<vmem>>, vector<32x256xf32>
      tpu.vector_store %arg6[%c0_11, %c0_12], %12 {strides = array<i32>} : memref<32x256xf32, #tpu.memory_space<vmem>>, vector<32x256xf32>,
    } else {
    }
    %c0 = arith.constant 0 : index
    %c0_1 = arith.constant 0 : index
    %3 = vector.load %arg6[%c0, %c0_1] : memref<32x256xf32, #tpu.memory_space<vmem>>, vector<32x256xf32>
    %c0_2 = arith.constant 0 : index
    %c0_3 = arith.constant 0 : index
    %4 = vector.load %arg3[%c0_2, %c0_3] : memref<32x1152xbf16, #tpu.memory_space<vmem>>, vector<32x1152xbf16>
    %c0_4 = arith.constant 0 : index
    %c0_5 = arith.constant 0 : index
    %5 = vector.load %arg4[%c0_4, %c0_5] : memref<1152x256xbf16, #tpu.memory_space<vmem>>, vector<1152x256xbf16>
    %cst = arith.constant dense<0.000000e+00> : vector<32x256xf32>
    %6 = tpu.matmul %4, %5, %cst {dimension_numbers = #tpu.dot_dimension_numbers<[1], [0], [0], [1], [0, 0, 1, 1], [], []>} : vector<32x1152xbf16>, vector<1152x256xbf16>, vector<32x256xf32> -> vector<32x256xf32>
    %7 = arith.addf %3, %6 : vector<32x256xf32>
    %c0_6 = arith.constant 0 : index
    %c0_7 = arith.constant 0 : index
    %8 = vector.load %arg6[%c0_6, %c0_7] : memref<32x256xf32, #tpu.memory_space<vmem>>, vector<32x256xf32>
    tpu.vector_store %arg6[%c0_6, %c0_7], %7 {strides = array<i32>} : memref<32x256xf32, #tpu.memory_space<vmem>>, vector<32x256xf32>,
    %c0_i32_8 = arith.constant 0 : i32
    %9 = arith.cmpi eq, %arg2, %c0_i32_8 : i32
    %10 = arith.extui %9 : i1 to i32
    %c0_i32_9 = arith.constant 0 : i32
    %11 = arith.cmpi ne, %10, %c0_i32_9 : i32
    scf.if %11 {
      %c0_10 = arith.constant 0 : index
      %c0_11 = arith.constant 0 : index
      %12 = vector.load %arg6[%c0_10, %c0_11] : memref<32x256xf32, #tpu.memory_space<vmem>>, vector<32x256xf32>
      %c0_12 = arith.constant 0 : index
      %c0_13 = arith.constant 0 : index
      %13 = vector.load %arg5[%c0_12, %c0_13] : memref<32x256xf32, #tpu.memory_space<vmem>>, vector<32x256xf32>
      tpu.vector_store %arg5[%c0_12, %c0_13], %12 {strides = array<i32>} : memref<32x256xf32, #tpu.memory_space<vmem>>, vector<32x256xf32>,
    } else {
    }
    return
  }
  func.func @transform_0(%arg0: i32, %arg1: i32, %arg2: i32) -> (i32, i32) {
    %c0_i32 = arith.constant 0 : i32
    return %arg0, %arg2 : i32, i32
  }
  func.func @transform_1(%arg0: i32, %arg1: i32, %arg2: i32) -> (i32, i32) {
    %c0_i32 = arith.constant 0 : i32
    return %arg2, %arg1 : i32, i32
  }
  func.func @transform_2(%arg0: i32, %arg1: i32, %arg2: i32) -> (i32, i32) {
    %c0_i32 = arith.constant 0 : i32
    return %arg0, %arg1 : i32, i32
  }
}

module attributes {stable_mosaic.version = 11 : i64} {
  func.func @_instnorm_kernel(%arg0: i32, %arg1: i32, %arg2: memref<1x16x128xf32, #tpu.memory_space<vmem>>, %arg3: memref<1x16x128xf32, #tpu.memory_space<vmem>>) attributes {dimension_semantics = [#tpu.dimension_semantics<parallel>, #tpu.dimension_semantics<parallel>], iteration_bounds = array<i64: 2, 2>, scalar_prefetch = 0 : i64, scratch_operands = 0 : i64, tpu.core_type = #tpu.core_type<tc>, window_params = [{transform_indices = @transform_0, window_bounds = array<i64: 1, 16, 128>}, {transform_indices = @transform_1, window_bounds = array<i64: 1, 16, 128>}]} {
    %c0 = arith.constant 0 : index
    %c0_0 = arith.constant 0 : index
    %c0_1 = arith.constant 0 : index
    %0 = vector.load %arg2[%c0, %c0_0, %c0_1] : memref<1x16x128xf32, #tpu.memory_space<vmem>>, vector<1x16x128xf32>
    %cst = arith.constant dense<0.000000e+00> : vector<1x128xf32>
    %1 = vector.multi_reduction <add>, %0, %cst [1] : vector<1x16x128xf32> to vector<1x128xf32>
    %2 = vector.shape_cast %1 : vector<1x128xf32> to vector<1x1x128xf32>
    %3 = arith.mulf %0, %0 : vector<1x16x128xf32>
    %cst_2 = arith.constant dense<0.000000e+00> : vector<1x128xf32>
    %4 = vector.multi_reduction <add>, %3, %cst_2 [1] : vector<1x16x128xf32> to vector<1x128xf32>
    %5 = vector.shape_cast %4 : vector<1x128xf32> to vector<1x1x128xf32>
    %cst_3 = arith.constant 6.250000e-02 : f32
    %6 = vector.broadcast %cst_3 : f32 to vector<1x1x128xf32>
    %7 = arith.mulf %2, %6 : vector<1x1x128xf32>
    %cst_4 = arith.constant 6.250000e-02 : f32
    %8 = vector.broadcast %cst_4 : f32 to vector<1x1x128xf32>
    %9 = arith.mulf %5, %8 : vector<1x1x128xf32>
    %10 = arith.mulf %7, %7 : vector<1x1x128xf32>
    %11 = arith.subf %9, %10 : vector<1x1x128xf32>
    %cst_5 = arith.constant 0.000000e+00 : f32
    %12 = vector.broadcast %cst_5 : f32 to vector<1x1x128xf32>
    %13 = arith.maximumf %11, %12 : vector<1x1x128xf32>
    %14 = vector.broadcast %7 : vector<1x1x128xf32> to vector<1x16x128xf32>
    %15 = arith.subf %0, %14 : vector<1x16x128xf32>
    %cst_6 = arith.constant 9.99999974E-6 : f32
    %16 = vector.broadcast %cst_6 : f32 to vector<1x1x128xf32>
    %17 = arith.addf %13, %16 : vector<1x1x128xf32>
    %18 = math.rsqrt %17 : vector<1x1x128xf32>
    %19 = vector.broadcast %18 : vector<1x1x128xf32> to vector<1x16x128xf32>
    %20 = arith.mulf %15, %19 : vector<1x16x128xf32>
    %cst_7 = arith.constant 0.000000e+00 : f32
    %21 = vector.broadcast %cst_7 : f32 to vector<1x16x128xf32>
    %22 = arith.maximumf %20, %21 : vector<1x16x128xf32>
    %c0_8 = arith.constant 0 : index
    %c0_9 = arith.constant 0 : index
    %c0_10 = arith.constant 0 : index
    %23 = vector.load %arg3[%c0_8, %c0_9, %c0_10] : memref<1x16x128xf32, #tpu.memory_space<vmem>>, vector<1x16x128xf32>
    tpu.vector_store %arg3[%c0_8, %c0_9, %c0_10], %22 {strides = array<i32>} : memref<1x16x128xf32, #tpu.memory_space<vmem>>, vector<1x16x128xf32>,
    return
  }
  func.func @transform_0(%arg0: i32, %arg1: i32) -> (i32, i32, i32) {
    %c0_i32 = arith.constant 0 : i32
    %c0_i32_0 = arith.constant 0 : i32
    return %arg0, %c0_i32, %arg1 : i32, i32, i32
  }
  func.func @transform_1(%arg0: i32, %arg1: i32) -> (i32, i32, i32) {
    %c0_i32 = arith.constant 0 : i32
    %c0_i32_0 = arith.constant 0 : i32
    return %arg0, %c0_i32, %arg1 : i32, i32, i32
  }
}

module attributes {stable_mosaic.version = 11 : i64} {
  func.func @_mm_kernel(%arg0: i32, %arg1: i32, %arg2: i32, %arg3: memref<32x1152xbf16, #tpu.memory_space<vmem>>, %arg4: memref<1152x256xbf16, #tpu.memory_space<vmem>>, %arg5: memref<32x256xf32, #tpu.memory_space<vmem>>, %arg6: memref<32x256xf32, #tpu.memory_space<vmem>>) attributes {dimension_semantics = [#tpu.dimension_semantics<parallel>, #tpu.dimension_semantics<parallel>, #tpu.dimension_semantics<arbitrary>], iteration_bounds = array<i64: 1, 1, 2>, scalar_prefetch = 0 : i64, scratch_operands = 1 : i64, tpu.core_type = #tpu.core_type<tc>, window_params = [{transform_indices = @transform_0, window_bounds = array<i64: 32, 1152>}, {transform_indices = @transform_1, window_bounds = array<i64: 1152, 256>}, {transform_indices = @transform_2, window_bounds = array<i64: 32, 256>}]} {
    %c0_i32 = arith.constant 0 : i32
    %0 = arith.cmpi eq, %arg2, %c0_i32 : i32
    %1 = arith.extui %0 : i1 to i32
    %c0_i32_0 = arith.constant 0 : i32
    %2 = arith.cmpi ne, %1, %c0_i32_0 : i32
    scf.if %2 {
      %cst_9 = arith.constant 0.000000e+00 : f32
      %12 = vector.broadcast %cst_9 : f32 to vector<32x256xf32>
      %c0_10 = arith.constant 0 : index
      %c0_11 = arith.constant 0 : index
      %13 = vector.load %arg6[%c0_10, %c0_11] : memref<32x256xf32, #tpu.memory_space<vmem>>, vector<32x256xf32>
      tpu.vector_store %arg6[%c0_10, %c0_11], %12 {strides = array<i32>} : memref<32x256xf32, #tpu.memory_space<vmem>>, vector<32x256xf32>,
    } else {
    }
    %c0 = arith.constant 0 : index
    %c0_1 = arith.constant 0 : index
    %3 = vector.load %arg6[%c0, %c0_1] : memref<32x256xf32, #tpu.memory_space<vmem>>, vector<32x256xf32>
    %c0_2 = arith.constant 0 : index
    %c0_3 = arith.constant 0 : index
    %4 = vector.load %arg3[%c0_2, %c0_3] : memref<32x1152xbf16, #tpu.memory_space<vmem>>, vector<32x1152xbf16>
    %c0_4 = arith.constant 0 : index
    %c0_5 = arith.constant 0 : index
    %5 = vector.load %arg4[%c0_4, %c0_5] : memref<1152x256xbf16, #tpu.memory_space<vmem>>, vector<1152x256xbf16>
    %cst = arith.constant dense<0.000000e+00> : vector<32x256xf32>
    %6 = tpu.matmul %4, %5, %cst {dimension_numbers = #tpu.dot_dimension_numbers<[1], [0], [0], [1], [0, 0, 1, 1], [], []>} : vector<32x1152xbf16>, vector<1152x256xbf16>, vector<32x256xf32> -> vector<32x256xf32>
    %7 = arith.addf %3, %6 : vector<32x256xf32>
    %c0_6 = arith.constant 0 : index
    %c0_7 = arith.constant 0 : index
    %8 = vector.load %arg6[%c0_6, %c0_7] : memref<32x256xf32, #tpu.memory_space<vmem>>, vector<32x256xf32>
    tpu.vector_store %arg6[%c0_6, %c0_7], %7 {strides = array<i32>} : memref<32x256xf32, #tpu.memory_space<vmem>>, vector<32x256xf32>,
    %c1_i32 = arith.constant 1 : i32
    %9 = arith.cmpi eq, %arg2, %c1_i32 : i32
    %10 = arith.extui %9 : i1 to i32
    %c0_i32_8 = arith.constant 0 : i32
    %11 = arith.cmpi ne, %10, %c0_i32_8 : i32
    scf.if %11 {
      %c0_9 = arith.constant 0 : index
      %c0_10 = arith.constant 0 : index
      %12 = vector.load %arg6[%c0_9, %c0_10] : memref<32x256xf32, #tpu.memory_space<vmem>>, vector<32x256xf32>
      %c0_11 = arith.constant 0 : index
      %c0_12 = arith.constant 0 : index
      %13 = vector.load %arg5[%c0_11, %c0_12] : memref<32x256xf32, #tpu.memory_space<vmem>>, vector<32x256xf32>
      tpu.vector_store %arg5[%c0_11, %c0_12], %12 {strides = array<i32>} : memref<32x256xf32, #tpu.memory_space<vmem>>, vector<32x256xf32>,
    } else {
    }
    return
  }
  func.func @transform_0(%arg0: i32, %arg1: i32, %arg2: i32) -> (i32, i32) {
    %c0_i32 = arith.constant 0 : i32
    return %arg0, %arg2 : i32, i32
  }
  func.func @transform_1(%arg0: i32, %arg1: i32, %arg2: i32) -> (i32, i32) {
    %c0_i32 = arith.constant 0 : i32
    return %arg2, %arg1 : i32, i32
  }
  func.func @transform_2(%arg0: i32, %arg1: i32, %arg2: i32) -> (i32, i32) {
    %c0_i32 = arith.constant 0 : i32
    return %arg0, %arg1 : i32, i32
  }
}

module attributes {stable_mosaic.version = 11 : i64} {
  func.func @_instnorm_add_kernel(%arg0: i32, %arg1: i32, %arg2: memref<1x16x128xf32, #tpu.memory_space<vmem>>, %arg3: memref<1x16x128xf32, #tpu.memory_space<vmem>>, %arg4: memref<1x16x128xf32, #tpu.memory_space<vmem>>) attributes {dimension_semantics = [#tpu.dimension_semantics<parallel>, #tpu.dimension_semantics<parallel>], iteration_bounds = array<i64: 2, 2>, scalar_prefetch = 0 : i64, scratch_operands = 0 : i64, tpu.core_type = #tpu.core_type<tc>, window_params = [{transform_indices = @transform_0, window_bounds = array<i64: 1, 16, 128>}, {transform_indices = @transform_1, window_bounds = array<i64: 1, 16, 128>}, {transform_indices = @transform_2, window_bounds = array<i64: 1, 16, 128>}]} {
    %c0 = arith.constant 0 : index
    %c0_0 = arith.constant 0 : index
    %c0_1 = arith.constant 0 : index
    %0 = vector.load %arg2[%c0, %c0_0, %c0_1] : memref<1x16x128xf32, #tpu.memory_space<vmem>>, vector<1x16x128xf32>
    %cst = arith.constant dense<0.000000e+00> : vector<1x128xf32>
    %1 = vector.multi_reduction <add>, %0, %cst [1] : vector<1x16x128xf32> to vector<1x128xf32>
    %2 = vector.shape_cast %1 : vector<1x128xf32> to vector<1x1x128xf32>
    %3 = arith.mulf %0, %0 : vector<1x16x128xf32>
    %cst_2 = arith.constant dense<0.000000e+00> : vector<1x128xf32>
    %4 = vector.multi_reduction <add>, %3, %cst_2 [1] : vector<1x16x128xf32> to vector<1x128xf32>
    %5 = vector.shape_cast %4 : vector<1x128xf32> to vector<1x1x128xf32>
    %cst_3 = arith.constant 6.250000e-02 : f32
    %6 = vector.broadcast %cst_3 : f32 to vector<1x1x128xf32>
    %7 = arith.mulf %2, %6 : vector<1x1x128xf32>
    %cst_4 = arith.constant 6.250000e-02 : f32
    %8 = vector.broadcast %cst_4 : f32 to vector<1x1x128xf32>
    %9 = arith.mulf %5, %8 : vector<1x1x128xf32>
    %10 = arith.mulf %7, %7 : vector<1x1x128xf32>
    %11 = arith.subf %9, %10 : vector<1x1x128xf32>
    %cst_5 = arith.constant 0.000000e+00 : f32
    %12 = vector.broadcast %cst_5 : f32 to vector<1x1x128xf32>
    %13 = arith.maximumf %11, %12 : vector<1x1x128xf32>
    %14 = vector.broadcast %7 : vector<1x1x128xf32> to vector<1x16x128xf32>
    %15 = arith.subf %0, %14 : vector<1x16x128xf32>
    %cst_6 = arith.constant 9.99999974E-6 : f32
    %16 = vector.broadcast %cst_6 : f32 to vector<1x1x128xf32>
    %17 = arith.addf %13, %16 : vector<1x1x128xf32>
    %18 = math.rsqrt %17 : vector<1x1x128xf32>
    %19 = vector.broadcast %18 : vector<1x1x128xf32> to vector<1x16x128xf32>
    %20 = arith.mulf %15, %19 : vector<1x16x128xf32>
    %c0_7 = arith.constant 0 : index
    %c0_8 = arith.constant 0 : index
    %c0_9 = arith.constant 0 : index
    %21 = vector.load %arg3[%c0_7, %c0_8, %c0_9] : memref<1x16x128xf32, #tpu.memory_space<vmem>>, vector<1x16x128xf32>
    %22 = arith.addf %21, %20 : vector<1x16x128xf32>
    %c0_10 = arith.constant 0 : index
    %c0_11 = arith.constant 0 : index
    %c0_12 = arith.constant 0 : index
    %23 = vector.load %arg4[%c0_10, %c0_11, %c0_12] : memref<1x16x128xf32, #tpu.memory_space<vmem>>, vector<1x16x128xf32>
    tpu.vector_store %arg4[%c0_10, %c0_11, %c0_12], %22 {strides = array<i32>} : memref<1x16x128xf32, #tpu.memory_space<vmem>>, vector<1x16x128xf32>,
    return
  }
  func.func @transform_0(%arg0: i32, %arg1: i32) -> (i32, i32, i32) {
    %c0_i32 = arith.constant 0 : i32
    %c0_i32_0 = arith.constant 0 : i32
    return %arg0, %c0_i32, %arg1 : i32, i32, i32
  }
  func.func @transform_1(%arg0: i32, %arg1: i32) -> (i32, i32, i32) {
    %c0_i32 = arith.constant 0 : i32
    %c0_i32_0 = arith.constant 0 : i32
    return %arg0, %c0_i32, %arg1 : i32, i32, i32
  }
  func.func @transform_2(%arg0: i32, %arg1: i32) -> (i32, i32, i32) {
    %c0_i32 = arith.constant 0 : i32
    %c0_i32_0 = arith.constant 0 : i32
    return %arg0, %c0_i32, %arg1 : i32, i32, i32
  }
}

module attributes {stable_mosaic.version = 11 : i64} {
  func.func @_mm_kernel(%arg0: i32, %arg1: i32, %arg2: i32, %arg3: memref<32x512xbf16, #tpu.memory_space<vmem>>, %arg4: memref<512x128xbf16, #tpu.memory_space<vmem>>, %arg5: memref<32x128xf32, #tpu.memory_space<vmem>>, %arg6: memref<32x128xf32, #tpu.memory_space<vmem>>) attributes {dimension_semantics = [#tpu.dimension_semantics<parallel>, #tpu.dimension_semantics<parallel>, #tpu.dimension_semantics<arbitrary>], iteration_bounds = array<i64: 1, 1, 1>, scalar_prefetch = 0 : i64, scratch_operands = 1 : i64, tpu.core_type = #tpu.core_type<tc>, window_params = [{transform_indices = @transform_0, window_bounds = array<i64: 32, 512>}, {transform_indices = @transform_1, window_bounds = array<i64: 512, 128>}, {transform_indices = @transform_2, window_bounds = array<i64: 32, 128>}]} {
    %c0_i32 = arith.constant 0 : i32
    %0 = arith.cmpi eq, %arg2, %c0_i32 : i32
    %1 = arith.extui %0 : i1 to i32
    %c0_i32_0 = arith.constant 0 : i32
    %2 = arith.cmpi ne, %1, %c0_i32_0 : i32
    scf.if %2 {
      %cst_10 = arith.constant 0.000000e+00 : f32
      %12 = vector.broadcast %cst_10 : f32 to vector<32x128xf32>
      %c0_11 = arith.constant 0 : index
      %c0_12 = arith.constant 0 : index
      %13 = vector.load %arg6[%c0_11, %c0_12] : memref<32x128xf32, #tpu.memory_space<vmem>>, vector<32x128xf32>
      tpu.vector_store %arg6[%c0_11, %c0_12], %12 {strides = array<i32>} : memref<32x128xf32, #tpu.memory_space<vmem>>, vector<32x128xf32>,
    } else {
    }
    %c0 = arith.constant 0 : index
    %c0_1 = arith.constant 0 : index
    %3 = vector.load %arg6[%c0, %c0_1] : memref<32x128xf32, #tpu.memory_space<vmem>>, vector<32x128xf32>
    %c0_2 = arith.constant 0 : index
    %c0_3 = arith.constant 0 : index
    %4 = vector.load %arg3[%c0_2, %c0_3] : memref<32x512xbf16, #tpu.memory_space<vmem>>, vector<32x512xbf16>
    %c0_4 = arith.constant 0 : index
    %c0_5 = arith.constant 0 : index
    %5 = vector.load %arg4[%c0_4, %c0_5] : memref<512x128xbf16, #tpu.memory_space<vmem>>, vector<512x128xbf16>
    %cst = arith.constant dense<0.000000e+00> : vector<32x128xf32>
    %6 = tpu.matmul %4, %5, %cst {dimension_numbers = #tpu.dot_dimension_numbers<[1], [0], [0], [1], [0, 0, 1, 1], [], []>} : vector<32x512xbf16>, vector<512x128xbf16>, vector<32x128xf32> -> vector<32x128xf32>
    %7 = arith.addf %3, %6 : vector<32x128xf32>
    %c0_6 = arith.constant 0 : index
    %c0_7 = arith.constant 0 : index
    %8 = vector.load %arg6[%c0_6, %c0_7] : memref<32x128xf32, #tpu.memory_space<vmem>>, vector<32x128xf32>
    tpu.vector_store %arg6[%c0_6, %c0_7], %7 {strides = array<i32>} : memref<32x128xf32, #tpu.memory_space<vmem>>, vector<32x128xf32>,
    %c0_i32_8 = arith.constant 0 : i32
    %9 = arith.cmpi eq, %arg2, %c0_i32_8 : i32
    %10 = arith.extui %9 : i1 to i32
    %c0_i32_9 = arith.constant 0 : i32
    %11 = arith.cmpi ne, %10, %c0_i32_9 : i32
    scf.if %11 {
      %c0_10 = arith.constant 0 : index
      %c0_11 = arith.constant 0 : index
      %12 = vector.load %arg6[%c0_10, %c0_11] : memref<32x128xf32, #tpu.memory_space<vmem>>, vector<32x128xf32>
      %c0_12 = arith.constant 0 : index
      %c0_13 = arith.constant 0 : index
      %13 = vector.load %arg5[%c0_12, %c0_13] : memref<32x128xf32, #tpu.memory_space<vmem>>, vector<32x128xf32>
      tpu.vector_store %arg5[%c0_12, %c0_13], %12 {strides = array<i32>} : memref<32x128xf32, #tpu.memory_space<vmem>>, vector<32x128xf32>,
    } else {
    }
    return
  }
  func.func @transform_0(%arg0: i32, %arg1: i32, %arg2: i32) -> (i32, i32) {
    %c0_i32 = arith.constant 0 : i32
    return %arg0, %arg2 : i32, i32
  }
  func.func @transform_1(%arg0: i32, %arg1: i32, %arg2: i32) -> (i32, i32) {
    %c0_i32 = arith.constant 0 : i32
    return %arg2, %arg1 : i32, i32
  }
  func.func @transform_2(%arg0: i32, %arg1: i32, %arg2: i32) -> (i32, i32) {
    %c0_i32 = arith.constant 0 : i32
    return %arg0, %arg1 : i32, i32
  }
}

module attributes {stable_mosaic.version = 11 : i64} {
  func.func @_mm_kernel(%arg0: i32, %arg1: i32, %arg2: i32, %arg3: memref<32x256xbf16, #tpu.memory_space<vmem>>, %arg4: memref<256x128xbf16, #tpu.memory_space<vmem>>, %arg5: memref<32x128xf32, #tpu.memory_space<vmem>>, %arg6: memref<32x128xf32, #tpu.memory_space<vmem>>) attributes {dimension_semantics = [#tpu.dimension_semantics<parallel>, #tpu.dimension_semantics<parallel>, #tpu.dimension_semantics<arbitrary>], iteration_bounds = array<i64: 1, 1, 1>, scalar_prefetch = 0 : i64, scratch_operands = 1 : i64, tpu.core_type = #tpu.core_type<tc>, window_params = [{transform_indices = @transform_0, window_bounds = array<i64: 32, 256>}, {transform_indices = @transform_1, window_bounds = array<i64: 256, 128>}, {transform_indices = @transform_2, window_bounds = array<i64: 32, 128>}]} {
    %c0_i32 = arith.constant 0 : i32
    %0 = arith.cmpi eq, %arg2, %c0_i32 : i32
    %1 = arith.extui %0 : i1 to i32
    %c0_i32_0 = arith.constant 0 : i32
    %2 = arith.cmpi ne, %1, %c0_i32_0 : i32
    scf.if %2 {
      %cst_10 = arith.constant 0.000000e+00 : f32
      %12 = vector.broadcast %cst_10 : f32 to vector<32x128xf32>
      %c0_11 = arith.constant 0 : index
      %c0_12 = arith.constant 0 : index
      %13 = vector.load %arg6[%c0_11, %c0_12] : memref<32x128xf32, #tpu.memory_space<vmem>>, vector<32x128xf32>
      tpu.vector_store %arg6[%c0_11, %c0_12], %12 {strides = array<i32>} : memref<32x128xf32, #tpu.memory_space<vmem>>, vector<32x128xf32>,
    } else {
    }
    %c0 = arith.constant 0 : index
    %c0_1 = arith.constant 0 : index
    %3 = vector.load %arg6[%c0, %c0_1] : memref<32x128xf32, #tpu.memory_space<vmem>>, vector<32x128xf32>
    %c0_2 = arith.constant 0 : index
    %c0_3 = arith.constant 0 : index
    %4 = vector.load %arg3[%c0_2, %c0_3] : memref<32x256xbf16, #tpu.memory_space<vmem>>, vector<32x256xbf16>
    %c0_4 = arith.constant 0 : index
    %c0_5 = arith.constant 0 : index
    %5 = vector.load %arg4[%c0_4, %c0_5] : memref<256x128xbf16, #tpu.memory_space<vmem>>, vector<256x128xbf16>
    %cst = arith.constant dense<0.000000e+00> : vector<32x128xf32>
    %6 = tpu.matmul %4, %5, %cst {dimension_numbers = #tpu.dot_dimension_numbers<[1], [0], [0], [1], [0, 0, 1, 1], [], []>} : vector<32x256xbf16>, vector<256x128xbf16>, vector<32x128xf32> -> vector<32x128xf32>
    %7 = arith.addf %3, %6 : vector<32x128xf32>
    %c0_6 = arith.constant 0 : index
    %c0_7 = arith.constant 0 : index
    %8 = vector.load %arg6[%c0_6, %c0_7] : memref<32x128xf32, #tpu.memory_space<vmem>>, vector<32x128xf32>
    tpu.vector_store %arg6[%c0_6, %c0_7], %7 {strides = array<i32>} : memref<32x128xf32, #tpu.memory_space<vmem>>, vector<32x128xf32>,
    %c0_i32_8 = arith.constant 0 : i32
    %9 = arith.cmpi eq, %arg2, %c0_i32_8 : i32
    %10 = arith.extui %9 : i1 to i32
    %c0_i32_9 = arith.constant 0 : i32
    %11 = arith.cmpi ne, %10, %c0_i32_9 : i32
    scf.if %11 {
      %c0_10 = arith.constant 0 : index
      %c0_11 = arith.constant 0 : index
      %12 = vector.load %arg6[%c0_10, %c0_11] : memref<32x128xf32, #tpu.memory_space<vmem>>, vector<32x128xf32>
      %c0_12 = arith.constant 0 : index
      %c0_13 = arith.constant 0 : index
      %13 = vector.load %arg5[%c0_12, %c0_13] : memref<32x128xf32, #tpu.memory_space<vmem>>, vector<32x128xf32>
      tpu.vector_store %arg5[%c0_12, %c0_13], %12 {strides = array<i32>} : memref<32x128xf32, #tpu.memory_space<vmem>>, vector<32x128xf32>,
    } else {
    }
    return
  }
  func.func @transform_0(%arg0: i32, %arg1: i32, %arg2: i32) -> (i32, i32) {
    %c0_i32 = arith.constant 0 : i32
    return %arg0, %arg2 : i32, i32
  }
  func.func @transform_1(%arg0: i32, %arg1: i32, %arg2: i32) -> (i32, i32) {
    %c0_i32 = arith.constant 0 : i32
    return %arg2, %arg1 : i32, i32
  }
  func.func @transform_2(%arg0: i32, %arg1: i32, %arg2: i32) -> (i32, i32) {
    %c0_i32 = arith.constant 0 : i32
    return %arg0, %arg1 : i32, i32
  }
}

module attributes {stable_mosaic.version = 11 : i64} {
  func.func @_mm_kernel(%arg0: i32, %arg1: i32, %arg2: i32, %arg3: memref<32x1024xbf16, #tpu.memory_space<vmem>>, %arg4: memref<1024x128xbf16, #tpu.memory_space<vmem>>, %arg5: memref<32x128xf32, #tpu.memory_space<vmem>>, %arg6: memref<32x128xf32, #tpu.memory_space<vmem>>) attributes {dimension_semantics = [#tpu.dimension_semantics<parallel>, #tpu.dimension_semantics<parallel>, #tpu.dimension_semantics<arbitrary>], iteration_bounds = array<i64: 1, 1, 1>, scalar_prefetch = 0 : i64, scratch_operands = 1 : i64, tpu.core_type = #tpu.core_type<tc>, window_params = [{transform_indices = @transform_0, window_bounds = array<i64: 32, 1024>}, {transform_indices = @transform_1, window_bounds = array<i64: 1024, 128>}, {transform_indices = @transform_2, window_bounds = array<i64: 32, 128>}]} {
    %c0_i32 = arith.constant 0 : i32
    %0 = arith.cmpi eq, %arg2, %c0_i32 : i32
    %1 = arith.extui %0 : i1 to i32
    %c0_i32_0 = arith.constant 0 : i32
    %2 = arith.cmpi ne, %1, %c0_i32_0 : i32
    scf.if %2 {
      %cst_10 = arith.constant 0.000000e+00 : f32
      %12 = vector.broadcast %cst_10 : f32 to vector<32x128xf32>
      %c0_11 = arith.constant 0 : index
      %c0_12 = arith.constant 0 : index
      %13 = vector.load %arg6[%c0_11, %c0_12] : memref<32x128xf32, #tpu.memory_space<vmem>>, vector<32x128xf32>
      tpu.vector_store %arg6[%c0_11, %c0_12], %12 {strides = array<i32>} : memref<32x128xf32, #tpu.memory_space<vmem>>, vector<32x128xf32>,
    } else {
    }
    %c0 = arith.constant 0 : index
    %c0_1 = arith.constant 0 : index
    %3 = vector.load %arg6[%c0, %c0_1] : memref<32x128xf32, #tpu.memory_space<vmem>>, vector<32x128xf32>
    %c0_2 = arith.constant 0 : index
    %c0_3 = arith.constant 0 : index
    %4 = vector.load %arg3[%c0_2, %c0_3] : memref<32x1024xbf16, #tpu.memory_space<vmem>>, vector<32x1024xbf16>
    %c0_4 = arith.constant 0 : index
    %c0_5 = arith.constant 0 : index
    %5 = vector.load %arg4[%c0_4, %c0_5] : memref<1024x128xbf16, #tpu.memory_space<vmem>>, vector<1024x128xbf16>
    %cst = arith.constant dense<0.000000e+00> : vector<32x128xf32>
    %6 = tpu.matmul %4, %5, %cst {dimension_numbers = #tpu.dot_dimension_numbers<[1], [0], [0], [1], [0, 0, 1, 1], [], []>} : vector<32x1024xbf16>, vector<1024x128xbf16>, vector<32x128xf32> -> vector<32x128xf32>
    %7 = arith.addf %3, %6 : vector<32x128xf32>
    %c0_6 = arith.constant 0 : index
    %c0_7 = arith.constant 0 : index
    %8 = vector.load %arg6[%c0_6, %c0_7] : memref<32x128xf32, #tpu.memory_space<vmem>>, vector<32x128xf32>
    tpu.vector_store %arg6[%c0_6, %c0_7], %7 {strides = array<i32>} : memref<32x128xf32, #tpu.memory_space<vmem>>, vector<32x128xf32>,
    %c0_i32_8 = arith.constant 0 : i32
    %9 = arith.cmpi eq, %arg2, %c0_i32_8 : i32
    %10 = arith.extui %9 : i1 to i32
    %c0_i32_9 = arith.constant 0 : i32
    %11 = arith.cmpi ne, %10, %c0_i32_9 : i32
    scf.if %11 {
      %c0_10 = arith.constant 0 : index
      %c0_11 = arith.constant 0 : index
      %12 = vector.load %arg6[%c0_10, %c0_11] : memref<32x128xf32, #tpu.memory_space<vmem>>, vector<32x128xf32>
      %c0_12 = arith.constant 0 : index
      %c0_13 = arith.constant 0 : index
      %13 = vector.load %arg5[%c0_12, %c0_13] : memref<32x128xf32, #tpu.memory_space<vmem>>, vector<32x128xf32>
      tpu.vector_store %arg5[%c0_12, %c0_13], %12 {strides = array<i32>} : memref<32x128xf32, #tpu.memory_space<vmem>>, vector<32x128xf32>,
    } else {
    }
    return
  }
  func.func @transform_0(%arg0: i32, %arg1: i32, %arg2: i32) -> (i32, i32) {
    %c0_i32 = arith.constant 0 : i32
    return %arg0, %arg2 : i32, i32
  }
  func.func @transform_1(%arg0: i32, %arg1: i32, %arg2: i32) -> (i32, i32) {
    %c0_i32 = arith.constant 0 : i32
    return %arg2, %arg1 : i32, i32
  }
  func.func @transform_2(%arg0: i32, %arg1: i32, %arg2: i32) -> (i32, i32) {
    %c0_i32 = arith.constant 0 : i32
    return %arg0, %arg1 : i32, i32
  }
}

module attributes {stable_mosaic.version = 11 : i64} {
  func.func @_mm_kernel(%arg0: i32, %arg1: i32, %arg2: i32, %arg3: memref<128x256xbf16, #tpu.memory_space<vmem>>, %arg4: memref<256x128xbf16, #tpu.memory_space<vmem>>, %arg5: memref<128x128xf32, #tpu.memory_space<vmem>>, %arg6: memref<128x128xf32, #tpu.memory_space<vmem>>) attributes {dimension_semantics = [#tpu.dimension_semantics<parallel>, #tpu.dimension_semantics<parallel>, #tpu.dimension_semantics<arbitrary>], iteration_bounds = array<i64: 1, 1, 1>, scalar_prefetch = 0 : i64, scratch_operands = 1 : i64, tpu.core_type = #tpu.core_type<tc>, window_params = [{transform_indices = @transform_0, window_bounds = array<i64: 128, 256>}, {transform_indices = @transform_1, window_bounds = array<i64: 256, 128>}, {transform_indices = @transform_2, window_bounds = array<i64: 128, 128>}]} {
    %c0_i32 = arith.constant 0 : i32
    %0 = arith.cmpi eq, %arg2, %c0_i32 : i32
    %1 = arith.extui %0 : i1 to i32
    %c0_i32_0 = arith.constant 0 : i32
    %2 = arith.cmpi ne, %1, %c0_i32_0 : i32
    scf.if %2 {
      %cst_10 = arith.constant 0.000000e+00 : f32
      %12 = vector.broadcast %cst_10 : f32 to vector<128x128xf32>
      %c0_11 = arith.constant 0 : index
      %c0_12 = arith.constant 0 : index
      %13 = vector.load %arg6[%c0_11, %c0_12] : memref<128x128xf32, #tpu.memory_space<vmem>>, vector<128x128xf32>
      tpu.vector_store %arg6[%c0_11, %c0_12], %12 {strides = array<i32>} : memref<128x128xf32, #tpu.memory_space<vmem>>, vector<128x128xf32>,
    } else {
    }
    %c0 = arith.constant 0 : index
    %c0_1 = arith.constant 0 : index
    %3 = vector.load %arg6[%c0, %c0_1] : memref<128x128xf32, #tpu.memory_space<vmem>>, vector<128x128xf32>
    %c0_2 = arith.constant 0 : index
    %c0_3 = arith.constant 0 : index
    %4 = vector.load %arg3[%c0_2, %c0_3] : memref<128x256xbf16, #tpu.memory_space<vmem>>, vector<128x256xbf16>
    %c0_4 = arith.constant 0 : index
    %c0_5 = arith.constant 0 : index
    %5 = vector.load %arg4[%c0_4, %c0_5] : memref<256x128xbf16, #tpu.memory_space<vmem>>, vector<256x128xbf16>
    %cst = arith.constant dense<0.000000e+00> : vector<128x128xf32>
    %6 = tpu.matmul %4, %5, %cst {dimension_numbers = #tpu.dot_dimension_numbers<[1], [0], [0], [1], [0, 0, 1, 1], [], []>} : vector<128x256xbf16>, vector<256x128xbf16>, vector<128x128xf32> -> vector<128x128xf32>
    %7 = arith.addf %3, %6 : vector<128x128xf32>
    %c0_6 = arith.constant 0 : index
    %c0_7 = arith.constant 0 : index
    %8 = vector.load %arg6[%c0_6, %c0_7] : memref<128x128xf32, #tpu.memory_space<vmem>>, vector<128x128xf32>
    tpu.vector_store %arg6[%c0_6, %c0_7], %7 {strides = array<i32>} : memref<128x128xf32, #tpu.memory_space<vmem>>, vector<128x128xf32>,
    %c0_i32_8 = arith.constant 0 : i32
    %9 = arith.cmpi eq, %arg2, %c0_i32_8 : i32
    %10 = arith.extui %9 : i1 to i32
    %c0_i32_9 = arith.constant 0 : i32
    %11 = arith.cmpi ne, %10, %c0_i32_9 : i32
    scf.if %11 {
      %c0_10 = arith.constant 0 : index
      %c0_11 = arith.constant 0 : index
      %12 = vector.load %arg6[%c0_10, %c0_11] : memref<128x128xf32, #tpu.memory_space<vmem>>, vector<128x128xf32>
      %c0_12 = arith.constant 0 : index
      %c0_13 = arith.constant 0 : index
      %13 = vector.load %arg5[%c0_12, %c0_13] : memref<128x128xf32, #tpu.memory_space<vmem>>, vector<128x128xf32>
      tpu.vector_store %arg5[%c0_12, %c0_13], %12 {strides = array<i32>} : memref<128x128xf32, #tpu.memory_space<vmem>>, vector<128x128xf32>,
    } else {
    }
    return
  }
  func.func @transform_0(%arg0: i32, %arg1: i32, %arg2: i32) -> (i32, i32) {
    %c0_i32 = arith.constant 0 : i32
    return %arg0, %arg2 : i32, i32
  }
  func.func @transform_1(%arg0: i32, %arg1: i32, %arg2: i32) -> (i32, i32) {
    %c0_i32 = arith.constant 0 : i32
    return %arg2, %arg1 : i32, i32
  }
  func.func @transform_2(%arg0: i32, %arg1: i32, %arg2: i32) -> (i32, i32) {
    %c0_i32 = arith.constant 0 : i32
    return %arg0, %arg1 : i32, i32
  }
}

module attributes {stable_mosaic.version = 11 : i64} {
  func.func @_mm_kernel(%arg0: i32, %arg1: i32, %arg2: i32, %arg3: memref<128x128xbf16, #tpu.memory_space<vmem>>, %arg4: memref<128x128xbf16, #tpu.memory_space<vmem>>, %arg5: memref<128x128xf32, #tpu.memory_space<vmem>>, %arg6: memref<128x128xf32, #tpu.memory_space<vmem>>) attributes {dimension_semantics = [#tpu.dimension_semantics<parallel>, #tpu.dimension_semantics<parallel>, #tpu.dimension_semantics<arbitrary>], iteration_bounds = array<i64: 1, 1, 1>, scalar_prefetch = 0 : i64, scratch_operands = 1 : i64, tpu.core_type = #tpu.core_type<tc>, window_params = [{transform_indices = @transform_0, window_bounds = array<i64: 128, 128>}, {transform_indices = @transform_1, window_bounds = array<i64: 128, 128>}, {transform_indices = @transform_2, window_bounds = array<i64: 128, 128>}]} {
    %c0_i32 = arith.constant 0 : i32
    %0 = arith.cmpi eq, %arg2, %c0_i32 : i32
    %1 = arith.extui %0 : i1 to i32
    %c0_i32_0 = arith.constant 0 : i32
    %2 = arith.cmpi ne, %1, %c0_i32_0 : i32
    scf.if %2 {
      %cst_10 = arith.constant 0.000000e+00 : f32
      %12 = vector.broadcast %cst_10 : f32 to vector<128x128xf32>
      %c0_11 = arith.constant 0 : index
      %c0_12 = arith.constant 0 : index
      %13 = vector.load %arg6[%c0_11, %c0_12] : memref<128x128xf32, #tpu.memory_space<vmem>>, vector<128x128xf32>
      tpu.vector_store %arg6[%c0_11, %c0_12], %12 {strides = array<i32>} : memref<128x128xf32, #tpu.memory_space<vmem>>, vector<128x128xf32>,
    } else {
    }
    %c0 = arith.constant 0 : index
    %c0_1 = arith.constant 0 : index
    %3 = vector.load %arg6[%c0, %c0_1] : memref<128x128xf32, #tpu.memory_space<vmem>>, vector<128x128xf32>
    %c0_2 = arith.constant 0 : index
    %c0_3 = arith.constant 0 : index
    %4 = vector.load %arg3[%c0_2, %c0_3] : memref<128x128xbf16, #tpu.memory_space<vmem>>, vector<128x128xbf16>
    %c0_4 = arith.constant 0 : index
    %c0_5 = arith.constant 0 : index
    %5 = vector.load %arg4[%c0_4, %c0_5] : memref<128x128xbf16, #tpu.memory_space<vmem>>, vector<128x128xbf16>
    %cst = arith.constant dense<0.000000e+00> : vector<128x128xf32>
    %6 = tpu.matmul %4, %5, %cst {dimension_numbers = #tpu.dot_dimension_numbers<[1], [0], [0], [1], [0, 0, 1, 1], [], []>} : vector<128x128xbf16>, vector<128x128xbf16>, vector<128x128xf32> -> vector<128x128xf32>
    %7 = arith.addf %3, %6 : vector<128x128xf32>
    %c0_6 = arith.constant 0 : index
    %c0_7 = arith.constant 0 : index
    %8 = vector.load %arg6[%c0_6, %c0_7] : memref<128x128xf32, #tpu.memory_space<vmem>>, vector<128x128xf32>
    tpu.vector_store %arg6[%c0_6, %c0_7], %7 {strides = array<i32>} : memref<128x128xf32, #tpu.memory_space<vmem>>, vector<128x128xf32>,
    %c0_i32_8 = arith.constant 0 : i32
    %9 = arith.cmpi eq, %arg2, %c0_i32_8 : i32
    %10 = arith.extui %9 : i1 to i32
    %c0_i32_9 = arith.constant 0 : i32
    %11 = arith.cmpi ne, %10, %c0_i32_9 : i32
    scf.if %11 {
      %c0_10 = arith.constant 0 : index
      %c0_11 = arith.constant 0 : index
      %12 = vector.load %arg6[%c0_10, %c0_11] : memref<128x128xf32, #tpu.memory_space<vmem>>, vector<128x128xf32>
      %c0_12 = arith.constant 0 : index
      %c0_13 = arith.constant 0 : index
      %13 = vector.load %arg5[%c0_12, %c0_13] : memref<128x128xf32, #tpu.memory_space<vmem>>, vector<128x128xf32>
      tpu.vector_store %arg5[%c0_12, %c0_13], %12 {strides = array<i32>} : memref<128x128xf32, #tpu.memory_space<vmem>>, vector<128x128xf32>,
    } else {
    }
    return
  }
  func.func @transform_0(%arg0: i32, %arg1: i32, %arg2: i32) -> (i32, i32) {
    %c0_i32 = arith.constant 0 : i32
    return %arg0, %arg2 : i32, i32
  }
  func.func @transform_1(%arg0: i32, %arg1: i32, %arg2: i32) -> (i32, i32) {
    %c0_i32 = arith.constant 0 : i32
    return %arg2, %arg1 : i32, i32
  }
  func.func @transform_2(%arg0: i32, %arg1: i32, %arg2: i32) -> (i32, i32) {
    %c0_i32 = arith.constant 0 : i32
    return %arg0, %arg1 : i32, i32
  }
}

module attributes {stable_mosaic.version = 11 : i64} {
  func.func @_mm_kernel(%arg0: i32, %arg1: i32, %arg2: i32, %arg3: memref<128x512xbf16, #tpu.memory_space<vmem>>, %arg4: memref<512x128xbf16, #tpu.memory_space<vmem>>, %arg5: memref<128x128xf32, #tpu.memory_space<vmem>>, %arg6: memref<128x128xf32, #tpu.memory_space<vmem>>) attributes {dimension_semantics = [#tpu.dimension_semantics<parallel>, #tpu.dimension_semantics<parallel>, #tpu.dimension_semantics<arbitrary>], iteration_bounds = array<i64: 1, 1, 1>, scalar_prefetch = 0 : i64, scratch_operands = 1 : i64, tpu.core_type = #tpu.core_type<tc>, window_params = [{transform_indices = @transform_0, window_bounds = array<i64: 128, 512>}, {transform_indices = @transform_1, window_bounds = array<i64: 512, 128>}, {transform_indices = @transform_2, window_bounds = array<i64: 128, 128>}]} {
    %c0_i32 = arith.constant 0 : i32
    %0 = arith.cmpi eq, %arg2, %c0_i32 : i32
    %1 = arith.extui %0 : i1 to i32
    %c0_i32_0 = arith.constant 0 : i32
    %2 = arith.cmpi ne, %1, %c0_i32_0 : i32
    scf.if %2 {
      %cst_10 = arith.constant 0.000000e+00 : f32
      %12 = vector.broadcast %cst_10 : f32 to vector<128x128xf32>
      %c0_11 = arith.constant 0 : index
      %c0_12 = arith.constant 0 : index
      %13 = vector.load %arg6[%c0_11, %c0_12] : memref<128x128xf32, #tpu.memory_space<vmem>>, vector<128x128xf32>
      tpu.vector_store %arg6[%c0_11, %c0_12], %12 {strides = array<i32>} : memref<128x128xf32, #tpu.memory_space<vmem>>, vector<128x128xf32>,
    } else {
    }
    %c0 = arith.constant 0 : index
    %c0_1 = arith.constant 0 : index
    %3 = vector.load %arg6[%c0, %c0_1] : memref<128x128xf32, #tpu.memory_space<vmem>>, vector<128x128xf32>
    %c0_2 = arith.constant 0 : index
    %c0_3 = arith.constant 0 : index
    %4 = vector.load %arg3[%c0_2, %c0_3] : memref<128x512xbf16, #tpu.memory_space<vmem>>, vector<128x512xbf16>
    %c0_4 = arith.constant 0 : index
    %c0_5 = arith.constant 0 : index
    %5 = vector.load %arg4[%c0_4, %c0_5] : memref<512x128xbf16, #tpu.memory_space<vmem>>, vector<512x128xbf16>
    %cst = arith.constant dense<0.000000e+00> : vector<128x128xf32>
    %6 = tpu.matmul %4, %5, %cst {dimension_numbers = #tpu.dot_dimension_numbers<[1], [0], [0], [1], [0, 0, 1, 1], [], []>} : vector<128x512xbf16>, vector<512x128xbf16>, vector<128x128xf32> -> vector<128x128xf32>
    %7 = arith.addf %3, %6 : vector<128x128xf32>
    %c0_6 = arith.constant 0 : index
    %c0_7 = arith.constant 0 : index
    %8 = vector.load %arg6[%c0_6, %c0_7] : memref<128x128xf32, #tpu.memory_space<vmem>>, vector<128x128xf32>
    tpu.vector_store %arg6[%c0_6, %c0_7], %7 {strides = array<i32>} : memref<128x128xf32, #tpu.memory_space<vmem>>, vector<128x128xf32>,
    %c0_i32_8 = arith.constant 0 : i32
    %9 = arith.cmpi eq, %arg2, %c0_i32_8 : i32
    %10 = arith.extui %9 : i1 to i32
    %c0_i32_9 = arith.constant 0 : i32
    %11 = arith.cmpi ne, %10, %c0_i32_9 : i32
    scf.if %11 {
      %c0_10 = arith.constant 0 : index
      %c0_11 = arith.constant 0 : index
      %12 = vector.load %arg6[%c0_10, %c0_11] : memref<128x128xf32, #tpu.memory_space<vmem>>, vector<128x128xf32>
      %c0_12 = arith.constant 0 : index
      %c0_13 = arith.constant 0 : index
      %13 = vector.load %arg5[%c0_12, %c0_13] : memref<128x128xf32, #tpu.memory_space<vmem>>, vector<128x128xf32>
      tpu.vector_store %arg5[%c0_12, %c0_13], %12 {strides = array<i32>} : memref<128x128xf32, #tpu.memory_space<vmem>>, vector<128x128xf32>,
    } else {
    }
    return
  }
  func.func @transform_0(%arg0: i32, %arg1: i32, %arg2: i32) -> (i32, i32) {
    %c0_i32 = arith.constant 0 : i32
    return %arg0, %arg2 : i32, i32
  }
  func.func @transform_1(%arg0: i32, %arg1: i32, %arg2: i32) -> (i32, i32) {
    %c0_i32 = arith.constant 0 : i32
    return %arg2, %arg1 : i32, i32
  }
  func.func @transform_2(%arg0: i32, %arg1: i32, %arg2: i32) -> (i32, i32) {
    %c0_i32 = arith.constant 0 : i32
    return %arg0, %arg1 : i32, i32
  }
}

module attributes {stable_mosaic.version = 11 : i64} {
  func.func @_mm_bias_kernel(%arg0: i32, %arg1: i32, %arg2: i32, %arg3: memref<512x1152xbf16, #tpu.memory_space<vmem>>, %arg4: memref<1152x128xbf16, #tpu.memory_space<vmem>>, %arg5: memref<1x128xf32, #tpu.memory_space<vmem>>, %arg6: memref<512x128xf32, #tpu.memory_space<vmem>>, %arg7: memref<512x128xf32, #tpu.memory_space<vmem>>) attributes {dimension_semantics = [#tpu.dimension_semantics<parallel>, #tpu.dimension_semantics<parallel>, #tpu.dimension_semantics<arbitrary>], iteration_bounds = array<i64: 1, 1, 3>, scalar_prefetch = 0 : i64, scratch_operands = 1 : i64, tpu.core_type = #tpu.core_type<tc>, window_params = [{transform_indices = @transform_0, window_bounds = array<i64: 512, 1152>}, {transform_indices = @transform_1, window_bounds = array<i64: 1152, 128>}, {transform_indices = @transform_2, window_bounds = array<i64: 1, 128>}, {transform_indices = @transform_3, window_bounds = array<i64: 512, 128>}]} {
    %c0_i32 = arith.constant 0 : i32
    %0 = arith.cmpi eq, %arg2, %c0_i32 : i32
    %1 = arith.extui %0 : i1 to i32
    %c0_i32_0 = arith.constant 0 : i32
    %2 = arith.cmpi ne, %1, %c0_i32_0 : i32
    scf.if %2 {
      %cst_9 = arith.constant 0.000000e+00 : f32
      %12 = vector.broadcast %cst_9 : f32 to vector<512x128xf32>
      %c0_10 = arith.constant 0 : index
      %c0_11 = arith.constant 0 : index
      %13 = vector.load %arg7[%c0_10, %c0_11] : memref<512x128xf32, #tpu.memory_space<vmem>>, vector<512x128xf32>
      tpu.vector_store %arg7[%c0_10, %c0_11], %12 {strides = array<i32>} : memref<512x128xf32, #tpu.memory_space<vmem>>, vector<512x128xf32>,
    } else {
    }
    %c0 = arith.constant 0 : index
    %c0_1 = arith.constant 0 : index
    %3 = vector.load %arg7[%c0, %c0_1] : memref<512x128xf32, #tpu.memory_space<vmem>>, vector<512x128xf32>
    %c0_2 = arith.constant 0 : index
    %c0_3 = arith.constant 0 : index
    %4 = vector.load %arg3[%c0_2, %c0_3] : memref<512x1152xbf16, #tpu.memory_space<vmem>>, vector<512x1152xbf16>
    %c0_4 = arith.constant 0 : index
    %c0_5 = arith.constant 0 : index
    %5 = vector.load %arg4[%c0_4, %c0_5] : memref<1152x128xbf16, #tpu.memory_space<vmem>>, vector<1152x128xbf16>
    %cst = arith.constant dense<0.000000e+00> : vector<512x128xf32>
    %6 = tpu.matmul %4, %5, %cst {dimension_numbers = #tpu.dot_dimension_numbers<[1], [0], [0], [1], [0, 0, 1, 1], [], []>} : vector<512x1152xbf16>, vector<1152x128xbf16>, vector<512x128xf32> -> vector<512x128xf32>
    %7 = arith.addf %3, %6 : vector<512x128xf32>
    %c0_6 = arith.constant 0 : index
    %c0_7 = arith.constant 0 : index
    %8 = vector.load %arg7[%c0_6, %c0_7] : memref<512x128xf32, #tpu.memory_space<vmem>>, vector<512x128xf32>
    tpu.vector_store %arg7[%c0_6, %c0_7], %7 {strides = array<i32>} : memref<512x128xf32, #tpu.memory_space<vmem>>, vector<512x128xf32>,
    %c2_i32 = arith.constant 2 : i32
    %9 = arith.cmpi eq, %arg2, %c2_i32 : i32
    %10 = arith.extui %9 : i1 to i32
    %c0_i32_8 = arith.constant 0 : i32
    %11 = arith.cmpi ne, %10, %c0_i32_8 : i32
    scf.if %11 {
      %c0_9 = arith.constant 0 : index
      %c0_10 = arith.constant 0 : index
      %12 = vector.load %arg7[%c0_9, %c0_10] : memref<512x128xf32, #tpu.memory_space<vmem>>, vector<512x128xf32>
      %c0_11 = arith.constant 0 : index
      %c0_12 = arith.constant 0 : index
      %13 = vector.load %arg5[%c0_11, %c0_12] : memref<1x128xf32, #tpu.memory_space<vmem>>, vector<1x128xf32>
      %14 = vector.broadcast %13 : vector<1x128xf32> to vector<512x128xf32>
      %15 = arith.addf %12, %14 : vector<512x128xf32>
      %16 = arith.negf %15 : vector<512x128xf32>
      %17 = math.exp %16 : vector<512x128xf32>
      %cst_13 = arith.constant 1.000000e+00 : f32
      %18 = vector.broadcast %cst_13 : f32 to vector<512x128xf32>
      %19 = arith.addf %18, %17 : vector<512x128xf32>
      %20 = arith.divf %18, %19 : vector<512x128xf32>
      %c0_14 = arith.constant 0 : index
      %c0_15 = arith.constant 0 : index
      %21 = vector.load %arg6[%c0_14, %c0_15] : memref<512x128xf32, #tpu.memory_space<vmem>>, vector<512x128xf32>
      tpu.vector_store %arg6[%c0_14, %c0_15], %20 {strides = array<i32>} : memref<512x128xf32, #tpu.memory_space<vmem>>, vector<512x128xf32>,
    } else {
    }
    return
  }
  func.func @transform_0(%arg0: i32, %arg1: i32, %arg2: i32) -> (i32, i32) {
    %c0_i32 = arith.constant 0 : i32
    return %arg0, %arg2 : i32, i32
  }
  func.func @transform_1(%arg0: i32, %arg1: i32, %arg2: i32) -> (i32, i32) {
    %c0_i32 = arith.constant 0 : i32
    return %arg2, %arg1 : i32, i32
  }
  func.func @transform_2(%arg0: i32, %arg1: i32, %arg2: i32) -> (i32, i32) {
    %c0_i32 = arith.constant 0 : i32
    %c0_i32_0 = arith.constant 0 : i32
    return %c0_i32, %arg1 : i32, i32
  }
  func.func @transform_3(%arg0: i32, %arg1: i32, %arg2: i32) -> (i32, i32) {
    %c0_i32 = arith.constant 0 : i32
    return %arg0, %arg1 : i32, i32
  }
}

</mosaic_0001>

<bundles_post_ra>
// kernel: generator_forward.54
= control target key start
LH: loop header
LB: loop body
LE: loop exit
PB: predicated region body
PF: predicated region fallthrough
CT: control target
= control target key end

     0   :  { %s642_s6 = smov 0   ;;  %s644_s7 = smov 0   ;;  %s1144_s0 = inlined_call_operand.vmem [shape: f32[2,256,64], index: 0, kind: input, shape index: {}]   ;;  %s1145_s1 = inlined_call_operand.vmem [shape: f32[2,256,64], index: 1, kind: output, shape index: {}]  }
   0x1   :  { %s646_s8 = smov 0  }
   0x2 LB: > { %s23_s9 = sadd.s32 1, %s626_s7  ;;  %p573_p0 = scmp.ge.s32.totalorder %s630_s8, 1  ;;  %s630_s8 = sphi %s646_s8, %s11_s8   ;;  %s626_s7 = sphi %s644_s7, %s1147_s7   ;;  %s622_s6 = sphi %s642_s6, %s1146_s6  }
   0x3   : > { %p25_p1 = scmp.ge.s32.totalorder %s23_s9, 2  ;;  %p106_p2 = scmp.lt.s32.totalorder %s630_s8, 3 }
   0x5   : > { %s1149_s9 = smov (%p25_p1, %s23_s9), 0  ;;  %p107_p3 = pnand %p573_p0, %p106_p2 }
   0x6   : > { %p132_p4 = scmp.lt.s32.totalorder (!%p107_p3), %s622_s6, 1 }
   0x7   : > { %110 = sbr.rel (%p107_p3) target bundleno = 142 (0x8e), region = 24 }
   0xc   : > { %s1151_s6 = smov (!%p132_p4, %s622_s6), 1  ;;  %vm180_vm0 = vcmask 523264  }
   0xd   : > { %s580_s10 = sshll.u32 %s1151_s6, 8 }
   0xe   : > { %s668_s13 = scalar_lea.vmem %s1144_s0, %s580_s10  ;;  %s1005_s16 = scalar_lea.vmem %s1145_s1, %s580_s10 }
   0xf   : > { %v671_v0 = vld [vmem:[%s668_s13] sm:$0xff]  ;;  %v674_v1 = vld [vmem:[%s668_s13 + $0x8] sm:$0xff]  ;;  %v677_v2 = vld [vmem:[%s668_s13 + $0x10] sm:$0xff] }
  0x10   : > { %v680_v3 = vld [vmem:[%s668_s13 + $0x18] sm:$0xff]  ;;  %v181_v4 = vsel %vm180_vm0, %v671_v0, 0.0  ;;  %v182_v5 = vsel %vm180_vm0, %v674_v1, 0.0  ;;  %v184_v6 = vsel %vm180_vm0, %v677_v2, 0.0  ;;  %v689_v7 = vld [vmem:[%s668_s13 + $0x20] sm:$0xff]  ;;  %v694_v10 = vld [vmem:[%s668_s13 + $0x28] sm:$0xff]  ;;  %v250_v29 = vmul.f32 %v671_v0, %v671_v0 }
  0x11   : > { %v183_v8 = vadd.f32 %v182_v5, %v181_v4  ;;  %v186_v9 = vsel %vm180_vm0, %v680_v3, 0.0  ;;  %v188_v12 = vsel %vm180_vm0, %v689_v7, 0.0  ;;  %v699_v13 = vld [vmem:[%s668_s13 + $0x30] sm:$0xff]  ;;  %v190_v15 = vsel %vm180_vm0, %v694_v10, 0.0  ;;  %v704_v16 = vld [vmem:[%s668_s13 + $0x38] sm:$0xff]  ;;  %v709_v19 = vld [vmem:[%s668_s13 + $0x40] sm:$0xff] }
  0x12   : > { %v192_v18 = vsel %vm180_vm0, %v699_v13, 0.0  ;;  %v194_v21 = vsel %vm180_vm0, %v704_v16, 0.0  ;;  %v714_v22 = vld [vmem:[%s668_s13 + $0x48] sm:$0xff]  ;;  %v196_v24 = vsel %vm180_vm0, %v709_v19, 0.0  ;;  %v719_v25 = vld [vmem:[%s668_s13 + $0x50] sm:$0xff]  ;;  %v722_v27 = vld [vmem:[%s668_s13 + $0x58] sm:$0xff]  ;;  %v251_v30 = vmul.f32 %v674_v1, %v674_v1 }
  0x13   : > { %v185_v11 = vadd.f32 %v184_v6, %v183_v8  ;;  %v198_v28 = vsel %vm180_vm0, %v714_v22, 0.0  ;;  %v252_v31 = vmul.f32 %v677_v2, %v677_v2  ;;  %v200_v33 = vsel %vm180_vm0, %v719_v25, 0.0  ;;  %v737_v35 = vld [vmem:[%s668_s13 + $0x60] sm:$0xff]  ;;  %v747_v42 = vld [vmem:[%s668_s13 + $0x68] sm:$0xff]  ;;  %v755_v48 = vld [vmem:[%s668_s13 + $0x70] sm:$0xff] }
  0x14   : > { %v253_v34 = vmul.f32 %v680_v3, %v680_v3  ;;  %v202_v37 = vsel %vm180_vm0, %v722_v27, 0.0  ;;  %v254_v38 = vmul.f32 %v689_v7, %v689_v7  ;;  %v282_v39 = vsel %vm180_vm0, %v250_v29, 0.0  ;;  %v763_v54 = vld [vmem:[%s668_s13 + $0x78] sm:$0xff]  ;;  %v771_v60 = vld [vmem:[%s668_s13 + $0x80] sm:$0xff]  ;;  %v779_v6 = vld [vmem:[%s668_s13 + $0x88] sm:$0xff] }
  0x15   : > { %v187_v14 = vadd.f32 %v186_v9, %v185_v11  ;;  %v283_v40 = vsel %vm180_vm0, %v251_v30, 0.0  ;;  %v285_v41 = vsel %vm180_vm0, %v252_v31, 0.0  ;;  %v204_v45 = vsel %vm180_vm0, %v737_v35, 0.0 }
  0x16   : > { %v284_v44 = vadd.f32 %v283_v40, %v282_v39  ;;  %v255_v46 = vmul.f32 %v694_v10, %v694_v10  ;;  %v287_v47 = vsel %vm180_vm0, %v253_v34, 0.0  ;;  %v206_v51 = vsel %vm180_vm0, %v747_v42, 0.0  ;;  %v811_v39 = vld [vmem:[%s668_s13 + $0xa8] sm:$0xff] }
  0x17   : > { %v189_v17 = vadd.f32 %v188_v12, %v187_v14  ;;  %v256_v52 = vmul.f32 %v699_v13, %v699_v13  ;;  %v289_v53 = vsel %vm180_vm0, %v254_v38, 0.0  ;;  %v208_v57 = vsel %vm180_vm0, %v755_v48, 0.0 }
  0x18   : > { %v286_v50 = vadd.f32 %v285_v41, %v284_v44  ;;  %v257_v58 = vmul.f32 %v704_v16, %v704_v16  ;;  %v291_v59 = vsel %vm180_vm0, %v255_v46, 0.0  ;;  %v210_v63 = vsel %vm180_vm0, %v763_v54, 0.0  ;;  %v819_v46 = vld [vmem:[%s668_s13 + $0xb0] sm:$0xff] }
  0x19   : > { %v191_v20 = vadd.f32 %v190_v15, %v189_v17  ;;  %v258_v4 = vmul.f32 %v709_v19, %v709_v19  ;;  %v293_v5 = vsel %vm180_vm0, %v256_v52, 0.0  ;;  %v212_v11 = vsel %vm180_vm0, %v771_v60, 0.0  ;;  %v787_v15 = vld [vmem:[%s668_s13 + $0x90] sm:$0xff] }
  0x1a   : > { %v288_v56 = vadd.f32 %v287_v47, %v286_v50  ;;  %v259_v12 = vmul.f32 %v714_v22, %v714_v22  ;;  %v295_v14 = vsel %vm180_vm0, %v257_v58, 0.0  ;;  %v216_v29 = vsel %vm180_vm0, %v787_v15, 0.0 }
  0x1b   : > { %v193_v23 = vadd.f32 %v192_v18, %v191_v20  ;;  %v214_v20 = vsel %vm180_vm0, %v779_v6, 0.0  ;;  %v261_v30 = vmul.f32 %v722_v27, %v722_v27  ;;  %v263_v44 = vmul.f32 %v747_v42, %v747_v42 }
  0x1c   : > { %v290_v62 = vadd.f32 %v289_v53, %v288_v56  ;;  %v299_v31 = vsel %vm180_vm0, %v259_v12, 0.0  ;;  %v222_v50 = vsel %vm180_vm0, %v811_v39, 0.0  ;;  %v827_v53 = vld [vmem:[%s668_s13 + $0xb8] sm:$0xff]  ;;  %v265_v58 = vmul.f32 %v763_v54, %v763_v54 }
  0x1d   : > { %v195_v26 = vadd.f32 %v194_v21, %v193_v23  ;;  %v260_v21 = vmul.f32 %v719_v25, %v719_v25  ;;  %v297_v23 = vsel %vm180_vm0, %v258_v4, 0.0  ;;  %v226_v4 = vsel %vm180_vm0, %v827_v53, 0.0 }
  0x1e   : > { %v292_v9 = vadd.f32 %v291_v59, %v290_v62  ;;  %v307_v59 = vsel %vm180_vm0, %v263_v44, 0.0 }
  0x1f   : > { %v197_v32 = vadd.f32 %v196_v24, %v195_v26  ;;  %v795_v24 = vld [vmem:[%s668_s13 + $0x98] sm:$0xff]  ;;  %v301_v38 = vsel %vm180_vm0, %v260_v21, 0.0 }
  0x20   : > { %v294_v18 = vadd.f32 %v293_v5, %v292_v9  ;;  %v266_v5 = vmul.f32 %v771_v60, %v771_v60  ;;  %v843_v9 = vld [vmem:[%s668_s13 + $0xc8] sm:$0xff] }
  0x21   : > { %v199_v36 = vadd.f32 %v198_v28, %v197_v32  ;;  %v803_v32 = vld [vmem:[%s668_s13 + $0xa0] sm:$0xff] }
  0x22   : > { %v296_v28 = vadd.f32 %v295_v14, %v294_v18  ;;  %v311_v18 = vsel %vm180_vm0, %v265_v58, 0.0  ;;  %v270_v44 = vmul.f32 %v803_v32, %v803_v32 }
  0x23   : > { %v201_v43 = vadd.f32 %v200_v33, %v199_v36  ;;  %v218_v36 = vsel %vm180_vm0, %v795_v24, 0.0 }
  0x24   : > { %v298_v34 = vadd.f32 %v297_v23, %v296_v28  ;;  %v268_v28 = vmul.f32 %v787_v15, %v787_v15 }
  0x25   : > { %v203_v49 = vadd.f32 %v202_v37, %v201_v43  ;;  %v262_v37 = vmul.f32 %v737_v35, %v737_v35  ;;  %v220_v43 = vsel %vm180_vm0, %v803_v32, 0.0 }
  0x26   : > { %v300_v41 = vadd.f32 %v299_v31, %v298_v34 }
  0x27   : > { %v205_v55 = vadd.f32 %v204_v45, %v203_v49  ;;  %v303_v45 = vsel %vm180_vm0, %v261_v30, 0.0  ;;  %v305_v52 = vsel %vm180_vm0, %v262_v37, 0.0  ;;  %v859_v30 = vld [vmem:[%s668_s13 + $0xd8] sm:$0xff] }
  0x28   : > { %v302_v49 = vadd.f32 %v301_v38, %v300_v41  ;;  %v867_v38 = vld [vmem:[%s668_s13 + $0xe0] sm:$0xff] }
  0x29   : > { %v207_v61 = vadd.f32 %v206_v51, %v205_v55  ;;  %v264_v51 = vmul.f32 %v755_v48, %v755_v48 }
  0x2a   : > { %v304_v56 = vadd.f32 %v303_v45, %v302_v49  ;;  %v317_v45 = vsel %vm180_vm0, %v268_v28, 0.0 }
  0x2b   : > { %v209_v8 = vadd.f32 %v208_v57, %v207_v61  ;;  %v224_v57 = vsel %vm180_vm0, %v819_v46, 0.0  ;;  %v835_v61 = vld [vmem:[%s668_s13 + $0xc0] sm:$0xff] }
  0x2c   : > { %v228_v14 = vsel %vm180_vm0, %v835_v61, 0.0 }
  0x2d   : > { %v211_v17 = vadd.f32 %v210_v63, %v209_v8  ;;  %v306_v63 = vadd.f32 %v305_v52, %v304_v56  ;;  %v309_v8 = vsel %vm180_vm0, %v264_v51, 0.0  ;;  %v236_v51 = vsel %vm180_vm0, %v867_v38, 0.0  ;;  %v883_v56 = vld [vmem:[%s668_s13 + $0xf0] sm:$0xff] }
  0x2e   : > { %v271_v52 = vmul.f32 %v811_v39, %v811_v39 }
  0x2f   : > { %v213_v26 = vadd.f32 %v212_v11, %v211_v17  ;;  %v308_v12 = vadd.f32 %v307_v59, %v306_v63  ;;  %v267_v17 = vmul.f32 %v779_v6, %v779_v6  ;;  %v321_v63 = vsel %vm180_vm0, %v270_v44, 0.0 }
  0x30   : > { %v277_v44 = vmul.f32 %v859_v30, %v859_v30 }
  0x31   : > { %v215_v33 = vadd.f32 %v214_v20, %v213_v26  ;;  %v851_v20 = vld [vmem:[%s668_s13 + $0xd0] sm:$0xff]  ;;  %v310_v23 = vadd.f32 %v309_v8, %v308_v12  ;;  %v230_v26 = vsel %vm180_vm0, %v843_v9, 0.0  ;;  %v315_v37 = vsel %vm180_vm0, %v267_v17, 0.0 }
  0x32   : > { %v232_v34 = vsel %vm180_vm0, %v851_v20, 0.0  ;;  %v273_v12 = vmul.f32 %v827_v53, %v827_v53 }
  0x33   : > { %v217_v40 = vadd.f32 %v216_v29, %v215_v33  ;;  %v313_v29 = vsel %vm180_vm0, %v266_v5, 0.0  ;;  %v312_v33 = vadd.f32 %v311_v18, %v310_v23  ;;  %v274_v23 = vmul.f32 %v835_v61, %v835_v61 }
  0x35   : > { %v219_v47 = vadd.f32 %v218_v36, %v217_v40  ;;  %v269_v36 = vmul.f32 %v795_v24, %v795_v24  ;;  %v314_v41 = vadd.f32 %v313_v29, %v312_v33  ;;  %v327_v33 = vsel %vm180_vm0, %v273_v12, 0.0 }
  0x37   : > { %v221_v55 = vadd.f32 %v220_v43, %v219_v47  ;;  %v234_v43 = vsel %vm180_vm0, %v859_v30, 0.0  ;;  %v875_v47 = vld [vmem:[%s668_s13 + $0xe8] sm:$0xff] }
  0x38   : > { %v238_v59 = vsel %vm180_vm0, %v875_v47, 0.0 }
  0x39   : > { %v223_v62 = vadd.f32 %v222_v50, %v221_v55  ;;  %v316_v50 = vadd.f32 %v315_v37, %v314_v41  ;;  %v319_v55 = vsel %vm180_vm0, %v269_v36, 0.0  ;;  %v276_v37 = vmul.f32 %v851_v20, %v851_v20 }
  0x3b   : > { %v225_v11 = vadd.f32 %v224_v57, %v223_v62  ;;  %v318_v58 = vadd.f32 %v317_v45, %v316_v50  ;;  %v272_v62 = vmul.f32 %v819_v46, %v819_v46  ;;  %v278_v50 = vmul.f32 %v867_v38, %v867_v38 }
  0x3d   : > { %v227_v21 = vadd.f32 %v226_v4, %v225_v11  ;;  %v891_v4 = vld [vmem:[%s668_s13 + $0xf8] sm:$0xff]  ;;  %v320_v8 = vadd.f32 %v319_v55, %v318_v58  ;;  %v240_v11 = vsel %vm180_vm0, %v883_v56, 0.0  ;;  %v335_v58 = vsel %vm180_vm0, %v277_v44, 0.0 }
  0x3f   : > { %v229_v31 = vadd.f32 %v228_v14, %v227_v21  ;;  %v323_v14 = vsel %vm180_vm0, %v271_v52, 0.0  ;;  %v322_v18 = vadd.f32 %v321_v63, %v320_v8  ;;  %v242_v21 = vsel %vm180_vm0, %v891_v4, 0.0 }
  0x40   : > { %v337_v63 = vsel %vm180_vm0, %v278_v50, 0.0 }
  0x41   : > { %v231_v40 = vadd.f32 %v230_v26, %v229_v31  ;;  %v325_v26 = vsel %vm180_vm0, %v272_v62, 0.0  ;;  %v324_v29 = vadd.f32 %v323_v14, %v322_v18  ;;  %v275_v31 = vmul.f32 %v843_v9, %v843_v9 }
  0x42   : > { %v280_v62 = vmul.f32 %v883_v56, %v883_v56 }
  0x43   : > { %v233_v49 = vadd.f32 %v232_v34, %v231_v40  ;;  %v326_v36 = vadd.f32 %v325_v26, %v324_v29  ;;  %v329_v40 = vsel %vm180_vm0, %v274_v23, 0.0  ;;  %v331_v45 = vsel %vm180_vm0, %v275_v31, 0.0 }
  0x45   : > { %v235_v57 = vadd.f32 %v234_v43, %v233_v49  ;;  %v328_v43 = vadd.f32 %v327_v33, %v326_v36 }
  0x47   : > { %v237_v5 = vadd.f32 %v236_v51, %v235_v57  ;;  %v330_v49 = vadd.f32 %v329_v40, %v328_v43  ;;  %v333_v51 = vsel %vm180_vm0, %v276_v37, 0.0  ;;  %v279_v57 = vmul.f32 %v875_v47, %v875_v47 }
  0x49   : > { %v239_v17 = vadd.f32 %v238_v59, %v237_v5  ;;  %v332_v55 = vadd.f32 %v331_v45, %v330_v49  ;;  %v339_v12 = vsel %vm180_vm0, %v279_v57, 0.0 }
  0x4b   : > { %v241_v28 = vadd.f32 %v240_v11, %v239_v17  ;;  %v334_v59 = vadd.f32 %v333_v51, %v332_v55  ;;  %v281_v11 = vmul.f32 %v891_v4, %v891_v4  ;;  %v341_v17 = vsel %vm180_vm0, %v280_v62, 0.0 }
  0x4d   : > { %v243_v34 = vadd.f32 %v242_v21, %v241_v28  ;;  %v336_v8 = vadd.f32 %v335_v58, %v334_v59  ;;  %v343_v23 = vsel %vm180_vm0, %v281_v11, 0.0 }
  0x4f   : > { %v244_v41 = vrot.slane %v243_v34, 4  ;;  %v338_v14 = vadd.f32 %v337_v63, %v336_v8 }
  0x51   : > { %v245_v52 = vadd.f32 %v244_v41, %v243_v34  ;;  %v340_v21 = vadd.f32 %v339_v12, %v338_v14 }
  0x53   : > { %v246_v5 = vrot.slane %v245_v52, 2  ;;  %v342_v26 = vadd.f32 %v341_v17, %v340_v21 }
  0x55   : > { %v247_v18 = vadd.f32 %v246_v5, %v245_v52  ;;  %v344_v29 = vadd.f32 %v343_v23, %v342_v26 }
  0x57   : > { %v248_v28 = vrot.slane %v247_v18, 1  ;;  %v345_v31 = vrot.slane %v344_v29, 4 }
  0x59   : > { %v249_v33 = vadd.f32 %v248_v28, %v247_v18  ;;  %v346_v34 = vadd.f32 %v345_v31, %v344_v29 }
  0x5b   : > { %v347_v36 = vrot.slane %v346_v34, 2  ;;  %v926_v40 = vmul.f32 0.00390625, %v249_v33 }
  0x5d   : > { %v348_v37 = vadd.f32 %v347_v36, %v346_v34  ;;  %v353_v44 = vmul.f32 %v926_v40, %v926_v40  ;;  %v356_v52 = vsub.f32 %v671_v0, %v926_v40  ;;  %v357_v55 = vsub.f32 %v674_v1, %v926_v40 }
  0x5e   : > { %v358_v57 = vsub.f32 %v677_v2, %v926_v40  ;;  %v359_v58 = vsub.f32 %v680_v3, %v926_v40  ;;  %v360_v59 = vsub.f32 %v689_v7, %v926_v40  ;;  %v361_v62 = vsub.f32 %v694_v10, %v926_v40 }
  0x5f   : > { %v349_v41 = vrot.slane %v348_v37, 1  ;;  %v362_v63 = vsub.f32 %v699_v13, %v926_v40  ;;  %v363_v0 = vsub.f32 %v704_v16, %v926_v40  ;;  %v364_v1 = vsub.f32 %v709_v19, %v926_v40 }
  0x60   : > { %v365_v2 = vsub.f32 %v714_v22, %v926_v40  ;;  %v366_v3 = vsub.f32 %v719_v25, %v926_v40  ;;  %v367_v7 = vsub.f32 %v722_v27, %v926_v40  ;;  %v368_v10 = vsub.f32 %v737_v35, %v926_v40 }
  0x61   : > { %v350_v43 = vadd.f32 %v349_v41, %v348_v37  ;;  %v369_v13 = vsub.f32 %v747_v42, %v926_v40  ;;  %v370_v16 = vsub.f32 %v755_v48, %v926_v40  ;;  %v371_v19 = vsub.f32 %v763_v54, %v926_v40 }
  0x62   : > { %v372_v22 = vsub.f32 %v771_v60, %v926_v40  ;;  %v373_v25 = vsub.f32 %v779_v6, %v926_v40  ;;  %v374_v27 = vsub.f32 %v787_v15, %v926_v40  ;;  %v375_v35 = vsub.f32 %v795_v24, %v926_v40 }
  0x63   : > { %v352_v45 = vmul.f32 0.00390625, %v350_v43  ;;  %v376_v42 = vsub.f32 %v803_v32, %v926_v40  ;;  %v377_v48 = vsub.f32 %v811_v39, %v926_v40  ;;  %v378_v54 = vsub.f32 %v819_v46, %v926_v40 }
  0x64   : > { %v379_v60 = vsub.f32 %v827_v53, %v926_v40  ;;  %v380_v6 = vsub.f32 %v835_v61, %v926_v40  ;;  %v381_v15 = vsub.f32 %v843_v9, %v926_v40  ;;  %v382_v24 = vsub.f32 %v851_v20, %v926_v40 }
  0x65   : > { %v354_v49 = vsub.f32 %v352_v45, %v353_v44  ;;  %v383_v5 = vsub.f32 %v859_v30, %v926_v40  ;;  %v384_v11 = vsub.f32 %v867_v38, %v926_v40  ;;  %v385_v12 = vsub.f32 %v875_v47, %v926_v40 }
  0x66   : > { %v386_v14 = vsub.f32 %v883_v56, %v926_v40  ;;  %v387_v17 = vsub.f32 %v891_v4, %v926_v40 }
  0x67   : > { %v355_v50 = vmax.f32 %v354_v49, 0.0 }
  0x69   : > { %v388_v51 = vadd.f32 1e-05, %v355_v50 }
  0x6b   : > { %606 = vrsqrt.f32 %v388_v51 }
  0x78   : > { %v986_v8 = vpop.eup %606 }
  0x79   : > { %v390_v18 = vmul.f32 %v986_v8, %v356_v52  ;;  %v391_v21 = vmul.f32 %v986_v8, %v357_v55  ;;  %v392_v23 = vmul.f32 %v986_v8, %v358_v57  ;;  %v393_v26 = vmul.f32 %v986_v8, %v359_v58 }
  0x7a   : > { %v394_v28 = vmul.f32 %v986_v8, %v360_v59  ;;  %v395_v29 = vmul.f32 %v986_v8, %v361_v62  ;;  %v396_v31 = vmul.f32 %v986_v8, %v362_v63  ;;  %v397_v33 = vmul.f32 %v986_v8, %v363_v0 }
  0x7b   : > { %v422_v34 = vmax.f32 %v390_v18, 0.0  ;;  %v423_v36 = vmax.f32 %v391_v21, 0.0  ;;  %v424_v37 = vmax.f32 %v392_v23, 0.0  ;;  %v425_v41 = vmax.f32 %v393_v26, 0.0 }
  0x7c   : > { %v426_v43 = vmax.f32 %v394_v28, 0.0  ;;  %v427_v44 = vmax.f32 %v395_v29, 0.0  ;;  %v428_v45 = vmax.f32 %v396_v31, 0.0  ;;  %v429_v49 = vmax.f32 %v397_v33, 0.0 }
  0x7d   : > { %454 = vst.msk [vmem:[%s1005_s16] sm:$0xff] %vm180_vm0, %v422_v34  ;;  %455 = vst.msk [vmem:[%s1005_s16 + $0x8] sm:$0xff] %vm180_vm0, %v423_v36  ;;  %v398_v50 = vmul.f32 %v986_v8, %v364_v1  ;;  %v399_v51 = vmul.f32 %v986_v8, %v365_v2  ;;  %v400_v52 = vmul.f32 %v986_v8, %v366_v3 }
  0x7e   : > { %456 = vst.msk [vmem:[%s1005_s16 + $0x10] sm:$0xff] %vm180_vm0, %v424_v37  ;;  %457 = vst.msk [vmem:[%s1005_s16 + $0x18] sm:$0xff] %vm180_vm0, %v425_v41  ;;  %v401_v55 = vmul.f32 %v986_v8, %v367_v7  ;;  %v402_v57 = vmul.f32 %v986_v8, %v368_v10  ;;  %v403_v58 = vmul.f32 %v986_v8, %v369_v13 }
  0x7f   : > { %458 = vst.msk [vmem:[%s1005_s16 + $0x20] sm:$0xff] %vm180_vm0, %v426_v43  ;;  %459 = vst.msk [vmem:[%s1005_s16 + $0x28] sm:$0xff] %vm180_vm0, %v427_v44  ;;  %v404_v59 = vmul.f32 %v986_v8, %v370_v16  ;;  %v405_v62 = vmul.f32 %v986_v8, %v371_v19  ;;  %v430_v63 = vmax.f32 %v398_v50, 0.0  ;;  %v431_v0 = vmax.f32 %v399_v51, 0.0 }
  0x80   : > { %460 = vst.msk [vmem:[%s1005_s16 + $0x30] sm:$0xff] %vm180_vm0, %v428_v45  ;;  %461 = vst.msk [vmem:[%s1005_s16 + $0x38] sm:$0xff] %vm180_vm0, %v429_v49  ;;  %v432_v1 = vmax.f32 %v400_v52, 0.0  ;;  %v433_v2 = vmax.f32 %v401_v55, 0.0  ;;  %v434_v3 = vmax.f32 %v402_v57, 0.0  ;;  %v435_v7 = vmax.f32 %v403_v58, 0.0 }
  0x81   : > { %v436_v18 = vmax.f32 %v404_v59, 0.0  ;;  %v437_v21 = vmax.f32 %v405_v62, 0.0  ;;  %462 = vst.msk [vmem:[%s1005_s16 + $0x40] sm:$0xff] %vm180_vm0, %v430_v63  ;;  %463 = vst.msk [vmem:[%s1005_s16 + $0x48] sm:$0xff] %vm180_vm0, %v431_v0  ;;  %v406_v10 = vmul.f32 %v986_v8, %v372_v22  ;;  %v407_v13 = vmul.f32 %v986_v8, %v373_v25 }
  0x82   : > { %464 = vst.msk [vmem:[%s1005_s16 + $0x50] sm:$0xff] %vm180_vm0, %v432_v1  ;;  %465 = vst.msk [vmem:[%s1005_s16 + $0x58] sm:$0xff] %vm180_vm0, %v433_v2  ;;  %v408_v16 = vmul.f32 %v986_v8, %v374_v27  ;;  %v409_v19 = vmul.f32 %v986_v8, %v375_v35  ;;  %v410_v22 = vmul.f32 %v986_v8, %v376_v42 }
  0x83   : > { %466 = vst.msk [vmem:[%s1005_s16 + $0x60] sm:$0xff] %vm180_vm0, %v434_v3  ;;  %467 = vst.msk [vmem:[%s1005_s16 + $0x68] sm:$0xff] %vm180_vm0, %v435_v7  ;;  %v411_v25 = vmul.f32 %v986_v8, %v377_v48  ;;  %v412_v27 = vmul.f32 %v986_v8, %v378_v54  ;;  %v413_v35 = vmul.f32 %v986_v8, %v379_v60  ;;  %v438_v23 = vmax.f32 %v406_v10, 0.0 }
  0x84   : > { %468 = vst.msk [vmem:[%s1005_s16 + $0x70] sm:$0xff] %vm180_vm0, %v436_v18  ;;  %469 = vst.msk [vmem:[%s1005_s16 + $0x78] sm:$0xff] %vm180_vm0, %v437_v21  ;;  %v439_v32 = vmax.f32 %v407_v13, 0.0  ;;  %v440_v42 = vmax.f32 %v408_v16, 0.0  ;;  %v441_v26 = vmax.f32 %v409_v19, 0.0  ;;  %v442_v39 = vmax.f32 %v410_v22, 0.0 }
  0x85   : > { %v443_v48 = vmax.f32 %v411_v25, 0.0  ;;  %v444_v28 = vmax.f32 %v412_v27, 0.0  ;;  %v445_v29 = vmax.f32 %v413_v35, 0.0  ;;  %470 = vst.msk [vmem:[%s1005_s16 + $0x80] sm:$0xff] %vm180_vm0, %v438_v23  ;;  %v414_v46 = vmul.f32 %v986_v8, %v380_v6 }
  0x86   : > { %471 = vst.msk [vmem:[%s1005_s16 + $0x88] sm:$0xff] %vm180_vm0, %v439_v32  ;;  %472 = vst.msk [vmem:[%s1005_s16 + $0x90] sm:$0xff] %vm180_vm0, %v440_v42  ;;  %v415_v53 = vmul.f32 %v986_v8, %v381_v15  ;;  %v416_v54 = vmul.f32 %v986_v8, %v382_v24  ;;  %v417_v60 = vmul.f32 %v986_v8, %v383_v5 }
  0x87   : > { %473 = vst.msk [vmem:[%s1005_s16 + $0x98] sm:$0xff] %vm180_vm0, %v441_v26  ;;  %474 = vst.msk [vmem:[%s1005_s16 + $0xa0] sm:$0xff] %vm180_vm0, %v442_v39  ;;  %v418_v61 = vmul.f32 %v986_v8, %v384_v11  ;;  %v419_v9 = vmul.f32 %v986_v8, %v385_v12  ;;  %v420_v20 = vmul.f32 %v986_v8, %v386_v14  ;;  %v446_v38 = vmax.f32 %v414_v46, 0.0 }
  0x88   : > { %475 = vst.msk [vmem:[%s1005_s16 + $0xa8] sm:$0xff] %vm180_vm0, %v443_v48  ;;  %476 = vst.msk [vmem:[%s1005_s16 + $0xb0] sm:$0xff] %vm180_vm0, %v444_v28  ;;  %v421_v30 = vmul.f32 %v986_v8, %v387_v17  ;;  %v447_v6 = vmax.f32 %v415_v53, 0.0  ;;  %v448_v15 = vmax.f32 %v416_v54, 0.0  ;;  %v449_v47 = vmax.f32 %v417_v60, 0.0 }
  0x89   : > { %477 = vst.msk [vmem:[%s1005_s16 + $0xb8] sm:$0xff] %vm180_vm0, %v445_v29  ;;  %v450_v24 = vmax.f32 %v418_v61, 0.0  ;;  %v451_v5 = vmax.f32 %v419_v9, 0.0  ;;  %v452_v11 = vmax.f32 %v420_v20, 0.0  ;;  %478 = vst.msk [vmem:[%s1005_s16 + $0xc0] sm:$0xff] %vm180_vm0, %v446_v38 }
  0x8a   : > { %v453_v12 = vmax.f32 %v421_v30, 0.0  ;;  %479 = vst.msk [vmem:[%s1005_s16 + $0xc8] sm:$0xff] %vm180_vm0, %v447_v6  ;;  %480 = vst.msk [vmem:[%s1005_s16 + $0xd0] sm:$0xff] %vm180_vm0, %v448_v15 }
  0x8b   : > { %481 = vst.msk [vmem:[%s1005_s16 + $0xd8] sm:$0xff] %vm180_vm0, %v449_v47  ;;  %482 = vst.msk [vmem:[%s1005_s16 + $0xe0] sm:$0xff] %vm180_vm0, %v450_v24 }
  0x8c   : > { %483 = vst.msk [vmem:[%s1005_s16 + $0xe8] sm:$0xff] %vm180_vm0, %v451_v5  ;;  %484 = vst.msk [vmem:[%s1005_s16 + $0xf0] sm:$0xff] %vm180_vm0, %v452_v11 }
  0x8d   : > { %485 = vst.msk [vmem:[%s1005_s16 + $0xf8] sm:$0xff] %vm180_vm0, %v453_v12 }
  0x8e PF: > { %s11_s8 = sadd.s32 1, %s630_s8   ;;  %s1146_s6 = smov %s626_s7 }
  0x8f   : > { %p8_p5 = scmp.ge.s32.totalorder %s11_s8, 4   ;;  %s1147_s7 = smov %s1149_s9 }
  0x91   :  { %10 = sbr.rel (!%p8_p5) target bundleno = 2 (0x2), region = 54 }

// kernel: generator_forward.53
= control target key start
LH: loop header
LB: loop body
LE: loop exit
PB: predicated region body
PF: predicated region fallthrough
CT: control target
= control target key end

     0   :  { %v1433_v0 = vmov 0   ;;  %s1913_s1 = inlined_call_operand.vmem [shape: bf16[256,128], index: 1, kind: input, shape index: {}]   ;;  %s1914_s0 = inlined_call_operand.vmem [shape: bf16[512,256], index: 0, kind: input, shape index: {}]   ;;  %s1915_s2 = inlined_call_operand.vmem [shape: f32[512,128], index: 2, kind: output, shape index: {}]  }
   0x1   :  { %656 = vmatprep.subr.bf16.mxu0 %v1433_v0  ;;  %1288 = vmatprep.subr.bf16.mxu1 %v1433_v0  ;;  %v1321_v1 = vld [vmem:[%s1913_s1 + $0x38] sm:$0xff]   ;;  %v1322_v2 = vld [vmem:[%s1913_s1 + $0x30] sm:$0xff]   ;;  %v1323_v3 = vld [vmem:[%s1913_s1 + $0x28] sm:$0xff]  }
   0x2   :  { %657 = vmatpush1.bf16.msra.mxu0 %v1321_v1  ;;  %1304 = vmatpush1.bf16.msra.mxu1 %v1321_v1  ;;  %v1324_v4 = vld [vmem:[%s1913_s1 + $0x20] sm:$0xff]   ;;  %v1325_v5 = vld [vmem:[%s1913_s1 + $0x18] sm:$0xff]   ;;  %v1326_v7 = vld [vmem:[%s1913_s1 + $0x10] sm:$0xff]  }
   0x3   :  { %658 = vmatprep.subr.bf16.mxu0 %v1433_v0  ;;  %1289 = vmatprep.subr.bf16.mxu1 %v1433_v0  ;;  %v1339_v6 = vld [vmem:[%s1914_s0 + $0x4] ss:$8 sps:$4 sm:$0xff]   ;;  %v1329_v11 = vld [vmem:[%s1913_s1 + $0x78] sm:$0xff]   ;;  %v1330_v12 = vld [vmem:[%s1913_s1 + $0x70] sm:$0xff]  }
   0x4   :  { %v1342_v8 = vld [vmem:[%s1914_s0 + $0x104] ss:$8 sps:$4 sm:$0xff]   ;;  %688 = vmatprep.mubr.bf16.mxu0 %v1339_v6  ;;  %v1333_v15 = vld [vmem:[%s1913_s1 + $0x58] sm:$0xff]   ;;  %v1334_v16 = vld [vmem:[%s1913_s1 + $0x50] sm:$0xff]  }
   0x5   :  { %816 = vmatprep.mubr.bf16.mxu1 %v1342_v8  ;;  %v1327_v9 = vld [vmem:[%s1913_s1 + $0x8] sm:$0xff]   ;;  %v1328_v10 = vld [vmem:[%s1913_s1] sm:$0xff]   ;;  %v1343_v21 = vld [vmem:[%s1914_s0 + $0x14] ss:$8 sps:$4 sm:$0xff]  }
   0x6   :  { %659 = vmatpush1.bf16.msra.mxu0 %v1322_v2  ;;  %1305 = vmatpush1.bf16.msra.mxu1 %v1322_v2  ;;  %v1331_v13 = vld [vmem:[%s1913_s1 + $0x68] sm:$0xff]   ;;  %v1332_v14 = vld [vmem:[%s1913_s1 + $0x60] sm:$0xff]   ;;  %v1345_v22 = vld [vmem:[%s1914_s0 + $0x114] ss:$8 sps:$4 sm:$0xff]  }
   0x7   :  { %660 = vmatprep.subr.bf16.mxu0 %v1433_v0  ;;  %1290 = vmatprep.subr.bf16.mxu1 %v1433_v0  ;;  %v1335_v17 = vld [vmem:[%s1913_s1 + $0x48] sm:$0xff]   ;;  %v1336_v18 = vld [vmem:[%s1913_s1 + $0x40] sm:$0xff]   ;;  %v1347_v23 = vld [vmem:[%s1914_s0 + $0x10] ss:$8 sps:$4 sm:$0xff]  }
   0x8   :  { %v1337_v19 = vld [vmem:[%s1914_s0] ss:$8 sps:$4 sm:$0xff]   ;;  %v1348_v24 = vld [vmem:[%s1914_s0 + $0x110] ss:$8 sps:$4 sm:$0xff]   ;;  %v1349_v25 = vld [vmem:[%s1914_s0 + $0x24] ss:$8 sps:$4 sm:$0xff]  }
   0x9   :  { %v1340_v20 = vld [vmem:[%s1914_s0 + $0x100] ss:$8 sps:$4 sm:$0xff]   ;;  %v1351_v26 = vld [vmem:[%s1914_s0 + $0x124] ss:$8 sps:$4 sm:$0xff]   ;;  %v1355_v29 = vld [vmem:[%s1914_s0 + $0x34] ss:$8 sps:$4 sm:$0xff]  }
   0xa   :  { %661 = vmatpush1.bf16.msra.mxu0 %v1323_v3  ;;  %1306 = vmatpush1.bf16.msra.mxu1 %v1323_v3  ;;  %v1353_v27 = vld [vmem:[%s1914_s0 + $0x20] ss:$8 sps:$4 sm:$0xff]   ;;  %v1357_v30 = vld [vmem:[%s1914_s0 + $0x134] ss:$8 sps:$4 sm:$0xff]   ;;  %v1359_v31 = vld [vmem:[%s1914_s0 + $0x30] ss:$8 sps:$4 sm:$0xff]  }
   0xb   :  { %662 = vmatprep.subr.bf16.mxu0 %v1433_v0  ;;  %1291 = vmatprep.subr.bf16.mxu1 %v1433_v0  ;;  %v1354_v28 = vld [vmem:[%s1914_s0 + $0x120] ss:$8 sps:$4 sm:$0xff]   ;;  %v1360_v32 = vld [vmem:[%s1914_s0 + $0x130] ss:$8 sps:$4 sm:$0xff]   ;;  %v1361_v33 = vld [vmem:[%s1914_s0 + $0x44] ss:$8 sps:$4 sm:$0xff]  }
   0xc   :  { %v1363_v34 = vld [vmem:[%s1914_s0 + $0x144] ss:$8 sps:$4 sm:$0xff]   ;;  %v1365_v35 = vld [vmem:[%s1914_s0 + $0x40] ss:$8 sps:$4 sm:$0xff]   ;;  %v1367_v37 = vld [vmem:[%s1914_s0 + $0x54] ss:$8 sps:$4 sm:$0xff]  }
   0xd   :  { %v1366_v36 = vld [vmem:[%s1914_s0 + $0x140] ss:$8 sps:$4 sm:$0xff]   ;;  %v1369_v38 = vld [vmem:[%s1914_s0 + $0x154] ss:$8 sps:$4 sm:$0xff]   ;;  %v1371_v39 = vld [vmem:[%s1914_s0 + $0x50] ss:$8 sps:$4 sm:$0xff]  }
   0xe   :  { %663 = vmatpush1.bf16.msra.mxu0 %v1324_v4  ;;  %1307 = vmatpush1.bf16.msra.mxu1 %v1324_v4  ;;  %v1372_v40 = vld [vmem:[%s1914_s0 + $0x150] ss:$8 sps:$4 sm:$0xff]   ;;  %v1373_v41 = vld [vmem:[%s1914_s0 + $0x64] ss:$8 sps:$4 sm:$0xff]   ;;  %v1377_v43 = vld [vmem:[%s1914_s0 + $0x60] ss:$8 sps:$4 sm:$0xff]  }
   0xf   :  { %664 = vmatprep.subr.bf16.mxu0 %v1433_v0  ;;  %1292 = vmatprep.subr.bf16.mxu1 %v1433_v0  ;;  %v1375_v42 = vld [vmem:[%s1914_s0 + $0x164] ss:$8 sps:$4 sm:$0xff]   ;;  %v1378_v44 = vld [vmem:[%s1914_s0 + $0x160] ss:$8 sps:$4 sm:$0xff]   ;;  %v1379_v45 = vld [vmem:[%s1914_s0 + $0x74] ss:$8 sps:$4 sm:$0xff]  }
  0x10   :  { %v1381_v46 = vld [vmem:[%s1914_s0 + $0x174] ss:$8 sps:$4 sm:$0xff]   ;;  %v1383_v47 = vld [vmem:[%s1914_s0 + $0x70] ss:$8 sps:$4 sm:$0xff]   ;;  %v1385_v49 = vld [vmem:[%s1914_s0 + $0x84] ss:$8 sps:$4 sm:$0xff]  }
  0x11   :  { %v1384_v48 = vld [vmem:[%s1914_s0 + $0x170] ss:$8 sps:$4 sm:$0xff]   ;;  %v1387_v50 = vld [vmem:[%s1914_s0 + $0x184] ss:$8 sps:$4 sm:$0xff]   ;;  %v1389_v51 = vld [vmem:[%s1914_s0 + $0x80] ss:$8 sps:$4 sm:$0xff]  }
  0x12   :  { %665 = vmatpush1.bf16.msra.mxu0 %v1325_v5  ;;  %1308 = vmatpush1.bf16.msra.mxu1 %v1325_v5  ;;  %v1390_v52 = vld [vmem:[%s1914_s0 + $0x180] ss:$8 sps:$4 sm:$0xff]   ;;  %v1391_v53 = vld [vmem:[%s1914_s0 + $0x94] ss:$8 sps:$4 sm:$0xff]   ;;  %v1395_v55 = vld [vmem:[%s1914_s0 + $0x90] ss:$8 sps:$4 sm:$0xff]  }
  0x13   :  { %666 = vmatprep.subr.bf16.mxu0 %v1433_v0  ;;  %1293 = vmatprep.subr.bf16.mxu1 %v1433_v0  ;;  %v1393_v54 = vld [vmem:[%s1914_s0 + $0x194] ss:$8 sps:$4 sm:$0xff]   ;;  %v1396_v56 = vld [vmem:[%s1914_s0 + $0x190] ss:$8 sps:$4 sm:$0xff]   ;;  %v1397_v57 = vld [vmem:[%s1914_s0 + $0xa4] ss:$8 sps:$4 sm:$0xff]  }
  0x14   :  { %v1399_v58 = vld [vmem:[%s1914_s0 + $0x1a4] ss:$8 sps:$4 sm:$0xff]   ;;  %v1401_v59 = vld [vmem:[%s1914_s0 + $0xa0] ss:$8 sps:$4 sm:$0xff]   ;;  %v1403_v61 = vld [vmem:[%s1914_s0 + $0xb4] ss:$8 sps:$4 sm:$0xff]  }
  0x15   :  { %v1402_v60 = vld [vmem:[%s1914_s0 + $0x1a0] ss:$8 sps:$4 sm:$0xff]   ;;  %v1405_v62 = vld [vmem:[%s1914_s0 + $0x1b4] ss:$8 sps:$4 sm:$0xff]   ;;  %v1407_v63 = vld [vmem:[%s1914_s0 + $0xb0] ss:$8 sps:$4 sm:$0xff]  }
  0x16   :  { %667 = vmatpush1.bf16.msra.mxu0 %v1326_v7  ;;  %1309 = vmatpush1.bf16.msra.mxu1 %v1326_v7  ;;  %v1409_v1 = vld [vmem:[%s1914_s0 + $0xc4] ss:$8 sps:$4 sm:$0xff]   ;;  %v1413_v3 = vld [vmem:[%s1914_s0 + $0xc0] ss:$8 sps:$4 sm:$0xff]   ;;  %v1415_v5 = vld [vmem:[%s1914_s0 + $0xd4] ss:$8 sps:$4 sm:$0xff]  }
  0x17   :  { %668 = vmatprep.subr.bf16.mxu0 %v1433_v0  ;;  %1294 = vmatprep.subr.bf16.mxu1 %v1433_v0  ;;  %v1411_v2 = vld [vmem:[%s1914_s0 + $0x1c4] ss:$8 sps:$4 sm:$0xff]   ;;  %v1414_v4 = vld [vmem:[%s1914_s0 + $0x1c0] ss:$8 sps:$4 sm:$0xff]   ;;  %v1417_v6 = vld [vmem:[%s1914_s0 + $0x1d4] ss:$8 sps:$4 sm:$0xff]  }
  0x18   :  { %v1419_v7 = vld [vmem:[%s1914_s0 + $0xd0] ss:$8 sps:$4 sm:$0xff]  }
  0x19   :  { %v1420_v8 = vld [vmem:[%s1914_s0 + $0x1d0] ss:$8 sps:$4 sm:$0xff]  }
  0x1a   :  { %669 = vmatpush1.bf16.msra.mxu0 %v1327_v9  ;;  %1310 = vmatpush1.bf16.msra.mxu1 %v1327_v9  ;;  %v1421_v9 = vld [vmem:[%s1914_s0 + $0xe4] ss:$8 sps:$4 sm:$0xff]  }
  0x1b   :  { %670 = vmatprep.subr.bf16.mxu0 %v1433_v0  ;;  %1295 = vmatprep.subr.bf16.mxu1 %v1433_v0 }
  0x1e   :  { %671 = vmatpush1.bf16.msra.mxu0 %v1328_v10  ;;  %1311 = vmatpush1.bf16.msra.mxu1 %v1328_v10  ;;  %v1423_v10 = vld [vmem:[%s1914_s0 + $0x1e4] ss:$8 sps:$4 sm:$0xff]  }
  0x1f   :  { %672 = vmatprep.subr.bf16.mxu0 %v1433_v0  ;;  %1296 = vmatprep.subr.bf16.mxu1 %v1433_v0 }
  0x22   :  { %673 = vmatpush2.bf16.msra.mxu0 %v1329_v11  ;;  %1312 = vmatpush2.bf16.msra.mxu1 %v1329_v11  ;;  %v1425_v11 = vld [vmem:[%s1914_s0 + $0xe0] ss:$8 sps:$4 sm:$0xff]  }
  0x23   :  { %674 = vmatprep.subr.bf16.mxu0 %v1433_v0  ;;  %1297 = vmatprep.subr.bf16.mxu1 %v1433_v0 }
  0x26   :  { %675 = vmatpush2.bf16.msra.mxu0 %v1330_v12  ;;  %1313 = vmatpush2.bf16.msra.mxu1 %v1330_v12  ;;  %v1426_v12 = vld [vmem:[%s1914_s0 + $0x1e0] ss:$8 sps:$4 sm:$0xff]  }
  0x27   :  { %676 = vmatprep.subr.bf16.mxu0 %v1433_v0  ;;  %1298 = vmatprep.subr.bf16.mxu1 %v1433_v0 }
  0x2a   :  { %677 = vmatpush2.bf16.msra.mxu0 %v1331_v13  ;;  %1314 = vmatpush2.bf16.msra.mxu1 %v1331_v13  ;;  %v1427_v13 = vld [vmem:[%s1914_s0 + $0xf4] ss:$8 sps:$4 sm:$0xff]  }
  0x2b   :  { %678 = vmatprep.subr.bf16.mxu0 %v1433_v0  ;;  %1299 = vmatprep.subr.bf16.mxu1 %v1433_v0 }
  0x2e   :  { %679 = vmatpush2.bf16.msra.mxu0 %v1332_v14  ;;  %1315 = vmatpush2.bf16.msra.mxu1 %v1332_v14  ;;  %v1429_v14 = vld [vmem:[%s1914_s0 + $0x1f4] ss:$8 sps:$4 sm:$0xff]  }
  0x2f   :  { %680 = vmatprep.subr.bf16.mxu0 %v1433_v0  ;;  %1300 = vmatprep.subr.bf16.mxu1 %v1433_v0 }
  0x32   :  { %681 = vmatpush2.bf16.msra.mxu0 %v1333_v15  ;;  %1316 = vmatpush2.bf16.msra.mxu1 %v1333_v15  ;;  %v1431_v15 = vld [vmem:[%s1914_s0 + $0xf0] ss:$8 sps:$4 sm:$0xff]  }
  0x33   :  { %682 = vmatprep.subr.bf16.mxu0 %v1433_v0  ;;  %1301 = vmatprep.subr.bf16.mxu1 %v1433_v0 }
  0x36   :  { %683 = vmatpush2.bf16.msra.mxu0 %v1334_v16  ;;  %1317 = vmatpush2.bf16.msra.mxu1 %v1334_v16  ;;  %v1432_v16 = vld [vmem:[%s1914_s0 + $0x1f0] ss:$8 sps:$4 sm:$0xff]  }
  0x37   :  { %684 = vmatprep.subr.bf16.mxu0 %v1433_v0  ;;  %1302 = vmatprep.subr.bf16.mxu1 %v1433_v0 }
  0x3a   :  { %685 = vmatpush2.bf16.msra.mxu0 %v1335_v17  ;;  %1318 = vmatpush2.bf16.msra.mxu1 %v1335_v17 }
  0x3b   :  { %686 = vmatprep.subr.bf16.mxu0 %v1433_v0  ;;  %1303 = vmatprep.subr.bf16.mxu1 %v1433_v0  ;;  %v1408_v0 = vld [vmem:[%s1914_s0 + $0x1b0] ss:$8 sps:$4 sm:$0xff]  }
  0x3e   :  { %687 = vmatpush2.bf16.msra.mxu0 %v1336_v18  ;;  %1319 = vmatpush2.bf16.msra.mxu1 %v1336_v18 }
  0x41   :  { %689 = vmatmul.mubr.bf16.vlgmr.msra.gmra.mxu0 %v1337_v19  ;;  %817 = vmatmul.mubr.bf16.vlgmr.msra.gmra.mxu1 %v1340_v20 }
  0x42   :  { %696 = vmatprep.mubr.bf16.mxu0 %v1343_v21  ;;  %824 = vmatprep.mubr.bf16.mxu1 %v1345_v22 }
  0x49   :  { %697 = vmatmul.mubr.bf16.gmra.mxu0 %v1347_v23  ;;  %825 = vmatmul.mubr.bf16.gmra.mxu1 %v1348_v24 }
  0x4a   :  { %704 = vmatprep.mubr.bf16.mxu0 %v1349_v25  ;;  %832 = vmatprep.mubr.bf16.mxu1 %v1351_v26 }
  0x51   :  { %705 = vmatmul.mubr.bf16.gmra.mxu0 %v1353_v27  ;;  %833 = vmatmul.mubr.bf16.gmra.mxu1 %v1354_v28 }
  0x52   :  { %712 = vmatprep.mubr.bf16.mxu0 %v1355_v29  ;;  %840 = vmatprep.mubr.bf16.mxu1 %v1357_v30 }
  0x59   :  { %713 = vmatmul.mubr.bf16.gmra.mxu0 %v1359_v31  ;;  %841 = vmatmul.mubr.bf16.gmra.mxu1 %v1360_v32 }
  0x5a   :  { %720 = vmatprep.mubr.bf16.mxu0 %v1361_v33  ;;  %848 = vmatprep.mubr.bf16.mxu1 %v1363_v34 }
  0x61   :  { %721 = vmatmul.mubr.bf16.gmra.mxu0 %v1365_v35  ;;  %849 = vmatmul.mubr.bf16.gmra.mxu1 %v1366_v36 }
  0x62   :  { %728 = vmatprep.mubr.bf16.mxu0 %v1367_v37  ;;  %856 = vmatprep.mubr.bf16.mxu1 %v1369_v38 }
  0x69   :  { %729 = vmatmul.mubr.bf16.gmra.mxu0 %v1371_v39  ;;  %857 = vmatmul.mubr.bf16.gmra.mxu1 %v1372_v40 }
  0x6a   :  { %736 = vmatprep.mubr.bf16.mxu0 %v1373_v41  ;;  %864 = vmatprep.mubr.bf16.mxu1 %v1375_v42 }
  0x71   :  { %737 = vmatmul.mubr.bf16.gmra.mxu0 %v1377_v43  ;;  %865 = vmatmul.mubr.bf16.gmra.mxu1 %v1378_v44 }
  0x72   :  { %744 = vmatprep.mubr.bf16.mxu0 %v1379_v45  ;;  %872 = vmatprep.mubr.bf16.mxu1 %v1381_v46 }
  0x79   :  { %745 = vmatmul.mubr.bf16.gmra.mxu0 %v1383_v47  ;;  %873 = vmatmul.mubr.bf16.gmra.mxu1 %v1384_v48 }
  0x7a   :  { %752 = vmatprep.mubr.bf16.mxu0 %v1385_v49  ;;  %880 = vmatprep.mubr.bf16.mxu1 %v1387_v50 }
  0x81   :  { %753 = vmatmul.mubr.bf16.gmra.mxu0 %v1389_v51  ;;  %881 = vmatmul.mubr.bf16.gmra.mxu1 %v1390_v52 }
  0x82   :  { %760 = vmatprep.mubr.bf16.mxu0 %v1391_v53  ;;  %888 = vmatprep.mubr.bf16.mxu1 %v1393_v54 }
  0x89   :  { %761 = vmatmul.mubr.bf16.gmra.mxu0 %v1395_v55  ;;  %889 = vmatmul.mubr.bf16.gmra.mxu1 %v1396_v56 }
  0x8a   :  { %768 = vmatprep.mubr.bf16.mxu0 %v1397_v57  ;;  %896 = vmatprep.mubr.bf16.mxu1 %v1399_v58 }
  0x91   :  { %769 = vmatmul.mubr.bf16.gmra.mxu0 %v1401_v59  ;;  %897 = vmatmul.mubr.bf16.gmra.mxu1 %v1402_v60 }
  0x92   :  { %776 = vmatprep.mubr.bf16.mxu0 %v1403_v61  ;;  %904 = vmatprep.mubr.bf16.mxu1 %v1405_v62 }
  0x99   :  { %777 = vmatmul.mubr.bf16.gmra.mxu0 %v1407_v63  ;;  %905 = vmatmul.mubr.bf16.gmra.mxu1 %v1408_v0 }
  0x9a   :  { %784 = vmatprep.mubr.bf16.mxu0 %v1409_v1  ;;  %912 = vmatprep.mubr.bf16.mxu1 %v1411_v2 }
  0xa1   :  { %785 = vmatmul.mubr.bf16.gmra.mxu0 %v1413_v3  ;;  %913 = vmatmul.mubr.bf16.gmra.mxu1 %v1414_v4 }
  0xa2   :  { %792 = vmatprep.mubr.bf16.mxu0 %v1415_v5  ;;  %920 = vmatprep.mubr.bf16.mxu1 %v1417_v6 }
  0xa9   :  { %793 = vmatmul.mubr.bf16.gmra.mxu0 %v1419_v7  ;;  %921 = vmatmul.mubr.bf16.gmra.mxu1 %v1420_v8 }
  0xaa   :  { %800 = vmatprep.mubr.bf16.mxu0 %v1421_v9  ;;  %928 = vmatprep.mubr.bf16.mxu1 %v1423_v10 }
  0xb1   :  { %801 = vmatmul.mubr.bf16.gmra.mxu0 %v1425_v11  ;;  %929 = vmatmul.mubr.bf16.gmra.mxu1 %v1426_v12 }
  0xb2   :  { %808 = vmatprep.mubr.bf16.mxu0 %v1427_v13  ;;  %936 = vmatprep.mubr.bf16.mxu1 %v1429_v14 }
  0xb9   :  { %809 = vmatmul.mubr.bf16.gmra.mxu0 %v1431_v15  ;;  %937 = vmatmul.mubr.bf16.gmra.mxu1 %v1432_v16 }
 0x101   :  { %v690_v17 = vpop.f32.mrf.mxu0  ;;  %v818_v18 = vpop.f32.mrf.mxu1 }
 0x102   :  { %1140 = vst [vmem:[%s1915_s2] sm:$0xff] %v690_v17  ;;  %1172 = vst [vmem:[%s1915_s2 + $0x100] sm:$0xff] %v818_v18 }
 0x103   :  { %v692_v19 = vpop.f32.mrf.mxu0  ;;  %v820_v20 = vpop.f32.mrf.mxu1 }
 0x105   :  { %v693_v21 = vpop.f32.mrf.mxu0  ;;  %v821_v22 = vpop.f32.mrf.mxu1 }
 0x106   :  { %1141 = vst [vmem:[%s1915_s2 + $0x8] sm:$0xff] %v693_v21  ;;  %1173 = vst [vmem:[%s1915_s2 + $0x108] sm:$0xff] %v821_v22 }
 0x107   :  { %v695_v23 = vpop.f32.mrf.mxu0  ;;  %v823_v24 = vpop.f32.mrf.mxu1 }
 0x109   :  { %v698_v25 = vpop.f32.mrf.mxu0  ;;  %v826_v26 = vpop.f32.mrf.mxu1 }
 0x10a   :  { %1142 = vst [vmem:[%s1915_s2 + $0x10] sm:$0xff] %v698_v25  ;;  %1174 = vst [vmem:[%s1915_s2 + $0x110] sm:$0xff] %v826_v26 }
 0x10b   :  { %v700_v27 = vpop.f32.mrf.mxu0  ;;  %v828_v28 = vpop.f32.mrf.mxu1 }
 0x10d   :  { %v701_v29 = vpop.f32.mrf.mxu0  ;;  %v829_v30 = vpop.f32.mrf.mxu1 }
 0x10e   :  { %1143 = vst [vmem:[%s1915_s2 + $0x18] sm:$0xff] %v701_v29  ;;  %1175 = vst [vmem:[%s1915_s2 + $0x118] sm:$0xff] %v829_v30 }
 0x10f   :  { %v703_v31 = vpop.f32.mrf.mxu0  ;;  %v831_v32 = vpop.f32.mrf.mxu1 }
 0x111   :  { %v706_v33 = vpop.f32.mrf.mxu0  ;;  %v834_v34 = vpop.f32.mrf.mxu1 }
 0x112   :  { %1144 = vst [vmem:[%s1915_s2 + $0x20] sm:$0xff] %v706_v33  ;;  %1176 = vst [vmem:[%s1915_s2 + $0x120] sm:$0xff] %v834_v34 }
 0x113   :  { %v708_v35 = vpop.f32.mrf.mxu0  ;;  %v836_v36 = vpop.f32.mrf.mxu1 }
 0x115   :  { %v709_v37 = vpop.f32.mrf.mxu0  ;;  %v837_v38 = vpop.f32.mrf.mxu1 }
 0x116   :  { %1145 = vst [vmem:[%s1915_s2 + $0x28] sm:$0xff] %v709_v37  ;;  %1177 = vst [vmem:[%s1915_s2 + $0x128] sm:$0xff] %v837_v38 }
 0x117   :  { %v711_v39 = vpop.f32.mrf.mxu0  ;;  %v839_v40 = vpop.f32.mrf.mxu1 }
 0x119   :  { %v714_v41 = vpop.f32.mrf.mxu0  ;;  %v842_v42 = vpop.f32.mrf.mxu1 }
 0x11a   :  { %1146 = vst [vmem:[%s1915_s2 + $0x30] sm:$0xff] %v714_v41  ;;  %1178 = vst [vmem:[%s1915_s2 + $0x130] sm:$0xff] %v842_v42 }
 0x11b   :  { %v716_v43 = vpop.f32.mrf.mxu0  ;;  %v844_v44 = vpop.f32.mrf.mxu1 }
 0x11d   :  { %v717_v45 = vpop.f32.mrf.mxu0  ;;  %v845_v46 = vpop.f32.mrf.mxu1 }
 0x11e   :  { %1147 = vst [vmem:[%s1915_s2 + $0x38] sm:$0xff] %v717_v45  ;;  %1179 = vst [vmem:[%s1915_s2 + $0x138] sm:$0xff] %v845_v46 }
 0x11f   :  { %v719_v47 = vpop.f32.mrf.mxu0  ;;  %v847_v48 = vpop.f32.mrf.mxu1 }
 0x121   :  { %v722_v49 = vpop.f32.mrf.mxu0  ;;  %v850_v50 = vpop.f32.mrf.mxu1 }
 0x122   :  { %1148 = vst [vmem:[%s1915_s2 + $0x40] sm:$0xff] %v722_v49  ;;  %1180 = vst [vmem:[%s1915_s2 + $0x140] sm:$0xff] %v850_v50 }
 0x123   :  { %v724_v51 = vpop.f32.mrf.mxu0  ;;  %v852_v52 = vpop.f32.mrf.mxu1 }
 0x125   :  { %v725_v53 = vpop.f32.mrf.mxu0  ;;  %v853_v54 = vpop.f32.mrf.mxu1 }
 0x126   :  { %1149 = vst [vmem:[%s1915_s2 + $0x48] sm:$0xff] %v725_v53  ;;  %1181 = vst [vmem:[%s1915_s2 + $0x148] sm:$0xff] %v853_v54 }
 0x127   :  { %v727_v55 = vpop.f32.mrf.mxu0  ;;  %v855_v56 = vpop.f32.mrf.mxu1 }
 0x129   :  { %v730_v57 = vpop.f32.mrf.mxu0  ;;  %v858_v58 = vpop.f32.mrf.mxu1 }
 0x12a   :  { %1150 = vst [vmem:[%s1915_s2 + $0x50] sm:$0xff] %v730_v57  ;;  %1182 = vst [vmem:[%s1915_s2 + $0x150] sm:$0xff] %v858_v58 }
 0x12b   :  { %v732_v59 = vpop.f32.mrf.mxu0  ;;  %v860_v60 = vpop.f32.mrf.mxu1 }
 0x12d   :  { %v733_v61 = vpop.f32.mrf.mxu0  ;;  %v861_v62 = vpop.f32.mrf.mxu1 }
 0x12e   :  { %1151 = vst [vmem:[%s1915_s2 + $0x58] sm:$0xff] %v733_v61  ;;  %1183 = vst [vmem:[%s1915_s2 + $0x158] sm:$0xff] %v861_v62 }
 0x12f   :  { %v735_v63 = vpop.f32.mrf.mxu0  ;;  %v863_v0 = vpop.f32.mrf.mxu1 }
 0x131   :  { %v738_v1 = vpop.f32.mrf.mxu0  ;;  %v866_v2 = vpop.f32.mrf.mxu1 }
 0x132   :  { %1152 = vst [vmem:[%s1915_s2 + $0x60] sm:$0xff] %v738_v1  ;;  %1184 = vst [vmem:[%s1915_s2 + $0x160] sm:$0xff] %v866_v2 }
 0x133   :  { %v740_v3 = vpop.f32.mrf.mxu0  ;;  %v868_v4 = vpop.f32.mrf.mxu1 }
 0x135   :  { %v741_v5 = vpop.f32.mrf.mxu0  ;;  %v869_v6 = vpop.f32.mrf.mxu1 }
 0x136   :  { %1153 = vst [vmem:[%s1915_s2 + $0x68] sm:$0xff] %v741_v5  ;;  %1185 = vst [vmem:[%s1915_s2 + $0x168] sm:$0xff] %v869_v6 }
 0x137   :  { %v743_v7 = vpop.f32.mrf.mxu0  ;;  %v871_v8 = vpop.f32.mrf.mxu1 }
 0x139   :  { %v746_v9 = vpop.f32.mrf.mxu0  ;;  %v874_v10 = vpop.f32.mrf.mxu1 }
 0x13a   :  { %1154 = vst [vmem:[%s1915_s2 + $0x70] sm:$0xff] %v746_v9  ;;  %1186 = vst [vmem:[%s1915_s2 + $0x170] sm:$0xff] %v874_v10 }
 0x13b   :  { %v748_v11 = vpop.f32.mrf.mxu0  ;;  %v876_v12 = vpop.f32.mrf.mxu1 }
 0x13d   :  { %v749_v13 = vpop.f32.mrf.mxu0  ;;  %v877_v14 = vpop.f32.mrf.mxu1 }
 0x13e   :  { %1155 = vst [vmem:[%s1915_s2 + $0x78] sm:$0xff] %v749_v13  ;;  %1187 = vst [vmem:[%s1915_s2 + $0x178] sm:$0xff] %v877_v14 }
 0x13f   :  { %v751_v15 = vpop.f32.mrf.mxu0  ;;  %v879_v16 = vpop.f32.mrf.mxu1 }
 0x141   :  { %v754_v17 = vpop.f32.mrf.mxu0  ;;  %v882_v18 = vpop.f32.mrf.mxu1 }
 0x142   :  { %1156 = vst [vmem:[%s1915_s2 + $0x80] sm:$0xff] %v754_v17  ;;  %1188 = vst [vmem:[%s1915_s2 + $0x180] sm:$0xff] %v882_v18 }
 0x143   :  { %v756_v19 = vpop.f32.mrf.mxu0  ;;  %v884_v20 = vpop.f32.mrf.mxu1 }
 0x145   :  { %v757_v21 = vpop.f32.mrf.mxu0  ;;  %v885_v22 = vpop.f32.mrf.mxu1 }
 0x146   :  { %1157 = vst [vmem:[%s1915_s2 + $0x88] sm:$0xff] %v757_v21  ;;  %1189 = vst [vmem:[%s1915_s2 + $0x188] sm:$0xff] %v885_v22 }
 0x147   :  { %v759_v23 = vpop.f32.mrf.mxu0  ;;  %v887_v24 = vpop.f32.mrf.mxu1 }
 0x149   :  { %v762_v25 = vpop.f32.mrf.mxu0  ;;  %v890_v26 = vpop.f32.mrf.mxu1 }
 0x14a   :  { %1158 = vst [vmem:[%s1915_s2 + $0x90] sm:$0xff] %v762_v25  ;;  %1190 = vst [vmem:[%s1915_s2 + $0x190] sm:$0xff] %v890_v26 }
 0x14b   :  { %v764_v27 = vpop.f32.mrf.mxu0  ;;  %v892_v28 = vpop.f32.mrf.mxu1 }
 0x14d   :  { %v765_v29 = vpop.f32.mrf.mxu0  ;;  %v893_v30 = vpop.f32.mrf.mxu1 }
 0x14e   :  { %1159 = vst [vmem:[%s1915_s2 + $0x98] sm:$0xff] %v765_v29  ;;  %1191 = vst [vmem:[%s1915_s2 + $0x198] sm:$0xff] %v893_v30 }
 0x14f   :  { %v767_v31 = vpop.f32.mrf.mxu0  ;;  %v895_v32 = vpop.f32.mrf.mxu1 }
 0x151   :  { %v770_v33 = vpop.f32.mrf.mxu0  ;;  %v898_v34 = vpop.f32.mrf.mxu1 }
 0x152   :  { %1160 = vst [vmem:[%s1915_s2 + $0xa0] sm:$0xff] %v770_v33  ;;  %1192 = vst [vmem:[%s1915_s2 + $0x1a0] sm:$0xff] %v898_v34 }
 0x153   :  { %v772_v35 = vpop.f32.mrf.mxu0  ;;  %v900_v36 = vpop.f32.mrf.mxu1 }
 0x155   :  { %v773_v37 = vpop.f32.mrf.mxu0  ;;  %v901_v38 = vpop.f32.mrf.mxu1 }
 0x156   :  { %1161 = vst [vmem:[%s1915_s2 + $0xa8] sm:$0xff] %v773_v37  ;;  %1193 = vst [vmem:[%s1915_s2 + $0x1a8] sm:$0xff] %v901_v38 }
 0x157   :  { %v775_v39 = vpop.f32.mrf.mxu0  ;;  %v903_v40 = vpop.f32.mrf.mxu1 }
 0x159   :  { %v778_v41 = vpop.f32.mrf.mxu0  ;;  %v906_v42 = vpop.f32.mrf.mxu1 }
 0x15a   :  { %1162 = vst [vmem:[%s1915_s2 + $0xb0] sm:$0xff] %v778_v41  ;;  %1194 = vst [vmem:[%s1915_s2 + $0x1b0] sm:$0xff] %v906_v42 }
 0x15b   :  { %v780_v43 = vpop.f32.mrf.mxu0  ;;  %v908_v44 = vpop.f32.mrf.mxu1 }
 0x15d   :  { %v781_v45 = vpop.f32.mrf.mxu0  ;;  %v909_v46 = vpop.f32.mrf.mxu1 }
 0x15e   :  { %1163 = vst [vmem:[%s1915_s2 + $0xb8] sm:$0xff] %v781_v45  ;;  %1195 = vst [vmem:[%s1915_s2 + $0x1b8] sm:$0xff] %v909_v46 }
 0x15f   :  { %v783_v47 = vpop.f32.mrf.mxu0  ;;  %v911_v48 = vpop.f32.mrf.mxu1 }
 0x161   :  { %v786_v49 = vpop.f32.mrf.mxu0  ;;  %v914_v50 = vpop.f32.mrf.mxu1 }
 0x162   :  { %1164 = vst [vmem:[%s1915_s2 + $0xc0] sm:$0xff] %v786_v49  ;;  %1196 = vst [vmem:[%s1915_s2 + $0x1c0] sm:$0xff] %v914_v50 }
 0x163   :  { %v788_v51 = vpop.f32.mrf.mxu0  ;;  %v916_v52 = vpop.f32.mrf.mxu1 }
 0x165   :  { %v789_v53 = vpop.f32.mrf.mxu0  ;;  %v917_v54 = vpop.f32.mrf.mxu1 }
 0x166   :  { %1165 = vst [vmem:[%s1915_s2 + $0xc8] sm:$0xff] %v789_v53  ;;  %1197 = vst [vmem:[%s1915_s2 + $0x1c8] sm:$0xff] %v917_v54 }
 0x167   :  { %v791_v55 = vpop.f32.mrf.mxu0  ;;  %v919_v56 = vpop.f32.mrf.mxu1 }
 0x169   :  { %v794_v57 = vpop.f32.mrf.mxu0  ;;  %v922_v58 = vpop.f32.mrf.mxu1 }
 0x16a   :  { %1166 = vst [vmem:[%s1915_s2 + $0xd0] sm:$0xff] %v794_v57  ;;  %1198 = vst [vmem:[%s1915_s2 + $0x1d0] sm:$0xff] %v922_v58 }
 0x16b   :  { %v796_v59 = vpop.f32.mrf.mxu0  ;;  %v924_v60 = vpop.f32.mrf.mxu1 }
 0x16d   :  { %v797_v61 = vpop.f32.mrf.mxu0  ;;  %v925_v62 = vpop.f32.mrf.mxu1 }
 0x16e   :  { %1167 = vst [vmem:[%s1915_s2 + $0xd8] sm:$0xff] %v797_v61  ;;  %1199 = vst [vmem:[%s1915_s2 + $0x1d8] sm:$0xff] %v925_v62 }
 0x16f   :  { %v799_v63 = vpop.f32.mrf.mxu0  ;;  %v927_v0 = vpop.f32.mrf.mxu1 }
 0x171   :  { %v802_v1 = vpop.f32.mrf.mxu0  ;;  %v930_v2 = vpop.f32.mrf.mxu1 }
 0x172   :  { %1168 = vst [vmem:[%s1915_s2 + $0xe0] sm:$0xff] %v802_v1  ;;  %1200 = vst [vmem:[%s1915_s2 + $0x1e0] sm:$0xff] %v930_v2 }
 0x173   :  { %v804_v3 = vpop.f32.mrf.mxu0  ;;  %v932_v4 = vpop.f32.mrf.mxu1 }
 0x175   :  { %v805_v5 = vpop.f32.mrf.mxu0  ;;  %v933_v6 = vpop.f32.mrf.mxu1 }
 0x176   :  { %1169 = vst [vmem:[%s1915_s2 + $0xe8] sm:$0xff] %v805_v5  ;;  %1201 = vst [vmem:[%s1915_s2 + $0x1e8] sm:$0xff] %v933_v6 }
 0x177   :  { %v807_v7 = vpop.f32.mrf.mxu0  ;;  %v935_v8 = vpop.f32.mrf.mxu1 }
 0x179   :  { %v810_v9 = vpop.f32.mrf.mxu0  ;;  %v938_v10 = vpop.f32.mrf.mxu1 }
 0x17a   :  { %1170 = vst [vmem:[%s1915_s2 + $0xf0] sm:$0xff] %v810_v9  ;;  %1202 = vst [vmem:[%s1915_s2 + $0x1f0] sm:$0xff] %v938_v10 }
 0x17b   :  { %v812_v11 = vpop.f32.mrf.mxu0  ;;  %v940_v12 = vpop.f32.mrf.mxu1 }
 0x17d   :  { %v813_v13 = vpop.f32.mrf.mxu0  ;;  %v941_v14 = vpop.f32.mrf.mxu1 }
 0x17e   :  { %1171 = vst [vmem:[%s1915_s2 + $0xf8] sm:$0xff] %v813_v13  ;;  %1203 = vst [vmem:[%s1915_s2 + $0x1f8] sm:$0xff] %v941_v14 }
 0x17f   :  { %v815_v15 = vpop.f32.mrf.mxu0  ;;  %v943_v16 = vpop.f32.mrf.mxu1 }

// kernel: generator_forward.56
= control target key start
LH: loop header
LB: loop body
LE: loop exit
PB: predicated region body
PF: predicated region fallthrough
CT: control target
= control target key end

     0   :  { %s385_s6 = smov 0   ;;  %s387_s7 = smov 0   ;;  %s425_s0 = inlined_call_operand.vmem [shape: f32[2,64,128], index: 0, kind: input, shape index: {}]   ;;  %s426_s1 = inlined_call_operand.vmem [shape: f32[2,64,128], index: 1, kind: output, shape index: {}]  }
   0x1   :  { %s389_s8 = smov 0  }
   0x2 LB: > { %s23_s9 = sadd.s32 1, %s369_s7  ;;  %p316_p0 = scmp.ge.s32.totalorder %s373_s8, 1  ;;  %s373_s8 = sphi %s389_s8, %s11_s8   ;;  %s369_s7 = sphi %s387_s7, %s428_s7   ;;  %s365_s6 = sphi %s385_s6, %s427_s6  }
   0x3   : > { %p25_p1 = scmp.ge.s32.totalorder %s23_s9, 2  ;;  %p106_p2 = scmp.lt.s32.totalorder %s373_s8, 3 }
   0x5   : > { %s430_s9 = smov (%p25_p1, %s23_s9), 0  ;;  %p107_p3 = pnand %p316_p0, %p106_p2 }
   0x6   : > { %p132_p4 = scmp.lt.s32.totalorder (!%p107_p3), %s365_s6, 1 }
   0x7   : > { %110 = sbr.rel (%p107_p3) target bundleno = 74 (0x4a), region = 24 }
   0xc   : > { %s432_s6 = smov (!%p132_p4, %s365_s6), 1 }
   0xd   : > { %s323_s10 = sshll.u32 %s432_s6, 6 }
   0xe   : > { %s139_s13 = scalar_lea.vmem %s425_s0, %s323_s10  ;;  %s147_s16 = scalar_lea.vmem %s426_s1, %s323_s10 }
   0xf   : > { %v148_v0 = vld [vmem:[%s139_s13] sm:$0xff]  ;;  %v149_v1 = vld [vmem:[%s139_s13 + $0x8] sm:$0xff]  ;;  %v150_v2 = vld [vmem:[%s139_s13 + $0x10] sm:$0xff] }
  0x10   : > { %v151_v3 = vld [vmem:[%s139_s13 + $0x18] sm:$0xff]  ;;  %v156_v4 = vadd.f32 %v149_v1, %v148_v0  ;;  %v169_v5 = vmul.f32 %v148_v0, %v148_v0  ;;  %v170_v6 = vmul.f32 %v149_v1, %v149_v1  ;;  %v171_v7 = vmul.f32 %v150_v2, %v150_v2  ;;  %v152_v8 = vld [vmem:[%s139_s13 + $0x20] sm:$0xff]  ;;  %v153_v12 = vld [vmem:[%s139_s13 + $0x28] sm:$0xff] }
  0x11   : > { %v172_v10 = vmul.f32 %v151_v3, %v151_v3  ;;  %v173_v14 = vmul.f32 %v152_v8, %v152_v8  ;;  %v154_v16 = vld [vmem:[%s139_s13 + $0x30] sm:$0xff]  ;;  %v174_v18 = vmul.f32 %v153_v12, %v153_v12  ;;  %v155_v20 = vld [vmem:[%s139_s13 + $0x38] sm:$0xff] }
  0x12   : > { %v157_v9 = vadd.f32 %v156_v4, %v150_v2  ;;  %v177_v11 = vadd.f32 %v170_v6, %v169_v5  ;;  %v175_v22 = vmul.f32 %v154_v16, %v154_v16  ;;  %v176_v25 = vmul.f32 %v155_v20, %v155_v20 }
  0x14   : > { %v158_v13 = vadd.f32 %v157_v9, %v151_v3  ;;  %v178_v15 = vadd.f32 %v177_v11, %v171_v7 }
  0x16   : > { %v159_v17 = vadd.f32 %v158_v13, %v152_v8  ;;  %v179_v19 = vadd.f32 %v178_v15, %v172_v10 }
  0x18   : > { %v160_v21 = vadd.f32 %v159_v17, %v153_v12  ;;  %v180_v23 = vadd.f32 %v179_v19, %v173_v14 }
  0x1a   : > { %v161_v24 = vadd.f32 %v160_v21, %v154_v16  ;;  %v181_v26 = vadd.f32 %v180_v23, %v174_v18 }
  0x1c   : > { %v162_v27 = vadd.f32 %v161_v24, %v155_v20  ;;  %v182_v28 = vadd.f32 %v181_v26, %v175_v22 }
  0x1e   : > { %v163_v29 = vrot.slane %v162_v27, 4  ;;  %v183_v30 = vadd.f32 %v182_v28, %v176_v25 }
  0x20   : > { %v164_v31 = vadd.f32 %v163_v29, %v162_v27  ;;  %v184_v32 = vrot.slane %v183_v30, 4 }
  0x22   : > { %v165_v33 = vrot.slane %v164_v31, 2  ;;  %v185_v34 = vadd.f32 %v184_v32, %v183_v30 }
  0x24   : > { %v166_v35 = vadd.f32 %v165_v33, %v164_v31  ;;  %v186_v36 = vrot.slane %v185_v34, 2 }
  0x26   : > { %v167_v37 = vrot.slane %v166_v35, 1  ;;  %v187_v38 = vadd.f32 %v186_v36, %v185_v34 }
  0x28   : > { %v168_v39 = vadd.f32 %v167_v37, %v166_v35  ;;  %v188_v40 = vrot.slane %v187_v38, 1 }
  0x2a   : > { %v189_v41 = vadd.f32 %v188_v40, %v187_v38  ;;  %v190_v42 = vmul.f32 0.015625, %v168_v39 }
  0x2c   : > { %v191_v43 = vmul.f32 0.015625, %v189_v41  ;;  %v192_v44 = vmul.f32 %v190_v42, %v190_v42  ;;  %v195_v48 = vsub.f32 %v148_v0, %v190_v42  ;;  %v196_v49 = vsub.f32 %v149_v1, %v190_v42 }
  0x2d   : > { %v197_v50 = vsub.f32 %v150_v2, %v190_v42  ;;  %v198_v51 = vsub.f32 %v151_v3, %v190_v42  ;;  %v199_v52 = vsub.f32 %v152_v8, %v190_v42  ;;  %v200_v53 = vsub.f32 %v153_v12, %v190_v42 }
  0x2e   : > { %v193_v45 = vsub.f32 %v191_v43, %v192_v44  ;;  %v201_v54 = vsub.f32 %v154_v16, %v190_v42  ;;  %v202_v55 = vsub.f32 %v155_v20, %v190_v42 }
  0x30   : > { %v194_v46 = vmax.f32 %v193_v45, 0.0 }
  0x32   : > { %v203_v47 = vadd.f32 1e-05, %v194_v46 }
  0x34   : > { %349 = vrsqrt.f32 %v203_v47 }
  0x41   : > { %v350_v56 = vpop.eup %349 }
  0x42   : > { %v205_v57 = vmul.f32 %v350_v56, %v195_v48  ;;  %v206_v58 = vmul.f32 %v350_v56, %v196_v49  ;;  %v207_v59 = vmul.f32 %v350_v56, %v197_v50  ;;  %v208_v60 = vmul.f32 %v350_v56, %v198_v51 }
  0x43   : > { %v209_v61 = vmul.f32 %v350_v56, %v199_v52  ;;  %v210_v62 = vmul.f32 %v350_v56, %v200_v53  ;;  %v211_v63 = vmul.f32 %v350_v56, %v201_v54  ;;  %v212_v0 = vmul.f32 %v350_v56, %v202_v55 }
  0x44   : > { %v213_v1 = vmax.f32 %v205_v57, 0.0  ;;  %v214_v2 = vmax.f32 %v206_v58, 0.0  ;;  %v215_v3 = vmax.f32 %v207_v59, 0.0  ;;  %v216_v4 = vmax.f32 %v208_v60, 0.0 }
  0x45   : > { %v217_v5 = vmax.f32 %v209_v61, 0.0  ;;  %v218_v6 = vmax.f32 %v210_v62, 0.0  ;;  %v219_v7 = vmax.f32 %v211_v63, 0.0  ;;  %v220_v8 = vmax.f32 %v212_v0, 0.0 }
  0x46   : > { %221 = vst [vmem:[%s147_s16] sm:$0xff] %v213_v1  ;;  %222 = vst [vmem:[%s147_s16 + $0x8] sm:$0xff] %v214_v2 }
  0x47   : > { %223 = vst [vmem:[%s147_s16 + $0x10] sm:$0xff] %v215_v3  ;;  %224 = vst [vmem:[%s147_s16 + $0x18] sm:$0xff] %v216_v4 }
  0x48   : > { %225 = vst [vmem:[%s147_s16 + $0x20] sm:$0xff] %v217_v5  ;;  %226 = vst [vmem:[%s147_s16 + $0x28] sm:$0xff] %v218_v6 }
  0x49   : > { %227 = vst [vmem:[%s147_s16 + $0x30] sm:$0xff] %v219_v7  ;;  %228 = vst [vmem:[%s147_s16 + $0x38] sm:$0xff] %v220_v8 }
  0x4a PF: > { %s11_s8 = sadd.s32 1, %s373_s8   ;;  %s427_s6 = smov %s369_s7 }
  0x4b   : > { %p8_p5 = scmp.ge.s32.totalorder %s11_s8, 4   ;;  %s428_s7 = smov %s430_s9 }
  0x4d   :  { %10 = sbr.rel (!%p8_p5) target bundleno = 2 (0x2), region = 54 }

// kernel: generator_forward.55
= control target key start
LH: loop header
LB: loop body
LE: loop exit
PB: predicated region body
PF: predicated region fallthrough
CT: control target
= control target key end

     0   :  { %s1741_s1 = inlined_call_operand.vmem [shape: bf16[640,128], index: 1, kind: input, shape index: {}]   ;;  %s1742_s0 = inlined_call_operand.vmem [shape: bf16[128,640], index: 0, kind: input, shape index: {}]   ;;  %s1743_s2 = inlined_call_operand.vmem [shape: f32[128,128], index: 2, kind: output, shape index: {}]  }
   0x1   :  { %v1258_v0 = vld [vmem:[%s1741_s1 + $0x78] sm:$0xff]   ;;  %v1262_v4 = vld [vmem:[%s1741_s1 + $0x70] sm:$0xff]   ;;  %v1266_v8 = vld [vmem:[%s1741_s1 + $0x68] sm:$0xff]  }
   0x2   :  { %v1259_v1 = vld [vmem:[%s1741_s1 + $0xf8] sm:$0xff]   ;;  %1066 = vmatprep.subr.bf16.mxu0 %v1258_v0  ;;  %v1263_v5 = vld [vmem:[%s1741_s1 + $0xf0] sm:$0xff]   ;;  %v1267_v9 = vld [vmem:[%s1741_s1 + $0xe8] sm:$0xff]  }
   0x3   :  { %v1260_v2 = vld [vmem:[%s1741_s1 + $0x38] sm:$0xff]   ;;  %1130 = vmatprep.subr.bf16.mxu1 %v1259_v1  ;;  %v1264_v6 = vld [vmem:[%s1741_s1 + $0x30] sm:$0xff]   ;;  %v1268_v10 = vld [vmem:[%s1741_s1 + $0x28] sm:$0xff]  }
   0x4   :  { %v1261_v3 = vld [vmem:[%s1741_s1 + $0xb8] sm:$0xff]   ;;  %1067 = vmatpush3.bf16.msra.mxu0 %v1260_v2  ;;  %v1265_v7 = vld [vmem:[%s1741_s1 + $0xb0] sm:$0xff]   ;;  %v1269_v11 = vld [vmem:[%s1741_s1 + $0xa8] sm:$0xff]  }
   0x5   :  { %1131 = vmatpush3.bf16.msra.mxu1 %v1261_v3  ;;  %1068 = vmatprep.subr.bf16.mxu0 %v1262_v4  ;;  %v1270_v12 = vld [vmem:[%s1741_s1 + $0x60] sm:$0xff]   ;;  %v1274_v16 = vld [vmem:[%s1741_s1 + $0x58] sm:$0xff]   ;;  %v1278_v20 = vld [vmem:[%s1741_s1 + $0x50] sm:$0xff]  }
   0x6   :  { %1132 = vmatprep.subr.bf16.mxu1 %v1263_v5  ;;  %v1271_v13 = vld [vmem:[%s1741_s1 + $0xe0] sm:$0xff]   ;;  %v1275_v17 = vld [vmem:[%s1741_s1 + $0xd8] sm:$0xff]   ;;  %v1279_v21 = vld [vmem:[%s1741_s1 + $0xd0] sm:$0xff]  }
   0x7   :  { %v1272_v14 = vld [vmem:[%s1741_s1 + $0x20] sm:$0xff]   ;;  %v1276_v18 = vld [vmem:[%s1741_s1 + $0x18] sm:$0xff]   ;;  %v1280_v22 = vld [vmem:[%s1741_s1 + $0x10] sm:$0xff]  }
   0x8   :  { %1069 = vmatpush3.bf16.msra.mxu0 %v1264_v6  ;;  %v1273_v15 = vld [vmem:[%s1741_s1 + $0xa0] sm:$0xff]   ;;  %v1277_v19 = vld [vmem:[%s1741_s1 + $0x98] sm:$0xff]   ;;  %v1281_v23 = vld [vmem:[%s1741_s1 + $0x90] sm:$0xff]  }
   0x9   :  { %1133 = vmatpush3.bf16.msra.mxu1 %v1265_v7  ;;  %1070 = vmatprep.subr.bf16.mxu0 %v1266_v8  ;;  %v1282_v24 = vld [vmem:[%s1741_s1 + $0x48] sm:$0xff]   ;;  %v1286_v28 = vld [vmem:[%s1741_s1 + $0x40] sm:$0xff]   ;;  %v1296_v36 = vld [vmem:[%s1741_s1 + $0x138] sm:$0xff]  }
   0xa   :  { %1134 = vmatprep.subr.bf16.mxu1 %v1267_v9  ;;  %v1283_v25 = vld [vmem:[%s1741_s1 + $0xc8] sm:$0xff]   ;;  %v1287_v29 = vld [vmem:[%s1741_s1 + $0xc0] sm:$0xff]   ;;  %v1303_v39 = vld [vmem:[%s1741_s1 + $0x130] sm:$0xff]  }
   0xb   :  { %v1284_v26 = vld [vmem:[%s1741_s1 + $0x8] sm:$0xff]   ;;  %v1288_v30 = vld [vmem:[%s1741_s1] sm:$0xff]   ;;  %v1306_v43 = vld [vmem:[%s1742_s0 + $0x5c] ss:$20 sps:$4 sm:$0xff]  }
   0xc   :  { %1071 = vmatpush3.bf16.msra.mxu0 %v1268_v10  ;;  %v1285_v27 = vld [vmem:[%s1741_s1 + $0x88] sm:$0xff]   ;;  %v1289_v31 = vld [vmem:[%s1741_s1 + $0x80] sm:$0xff]   ;;  %v1311_v48 = vld [vmem:[%s1742_s0 + $0x7c] ss:$20 sps:$4 sm:$0xff]  }
   0xd   :  { %1135 = vmatpush3.bf16.msra.mxu1 %v1269_v11  ;;  %1072 = vmatprep.subr.bf16.mxu0 %v1270_v12  ;;  %v1290_v32 = vld [vmem:[%s1742_s0] ss:$20 sps:$4 sm:$0xff]   ;;  %v1292_v33 = vld [vmem:[%s1742_s0 + $0x4] ss:$20 sps:$4 sm:$0xff]   ;;  %v1293_v34 = vld [vmem:[%s1742_s0 + $0x8] ss:$20 sps:$4 sm:$0xff]  }
   0xe   :  { %1136 = vmatprep.subr.bf16.mxu1 %v1271_v13  ;;  %v1295_v35 = vld [vmem:[%s1742_s0 + $0xc] ss:$20 sps:$4 sm:$0xff]   ;;  %656 = vmatprep.mubr.bf16.mxu0 %v1292_v33  ;;  %v1299_v38 = vld [vmem:[%s1742_s0 + $0x34] ss:$20 sps:$4 sm:$0xff]   ;;  %v1302_v41 = vld [vmem:[%s1742_s0 + $0x30] ss:$20 sps:$4 sm:$0xff]  }
   0xf   :  { %753 = vmatprep.mubr.bf16.mxu1 %v1295_v35  ;;  %v1297_v37 = vld [vmem:[%s1742_s0 + $0x2c] ss:$20 sps:$4 sm:$0xff]   ;;  %v1301_v40 = vld [vmem:[%s1742_s0 + $0x28] ss:$20 sps:$4 sm:$0xff]   ;;  %v1308_v46 = vld [vmem:[%s1742_s0 + $0x50] ss:$20 sps:$4 sm:$0xff]  }
  0x10   :  { %1073 = vmatpush3.bf16.msra.mxu0 %v1272_v14  ;;  %v1304_v42 = vld [vmem:[%s1742_s0 + $0x54] ss:$20 sps:$4 sm:$0xff]   ;;  %v1317_v45 = vld [vmem:[%s1741_s1 + $0x120] sm:$0xff]   ;;  %v1309_v47 = vld [vmem:[%s1742_s0 + $0x58] ss:$20 sps:$4 sm:$0xff]  }
  0x11   :  { %1137 = vmatpush3.bf16.msra.mxu1 %v1273_v15  ;;  %1074 = vmatprep.subr.bf16.mxu0 %v1274_v16  ;;  %v1310_v44 = vld [vmem:[%s1741_s1 + $0x128] sm:$0xff]   ;;  %v1313_v49 = vld [vmem:[%s1742_s0 + $0x84] ss:$20 sps:$4 sm:$0xff]   ;;  %v1331_v51 = vld [vmem:[%s1741_s1 + $0x110] sm:$0xff]  }
  0x12   :  { %1138 = vmatprep.subr.bf16.mxu1 %v1275_v17  ;;  %v1324_v50 = vld [vmem:[%s1741_s1 + $0x118] sm:$0xff]   ;;  %v1316_v53 = vld [vmem:[%s1742_s0 + $0x80] ss:$20 sps:$4 sm:$0xff]   ;;  %v1338_v55 = vld [vmem:[%s1741_s1 + $0x108] sm:$0xff]  }
  0x13   :  { %v1315_v52 = vld [vmem:[%s1742_s0 + $0x78] ss:$20 sps:$4 sm:$0xff]   ;;  %v1345_v57 = vld [vmem:[%s1741_s1 + $0x100] sm:$0xff]   ;;  %v1323_v59 = vld [vmem:[%s1742_s0 + $0xa8] ss:$20 sps:$4 sm:$0xff]  }
  0x14   :  { %1075 = vmatpush3.bf16.msra.mxu0 %v1276_v18  ;;  %v1318_v54 = vld [vmem:[%s1742_s0 + $0xa4] ss:$20 sps:$4 sm:$0xff]   ;;  %v1320_v56 = vld [vmem:[%s1742_s0 + $0xac] ss:$20 sps:$4 sm:$0xff]   ;;  %v1327_v61 = vld [vmem:[%s1742_s0 + $0xd4] ss:$20 sps:$4 sm:$0xff]  }
  0x15   :  { %1139 = vmatpush3.bf16.msra.mxu1 %v1277_v19  ;;  %1076 = vmatprep.subr.bf16.mxu0 %v1278_v20  ;;  %v1322_v58 = vld [vmem:[%s1742_s0 + $0xa0] ss:$20 sps:$4 sm:$0xff]   ;;  %v1329_v62 = vld [vmem:[%s1742_s0 + $0xc8] ss:$20 sps:$4 sm:$0xff]   ;;  %v1330_v63 = vld [vmem:[%s1742_s0 + $0xd0] ss:$20 sps:$4 sm:$0xff]  }
  0x16   :  { %1140 = vmatprep.subr.bf16.mxu1 %v1279_v21  ;;  %v1325_v60 = vld [vmem:[%s1742_s0 + $0xcc] ss:$20 sps:$4 sm:$0xff]   ;;  %v1332_v0 = vld [vmem:[%s1742_s0 + $0xf4] ss:$20 sps:$4 sm:$0xff]   ;;  %v1334_v1 = vld [vmem:[%s1742_s0 + $0xfc] ss:$20 sps:$4 sm:$0xff]  }
  0x17   :  { %v1336_v2 = vld [vmem:[%s1742_s0 + $0xf0] ss:$20 sps:$4 sm:$0xff]   ;;  %v1337_v3 = vld [vmem:[%s1742_s0 + $0xf8] ss:$20 sps:$4 sm:$0xff]   ;;  %v1344_v7 = vld [vmem:[%s1742_s0 + $0x120] ss:$20 sps:$4 sm:$0xff]  }
  0x18   :  { %1077 = vmatpush3.bf16.msra.mxu0 %v1280_v22  ;;  %v1339_v4 = vld [vmem:[%s1742_s0 + $0x11c] ss:$20 sps:$4 sm:$0xff]   ;;  %v1341_v5 = vld [vmem:[%s1742_s0 + $0x124] ss:$20 sps:$4 sm:$0xff]   ;;  %v1350_v12 = vld [vmem:[%s1742_s0 + $0x60] ss:$20 sps:$4 sm:$0xff]  }
  0x19   :  { %1141 = vmatpush3.bf16.msra.mxu1 %v1281_v23  ;;  %1078 = vmatprep.subr.bf16.mxu0 %v1282_v24  ;;  %v1343_v6 = vld [vmem:[%s1742_s0 + $0x118] ss:$20 sps:$4 sm:$0xff]   ;;  %v1346_v8 = vld [vmem:[%s1742_s0 + $0x10] ss:$20 sps:$4 sm:$0xff]   ;;  %v1351_v13 = vld [vmem:[%s1742_s0 + $0x100] ss:$20 sps:$4 sm:$0xff]  }
  0x1a   :  { %1142 = vmatprep.subr.bf16.mxu1 %v1283_v25  ;;  %v1347_v9 = vld [vmem:[%s1742_s0 + $0xb0] ss:$20 sps:$4 sm:$0xff]   ;;  %v1348_v10 = vld [vmem:[%s1742_s0 + $0x38] ss:$20 sps:$4 sm:$0xff]   ;;  %v1352_v14 = vld [vmem:[%s1742_s0 + $0x88] ss:$20 sps:$4 sm:$0xff]  }
  0x1b   :  { %v1349_v11 = vld [vmem:[%s1742_s0 + $0xd8] ss:$20 sps:$4 sm:$0xff]   ;;  %v1353_v15 = vld [vmem:[%s1742_s0 + $0x128] ss:$20 sps:$4 sm:$0xff]  }
  0x1c   :  { %1079 = vmatpush3.bf16.msra.mxu0 %v1284_v26 }
  0x1d   :  { %1143 = vmatpush3.bf16.msra.mxu1 %v1285_v27  ;;  %1080 = vmatprep.subr.bf16.mxu0 %v1286_v28 }
  0x1e   :  { %1144 = vmatprep.subr.bf16.mxu1 %v1287_v29 }
  0x20   :  { %1081 = vmatpush3.bf16.msra.mxu0 %v1288_v30 }
  0x21   :  { %1145 = vmatpush3.bf16.msra.mxu1 %v1289_v31  ;;  %1210 = vmatprep.subr.bf16.mxu0 %v1296_v36 }
  0x22   :  { %1242 = vmatprep.subr.bf16.mxu1 %v1296_v36 }
  0x23   :  { %657 = vmatmul.mubr.bf16.vlgmr.msra.gmra.mxu0 %v1290_v32 }
  0x24   :  { %754 = vmatmul.mubr.bf16.vlgmr.msra.gmra.mxu1 %v1293_v34  ;;  %1211 = vmatpush3.bf16.msra.mxu0 %v1296_v36 }
  0x25   :  { %1250 = vmatpush3.bf16.msra.mxu1 %v1296_v36  ;;  %664 = vmatprep.mubr.bf16.mxu0 %v1297_v37 }
  0x26   :  { %761 = vmatprep.mubr.bf16.mxu1 %v1299_v38  ;;  %1212 = vmatprep.subr.bf16.mxu0 %v1303_v39 }
  0x27   :  { %1243 = vmatprep.subr.bf16.mxu1 %v1303_v39 }
  0x28   :  { %1213 = vmatpush3.bf16.msra.mxu0 %v1303_v39 }
  0x29   :  { %1251 = vmatpush3.bf16.msra.mxu1 %v1303_v39  ;;  %1214 = vmatprep.subr.bf16.mxu0 %v1310_v44 }
  0x2a   :  { %1244 = vmatprep.subr.bf16.mxu1 %v1310_v44 }
  0x2b   :  { %665 = vmatmul.mubr.bf16.gmra.mxu0 %v1301_v40 }
  0x2c   :  { %762 = vmatmul.mubr.bf16.gmra.mxu1 %v1302_v41  ;;  %672 = vmatprep.mubr.bf16.mxu0 %v1304_v42 }
  0x2d   :  { %769 = vmatprep.mubr.bf16.mxu1 %v1306_v43  ;;  %1215 = vmatpush3.bf16.msra.mxu0 %v1310_v44 }
  0x2e   :  { %1252 = vmatpush3.bf16.msra.mxu1 %v1310_v44  ;;  %1216 = vmatprep.subr.bf16.mxu0 %v1317_v45 }
  0x2f   :  { %1245 = vmatprep.subr.bf16.mxu1 %v1317_v45 }
  0x31   :  { %1217 = vmatpush3.bf16.msra.mxu0 %v1317_v45 }
  0x32   :  { %1253 = vmatpush3.bf16.msra.mxu1 %v1317_v45  ;;  %1218 = vmatprep.subr.bf16.mxu0 %v1324_v50 }
  0x33   :  { %673 = vmatmul.mubr.bf16.gmra.mxu0 %v1308_v46  ;;  %1246 = vmatprep.subr.bf16.mxu1 %v1324_v50 }
  0x34   :  { %770 = vmatmul.mubr.bf16.gmra.mxu1 %v1309_v47  ;;  %680 = vmatprep.mubr.bf16.mxu0 %v1311_v48 }
  0x35   :  { %777 = vmatprep.mubr.bf16.mxu1 %v1313_v49  ;;  %1219 = vmatpush3.bf16.msra.mxu0 %v1324_v50 }
  0x36   :  { %1254 = vmatpush3.bf16.msra.mxu1 %v1324_v50  ;;  %1220 = vmatprep.subr.bf16.mxu0 %v1331_v51 }
  0x37   :  { %1247 = vmatprep.subr.bf16.mxu1 %v1331_v51 }
  0x39   :  { %1221 = vmatpush3.bf16.msra.mxu0 %v1331_v51 }
  0x3a   :  { %1255 = vmatpush3.bf16.msra.mxu1 %v1331_v51  ;;  %1222 = vmatprep.subr.bf16.mxu0 %v1338_v55 }
  0x3b   :  { %681 = vmatmul.mubr.bf16.gmra.mxu0 %v1315_v52  ;;  %1248 = vmatprep.subr.bf16.mxu1 %v1338_v55 }
  0x3c   :  { %778 = vmatmul.mubr.bf16.gmra.mxu1 %v1316_v53  ;;  %688 = vmatprep.mubr.bf16.mxu0 %v1318_v54 }
  0x3d   :  { %785 = vmatprep.mubr.bf16.mxu1 %v1320_v56  ;;  %1223 = vmatpush3.bf16.msra.mxu0 %v1338_v55 }
  0x3e   :  { %1256 = vmatpush3.bf16.msra.mxu1 %v1338_v55  ;;  %1224 = vmatprep.subr.bf16.mxu0 %v1345_v57 }
  0x3f   :  { %1249 = vmatprep.subr.bf16.mxu1 %v1345_v57 }
  0x41   :  { %1225 = vmatpush3.bf16.msra.mxu0 %v1345_v57 }
  0x42   :  { %1257 = vmatpush3.bf16.msra.mxu1 %v1345_v57 }
  0x43   :  { %689 = vmatmul.mubr.bf16.gmra.mxu0 %v1322_v58 }
  0x44   :  { %786 = vmatmul.mubr.bf16.gmra.mxu1 %v1323_v59  ;;  %696 = vmatprep.mubr.bf16.mxu0 %v1325_v60 }
  0x45   :  { %793 = vmatprep.mubr.bf16.mxu1 %v1327_v61 }
  0x4b   :  { %697 = vmatmul.mubr.bf16.gmra.mxu0 %v1329_v62 }
  0x4c   :  { %794 = vmatmul.mubr.bf16.gmra.mxu1 %v1330_v63  ;;  %704 = vmatprep.mubr.bf16.mxu0 %v1332_v0 }
  0x4d   :  { %801 = vmatprep.mubr.bf16.mxu1 %v1334_v1 }
  0x53   :  { %705 = vmatmul.mubr.bf16.gmra.mxu0 %v1336_v2 }
  0x54   :  { %802 = vmatmul.mubr.bf16.gmra.mxu1 %v1337_v3  ;;  %712 = vmatprep.mubr.bf16.mxu0 %v1339_v4 }
  0x55   :  { %809 = vmatprep.mubr.bf16.mxu1 %v1341_v5 }
  0x5b   :  { %713 = vmatmul.mubr.bf16.gmra.mxu0 %v1343_v6 }
  0x5c   :  { %810 = vmatmul.mubr.bf16.gmra.mxu1 %v1344_v7  ;;  %1226 = vmatprep.mubr.bf16.mxu0 %v1346_v8 }
  0x5d   :  { %1234 = vmatprep.mubr.bf16.mxu1 %v1347_v9 }
  0x63   :  { %1227 = vmatmul.mubr.bf16.vlgmr.msra.gmra.mxu0 %v1348_v10 }
  0x64   :  { %1235 = vmatmul.mubr.bf16.vlgmr.msra.gmra.mxu1 %v1349_v11  ;;  %1230 = vmatprep.mubr.bf16.mxu0 %v1350_v12 }
  0x65   :  { %1238 = vmatprep.mubr.bf16.mxu1 %v1351_v13 }
  0x6b   :  { %1231 = vmatmul.mubr.bf16.gmra.mxu0 %v1352_v14 }
  0x6c   :  { %1239 = vmatmul.mubr.bf16.gmra.mxu1 %v1353_v15 }
  0xe3   :  { %v1609_v16 = vpop.f32.mrf.mxu0 }
  0xe4   :  { %v1611_v17 = vpop.f32.mrf.mxu1 }
  0xe5   :  { %v1613_v18 = vpop.f32.mrf.mxu0 }
  0xe6   :  { %v1615_v19 = vpop.f32.mrf.mxu1 }
  0xe7   :  { %v1617_v20 = vpop.f32.mrf.mxu0 }
  0xe8   :  { %v1619_v21 = vpop.f32.mrf.mxu1 }
  0xe9   :  { %v1621_v22 = vpop.f32.mrf.mxu0 }
  0xea   :  { %v1623_v23 = vpop.f32.mrf.mxu1 }
  0xeb   :  { %v1088_v24 = vpop.f32.mrf.mxu0 }
  0xec   :  { %v1152_v25 = vpop.f32.mrf.mxu1 }
  0xed   :  { %v1089_v26 = vpop.f32.mrf.mxu0 }
  0xee   :  { %v1153_v27 = vpop.f32.mrf.mxu1  ;;  %v1090_v11 = vadd.f32 %v1089_v26, %v1088_v24 }
  0xef   :  { %v1091_v28 = vpop.f32.mrf.mxu0  ;;  %v1154_v12 = vadd.f32 %v1153_v27, %v1152_v25 }
  0xf0   :  { %v1155_v29 = vpop.f32.mrf.mxu1 }
  0xf1   :  { %v1092_v30 = vpop.f32.mrf.mxu0 }
  0xf2   :  { %v1156_v31 = vpop.f32.mrf.mxu1 }
  0xf3   :  { %v1625_v32 = vpop.f32.mrf.mxu0 }
  0xf4   :  { %v1627_v33 = vpop.f32.mrf.mxu1 }
  0xf5   :  { %v1629_v34 = vpop.f32.mrf.mxu0 }
  0xf6   :  { %v1631_v35 = vpop.f32.mrf.mxu1 }
  0xf7   :  { %v1633_v36 = vpop.f32.mrf.mxu0 }
  0xf8   :  { %1744 = vst [vmem:[#allocation3_spill] sm:$0xff] %v1633_v36  ;;  %v1635_v37 = vpop.f32.mrf.mxu1 }
  0xf9   :  { %1745 = vst [vmem:[#allocation4_spill] sm:$0xff] %v1635_v37  ;;  %v1637_v38 = vpop.f32.mrf.mxu0  ;;  %v1084_v37 = vadd.f32 %v1613_v18, %v1609_v16  ;;  %v1151_v16 = vadd.f32 %v1623_v23, %v1619_v21 }
  0xfa   :  { %1746 = vst [vmem:[#allocation5_spill] sm:$0xff] %v1637_v38  ;;  %v1639_v39 = vpop.f32.mrf.mxu1 }
  0xfb   :  { %1747 = vst [vmem:[#allocation6_spill] sm:$0xff] %v1639_v39  ;;  %v1641_v40 = vpop.f32.mrf.mxu0 }
  0xfc   :  { %v1643_v41 = vpop.f32.mrf.mxu1 }
  0xfd   :  { %v1645_v42 = vpop.f32.mrf.mxu0 }
  0xfe   :  { %v1647_v43 = vpop.f32.mrf.mxu1 }
  0xff   :  { %v1649_v44 = vpop.f32.mrf.mxu0 }
 0x100   :  { %v1651_v45 = vpop.f32.mrf.mxu1 }
 0x101   :  { %1748 = vst [vmem:[#allocation7_spill] sm:$0xff] %v1651_v45  ;;  %v1653_v46 = vpop.f32.mrf.mxu0 }
 0x102   :  { %1749 = vst [vmem:[#allocation8_spill] sm:$0xff] %v1653_v46  ;;  %v1655_v47 = vpop.f32.mrf.mxu1  ;;  %v764_v46 = vadd.f32 %v1154_v12, %v1090_v11 }
 0x103   :  { %1750 = vst [vmem:[#allocation9_spill] sm:$0xff] %v1655_v47  ;;  %v1106_v48 = vpop.f32.mrf.mxu0  ;;  %v1157_v47 = vadd.f32 %v1156_v31, %v1155_v29  ;;  %v1166_v31 = vadd.f32 %v1647_v43, %v1643_v41  ;;  %v1160_v41 = vadd.f32 %v1631_v35, %v1627_v33 }
 0x104   :  { %v1170_v49 = vpop.f32.mrf.mxu1 }
 0x105   :  { %v1107_v50 = vpop.f32.mrf.mxu0 }
 0x106   :  { %v1171_v51 = vpop.f32.mrf.mxu1  ;;  %v1108_v38 = vadd.f32 %v1107_v50, %v1106_v48 }
 0x107   :  { %v1109_v52 = vpop.f32.mrf.mxu0 }
 0x108   :  { %v1173_v53 = vpop.f32.mrf.mxu1  ;;  %v1756_v33 = vld [vmem:[#allocation7_spill] sm:$0xff] }
 0x109   :  { %v1110_v54 = vpop.f32.mrf.mxu0 }
 0x10a   :  { %v1174_v55 = vpop.f32.mrf.mxu1  ;;  %v1111_v48 = vadd.f32 %v1110_v54, %v1109_v52  ;;  %v1757_v35 = vld [vmem:[#allocation9_spill] sm:$0xff] }
 0x10b   :  { %v1112_v56 = vpop.f32.mrf.mxu0 }
 0x10c   :  { %v1176_v57 = vpop.f32.mrf.mxu1 }
 0x10d   :  { %v1113_v58 = vpop.f32.mrf.mxu0 }
 0x10e   :  { %v1177_v59 = vpop.f32.mrf.mxu1  ;;  %v1114_v14 = vadd.f32 %v1113_v58, %v1112_v56  ;;  %v1087_v56 = vadd.f32 %v1621_v22, %v1617_v20  ;;  %v1169_v58 = vadd.f32 %v1757_v35, %v1756_v33 }
 0x10f   :  { %v1115_v60 = vpop.f32.mrf.mxu0  ;;  %v1178_v15 = vadd.f32 %v1177_v59, %v1176_v57 }
 0x110   :  { %v1179_v61 = vpop.f32.mrf.mxu1 }
 0x111   :  { %v1116_v62 = vpop.f32.mrf.mxu0  ;;  %v796_v27 = vadd.f32 %v1178_v15, %v1114_v14 }
 0x112   :  { %v1180_v63 = vpop.f32.mrf.mxu1  ;;  %v1117_v24 = vadd.f32 %v1116_v62, %v1115_v60 }
 0x113   :  { %v1118_v0 = vpop.f32.mrf.mxu0  ;;  %v1181_v25 = vadd.f32 %v1180_v63, %v1179_v61 }
 0x114   :  { %v1182_v1 = vpop.f32.mrf.mxu1 }
 0x115   :  { %v1119_v2 = vpop.f32.mrf.mxu0 }
 0x116   :  { %v1183_v3 = vpop.f32.mrf.mxu1  ;;  %v1120_v52 = vadd.f32 %v1119_v2, %v1118_v0 }
 0x117   :  { %v1657_v4 = vpop.f32.mrf.mxu0 }
 0x118   :  { %1751 = vst [vmem:[#allocation10_spill] sm:$0xff] %v1657_v4  ;;  %v1659_v5 = vpop.f32.mrf.mxu1  ;;  %v1148_v4 = vadd.f32 %v1615_v19, %v1611_v17 }
 0x119   :  { %1752 = vst [vmem:[#allocation11_spill] sm:$0xff] %v1659_v5  ;;  %v1661_v6 = vpop.f32.mrf.mxu0 }
 0x11a   :  { %1753 = vst [vmem:[#allocation12_spill] sm:$0xff] %v1661_v6  ;;  %v1663_v7 = vpop.f32.mrf.mxu1  ;;  %v1172_v6 = vadd.f32 %v1171_v51, %v1170_v49  ;;  %v756_v19 = vadd.f32 %v1148_v4, %v1084_v37  ;;  %v1175_v49 = vadd.f32 %v1174_v55, %v1173_v53  ;;  %v799_v51 = vadd.f32 %v1181_v25, %v1117_v24 }
 0x11b   :  { %1754 = vst [vmem:[#allocation13_spill] sm:$0xff] %v1663_v7  ;;  %v1124_v8 = vpop.f32.mrf.mxu0  ;;  %v1093_v7 = vadd.f32 %v1092_v30, %v1091_v28  ;;  %v1102_v30 = vadd.f32 %v1645_v42, %v1641_v40  ;;  %v1096_v40 = vadd.f32 %v1629_v34, %v1625_v32  ;;  %v1184_v53 = vadd.f32 %v1183_v3, %v1182_v1  ;;  %v1755_v32 = vld [vmem:[#allocation8_spill] sm:$0xff]  ;;  %v1759_v3 = vld [vmem:[#allocation5_spill] sm:$0xff] }
 0x11c   :  { %v1188_v9 = vpop.f32.mrf.mxu1  ;;  %v788_v29 = vadd.f32 %v1172_v6, %v1108_v38  ;;  %v791_v57 = vadd.f32 %v1175_v49, %v1111_v48  ;;  %v1105_v34 = vadd.f32 %v1755_v32, %v1649_v44  ;;  %v1758_v44 = vld [vmem:[#allocation3_spill] sm:$0xff]  ;;  %v1760_v6 = vld [vmem:[#allocation4_spill] sm:$0xff] }
 0x11d   :  { %v1125_v10 = vpop.f32.mrf.mxu0  ;;  %v767_v22 = vadd.f32 %v1157_v47, %v1093_v7  ;;  %v759_v47 = vadd.f32 %v1151_v16, %v1087_v56  ;;  %v780_v61 = vadd.f32 %v1166_v31, %v1102_v30  ;;  %v1099_v4 = vadd.f32 %v1759_v3, %v1758_v44  ;;  %v1761_v7 = vld [vmem:[#allocation6_spill] sm:$0xff] }
 0x11e   :  { %v1189_v13 = vpop.f32.mrf.mxu1  ;;  %v1126_v23 = vadd.f32 %v1125_v10, %v1124_v8  ;;  %v1163_v8 = vadd.f32 %v1761_v7, %v1760_v6  ;;  %v804_v24 = vadd.f32 %v1184_v53, %v1120_v52 }
 0x11f   :  { %v1127_v39 = vpop.f32.mrf.mxu0  ;;  %v1190_v37 = vadd.f32 %v1189_v13, %v1188_v9 }
 0x120   :  { %v1191_v5 = vpop.f32.mrf.mxu1  ;;  %v1764_v11 = vld [vmem:[#allocation11_spill] sm:$0xff]  ;;  %v775_v48 = vadd.f32 %v1163_v8, %v1099_v4 }
 0x121   :  { %v1128_v36 = vpop.f32.mrf.mxu0  ;;  %v812_v2 = vadd.f32 %v1190_v37, %v1126_v23 }
 0x122   :  { %v1192_v45 = vpop.f32.mrf.mxu1  ;;  %v1129_v62 = vadd.f32 %v1128_v36, %v1127_v39  ;;  %v772_v39 = vadd.f32 %v1160_v41, %v1096_v40  ;;  %v1765_v12 = vld [vmem:[#allocation13_spill] sm:$0xff] }
 0x123   :  { %v1228_v26 = vpop.f32.mrf.mxu0  ;;  %v1193_v63 = vadd.f32 %v1192_v45, %v1191_v5  ;;  %v1762_v45 = vld [vmem:[#allocation10_spill] sm:$0xff]  ;;  %v1763_v5 = vld [vmem:[#allocation12_spill] sm:$0xff]  ;;  %v1187_v13 = vadd.f32 %v1765_v12, %v1764_v11 }
 0x124   :  { %v861_v18 = vadd.f32 %v1228_v26, %v764_v46  ;;  %v1236_v17 = vpop.f32.mrf.mxu1  ;;  %v1123_v10 = vadd.f32 %v1763_v5, %v1762_v45 }
 0x125   :  { %v893_v50 = vadd.f32 %v1236_v17, %v796_v27  ;;  %v852_v28 = vpop.f32.mrf.mxu0  ;;  %v783_v27 = vadd.f32 %v1169_v58, %v1105_v34 }
 0x126   :  { %968 = vst [vmem:[%s1743_s2 + $0x10] sm:$0xff] %v861_v18  ;;  %v853_v20 = vadd.f32 %v852_v28, %v756_v19  ;;  %v884_v21 = vpop.f32.mrf.mxu1  ;;  %v815_v18 = vadd.f32 %v1193_v63, %v1129_v62  ;;  %v807_v28 = vadd.f32 %v1187_v13, %v1123_v10 }
 0x127   :  { %976 = vst [vmem:[%s1743_s2 + $0x50] sm:$0xff] %v893_v50  ;;  %v885_v38 = vadd.f32 %v884_v21, %v788_v29  ;;  %v1229_v46 = vpop.f32.mrf.mxu0 }
 0x128   :  { %966 = vst [vmem:[%s1743_s2] sm:$0xff] %v853_v20  ;;  %v864_v42 = vadd.f32 %v1229_v46, %v767_v22  ;;  %v1237_v43 = vpop.f32.mrf.mxu1 }
 0x129   :  { %974 = vst [vmem:[%s1743_s2 + $0x40] sm:$0xff] %v885_v38  ;;  %v896_v54 = vadd.f32 %v1237_v43, %v799_v51  ;;  %v855_v55 = vpop.f32.mrf.mxu0 }
 0x12a   :  { %969 = vst [vmem:[%s1743_s2 + $0x18] sm:$0xff] %v864_v42  ;;  %v856_v59 = vadd.f32 %v855_v55, %v759_v47  ;;  %v887_v60 = vpop.f32.mrf.mxu1 }
 0x12b   :  { %977 = vst [vmem:[%s1743_s2 + $0x58] sm:$0xff] %v896_v54  ;;  %v888_v0 = vadd.f32 %v887_v60, %v791_v57  ;;  %v1232_v1 = vpop.f32.mrf.mxu0 }
 0x12c   :  { %967 = vst [vmem:[%s1743_s2 + $0x8] sm:$0xff] %v856_v59  ;;  %v877_v9 = vadd.f32 %v1232_v1, %v780_v61  ;;  %v1240_v36 = vpop.f32.mrf.mxu1 }
 0x12d   :  { %975 = vst [vmem:[%s1743_s2 + $0x48] sm:$0xff] %v888_v0  ;;  %v909_v14 = vadd.f32 %v1240_v36, %v812_v2  ;;  %v868_v15 = vpop.f32.mrf.mxu0 }
 0x12e   :  { %972 = vst [vmem:[%s1743_s2 + $0x30] sm:$0xff] %v877_v9  ;;  %v869_v25 = vadd.f32 %v868_v15, %v772_v39  ;;  %v900_v26 = vpop.f32.mrf.mxu1 }
 0x12f   :  { %980 = vst [vmem:[%s1743_s2 + $0x70] sm:$0xff] %v909_v14  ;;  %v901_v56 = vadd.f32 %v900_v26, %v804_v24  ;;  %v1233_v16 = vpop.f32.mrf.mxu0 }
 0x130   :  { %970 = vst [vmem:[%s1743_s2 + $0x20] sm:$0xff] %v869_v25  ;;  %v880_v17 = vadd.f32 %v1233_v16, %v783_v27  ;;  %v1241_v19 = vpop.f32.mrf.mxu1 }
 0x131   :  { %978 = vst [vmem:[%s1743_s2 + $0x60] sm:$0xff] %v901_v56  ;;  %v912_v49 = vadd.f32 %v1241_v19, %v815_v18  ;;  %v871_v50 = vpop.f32.mrf.mxu0 }
 0x132   :  { %973 = vst [vmem:[%s1743_s2 + $0x38] sm:$0xff] %v880_v17  ;;  %v872_v29 = vadd.f32 %v871_v50, %v775_v48  ;;  %v903_v30 = vpop.f32.mrf.mxu1 }
 0x133   :  { %981 = vst [vmem:[%s1743_s2 + $0x78] sm:$0xff] %v912_v49  ;;  %v904_v31 = vadd.f32 %v903_v30, %v807_v28 }
 0x134   :  { %971 = vst [vmem:[%s1743_s2 + $0x28] sm:$0xff] %v872_v29 }
 0x135   :  { %979 = vst [vmem:[%s1743_s2 + $0x68] sm:$0xff] %v904_v31 }

// kernel: generator_forward.58
= control target key start
LH: loop header
LB: loop body
LE: loop exit
PB: predicated region body
PF: predicated region fallthrough
CT: control target
= control target key end

     0   :  { %s460_s6 = smov 0   ;;  %s462_s7 = smov 0   ;;  %s560_s0 = inlined_call_operand.vmem [shape: f32[2,16,256], index: 0, kind: input, shape index: {}]   ;;  %s561_s1 = inlined_call_operand.vmem [shape: f32[2,16,256], index: 1, kind: output, shape index: {}]  }
   0x1   :  { %s464_s8 = smov 0   ;;  %s466_s9 = smov 0  }
   0x2   :  { %s468_s10 = smov 0   ;;  %s470_s11 = smov 0  }
   0x3   :  { %s472_s12 = smov 0  }
   0x4 LB: > { %s20_s13 = sadd.s32 1, %s440_s10  ;;  %s23_s14 = sadd.s32 1, %s444_s11  ;;  %s448_s12 = sphi %s472_s12, %s11_s12   ;;  %s444_s11 = sphi %s470_s11, %s568_s11   ;;  %s440_s10 = sphi %s468_s10, %s567_s10   ;;  %s436_s9 = sphi %s466_s9, %s566_s9   ;;  %s432_s8 = sphi %s464_s8, %s565_s8   ;;  %s428_s7 = sphi %s462_s7, %s564_s7   ;;  %s424_s6 = sphi %s460_s6, %s563_s6  }
   0x5   : > { %p21_p0 = scmp.ge.s32.totalorder %s20_s13, 2  ;;  %s321_s15 = sadd.s32 4294967295, %s448_s12  }
   0x6   : > { %p39_p1 = scmp.ne.s32.totalorder %s428_s7, %s424_s6  ;;  %p40_p2 = scmp.eq.s32.totalorder %s448_s12, 0 }
   0x7   : > { %s570_s13 = smov (%p21_p0, %s20_s13), 0  ;;  %s572_s14 = smov (!%p21_p0, %s23_s14), %s444_s11 }
   0x8   : > { %p25_p3 = scmp.ge.s32.totalorder %s572_s14, 2  ;;  %p71_p4 = scmp.eq.s32.totalorder %s321_s15, 3 }
   0x9   : > { %s28_s16 = ssub.s32 %s440_s10, %s570_s13  ;;  %p41_p5 = por %p40_p2, %p39_p1 }
   0xa   : > { %s574_s14 = smov (%p25_p3, %s572_s14), 0  ;;  %p508_p6 = por %p71_p4, %p39_p1 }
   0xb   : > { %s27_s18 = ssub.s32 %s444_s11, %s574_s14  ;;  %s32_s20 = sadd.s32 1, %s428_s7 }
   0xc   : > { %s29_s19 = sor.u32 %s28_s16, %s27_s18  ;;  %p324_p8 = scmp.ge.s32.totalorder %s448_s12, 4 }
   0xd   : > { %p30_p7 = scmp.eq.s32.totalorder %s29_s19, 0 }
   0xe   : > { %93 = sbr.rel (%p324_p8) target bundleno = 26 (0x1a), region = 16 }
   0xf   : > { %s516_s21 = scalar_select %p30_p7, %s428_s7, %s32_s20  }
  0x13   : > { %96 = sbr.rel (!%p41_p5) target bundleno = 26 (0x1a), region = 20  ;;  %s98_s22 = sand.u32 (%p41_p5), 1, %s428_s7  }
  0x14   : > { %s326_s23 = sshll.u32 (%p41_p5), %s444_s11, 2  ;;  %s325_s24 = sshll.u32 (%p41_p5), %s98_s22, 4 }
  0x15   : > { %s102_s25 = sadd.s32 (%p41_p5), %s440_s10, %s326_s23  ;;  %s100_s30 = scalar_lea.vmem (%p41_p5), [#allocation2], %s325_s24 }
  0x16   : > { %s327_s26 = sshll.u32 (%p41_p5), %s102_s25, 3 }
  0x17   : > { %s104_s29 = scalar_lea.vmem (%p41_p5), %s560_s0, %s327_s26 }
  0x18   : > { %v135_v0 = vld [vmem:[%s104_s29] sm:$0xff]  ;;  %v137_v1 = vld [vmem:[%s104_s29 + $0x10] sm:$0xff] }
  0x19   : > { %136 = vst [vmem:[%s100_s30] sm:$0xff] %v135_v0  ;;  %138 = vst [vmem:[%s100_s30 + $0x8] sm:$0xff] %v137_v1 }
  0x1a PF: > { %p328_p9 = scmp.ge.s32.totalorder %s448_s12, 1  ;;  %p143_p10 = scmp.lt.s32.totalorder %s448_s12, 5 }
  0x1c   : > { %p144_p11 = pnand %p328_p9, %p143_p10 }
  0x1d   : > { %s150_s2 = sand.u32 (!%p144_p11), 1, %s424_s6  }
  0x1e   : > { %147 = sbr.rel (%p144_p11) target bundleno = 87 (0x57), region = 58  ;;  %s528_s3 = sshll.u32 (!%p144_p11), %s150_s2, 4 }
  0x1f   : > { %s152_s4 = scalar_lea.vmem (!%p144_p11), [#allocation2], %s528_s3  ;;  %s167_s5 = scalar_lea.vmem (!%p144_p11), [#allocation3], %s528_s3 }
  0x23   : > { %v168_v2 = vld [vmem:[%s152_s4] sm:$0xff]  ;;  %v169_v3 = vld [vmem:[%s152_s4 + $0x8] sm:$0xff]  ;;  %s332_s6 = sshll.u32 (%p508_p6), %s436_s9, 2 }
  0x24   : > { %v170_v4 = vadd.f32 %v169_v3, %v168_v2  ;;  %v177_v5 = vmul.f32 %v168_v2, %v168_v2  ;;  %v178_v6 = vmul.f32 %v169_v3, %v169_v3  ;;  %s209_s15 = sadd.s32 (%p508_p6), %s432_s8, %s332_s6 }
  0x25   : > { %s333_s16 = sshll.u32 (%p508_p6), %s209_s15, 3 }
  0x26   : > { %v171_v7 = vrot.slane %v170_v4, 4  ;;  %v179_v8 = vadd.f32 %v178_v6, %v177_v5  ;;  %s211_s20 = scalar_lea.vmem (%p508_p6), %s561_s1, %s333_s16 }
  0x28   : > { %v172_v9 = vadd.f32 %v171_v7, %v170_v4  ;;  %v180_v10 = vrot.slane %v179_v8, 4 }
  0x2a   : > { %v173_v11 = vrot.slane %v172_v9, 2  ;;  %v181_v12 = vadd.f32 %v180_v10, %v179_v8 }
  0x2c   : > { %v174_v13 = vadd.f32 %v173_v11, %v172_v9  ;;  %v182_v14 = vrot.slane %v181_v12, 2 }
  0x2e   : > { %v175_v15 = vrot.slane %v174_v13, 1  ;;  %v183_v16 = vadd.f32 %v182_v14, %v181_v12 }
  0x30   : > { %v176_v17 = vadd.f32 %v175_v15, %v174_v13  ;;  %v184_v18 = vrot.slane %v183_v16, 1 }
  0x32   : > { %v185_v19 = vadd.f32 %v184_v18, %v183_v16  ;;  %v186_v20 = vmul.f32 0.0625, %v176_v17 }
  0x34   : > { %v187_v21 = vmul.f32 0.0625, %v185_v19  ;;  %v188_v22 = vmul.f32 %v186_v20, %v186_v20  ;;  %v191_v26 = vsub.f32 %v168_v2, %v186_v20  ;;  %v192_v27 = vsub.f32 %v169_v3, %v186_v20 }
  0x36   : > { %v189_v23 = vsub.f32 %v187_v21, %v188_v22 }
  0x38   : > { %v190_v24 = vmax.f32 %v189_v23, 0.0 }
  0x3a   : > { %v193_v25 = vadd.f32 1e-05, %v190_v24 }
  0x3c   : > { %392 = vrsqrt.f32 %v193_v25 }
  0x49   : > { %v393_v28 = vpop.eup %392 }
  0x4a   : > { %v195_v29 = vmul.f32 %v393_v28, %v191_v26  ;;  %v196_v30 = vmul.f32 %v393_v28, %v192_v27  ;;  %207 = sbr.rel (!%p508_p6) target bundleno = 87 (0x57), region = 66 }
  0x4c   : > { %v197_v31 = vmax.f32 %v195_v29, 0.0  ;;  %v198_v32 = vmax.f32 %v196_v30, 0.0 }
  0x4e   : > { %199 = vst [vmem:[%s167_s5] sm:$0xff] %v197_v31  ;;  %200 = vst [vmem:[%s167_s5 + $0x8] sm:$0xff] %v198_v32 }
  0x55   : > { %v242_v33 = vld [vmem:[%s167_s5] sm:$0xff]  ;;  %v244_v34 = vld [vmem:[%s167_s5 + $0x8] sm:$0xff] }
  0x56   : > { %243 = vst [vmem:[%s211_s20] sm:$0xff] %v242_v33  ;;  %245 = vst [vmem:[%s211_s20 + $0x10] sm:$0xff] %v244_v34 }
  0x57 PF: > { %s11_s12 = sadd.s32 1, %s448_s12   ;;  %s563_s6 = smov %s428_s7 }
  0x58   : > { %p8_p12 = scmp.ge.s32.totalorder %s11_s12, 6   ;;  %s564_s7 = smov %s516_s21 }
  0x59   : > { %s565_s8 = smov %s440_s10  ;;  %s566_s9 = smov %s444_s11 }
  0x5a   : > { %s567_s10 = smov %s570_s13  ;;  %s568_s11 = smov %s574_s14 }
  0x5b   :  { %10 = sbr.rel (!%p8_p12) target bundleno = 4 (0x4), region = 135 }

// kernel: generator_forward.57
= control target key start
LH: loop header
LB: loop body
LE: loop exit
PB: predicated region body
PF: predicated region fallthrough
CT: control target
= control target key end

     0   :  { %s2259_s1 = inlined_call_operand.vmem [shape: bf16[1152,256], index: 1, kind: input, shape index: {}]   ;;  %s2260_s0 = inlined_call_operand.vmem [shape: bf16[32,1152], index: 0, kind: input, shape index: {}]   ;;  %s2261_s2 = inlined_call_operand.vmem [shape: f32[32,256], index: 2, kind: output, shape index: {}]  }
   0x1   :  { %v1491_v0 = vld [vmem:[%s2259_s1 + $0x74] ss:$8 sps:$4 sm:$0xff]   ;;  %v1495_v2 = vld [vmem:[%s2259_s1 + $0x70] ss:$8 sps:$4 sm:$0xff]   ;;  %v1497_v4 = vld [vmem:[%s2259_s1 + $0x64] ss:$8 sps:$4 sm:$0xff]  }
   0x2   :  { %v1493_v1 = vld [vmem:[%s2259_s1 + $0x174] ss:$8 sps:$4 sm:$0xff]   ;;  %1008 = vmatprep.subr.bf16.mxu0 %v1491_v0  ;;  %v1496_v3 = vld [vmem:[%s2259_s1 + $0x170] ss:$8 sps:$4 sm:$0xff]   ;;  %v1499_v5 = vld [vmem:[%s2259_s1 + $0x164] ss:$8 sps:$4 sm:$0xff]  }
   0x3   :  { %1061 = vmatprep.subr.bf16.mxu1 %v1493_v1  ;;  %1009 = vmatpush1.bf16.msra.mxu0 %v1495_v2  ;;  %v1501_v6 = vld [vmem:[%s2259_s1 + $0x60] ss:$8 sps:$4 sm:$0xff]   ;;  %v1503_v8 = vld [vmem:[%s2259_s1 + $0x54] ss:$8 sps:$4 sm:$0xff]   ;;  %v1507_v10 = vld [vmem:[%s2259_s1 + $0x50] ss:$8 sps:$4 sm:$0xff]  }
   0x4   :  { %1062 = vmatpush1.bf16.msra.mxu1 %v1496_v3  ;;  %1010 = vmatprep.subr.bf16.mxu0 %v1497_v4  ;;  %v1502_v7 = vld [vmem:[%s2259_s1 + $0x160] ss:$8 sps:$4 sm:$0xff]   ;;  %v1505_v9 = vld [vmem:[%s2259_s1 + $0x154] ss:$8 sps:$4 sm:$0xff]   ;;  %v1508_v11 = vld [vmem:[%s2259_s1 + $0x150] ss:$8 sps:$4 sm:$0xff]  }
   0x5   :  { %1063 = vmatprep.subr.bf16.mxu1 %v1499_v5  ;;  %v1509_v12 = vld [vmem:[%s2259_s1 + $0x44] ss:$8 sps:$4 sm:$0xff]   ;;  %v1513_v14 = vld [vmem:[%s2259_s1 + $0x40] ss:$8 sps:$4 sm:$0xff]   ;;  %v1515_v16 = vld [vmem:[%s2259_s1 + $0x34] ss:$8 sps:$4 sm:$0xff]  }
   0x6   :  { %v1511_v13 = vld [vmem:[%s2259_s1 + $0x144] ss:$8 sps:$4 sm:$0xff]   ;;  %v1514_v15 = vld [vmem:[%s2259_s1 + $0x140] ss:$8 sps:$4 sm:$0xff]   ;;  %v1517_v17 = vld [vmem:[%s2259_s1 + $0x134] ss:$8 sps:$4 sm:$0xff]  }
   0x7   :  { %1011 = vmatpush1.bf16.msra.mxu0 %v1501_v6  ;;  %v1519_v18 = vld [vmem:[%s2259_s1 + $0x30] ss:$8 sps:$4 sm:$0xff]   ;;  %v1521_v20 = vld [vmem:[%s2259_s1 + $0x24] ss:$8 sps:$4 sm:$0xff]   ;;  %v1525_v22 = vld [vmem:[%s2259_s1 + $0x20] ss:$8 sps:$4 sm:$0xff]  }
   0x8   :  { %1064 = vmatpush1.bf16.msra.mxu1 %v1502_v7  ;;  %1012 = vmatprep.subr.bf16.mxu0 %v1503_v8  ;;  %v1520_v19 = vld [vmem:[%s2259_s1 + $0x130] ss:$8 sps:$4 sm:$0xff]   ;;  %v1523_v21 = vld [vmem:[%s2259_s1 + $0x124] ss:$8 sps:$4 sm:$0xff]   ;;  %v1526_v23 = vld [vmem:[%s2259_s1 + $0x120] ss:$8 sps:$4 sm:$0xff]  }
   0x9   :  { %1065 = vmatprep.subr.bf16.mxu1 %v1505_v9  ;;  %v1527_v24 = vld [vmem:[%s2259_s1 + $0x14] ss:$8 sps:$4 sm:$0xff]   ;;  %v1531_v26 = vld [vmem:[%s2259_s1 + $0x10] ss:$8 sps:$4 sm:$0xff]   ;;  %v1533_v28 = vld [vmem:[%s2259_s1 + $0x4] ss:$8 sps:$4 sm:$0xff]  }
   0xa   :  { %v1529_v25 = vld [vmem:[%s2259_s1 + $0x114] ss:$8 sps:$4 sm:$0xff]   ;;  %v1532_v27 = vld [vmem:[%s2259_s1 + $0x110] ss:$8 sps:$4 sm:$0xff]   ;;  %v1535_v29 = vld [vmem:[%s2259_s1 + $0x104] ss:$8 sps:$4 sm:$0xff]  }
   0xb   :  { %1013 = vmatpush1.bf16.msra.mxu0 %v1507_v10  ;;  %v1537_v30 = vld [vmem:[%s2259_s1] ss:$8 sps:$4 sm:$0xff]   ;;  %v1539_v32 = vld [vmem:[%s2259_s1 + $0xf4] ss:$8 sps:$4 sm:$0xff]   ;;  %v1543_v34 = vld [vmem:[%s2259_s1 + $0xf0] ss:$8 sps:$4 sm:$0xff]  }
   0xc   :  { %1066 = vmatpush1.bf16.msra.mxu1 %v1508_v11  ;;  %1014 = vmatprep.subr.bf16.mxu0 %v1509_v12  ;;  %v1538_v31 = vld [vmem:[%s2259_s1 + $0x100] ss:$8 sps:$4 sm:$0xff]   ;;  %v1541_v33 = vld [vmem:[%s2259_s1 + $0x1f4] ss:$8 sps:$4 sm:$0xff]   ;;  %v1544_v35 = vld [vmem:[%s2259_s1 + $0x1f0] ss:$8 sps:$4 sm:$0xff]  }
   0xd   :  { %1067 = vmatprep.subr.bf16.mxu1 %v1511_v13  ;;  %v1545_v36 = vld [vmem:[%s2259_s1 + $0xe4] ss:$8 sps:$4 sm:$0xff]   ;;  %v1549_v38 = vld [vmem:[%s2259_s1 + $0xe0] ss:$8 sps:$4 sm:$0xff]   ;;  %v1551_v40 = vld [vmem:[%s2259_s1 + $0xd4] ss:$8 sps:$4 sm:$0xff]  }
   0xe   :  { %v1547_v37 = vld [vmem:[%s2259_s1 + $0x1e4] ss:$8 sps:$4 sm:$0xff]   ;;  %v1550_v39 = vld [vmem:[%s2259_s1 + $0x1e0] ss:$8 sps:$4 sm:$0xff]   ;;  %v1553_v41 = vld [vmem:[%s2259_s1 + $0x1d4] ss:$8 sps:$4 sm:$0xff]  }
   0xf   :  { %1015 = vmatpush1.bf16.msra.mxu0 %v1513_v14  ;;  %v1555_v42 = vld [vmem:[%s2259_s1 + $0xd0] ss:$8 sps:$4 sm:$0xff]   ;;  %v1557_v44 = vld [vmem:[%s2259_s1 + $0xc4] ss:$8 sps:$4 sm:$0xff]   ;;  %v1561_v46 = vld [vmem:[%s2259_s1 + $0xc0] ss:$8 sps:$4 sm:$0xff]  }
  0x10   :  { %1068 = vmatpush1.bf16.msra.mxu1 %v1514_v15  ;;  %1016 = vmatprep.subr.bf16.mxu0 %v1515_v16  ;;  %v1556_v43 = vld [vmem:[%s2259_s1 + $0x1d0] ss:$8 sps:$4 sm:$0xff]   ;;  %v1559_v45 = vld [vmem:[%s2259_s1 + $0x1c4] ss:$8 sps:$4 sm:$0xff]   ;;  %v1562_v47 = vld [vmem:[%s2259_s1 + $0x1c0] ss:$8 sps:$4 sm:$0xff]  }
  0x11   :  { %1069 = vmatprep.subr.bf16.mxu1 %v1517_v17  ;;  %v1563_v48 = vld [vmem:[%s2259_s1 + $0xb4] ss:$8 sps:$4 sm:$0xff]   ;;  %v1589_v49 = vld [vmem:[%s2260_s0 + $0x4] ss:$36 sps:$4 sm:$0xff]   ;;  %v1592_v51 = vld [vmem:[%s2260_s0 + $0xc] ss:$36 sps:$4 sm:$0xff]  }
  0x12   :  { %v1565_v50 = vld [vmem:[%s2259_s1 + $0x1b4] ss:$8 sps:$4 sm:$0xff]   ;;  %1040 = vmatprep.mubr.bf16.mxu0 %v1589_v49  ;;  %v1567_v52 = vld [vmem:[%s2259_s1 + $0xb0] ss:$8 sps:$4 sm:$0xff]   ;;  %1093 = vmatprep.mubr.bf16.mxu1 %v1592_v51  ;;  %v1569_v54 = vld [vmem:[%s2259_s1 + $0xa4] ss:$8 sps:$4 sm:$0xff]  }
  0x13   :  { %1017 = vmatpush1.bf16.msra.mxu0 %v1519_v18  ;;  %v1568_v53 = vld [vmem:[%s2259_s1 + $0x1b0] ss:$8 sps:$4 sm:$0xff]   ;;  %v1571_v55 = vld [vmem:[%s2259_s1 + $0x1a4] ss:$8 sps:$4 sm:$0xff]   ;;  %v1573_v56 = vld [vmem:[%s2259_s1 + $0xa0] ss:$8 sps:$4 sm:$0xff]  }
  0x14   :  { %1070 = vmatpush1.bf16.msra.mxu1 %v1520_v19  ;;  %1018 = vmatprep.subr.bf16.mxu0 %v1521_v20  ;;  %v1574_v57 = vld [vmem:[%s2259_s1 + $0x1a0] ss:$8 sps:$4 sm:$0xff]   ;;  %v1575_v58 = vld [vmem:[%s2259_s1 + $0x94] ss:$8 sps:$4 sm:$0xff]   ;;  %v1579_v60 = vld [vmem:[%s2259_s1 + $0x90] ss:$8 sps:$4 sm:$0xff]  }
  0x15   :  { %1071 = vmatprep.subr.bf16.mxu1 %v1523_v21  ;;  %v1577_v59 = vld [vmem:[%s2259_s1 + $0x194] ss:$8 sps:$4 sm:$0xff]   ;;  %v1580_v61 = vld [vmem:[%s2259_s1 + $0x190] ss:$8 sps:$4 sm:$0xff]   ;;  %v1581_v62 = vld [vmem:[%s2259_s1 + $0x84] ss:$8 sps:$4 sm:$0xff]  }
  0x16   :  { %v1583_v63 = vld [vmem:[%s2259_s1 + $0x184] ss:$8 sps:$4 sm:$0xff]   ;;  %v1585_v0 = vld [vmem:[%s2259_s1 + $0x80] ss:$8 sps:$4 sm:$0xff]   ;;  %v1595_v2 = vld [vmem:[%s2259_s1 + $0x274] ss:$8 sps:$4 sm:$0xff]  }
  0x17   :  { %1019 = vmatpush1.bf16.msra.mxu0 %v1525_v22  ;;  %v1586_v1 = vld [vmem:[%s2259_s1 + $0x180] ss:$8 sps:$4 sm:$0xff]   ;;  %v1598_v3 = vld [vmem:[%s2259_s1 + $0x374] ss:$8 sps:$4 sm:$0xff]   ;;  %v1593_v6 = vld [vmem:[%s2259_s1 + $0x270] ss:$8 sps:$4 sm:$0xff]  }
  0x18   :  { %1072 = vmatpush1.bf16.msra.mxu1 %v1526_v23  ;;  %1020 = vmatprep.subr.bf16.mxu0 %v1527_v24  ;;  %v1587_v4 = vld [vmem:[%s2260_s0] ss:$36 sps:$4 sm:$0xff]   ;;  %v1590_v5 = vld [vmem:[%s2260_s0 + $0x8] ss:$36 sps:$4 sm:$0xff]   ;;  %v1596_v7 = vld [vmem:[%s2259_s1 + $0x370] ss:$8 sps:$4 sm:$0xff]  }
  0x19   :  { %1073 = vmatprep.subr.bf16.mxu1 %v1529_v25  ;;  %v1601_v8 = vld [vmem:[%s2259_s1 + $0x264] ss:$8 sps:$4 sm:$0xff]   ;;  %v1599_v10 = vld [vmem:[%s2259_s1 + $0x260] ss:$8 sps:$4 sm:$0xff]   ;;  %v1607_v12 = vld [vmem:[%s2259_s1 + $0x254] ss:$8 sps:$4 sm:$0xff]  }
  0x1a   :  { %v1604_v9 = vld [vmem:[%s2259_s1 + $0x364] ss:$8 sps:$4 sm:$0xff]   ;;  %v1602_v11 = vld [vmem:[%s2259_s1 + $0x360] ss:$8 sps:$4 sm:$0xff]   ;;  %v1610_v13 = vld [vmem:[%s2259_s1 + $0x354] ss:$8 sps:$4 sm:$0xff]  }
  0x1b   :  { %1021 = vmatpush1.bf16.msra.mxu0 %v1531_v26  ;;  %v1605_v14 = vld [vmem:[%s2259_s1 + $0x250] ss:$8 sps:$4 sm:$0xff]   ;;  %v1613_v16 = vld [vmem:[%s2259_s1 + $0x244] ss:$8 sps:$4 sm:$0xff]   ;;  %v1611_v18 = vld [vmem:[%s2259_s1 + $0x240] ss:$8 sps:$4 sm:$0xff]  }
  0x1c   :  { %1074 = vmatpush1.bf16.msra.mxu1 %v1532_v27  ;;  %1022 = vmatprep.subr.bf16.mxu0 %v1533_v28  ;;  %v1608_v15 = vld [vmem:[%s2259_s1 + $0x350] ss:$8 sps:$4 sm:$0xff]   ;;  %v1616_v17 = vld [vmem:[%s2259_s1 + $0x344] ss:$8 sps:$4 sm:$0xff]   ;;  %v1614_v19 = vld [vmem:[%s2259_s1 + $0x340] ss:$8 sps:$4 sm:$0xff]  }
  0x1d   :  { %1075 = vmatprep.subr.bf16.mxu1 %v1535_v29  ;;  %v1619_v20 = vld [vmem:[%s2259_s1 + $0x234] ss:$8 sps:$4 sm:$0xff]   ;;  %v1617_v22 = vld [vmem:[%s2259_s1 + $0x230] ss:$8 sps:$4 sm:$0xff]   ;;  %v1625_v24 = vld [vmem:[%s2259_s1 + $0x224] ss:$8 sps:$4 sm:$0xff]  }
  0x1e   :  { %v1622_v21 = vld [vmem:[%s2259_s1 + $0x334] ss:$8 sps:$4 sm:$0xff]   ;;  %v1620_v23 = vld [vmem:[%s2259_s1 + $0x330] ss:$8 sps:$4 sm:$0xff]   ;;  %v1628_v25 = vld [vmem:[%s2259_s1 + $0x324] ss:$8 sps:$4 sm:$0xff]  }
  0x1f   :  { %1023 = vmatpush1.bf16.msra.mxu0 %v1537_v30  ;;  %v1671_v26 = vld [vmem:[%s2260_s0 + $0x4c] ss:$36 sps:$4 sm:$0xff]   ;;  %v1673_v27 = vld [vmem:[%s2260_s0 + $0x54] ss:$36 sps:$4 sm:$0xff]   ;;  %v1623_v30 = vld [vmem:[%s2259_s1 + $0x220] ss:$8 sps:$4 sm:$0xff]  }
  0x20   :  { %1076 = vmatpush1.bf16.msra.mxu1 %v1538_v31  ;;  %1024 = vmatprep.subr.bf16.mxu0 %v1539_v32  ;;  %v1675_v28 = vld [vmem:[%s2260_s0 + $0x48] ss:$36 sps:$4 sm:$0xff]   ;;  %v1676_v29 = vld [vmem:[%s2260_s0 + $0x50] ss:$36 sps:$4 sm:$0xff]  }
  0x21   :  { %1077 = vmatprep.subr.bf16.mxu1 %v1541_v33  ;;  %v1626_v31 = vld [vmem:[%s2259_s1 + $0x320] ss:$8 sps:$4 sm:$0xff]   ;;  %v1631_v32 = vld [vmem:[%s2259_s1 + $0x214] ss:$8 sps:$4 sm:$0xff]  }
  0x22   :  { %v1634_v33 = vld [vmem:[%s2259_s1 + $0x314] ss:$8 sps:$4 sm:$0xff]   ;;  %v1650_v49 = vld [vmem:[%s2259_s1 + $0x3e0] ss:$8 sps:$4 sm:$0xff]  }
  0x23   :  { %1025 = vmatpush2.bf16.msra.mxu0 %v1543_v34  ;;  %v1629_v34 = vld [vmem:[%s2259_s1 + $0x210] ss:$8 sps:$4 sm:$0xff]   ;;  %v1658_v51 = vld [vmem:[%s2259_s1 + $0x3d4] ss:$8 sps:$4 sm:$0xff]  }
  0x24   :  { %1078 = vmatpush2.bf16.msra.mxu1 %v1544_v35  ;;  %1026 = vmatprep.subr.bf16.mxu0 %v1545_v36  ;;  %v1632_v35 = vld [vmem:[%s2259_s1 + $0x310] ss:$8 sps:$4 sm:$0xff]   ;;  %v1637_v36 = vld [vmem:[%s2259_s1 + $0x204] ss:$8 sps:$4 sm:$0xff]  }
  0x25   :  { %1079 = vmatprep.subr.bf16.mxu1 %v1547_v37  ;;  %v1640_v37 = vld [vmem:[%s2259_s1 + $0x304] ss:$8 sps:$4 sm:$0xff]  }
  0x27   :  { %1027 = vmatpush2.bf16.msra.mxu0 %v1549_v38  ;;  %v1635_v38 = vld [vmem:[%s2259_s1 + $0x200] ss:$8 sps:$4 sm:$0xff]  }
  0x28   :  { %1080 = vmatpush2.bf16.msra.mxu1 %v1550_v39  ;;  %1028 = vmatprep.subr.bf16.mxu0 %v1551_v40  ;;  %v1638_v39 = vld [vmem:[%s2259_s1 + $0x300] ss:$8 sps:$4 sm:$0xff]   ;;  %v1643_v40 = vld [vmem:[%s2259_s1 + $0x2f4] ss:$8 sps:$4 sm:$0xff]  }
  0x29   :  { %1081 = vmatprep.subr.bf16.mxu1 %v1553_v41  ;;  %v1697_v41 = vld [vmem:[%s2260_s0 + $0x14] ss:$36 sps:$4 sm:$0xff]  }
  0x2b   :  { %1029 = vmatpush2.bf16.msra.mxu0 %v1555_v42  ;;  %v1646_v42 = vld [vmem:[%s2259_s1 + $0x3f4] ss:$8 sps:$4 sm:$0xff]  }
  0x2c   :  { %1082 = vmatpush2.bf16.msra.mxu1 %v1556_v43  ;;  %1030 = vmatprep.subr.bf16.mxu0 %v1557_v44  ;;  %v1700_v43 = vld [vmem:[%s2260_s0 + $0x1c] ss:$36 sps:$4 sm:$0xff]   ;;  %v1641_v44 = vld [vmem:[%s2259_s1 + $0x2f0] ss:$8 sps:$4 sm:$0xff]  }
  0x2d   :  { %1083 = vmatprep.subr.bf16.mxu1 %v1559_v45  ;;  %v1644_v45 = vld [vmem:[%s2259_s1 + $0x3f0] ss:$8 sps:$4 sm:$0xff]  }
  0x2f   :  { %1031 = vmatpush2.bf16.msra.mxu0 %v1561_v46  ;;  %v1649_v46 = vld [vmem:[%s2259_s1 + $0x2e4] ss:$8 sps:$4 sm:$0xff]  }
  0x30   :  { %1084 = vmatpush2.bf16.msra.mxu1 %v1562_v47  ;;  %1032 = vmatprep.subr.bf16.mxu0 %v1563_v48  ;;  %v1652_v47 = vld [vmem:[%s2259_s1 + $0x3e4] ss:$8 sps:$4 sm:$0xff]   ;;  %v1647_v48 = vld [vmem:[%s2259_s1 + $0x2e0] ss:$8 sps:$4 sm:$0xff]  }
  0x31   :  { %1085 = vmatprep.subr.bf16.mxu1 %v1565_v50  ;;  %v1655_v50 = vld [vmem:[%s2259_s1 + $0x2d4] ss:$8 sps:$4 sm:$0xff]  }
  0x33   :  { %1033 = vmatpush2.bf16.msra.mxu0 %v1567_v52  ;;  %v1653_v52 = vld [vmem:[%s2259_s1 + $0x2d0] ss:$8 sps:$4 sm:$0xff]  }
  0x34   :  { %1086 = vmatpush2.bf16.msra.mxu1 %v1568_v53  ;;  %1034 = vmatprep.subr.bf16.mxu0 %v1569_v54  ;;  %v1656_v53 = vld [vmem:[%s2259_s1 + $0x3d0] ss:$8 sps:$4 sm:$0xff]   ;;  %v1661_v54 = vld [vmem:[%s2259_s1 + $0x2c4] ss:$8 sps:$4 sm:$0xff]  }
  0x35   :  { %1087 = vmatprep.subr.bf16.mxu1 %v1571_v55  ;;  %v1664_v55 = vld [vmem:[%s2259_s1 + $0x3c4] ss:$8 sps:$4 sm:$0xff]  }
  0x37   :  { %1035 = vmatpush2.bf16.msra.mxu0 %v1573_v56  ;;  %v1659_v56 = vld [vmem:[%s2259_s1 + $0x2c0] ss:$8 sps:$4 sm:$0xff]  }
  0x38   :  { %1088 = vmatpush2.bf16.msra.mxu1 %v1574_v57  ;;  %1036 = vmatprep.subr.bf16.mxu0 %v1575_v58  ;;  %v1662_v57 = vld [vmem:[%s2259_s1 + $0x3c0] ss:$8 sps:$4 sm:$0xff]   ;;  %v1667_v58 = vld [vmem:[%s2259_s1 + $0x2b4] ss:$8 sps:$4 sm:$0xff]  }
  0x39   :  { %1089 = vmatprep.subr.bf16.mxu1 %v1577_v59  ;;  %v1670_v59 = vld [vmem:[%s2259_s1 + $0x3b4] ss:$8 sps:$4 sm:$0xff]  }
  0x3b   :  { %1037 = vmatpush2.bf16.msra.mxu0 %v1579_v60  ;;  %v1665_v60 = vld [vmem:[%s2259_s1 + $0x2b0] ss:$8 sps:$4 sm:$0xff]  }
  0x3c   :  { %1090 = vmatpush2.bf16.msra.mxu1 %v1580_v61  ;;  %1038 = vmatprep.subr.bf16.mxu0 %v1581_v62  ;;  %v1668_v61 = vld [vmem:[%s2259_s1 + $0x3b0] ss:$8 sps:$4 sm:$0xff]   ;;  %v1679_v62 = vld [vmem:[%s2259_s1 + $0x2a4] ss:$8 sps:$4 sm:$0xff]  }
  0x3d   :  { %1091 = vmatprep.subr.bf16.mxu1 %v1583_v63  ;;  %v1682_v63 = vld [vmem:[%s2259_s1 + $0x3a4] ss:$8 sps:$4 sm:$0xff]  }
  0x3f   :  { %1039 = vmatpush2.bf16.msra.mxu0 %v1585_v0  ;;  %v1677_v0 = vld [vmem:[%s2259_s1 + $0x2a0] ss:$8 sps:$4 sm:$0xff]  }
  0x40   :  { %1092 = vmatpush2.bf16.msra.mxu1 %v1586_v1  ;;  %1114 = vmatprep.subr.bf16.mxu0 %v1595_v2  ;;  %v1680_v1 = vld [vmem:[%s2259_s1 + $0x3a0] ss:$8 sps:$4 sm:$0xff]   ;;  %v1685_v2 = vld [vmem:[%s2259_s1 + $0x294] ss:$8 sps:$4 sm:$0xff]  }
  0x41   :  { %1167 = vmatprep.subr.bf16.mxu1 %v1598_v3  ;;  %v1688_v3 = vld [vmem:[%s2259_s1 + $0x394] ss:$8 sps:$4 sm:$0xff]  }
  0x42   :  { %1041 = vmatmul.mubr.bf16.vlgmr.msra.gmra.mxu0 %v1587_v4  ;;  %v1683_v4 = vld [vmem:[%s2259_s1 + $0x290] ss:$8 sps:$4 sm:$0xff]  }
  0x43   :  { %1094 = vmatmul.mubr.bf16.vlgmr.msra.gmra.mxu1 %v1590_v5  ;;  %1115 = vmatpush1.bf16.msra.mxu0 %v1593_v6  ;;  %v1686_v5 = vld [vmem:[%s2259_s1 + $0x390] ss:$8 sps:$4 sm:$0xff]   ;;  %v1691_v6 = vld [vmem:[%s2259_s1 + $0x284] ss:$8 sps:$4 sm:$0xff]  }
  0x44   :  { %1168 = vmatpush1.bf16.msra.mxu1 %v1596_v7  ;;  %1116 = vmatprep.subr.bf16.mxu0 %v1601_v8  ;;  %v1694_v7 = vld [vmem:[%s2259_s1 + $0x384] ss:$8 sps:$4 sm:$0xff]   ;;  %v1689_v8 = vld [vmem:[%s2259_s1 + $0x280] ss:$8 sps:$4 sm:$0xff]  }
  0x45   :  { %1169 = vmatprep.subr.bf16.mxu1 %v1604_v9  ;;  %1050 = vmatprep.mubr.bf16.mxu0 %v1671_v26  ;;  %v1692_v9 = vld [vmem:[%s2259_s1 + $0x380] ss:$8 sps:$4 sm:$0xff]   ;;  %v1719_v26 = vld [vmem:[%s2259_s1 + $0x430] ss:$8 sps:$4 sm:$0xff]  }
  0x46   :  { %1103 = vmatprep.mubr.bf16.mxu1 %v1673_v27  ;;  %v1724_v27 = vld [vmem:[%s2259_s1 + $0x424] ss:$8 sps:$4 sm:$0xff]  }
  0x47   :  { %1117 = vmatpush1.bf16.msra.mxu0 %v1599_v10  ;;  %v1703_v10 = vld [vmem:[%s2259_s1 + $0x474] ss:$8 sps:$4 sm:$0xff]  }
  0x48   :  { %1170 = vmatpush1.bf16.msra.mxu1 %v1602_v11  ;;  %1118 = vmatprep.subr.bf16.mxu0 %v1607_v12  ;;  %v1695_v11 = vld [vmem:[%s2260_s0 + $0x10] ss:$36 sps:$4 sm:$0xff]   ;;  %v1698_v12 = vld [vmem:[%s2260_s0 + $0x18] ss:$36 sps:$4 sm:$0xff]  }
  0x49   :  { %1171 = vmatprep.subr.bf16.mxu1 %v1610_v13  ;;  %v1701_v13 = vld [vmem:[%s2259_s1 + $0x470] ss:$8 sps:$4 sm:$0xff]  }
  0x4a   :  { %1051 = vmatmul.mubr.bf16.gmra.mxu0 %v1675_v28  ;;  %v1722_v28 = vld [vmem:[%s2259_s1 + $0x420] ss:$8 sps:$4 sm:$0xff]  }
  0x4b   :  { %1119 = vmatpush1.bf16.msra.mxu0 %v1605_v14  ;;  %1104 = vmatmul.mubr.bf16.gmra.mxu1 %v1676_v29  ;;  %v1706_v14 = vld [vmem:[%s2259_s1 + $0x464] ss:$8 sps:$4 sm:$0xff]   ;;  %v1727_v29 = vld [vmem:[%s2259_s1 + $0x414] ss:$8 sps:$4 sm:$0xff]  }
  0x4c   :  { %1172 = vmatpush1.bf16.msra.mxu1 %v1608_v15  ;;  %1120 = vmatprep.subr.bf16.mxu0 %v1613_v16  ;;  %v1707_v15 = vld [vmem:[%s2260_s0 + $0x5c] ss:$36 sps:$4 sm:$0xff]   ;;  %v1713_v16 = vld [vmem:[%s2260_s0 + $0x64] ss:$36 sps:$4 sm:$0xff]  }
  0x4d   :  { %1173 = vmatprep.subr.bf16.mxu1 %v1616_v17  ;;  %1146 = vmatprep.mubr.bf16.mxu0 %v1697_v41  ;;  %v1704_v17 = vld [vmem:[%s2259_s1 + $0x460] ss:$8 sps:$4 sm:$0xff]  }
  0x4e   :  { %1199 = vmatprep.mubr.bf16.mxu1 %v1700_v43 }
  0x4f   :  { %1121 = vmatpush1.bf16.msra.mxu0 %v1611_v18  ;;  %v1712_v18 = vld [vmem:[%s2259_s1 + $0x454] ss:$8 sps:$4 sm:$0xff]  }
  0x50   :  { %1174 = vmatpush1.bf16.msra.mxu1 %v1614_v19  ;;  %1122 = vmatprep.subr.bf16.mxu0 %v1619_v20  ;;  %v1709_v19 = vld [vmem:[%s2260_s0 + $0x58] ss:$36 sps:$4 sm:$0xff]   ;;  %v1715_v20 = vld [vmem:[%s2260_s0 + $0x60] ss:$36 sps:$4 sm:$0xff]  }
  0x51   :  { %1175 = vmatprep.subr.bf16.mxu1 %v1622_v21  ;;  %v1710_v21 = vld [vmem:[%s2259_s1 + $0x450] ss:$8 sps:$4 sm:$0xff]  }
  0x53   :  { %1123 = vmatpush1.bf16.msra.mxu0 %v1617_v22  ;;  %v1718_v22 = vld [vmem:[%s2259_s1 + $0x444] ss:$8 sps:$4 sm:$0xff]  }
  0x54   :  { %1176 = vmatpush1.bf16.msra.mxu1 %v1620_v23  ;;  %1124 = vmatprep.subr.bf16.mxu0 %v1625_v24  ;;  %v1716_v23 = vld [vmem:[%s2259_s1 + $0x440] ss:$8 sps:$4 sm:$0xff]   ;;  %v1721_v24 = vld [vmem:[%s2259_s1 + $0x434] ss:$8 sps:$4 sm:$0xff]  }
  0x55   :  { %1177 = vmatprep.subr.bf16.mxu1 %v1628_v25  ;;  %v1733_v25 = vmov 0  }
  0x57   :  { %1125 = vmatpush1.bf16.msra.mxu0 %v1623_v30  ;;  %v1725_v30 = vld [vmem:[%s2259_s1 + $0x410] ss:$8 sps:$4 sm:$0xff]  }
  0x58   :  { %1178 = vmatpush1.bf16.msra.mxu1 %v1626_v31  ;;  %1126 = vmatprep.subr.bf16.mxu0 %v1631_v32  ;;  %v1730_v31 = vld [vmem:[%s2259_s1 + $0x404] ss:$8 sps:$4 sm:$0xff]   ;;  %v1728_v32 = vld [vmem:[%s2259_s1 + $0x400] ss:$8 sps:$4 sm:$0xff]  }
  0x59   :  { %1179 = vmatprep.subr.bf16.mxu1 %v1634_v33  ;;  %v1731_v33 = vld [vmem:[%s2260_s0 + $0x20] ss:$36 sps:$4 sm:$0xff]  }
  0x5b   :  { %1127 = vmatpush1.bf16.msra.mxu0 %v1629_v34  ;;  %v1732_v34 = vld [vmem:[%s2260_s0 + $0x68] ss:$36 sps:$4 sm:$0xff]  }
  0x5c   :  { %1180 = vmatpush1.bf16.msra.mxu1 %v1632_v35  ;;  %1128 = vmatprep.subr.bf16.mxu0 %v1637_v36 }
  0x5d   :  { %1181 = vmatprep.subr.bf16.mxu1 %v1640_v37 }
  0x5f   :  { %1129 = vmatpush1.bf16.msra.mxu0 %v1635_v38 }
  0x60   :  { %1182 = vmatpush1.bf16.msra.mxu1 %v1638_v39  ;;  %1130 = vmatprep.subr.bf16.mxu0 %v1643_v40 }
  0x61   :  { %1183 = vmatprep.subr.bf16.mxu1 %v1646_v42 }
  0x63   :  { %1131 = vmatpush2.bf16.msra.mxu0 %v1641_v44 }
  0x64   :  { %1184 = vmatpush2.bf16.msra.mxu1 %v1644_v45  ;;  %1132 = vmatprep.subr.bf16.mxu0 %v1649_v46 }
  0x65   :  { %1185 = vmatprep.subr.bf16.mxu1 %v1652_v47 }
  0x67   :  { %1133 = vmatpush2.bf16.msra.mxu0 %v1647_v48 }
  0x68   :  { %1186 = vmatpush2.bf16.msra.mxu1 %v1650_v49  ;;  %1134 = vmatprep.subr.bf16.mxu0 %v1655_v50 }
  0x69   :  { %1187 = vmatprep.subr.bf16.mxu1 %v1658_v51 }
  0x6b   :  { %1135 = vmatpush2.bf16.msra.mxu0 %v1653_v52 }
  0x6c   :  { %1188 = vmatpush2.bf16.msra.mxu1 %v1656_v53  ;;  %1136 = vmatprep.subr.bf16.mxu0 %v1661_v54 }
  0x6d   :  { %1189 = vmatprep.subr.bf16.mxu1 %v1664_v55 }
  0x6f   :  { %1137 = vmatpush2.bf16.msra.mxu0 %v1659_v56 }
  0x70   :  { %1190 = vmatpush2.bf16.msra.mxu1 %v1662_v57  ;;  %1138 = vmatprep.subr.bf16.mxu0 %v1667_v58 }
  0x71   :  { %1191 = vmatprep.subr.bf16.mxu1 %v1670_v59 }
  0x73   :  { %1139 = vmatpush2.bf16.msra.mxu0 %v1665_v60 }
  0x74   :  { %1192 = vmatpush2.bf16.msra.mxu1 %v1668_v61  ;;  %1140 = vmatprep.subr.bf16.mxu0 %v1679_v62 }
  0x75   :  { %1193 = vmatprep.subr.bf16.mxu1 %v1682_v63 }
  0x77   :  { %1141 = vmatpush2.bf16.msra.mxu0 %v1677_v0 }
  0x78   :  { %1194 = vmatpush2.bf16.msra.mxu1 %v1680_v1  ;;  %1142 = vmatprep.subr.bf16.mxu0 %v1685_v2 }
  0x79   :  { %1195 = vmatprep.subr.bf16.mxu1 %v1688_v3 }
  0x7b   :  { %1143 = vmatpush2.bf16.msra.mxu0 %v1683_v4 }
  0x7c   :  { %1196 = vmatpush2.bf16.msra.mxu1 %v1686_v5  ;;  %1144 = vmatprep.subr.bf16.mxu0 %v1691_v6 }
  0x7d   :  { %1197 = vmatprep.subr.bf16.mxu1 %v1694_v7 }
  0x7f   :  { %1145 = vmatpush2.bf16.msra.mxu0 %v1689_v8 }
  0x80   :  { %1198 = vmatpush2.bf16.msra.mxu1 %v1692_v9  ;;  %1220 = vmatprep.subr.bf16.mxu0 %v1703_v10 }
  0x81   :  { %1474 = vmatprep.subr.bf16.mxu1 %v1703_v10 }
  0x82   :  { %1147 = vmatmul.mubr.bf16.vlgmr.msra.gmra.mxu0 %v1695_v11 }
  0x83   :  { %1200 = vmatmul.mubr.bf16.vlgmr.msra.gmra.mxu1 %v1698_v12  ;;  %1221 = vmatpush1.bf16.msra.mxu0 %v1701_v13 }
  0x84   :  { %1482 = vmatpush1.bf16.msra.mxu1 %v1701_v13  ;;  %1222 = vmatprep.subr.bf16.mxu0 %v1706_v14 }
  0x85   :  { %1475 = vmatprep.subr.bf16.mxu1 %v1706_v14  ;;  %1156 = vmatprep.mubr.bf16.mxu0 %v1707_v15 }
  0x86   :  { %1209 = vmatprep.mubr.bf16.mxu1 %v1713_v16 }
  0x87   :  { %1223 = vmatpush1.bf16.msra.mxu0 %v1704_v17 }
  0x88   :  { %1483 = vmatpush1.bf16.msra.mxu1 %v1704_v17  ;;  %1224 = vmatprep.subr.bf16.mxu0 %v1712_v18 }
  0x89   :  { %1476 = vmatprep.subr.bf16.mxu1 %v1712_v18 }
  0x8a   :  { %1157 = vmatmul.mubr.bf16.gmra.mxu0 %v1709_v19 }
  0x8b   :  { %1210 = vmatmul.mubr.bf16.gmra.mxu1 %v1715_v20  ;;  %1225 = vmatpush1.bf16.msra.mxu0 %v1710_v21 }
  0x8c   :  { %1484 = vmatpush1.bf16.msra.mxu1 %v1710_v21  ;;  %1226 = vmatprep.subr.bf16.mxu0 %v1718_v22 }
  0x8d   :  { %1477 = vmatprep.subr.bf16.mxu1 %v1718_v22  ;;  %1252 = vmatprep.mubr.bf16.mxu0 %v1733_v25 }
  0x8e   :  { %1262 = vmatprep.mubr.bf16.mxu1 %v1733_v25 }
  0x8f   :  { %1227 = vmatpush1.bf16.msra.mxu0 %v1716_v23 }
  0x90   :  { %1485 = vmatpush1.bf16.msra.mxu1 %v1716_v23  ;;  %1228 = vmatprep.subr.bf16.mxu0 %v1721_v24 }
  0x91   :  { %1478 = vmatprep.subr.bf16.mxu1 %v1721_v24 }
  0x93   :  { %1229 = vmatpush1.bf16.msra.mxu0 %v1719_v26 }
  0x94   :  { %1486 = vmatpush1.bf16.msra.mxu1 %v1719_v26  ;;  %1230 = vmatprep.subr.bf16.mxu0 %v1724_v27 }
  0x95   :  { %1479 = vmatprep.subr.bf16.mxu1 %v1724_v27 }
  0x97   :  { %1231 = vmatpush1.bf16.msra.mxu0 %v1722_v28 }
  0x98   :  { %1487 = vmatpush1.bf16.msra.mxu1 %v1722_v28  ;;  %1232 = vmatprep.subr.bf16.mxu0 %v1727_v29 }
  0x99   :  { %1480 = vmatprep.subr.bf16.mxu1 %v1727_v29 }
  0x9b   :  { %1233 = vmatpush1.bf16.msra.mxu0 %v1725_v30 }
  0x9c   :  { %1488 = vmatpush1.bf16.msra.mxu1 %v1725_v30  ;;  %1234 = vmatprep.subr.bf16.mxu0 %v1730_v31 }
  0x9d   :  { %1481 = vmatprep.subr.bf16.mxu1 %v1730_v31 }
  0x9f   :  { %1235 = vmatpush1.bf16.msra.mxu0 %v1728_v32 }
  0xa0   :  { %1489 = vmatpush1.bf16.msra.mxu1 %v1728_v32 }
  0xa2   :  { %1253 = vmatmul.mubr.bf16.vlgmr.msra.gmra.mxu0 %v1731_v33 }
  0xa3   :  { %1263 = vmatmul.mubr.bf16.vlgmr.msra.gmra.mxu1 %v1732_v34 }
 0x102   :  { %v1042_v35 = vpop.f32.mrf.mxu0 }
 0x103   :  { %v1095_v36 = vpop.f32.mrf.mxu1 }
 0x104   :  { %v1044_v37 = vpop.f32.mrf.mxu0  ;;  %v1096_v63 = vadd.f32 %v1095_v36, %v1042_v35 }
 0x105   :  { %v1097_v38 = vpop.f32.mrf.mxu1 }
 0x106   :  { %v1046_v39 = vpop.f32.mrf.mxu0  ;;  %v1098_v1 = vadd.f32 %v1097_v38, %v1044_v37 }
 0x107   :  { %v1099_v40 = vpop.f32.mrf.mxu1 }
 0x108   :  { %v1048_v41 = vpop.f32.mrf.mxu0  ;;  %v1100_v8 = vadd.f32 %v1099_v40, %v1046_v39 }
 0x109   :  { %v1101_v42 = vpop.f32.mrf.mxu1 }
 0x10a   :  { %v1052_v43 = vpop.f32.mrf.mxu0  ;;  %v1102_v11 = vadd.f32 %v1101_v42, %v1048_v41 }
 0x10b   :  { %v1105_v44 = vpop.f32.mrf.mxu1 }
 0x10c   :  { %v1054_v45 = vpop.f32.mrf.mxu0  ;;  %v1106_v0 = vadd.f32 %v1105_v44, %v1052_v43 }
 0x10d   :  { %v1107_v46 = vpop.f32.mrf.mxu1 }
 0x10e   :  { %v1056_v47 = vpop.f32.mrf.mxu0  ;;  %v1108_v4 = vadd.f32 %v1107_v46, %v1054_v45 }
 0x10f   :  { %v1109_v48 = vpop.f32.mrf.mxu1 }
 0x110   :  { %v1058_v49 = vpop.f32.mrf.mxu0  ;;  %v1110_v9 = vadd.f32 %v1109_v48, %v1056_v47 }
 0x111   :  { %v1111_v50 = vpop.f32.mrf.mxu1 }
 0x112   :  { %v1112_v12 = vadd.f32 %v1111_v50, %v1058_v49 }
 0x142   :  { %v1148_v51 = vpop.f32.mrf.mxu0 }
 0x143   :  { %v1201_v52 = vpop.f32.mrf.mxu1  ;;  %v1149_v5 = vadd.f32 %v1148_v51, %v1096_v63 }
 0x144   :  { %v1150_v53 = vpop.f32.mrf.mxu0 }
 0x145   :  { %v1203_v54 = vpop.f32.mrf.mxu1  ;;  %v1151_v7 = vadd.f32 %v1150_v53, %v1098_v1  ;;  %v1202_v15 = vadd.f32 %v1201_v52, %v1149_v5 }
 0x146   :  { %v1152_v55 = vpop.f32.mrf.mxu0 }
 0x147   :  { %v1205_v56 = vpop.f32.mrf.mxu1  ;;  %v1153_v16 = vadd.f32 %v1152_v55, %v1100_v8  ;;  %v1204_v19 = vadd.f32 %v1203_v54, %v1151_v7 }
 0x148   :  { %v1154_v57 = vpop.f32.mrf.mxu0 }
 0x149   :  { %v1207_v58 = vpop.f32.mrf.mxu1  ;;  %v1155_v20 = vadd.f32 %v1154_v57, %v1102_v11  ;;  %v1206_v29 = vadd.f32 %v1205_v56, %v1153_v16 }
 0x14a   :  { %v1158_v59 = vpop.f32.mrf.mxu0 }
 0x14b   :  { %v1211_v60 = vpop.f32.mrf.mxu1  ;;  %v1159_v6 = vadd.f32 %v1158_v59, %v1106_v0  ;;  %v1208_v35 = vadd.f32 %v1207_v58, %v1155_v20 }
 0x14c   :  { %v1160_v61 = vpop.f32.mrf.mxu0 }
 0x14d   :  { %v1213_v62 = vpop.f32.mrf.mxu1  ;;  %v1161_v10 = vadd.f32 %v1160_v61, %v1108_v4  ;;  %v1212_v17 = vadd.f32 %v1211_v60, %v1159_v6 }
 0x14e   :  { %v1162_v2 = vpop.f32.mrf.mxu0 }
 0x14f   :  { %v1215_v3 = vpop.f32.mrf.mxu1  ;;  %v1163_v18 = vadd.f32 %v1162_v2, %v1110_v9  ;;  %v1214_v23 = vadd.f32 %v1213_v62, %v1161_v10 }
 0x150   :  { %v1164_v13 = vpop.f32.mrf.mxu0 }
 0x151   :  { %v1217_v14 = vpop.f32.mrf.mxu1  ;;  %v1165_v24 = vadd.f32 %v1164_v13, %v1112_v12  ;;  %v1216_v30 = vadd.f32 %v1215_v3, %v1163_v18 }
 0x153   :  { %v1218_v36 = vadd.f32 %v1217_v14, %v1165_v24 }
 0x162   :  { %v1254_v21 = vpop.f32.mrf.mxu0 }
 0x163   :  { %v1264_v22 = vpop.f32.mrf.mxu1  ;;  %v1255_v25 = vadd.f32 %v1254_v21, %v1202_v15 }
 0x164   :  { %v1265_v26 = vadd.f32 %v1264_v22, %v1212_v17  ;;  %v1256_v27 = vpop.f32.mrf.mxu0 }
 0x165   :  { %v1266_v28 = vpop.f32.mrf.mxu1  ;;  %1300 = vst [vmem:[%s2261_s2] sm:$0xff] %v1255_v25  ;;  %v1257_v31 = vadd.f32 %v1256_v27, %v1204_v19 }
 0x166   :  { %1304 = vst [vmem:[%s2261_s2 + $0x20] sm:$0xff] %v1265_v26  ;;  %v1267_v32 = vadd.f32 %v1266_v28, %v1214_v23  ;;  %v1258_v33 = vpop.f32.mrf.mxu0 }
 0x167   :  { %v1268_v34 = vpop.f32.mrf.mxu1  ;;  %1301 = vst [vmem:[%s2261_s2 + $0x8] sm:$0xff] %v1257_v31  ;;  %v1259_v37 = vadd.f32 %v1258_v33, %v1206_v29 }
 0x168   :  { %1305 = vst [vmem:[%s2261_s2 + $0x28] sm:$0xff] %v1267_v32  ;;  %v1269_v38 = vadd.f32 %v1268_v34, %v1216_v30  ;;  %v1260_v39 = vpop.f32.mrf.mxu0 }
 0x169   :  { %v1270_v40 = vpop.f32.mrf.mxu1  ;;  %1302 = vst [vmem:[%s2261_s2 + $0x10] sm:$0xff] %v1259_v37  ;;  %v1261_v41 = vadd.f32 %v1260_v39, %v1208_v35 }
 0x16a   :  { %1306 = vst [vmem:[%s2261_s2 + $0x30] sm:$0xff] %v1269_v38  ;;  %v1271_v42 = vadd.f32 %v1270_v40, %v1218_v36 }
 0x16b   :  { %1303 = vst [vmem:[%s2261_s2 + $0x18] sm:$0xff] %v1261_v41 }
 0x16c   :  { %1307 = vst [vmem:[%s2261_s2 + $0x38] sm:$0xff] %v1271_v42 }

// kernel: generator_forward.62
= control target key start
LH: loop header
LB: loop body
LE: loop exit
PB: predicated region body
PF: predicated region fallthrough
CT: control target
= control target key end

     0   :  { %s581_s9 = smov 0   ;;  %s583_s10 = smov 0   ;;  %s696_s0 = inlined_call_operand.vmem [shape: f32[2,16,256], index: 0, kind: input, shape index: {}]   ;;  %s697_s1 = inlined_call_operand.vmem [shape: f32[2,16,256], index: 1, kind: input, shape index: {}]   ;;  %s698_s2 = inlined_call_operand.vmem [shape: f32[2,16,256], index: 2, kind: output, shape index: {}]  }
   0x1   :  { %s585_s11 = smov 0   ;;  %s587_s12 = smov 0  }
   0x2   :  { %s589_s13 = smov 0   ;;  %s591_s14 = smov 0  }
   0x3   :  { %s593_s15 = smov 0  }
   0x4 LB: > { %s21_s16 = sadd.s32 1, %s556_s13  ;;  %s24_s17 = sadd.s32 1, %s560_s14  ;;  %s564_s15 = sphi %s593_s15, %s12_s15   ;;  %s560_s14 = sphi %s591_s14, %s706_s14   ;;  %s556_s13 = sphi %s589_s13, %s705_s13   ;;  %s552_s12 = sphi %s587_s12, %s704_s12   ;;  %s548_s11 = sphi %s585_s11, %s703_s11   ;;  %s544_s10 = sphi %s583_s10, %s702_s10   ;;  %s540_s9 = sphi %s581_s9, %s701_s9  }
   0x5   : > { %p22_p0 = scmp.ge.s32.totalorder %s21_s16, 2  ;;  %s433_s18 = sadd.s32 4294967295, %s564_s15  }
   0x6   : > { %p40_p1 = scmp.ne.s32.totalorder %s544_s10, %s540_s9  ;;  %p41_p2 = scmp.eq.s32.totalorder %s564_s15, 0 }
   0x7   : > { %s708_s16 = smov (%p22_p0, %s21_s16), 0  ;;  %s710_s17 = smov (!%p22_p0, %s24_s17), %s560_s14 }
   0x8   : > { %p26_p3 = scmp.ge.s32.totalorder %s710_s17, 2  ;;  %p100_p4 = scmp.eq.s32.totalorder %s433_s18, 3 }
   0x9   : > { %s29_s19 = ssub.s32 %s556_s13, %s708_s16  ;;  %p627_p5 = por %p41_p2, %p40_p1 }
   0xa   : > { %s712_s17 = smov (%p26_p3, %s710_s17), 0  ;;  %p633_p6 = por %p100_p4, %p40_p1 }
   0xb   : > { %s28_s22 = ssub.s32 %s560_s14, %s712_s17  ;;  %s33_s24 = sadd.s32 1, %s544_s10 }
   0xc   : > { %s30_s23 = sor.u32 %s29_s19, %s28_s22  ;;  %p436_p8 = scmp.ge.s32.totalorder %s564_s15, 4 }
   0xd   : > { %p31_p7 = scmp.eq.s32.totalorder %s30_s23, 0 }
   0xe   : > { %122 = sbr.rel (%p436_p8) target bundleno = 33 (0x21), region = 16 }
   0xf   : > { %s641_s25 = scalar_select %p31_p7, %s544_s10, %s33_s24  }
  0x13   : > { %125 = sbr.rel (!%p627_p5) target bundleno = 26 (0x1a), region = 20  ;;  %s127_s26 = sand.u32 (%p627_p5), 1, %s544_s10  }
  0x14   : > { %s438_s27 = sshll.u32 (%p627_p5), %s560_s14, 2  ;;  %s437_s28 = sshll.u32 (%p627_p5), %s127_s26, 4 }
  0x15   : > { %s131_s29 = sadd.s32 (%p627_p5), %s556_s13, %s438_s27  ;;  %s129_s6 = scalar_lea.vmem (%p627_p5), [#allocation2], %s437_s28 }
  0x16   : > { %s439_s30 = sshll.u32 (%p627_p5), %s131_s29, 3 }
  0x17   : > { %s133_s5 = scalar_lea.vmem (%p627_p5), %s696_s0, %s439_s30 }
  0x18   : > { %v164_v0 = vld [vmem:[%s133_s5] sm:$0xff]  ;;  %v166_v1 = vld [vmem:[%s133_s5 + $0x10] sm:$0xff] }
  0x19   : > { %165 = vst [vmem:[%s129_s6] sm:$0xff] %v164_v0  ;;  %167 = vst [vmem:[%s129_s6 + $0x8] sm:$0xff] %v166_v1 }
  0x1a PF: > { %173 = sbr.rel (!%p627_p5) target bundleno = 33 (0x21), region = 58  ;;  %s175_s7 = sand.u32 (%p627_p5), 1, %s544_s10  }
  0x1b   : > { %s441_s8 = sshll.u32 (%p627_p5), %s560_s14, 2  ;;  %s440_s18 = sshll.u32 (%p627_p5), %s175_s7, 4 }
  0x1c   : > { %s179_s19 = sadd.s32 (%p627_p5), %s556_s13, %s441_s8  ;;  %s177_s27 = scalar_lea.vmem (%p627_p5), [#allocation3], %s440_s18 }
  0x1d   : > { %s442_s22 = sshll.u32 (%p627_p5), %s179_s19, 3 }
  0x1e   : > { %s181_s26 = scalar_lea.vmem (%p627_p5), %s697_s1, %s442_s22 }
  0x1f   : > { %v212_v2 = vld [vmem:[%s181_s26] sm:$0xff]  ;;  %v214_v3 = vld [vmem:[%s181_s26 + $0x10] sm:$0xff] }
  0x20   : > { %213 = vst [vmem:[%s177_s27] sm:$0xff] %v212_v2  ;;  %215 = vst [vmem:[%s177_s27 + $0x8] sm:$0xff] %v214_v3 }
  0x21 PF: > { %p443_p9 = scmp.ge.s32.totalorder %s564_s15, 1  ;;  %p220_p10 = scmp.lt.s32.totalorder %s564_s15, 5 }
  0x23   : > { %p221_p11 = pnand %p443_p9, %p220_p10 }
  0x24   : > { %s227_s20 = sand.u32 (!%p221_p11), 1, %s540_s9  }
  0x25   : > { %224 = sbr.rel (%p221_p11) target bundleno = 94 (0x5e), region = 96  ;;  %s663_s28 = sshll.u32 (!%p221_p11), %s227_s20, 4 }
  0x26   : > { %s229_s29 = scalar_lea.vmem (!%p221_p11), [#allocation2], %s663_s28  ;;  %s236_s9 = scalar_lea.vmem (!%p221_p11), [#allocation3], %s663_s28 }
  0x27   : > { %s257_s30 = scalar_lea.vmem (!%p221_p11), [#allocation4], %s663_s28 }
  0x2a   : > { %v258_v4 = vld [vmem:[%s229_s29] sm:$0xff]  ;;  %v259_v5 = vld [vmem:[%s229_s29 + $0x8] sm:$0xff]  ;;  %s448_s3 = sshll.u32 (%p633_p6), %s552_s12, 2 }
  0x2b   : > { %v260_v6 = vadd.f32 %v259_v5, %v258_v4  ;;  %v267_v7 = vmul.f32 %v258_v4, %v258_v4  ;;  %v268_v8 = vmul.f32 %v259_v5, %v259_v5  ;;  %v287_v31 = vld [vmem:[%s236_s9] sm:$0xff]  ;;  %v288_v32 = vld [vmem:[%s236_s9 + $0x8] sm:$0xff]  ;;  %s301_s4 = sadd.s32 (%p633_p6), %s548_s11, %s448_s3 }
  0x2c   : > { %s449_s5 = sshll.u32 (%p633_p6), %s301_s4, 3 }
  0x2d   : > { %v261_v9 = vrot.slane %v260_v6, 4  ;;  %v269_v10 = vadd.f32 %v268_v8, %v267_v7  ;;  %s303_s8 = scalar_lea.vmem (%p633_p6), %s698_s2, %s449_s5 }
  0x2f   : > { %v262_v11 = vadd.f32 %v261_v9, %v260_v6  ;;  %v270_v12 = vrot.slane %v269_v10, 4 }
  0x31   : > { %v263_v13 = vrot.slane %v262_v11, 2  ;;  %v271_v14 = vadd.f32 %v270_v12, %v269_v10 }
  0x33   : > { %v264_v15 = vadd.f32 %v263_v13, %v262_v11  ;;  %v272_v16 = vrot.slane %v271_v14, 2 }
  0x35   : > { %v265_v17 = vrot.slane %v264_v15, 1  ;;  %v273_v18 = vadd.f32 %v272_v16, %v271_v14 }
  0x37   : > { %v266_v19 = vadd.f32 %v265_v17, %v264_v15  ;;  %v274_v20 = vrot.slane %v273_v18, 1 }
  0x39   : > { %v275_v21 = vadd.f32 %v274_v20, %v273_v18  ;;  %v276_v22 = vmul.f32 0.0625, %v266_v19 }
  0x3b   : > { %v277_v23 = vmul.f32 0.0625, %v275_v21  ;;  %v278_v24 = vmul.f32 %v276_v22, %v276_v22  ;;  %v281_v28 = vsub.f32 %v258_v4, %v276_v22  ;;  %v282_v29 = vsub.f32 %v259_v5, %v276_v22 }
  0x3d   : > { %v279_v25 = vsub.f32 %v277_v23, %v278_v24 }
  0x3f   : > { %v280_v26 = vmax.f32 %v279_v25, 0.0 }
  0x41   : > { %v283_v27 = vadd.f32 1e-05, %v280_v26 }
  0x43   : > { %508 = vrsqrt.f32 %v283_v27 }
  0x50   : > { %v509_v30 = vpop.eup %508 }
  0x51   : > { %v285_v33 = vmul.f32 %v509_v30, %v281_v28  ;;  %v286_v34 = vmul.f32 %v509_v30, %v282_v29  ;;  %299 = sbr.rel (!%p633_p6) target bundleno = 94 (0x5e), region = 108 }
  0x53   : > { %v289_v35 = vadd.f32 %v287_v31, %v285_v33  ;;  %v290_v36 = vadd.f32 %v288_v32, %v286_v34 }
  0x55   : > { %291 = vst [vmem:[%s257_s30] sm:$0xff] %v289_v35  ;;  %292 = vst [vmem:[%s257_s30 + $0x8] sm:$0xff] %v290_v36 }
  0x5c   : > { %v334_v37 = vld [vmem:[%s257_s30] sm:$0xff]  ;;  %v336_v38 = vld [vmem:[%s257_s30 + $0x8] sm:$0xff] }
  0x5d   : > { %335 = vst [vmem:[%s303_s8] sm:$0xff] %v334_v37  ;;  %337 = vst [vmem:[%s303_s8 + $0x10] sm:$0xff] %v336_v38 }
  0x5e PF: > { %s12_s15 = sadd.s32 1, %s564_s15   ;;  %s701_s9 = smov %s544_s10 }
  0x5f   : > { %p9_p12 = scmp.ge.s32.totalorder %s12_s15, 6   ;;  %s702_s10 = smov %s641_s25 }
  0x60   : > { %s703_s11 = smov %s556_s13  ;;  %s704_s12 = smov %s560_s14 }
  0x61   : > { %s705_s13 = smov %s708_s16  ;;  %s706_s14 = smov %s712_s17 }
  0x62   :  { %11 = sbr.rel (!%p9_p12) target bundleno = 4 (0x4), region = 185 }

// kernel: generator_forward.59
= control target key start
LH: loop header
LB: loop body
LE: loop exit
PB: predicated region body
PF: predicated region fallthrough
CT: control target
= control target key end

     0   :  { %s2250_s9 = smov 0   ;;  %s2252_s10 = smov 0   ;;  %s2551_s0 = inlined_call_operand.vmem [shape: bf16[32,2304], index: 0, kind: input, shape index: {}]   ;;  %s2552_s1 = inlined_call_operand.vmem [shape: bf16[2304,256], index: 1, kind: input, shape index: {}]   ;;  %s2553_s2 = inlined_call_operand.vmem [shape: f32[32,256], index: 2, kind: output, shape index: {}]  }
   0x1   :  { %s2254_s11 = smov 0   ;;  %s2256_s12 = smov 0  }
   0x2   :  { %s2258_s13 = smov 0  }
   0x3 LB: > { %s24_s14 = sadd.s32 1, %s2227_s12  ;;  %p47_p1 = scmp.ne.s32.totalorder %s2219_s10, %s2215_s9  ;;  %s2231_s13 = sphi %s2258_s13, %s12_s13   ;;  %s2227_s12 = sphi %s2256_s12, %s2557_s12   ;;  %s2223_s11 = sphi %s2254_s11, %s2556_s11   ;;  %s2219_s10 = sphi %s2252_s10, %s2555_s10   ;;  %s2215_s9 = sphi %s2250_s9, %s2554_s9  }
   0x4   : > { %p25_p0 = scmp.ge.s32.totalorder %s24_s14, 2  ;;  %p48_p2 = scmp.eq.s32.totalorder %s2231_s13, 0 }
   0x5   : > { %s40_s16 = sadd.s32 1, %s2219_s10  ;;  %p1708_p5 = scmp.ge.s32.totalorder %s2231_s13, 2 }
   0x6   : > { %s2559_s14 = smov (%p25_p0, %s24_s14), 0  ;;  %p49_p3 = por %p48_p2, %p47_p1 }
   0x7   : > { %s36_s15 = ssub.s32 %s2227_s12, %s2559_s14  ;;  %129 = sbr.rel (%p1708_p5) target bundleno = 27 (0x1b), region = 16 }
   0x8   : > { %p38_p4 = scmp.eq.s32.totalorder %s36_s15, 0 }
   0xa   : > { %s2285_s17 = scalar_select %p38_p4, %s2219_s10, %s40_s16  }
   0xc   : > { %132 = sbr.rel (!%p49_p3) target bundleno = 27 (0x1b), region = 20  ;;  %s134_s18 = sand.u32 (%p49_p3), 1, %s2219_s10  }
   0xd   : > { %s1889_s19 = smul.u32 (%p49_p3), 36, %s2227_s12 }
   0xe   : > { %s1907_s20 = smul.u32 (%p49_p3), 144, %s134_s18 }
   0xf   : > { %s2293_s23 = scalar_lea.vmem (%p49_p3), %s2551_s0, %s1889_s19 }
  0x10   : > { %v157_v0 = vld [vmem:[%s2293_s23] sm:$0xff] (%p49_p3)  ;;  %v159_v1 = vld [vmem:[%s2293_s23 + $0x8] sm:$0xff] (%p49_p3)  ;;  %v161_v2 = vld [vmem:[%s2293_s23 + $0x10] sm:$0xff] (%p49_p3)  ;;  %s2298_s24 = scalar_lea.vmem (%p49_p3), [#allocation3], %s1907_s20 }
  0x11   : > { %158 = vst [vmem:[%s2298_s24] sm:$0xff] %v157_v0  ;;  %160 = vst [vmem:[%s2298_s24 + $0x8] sm:$0xff] %v159_v1  ;;  %v163_v3 = vld [vmem:[%s2293_s23 + $0x18] sm:$0xff]  ;;  %v165_v4 = vld [vmem:[%s2293_s23 + $0x48] sm:$0xff] }
  0x12   : > { %162 = vst [vmem:[%s2298_s24 + $0x10] sm:$0xff] %v161_v2  ;;  %v167_v5 = vld [vmem:[%s2293_s23 + $0x50] sm:$0xff]  ;;  %164 = vst [vmem:[%s2298_s24 + $0x18] sm:$0xff] %v163_v3  ;;  %v169_v6 = vld [vmem:[%s2293_s23 + $0x58] sm:$0xff] }
  0x13   : > { %166 = vst [vmem:[%s2298_s24 + $0x24] sm:$0xff] %v165_v4  ;;  %168 = vst [vmem:[%s2298_s24 + $0x2c] sm:$0xff] %v167_v5  ;;  %v171_v7 = vld [vmem:[%s2293_s23 + $0x60] sm:$0xff]  ;;  %v173_v8 = vld [vmem:[%s2293_s23 + $0x90] sm:$0xff] }
  0x14   : > { %170 = vst [vmem:[%s2298_s24 + $0x34] sm:$0xff] %v169_v6  ;;  %172 = vst [vmem:[%s2298_s24 + $0x3c] sm:$0xff] %v171_v7  ;;  %v175_v9 = vld [vmem:[%s2293_s23 + $0x98] sm:$0xff]  ;;  %v177_v10 = vld [vmem:[%s2293_s23 + $0xa0] sm:$0xff] }
  0x15   : > { %174 = vst [vmem:[%s2298_s24 + $0x48] sm:$0xff] %v173_v8  ;;  %v179_v11 = vld [vmem:[%s2293_s23 + $0xa8] sm:$0xff]  ;;  %176 = vst [vmem:[%s2298_s24 + $0x50] sm:$0xff] %v175_v9  ;;  %v181_v12 = vld [vmem:[%s2293_s23 + $0xd8] sm:$0xff] }
  0x16   : > { %178 = vst [vmem:[%s2298_s24 + $0x58] sm:$0xff] %v177_v10  ;;  %180 = vst [vmem:[%s2298_s24 + $0x60] sm:$0xff] %v179_v11  ;;  %v183_v13 = vld [vmem:[%s2293_s23 + $0xe0] sm:$0xff]  ;;  %v185_v14 = vld [vmem:[%s2293_s23 + $0xe8] sm:$0xff] }
  0x17   : > { %182 = vst [vmem:[%s2298_s24 + $0x6c] sm:$0xff] %v181_v12  ;;  %184 = vst [vmem:[%s2298_s24 + $0x74] sm:$0xff] %v183_v13  ;;  %v187_v15 = vld [vmem:[%s2293_s23 + $0xf0] sm:$0xff]  ;;  %v1710_v16 = vld [vmem:[%s2293_s23 + $0x20] sm:$0xf] }
  0x18   : > { %186 = vst [vmem:[%s2298_s24 + $0x7c] sm:$0xff] %v185_v14  ;;  %v1712_v17 = vld [vmem:[%s2293_s23 + $0x68] sm:$0xf]  ;;  %188 = vst [vmem:[%s2298_s24 + $0x84] sm:$0xff] %v187_v15  ;;  %v1714_v18 = vld [vmem:[%s2293_s23 + $0xb0] sm:$0xf] }
  0x19   : > { %1711 = vst [vmem:[%s2298_s24 + $0x20] sm:$0xf] %v1710_v16  ;;  %1713 = vst [vmem:[%s2298_s24 + $0x44] sm:$0xf] %v1712_v17  ;;  %v1716_v19 = vld [vmem:[%s2293_s23 + $0xf8] sm:$0xf] }
  0x1a   : > { %1715 = vst [vmem:[%s2298_s24 + $0x68] sm:$0xf] %v1714_v18  ;;  %1717 = vst [vmem:[%s2298_s24 + $0x8c] sm:$0xf] %v1716_v19 }
  0x1b PF: > { %p1718_p6 = scmp.ge.s32.totalorder %s2231_s13, 1  ;;  %p224_p7 = scmp.lt.s32.totalorder %s2231_s13, 3 }
  0x1d   : > { %p225_p8 = pnand %p1718_p6, %p224_p7 }
  0x1e   : > { %s231_s25 = sand.u32 (!%p225_p8), 1, %s2215_s9   ;;  %s269_s26 = smul.u32 (!%p225_p8), 144, %s2223_s11 }
  0x1f   : > { %228 = sbr.rel (%p225_p8) target bundleno = 420 (0x1a4), region = 50  ;;  %p1721_p10 = scmp.ne.s32.totalorder (!%p225_p8), %s2223_s11, 0 }
  0x20   : > { %s1908_s27 = smul.u32 (!%p225_p8), 144, %s231_s25  ;;  %p271_p9 = scmp.lt.s32.totalorder (!%p225_p8), %s269_s26, 287 }
  0x22   : > { %s2346_s4 = scalar_lea.vmem (!%p225_p8), [#allocation3], %s1908_s27 }
  0x24   : > { %s2561_s26 = smov (!%p271_p9, %s269_s26), 287  ;;  %297 = sbr.rel (%p1721_p10) target bundleno = 46 (0x2e), region = 58 }
  0x25   : > { %s1890_s28 = sshll.u32 %s2561_s26, 3 }
  0x26   : > { %s2344_s3 = scalar_lea.vmem %s2552_s1, %s1890_s28 }
  0x29   : > { %v2233_v20 = vmov 0.0  }
  0x2a   : > { %298 = vst [vmem:[#allocation2 + $0x30] sm:$0xff] %v2233_v20  ;;  %299 = vst [vmem:[#allocation2] sm:$0xff] %v2233_v20 }
  0x2b   : > { %300 = vst [vmem:[#allocation2 + $0x18] sm:$0xff] %v2233_v20  ;;  %301 = vst [vmem:[#allocation2 + $0x10] sm:$0xff] %v2233_v20 }
  0x2c   : > { %302 = vst [vmem:[#allocation2 + $0x8] sm:$0xff] %v2233_v20  ;;  %303 = vst [vmem:[#allocation2 + $0x20] sm:$0xff] %v2233_v20 }
  0x2d   : > { %304 = vst [vmem:[#allocation2 + $0x28] sm:$0xff] %v2233_v20  ;;  %305 = vst [vmem:[#allocation2 + $0x38] sm:$0xff] %v2233_v20 }
  0x2e PF: > { %v1951_v21 = vld [vmem:[%s2344_s3 + $0x74] ss:$8 sps:$4 sm:$0xff]   ;;  %v1955_v23 = vld [vmem:[%s2344_s3 + $0x70] ss:$8 sps:$4 sm:$0xff]   ;;  %v1957_v25 = vld [vmem:[%s2344_s3 + $0x64] ss:$8 sps:$4 sm:$0xff]  }
  0x2f   : > { %v1953_v22 = vld [vmem:[%s2344_s3 + $0x174] ss:$8 sps:$4 sm:$0xff]   ;;  %1290 = vmatprep.subr.bf16.mxu0 %v1951_v21  ;;  %v1956_v24 = vld [vmem:[%s2344_s3 + $0x170] ss:$8 sps:$4 sm:$0xff]   ;;  %v1959_v26 = vld [vmem:[%s2344_s3 + $0x164] ss:$8 sps:$4 sm:$0xff]  }
  0x30   : > { %1343 = vmatprep.subr.bf16.mxu1 %v1953_v22  ;;  %1291 = vmatpush1.bf16.msra.mxu0 %v1955_v23  ;;  %v1961_v27 = vld [vmem:[%s2344_s3 + $0x60] ss:$8 sps:$4 sm:$0xff]   ;;  %v1963_v29 = vld [vmem:[%s2344_s3 + $0x54] ss:$8 sps:$4 sm:$0xff]   ;;  %v1967_v31 = vld [vmem:[%s2344_s3 + $0x50] ss:$8 sps:$4 sm:$0xff]  }
  0x31   : > { %1344 = vmatpush1.bf16.msra.mxu1 %v1956_v24  ;;  %1292 = vmatprep.subr.bf16.mxu0 %v1957_v25  ;;  %v1962_v28 = vld [vmem:[%s2344_s3 + $0x160] ss:$8 sps:$4 sm:$0xff]   ;;  %v1965_v30 = vld [vmem:[%s2344_s3 + $0x154] ss:$8 sps:$4 sm:$0xff]   ;;  %v1968_v32 = vld [vmem:[%s2344_s3 + $0x150] ss:$8 sps:$4 sm:$0xff]  }
  0x32   : > { %1345 = vmatprep.subr.bf16.mxu1 %v1959_v26  ;;  %v1969_v33 = vld [vmem:[%s2344_s3 + $0x44] ss:$8 sps:$4 sm:$0xff]   ;;  %v1973_v35 = vld [vmem:[%s2344_s3 + $0x40] ss:$8 sps:$4 sm:$0xff]   ;;  %v1975_v37 = vld [vmem:[%s2344_s3 + $0x34] ss:$8 sps:$4 sm:$0xff]  }
  0x33   : > { %v1971_v34 = vld [vmem:[%s2344_s3 + $0x144] ss:$8 sps:$4 sm:$0xff]   ;;  %v1974_v36 = vld [vmem:[%s2344_s3 + $0x140] ss:$8 sps:$4 sm:$0xff]   ;;  %v1977_v38 = vld [vmem:[%s2344_s3 + $0x134] ss:$8 sps:$4 sm:$0xff]  }
  0x34   : > { %1293 = vmatpush1.bf16.msra.mxu0 %v1961_v27  ;;  %v1979_v39 = vld [vmem:[%s2344_s3 + $0x30] ss:$8 sps:$4 sm:$0xff]   ;;  %v1981_v41 = vld [vmem:[%s2344_s3 + $0x24] ss:$8 sps:$4 sm:$0xff]   ;;  %v1985_v43 = vld [vmem:[%s2344_s3 + $0x20] ss:$8 sps:$4 sm:$0xff]  }
  0x35   : > { %1346 = vmatpush1.bf16.msra.mxu1 %v1962_v28  ;;  %1294 = vmatprep.subr.bf16.mxu0 %v1963_v29  ;;  %v1980_v40 = vld [vmem:[%s2344_s3 + $0x130] ss:$8 sps:$4 sm:$0xff]   ;;  %v1983_v42 = vld [vmem:[%s2344_s3 + $0x124] ss:$8 sps:$4 sm:$0xff]   ;;  %v1986_v44 = vld [vmem:[%s2344_s3 + $0x120] ss:$8 sps:$4 sm:$0xff]  }
  0x36   : > { %1347 = vmatprep.subr.bf16.mxu1 %v1965_v30  ;;  %v1987_v45 = vld [vmem:[%s2344_s3 + $0x14] ss:$8 sps:$4 sm:$0xff]   ;;  %v1991_v47 = vld [vmem:[%s2344_s3 + $0x10] ss:$8 sps:$4 sm:$0xff]   ;;  %v1993_v49 = vld [vmem:[%s2344_s3 + $0x4] ss:$8 sps:$4 sm:$0xff]  }
  0x37   : > { %v1989_v46 = vld [vmem:[%s2344_s3 + $0x114] ss:$8 sps:$4 sm:$0xff]   ;;  %v1992_v48 = vld [vmem:[%s2344_s3 + $0x110] ss:$8 sps:$4 sm:$0xff]   ;;  %v1995_v50 = vld [vmem:[%s2344_s3 + $0x104] ss:$8 sps:$4 sm:$0xff]  }
  0x38   : > { %1295 = vmatpush1.bf16.msra.mxu0 %v1967_v31  ;;  %v1997_v51 = vld [vmem:[%s2344_s3] ss:$8 sps:$4 sm:$0xff]   ;;  %v1999_v53 = vld [vmem:[%s2344_s3 + $0xf4] ss:$8 sps:$4 sm:$0xff]   ;;  %v2003_v55 = vld [vmem:[%s2344_s3 + $0xf0] ss:$8 sps:$4 sm:$0xff]  }
  0x39   : > { %1348 = vmatpush1.bf16.msra.mxu1 %v1968_v32  ;;  %1296 = vmatprep.subr.bf16.mxu0 %v1969_v33  ;;  %v1998_v52 = vld [vmem:[%s2344_s3 + $0x100] ss:$8 sps:$4 sm:$0xff]   ;;  %v2001_v54 = vld [vmem:[%s2344_s3 + $0x1f4] ss:$8 sps:$4 sm:$0xff]   ;;  %v2004_v56 = vld [vmem:[%s2344_s3 + $0x1f0] ss:$8 sps:$4 sm:$0xff]  }
  0x3a   : > { %1349 = vmatprep.subr.bf16.mxu1 %v1971_v34  ;;  %v2005_v57 = vld [vmem:[%s2344_s3 + $0xe4] ss:$8 sps:$4 sm:$0xff]   ;;  %v2009_v59 = vld [vmem:[%s2344_s3 + $0xe0] ss:$8 sps:$4 sm:$0xff]   ;;  %v2011_v61 = vld [vmem:[%s2344_s3 + $0xd4] ss:$8 sps:$4 sm:$0xff]  }
  0x3b   : > { %v2007_v58 = vld [vmem:[%s2344_s3 + $0x1e4] ss:$8 sps:$4 sm:$0xff]   ;;  %v2010_v60 = vld [vmem:[%s2344_s3 + $0x1e0] ss:$8 sps:$4 sm:$0xff]   ;;  %v2013_v62 = vld [vmem:[%s2344_s3 + $0x1d4] ss:$8 sps:$4 sm:$0xff]  }
  0x3c   : > { %1297 = vmatpush1.bf16.msra.mxu0 %v1973_v35  ;;  %v2015_v63 = vld [vmem:[%s2344_s3 + $0xd0] ss:$8 sps:$4 sm:$0xff]   ;;  %v2017_v1 = vld [vmem:[%s2344_s3 + $0xc4] ss:$8 sps:$4 sm:$0xff]   ;;  %v2021_v3 = vld [vmem:[%s2344_s3 + $0xc0] ss:$8 sps:$4 sm:$0xff]  }
  0x3d   : > { %1350 = vmatpush1.bf16.msra.mxu1 %v1974_v36  ;;  %1298 = vmatprep.subr.bf16.mxu0 %v1975_v37  ;;  %v2016_v0 = vld [vmem:[%s2344_s3 + $0x1d0] ss:$8 sps:$4 sm:$0xff]   ;;  %v2019_v2 = vld [vmem:[%s2344_s3 + $0x1c4] ss:$8 sps:$4 sm:$0xff]   ;;  %v2022_v4 = vld [vmem:[%s2344_s3 + $0x1c0] ss:$8 sps:$4 sm:$0xff]  }
  0x3e   : > { %1351 = vmatprep.subr.bf16.mxu1 %v1977_v38  ;;  %v2023_v5 = vld [vmem:[%s2344_s3 + $0xb4] ss:$8 sps:$4 sm:$0xff]   ;;  %v2027_v9 = vld [vmem:[%s2344_s3 + $0xb0] ss:$8 sps:$4 sm:$0xff]   ;;  %v2029_v11 = vld [vmem:[%s2344_s3 + $0xa4] ss:$8 sps:$4 sm:$0xff]  }
  0x3f   : > { %v2049_v6 = vld [vmem:[%s2346_s4 + $0x4] ss:$36 sps:$4 sm:$0xff]   ;;  %v2052_v8 = vld [vmem:[%s2346_s4 + $0xc] ss:$36 sps:$4 sm:$0xff]   ;;  %p1884_p11 = scmp.ne.s32.totalorder %s2223_s11, 1 }
  0x40   : > { %1299 = vmatpush1.bf16.msra.mxu0 %v1979_v39  ;;  %v2025_v7 = vld [vmem:[%s2344_s3 + $0x1b4] ss:$8 sps:$4 sm:$0xff]   ;;  %1322 = vmatprep.mubr.bf16.mxu0 %v2049_v6  ;;  %v2028_v10 = vld [vmem:[%s2344_s3 + $0x1b0] ss:$8 sps:$4 sm:$0xff]   ;;  %v2031_v12 = vld [vmem:[%s2344_s3 + $0x1a4] ss:$8 sps:$4 sm:$0xff]  }
  0x41   : > { %1352 = vmatpush1.bf16.msra.mxu1 %v1980_v40  ;;  %1300 = vmatprep.subr.bf16.mxu0 %v1981_v41  ;;  %v2033_v13 = vld [vmem:[%s2344_s3 + $0xa0] ss:$8 sps:$4 sm:$0xff]   ;;  %v2035_v15 = vld [vmem:[%s2344_s3 + $0x94] ss:$8 sps:$4 sm:$0xff]   ;;  %v2039_v17 = vld [vmem:[%s2344_s3 + $0x90] ss:$8 sps:$4 sm:$0xff]  }
  0x42   : > { %1353 = vmatprep.subr.bf16.mxu1 %v1983_v42  ;;  %1375 = vmatprep.mubr.bf16.mxu1 %v2052_v8  ;;  %v2034_v14 = vld [vmem:[%s2344_s3 + $0x1a0] ss:$8 sps:$4 sm:$0xff]   ;;  %v2037_v16 = vld [vmem:[%s2344_s3 + $0x194] ss:$8 sps:$4 sm:$0xff]   ;;  %v2040_v18 = vld [vmem:[%s2344_s3 + $0x190] ss:$8 sps:$4 sm:$0xff]  }
  0x43   : > { %v2041_v19 = vld [vmem:[%s2344_s3 + $0x84] ss:$8 sps:$4 sm:$0xff]   ;;  %v2045_v21 = vld [vmem:[%s2344_s3 + $0x80] ss:$8 sps:$4 sm:$0xff]   ;;  %v2055_v23 = vld [vmem:[%s2344_s3 + $0x274] ss:$8 sps:$4 sm:$0xff]  }
  0x44   : > { %1301 = vmatpush1.bf16.msra.mxu0 %v1985_v43  ;;  %v2043_v20 = vld [vmem:[%s2344_s3 + $0x184] ss:$8 sps:$4 sm:$0xff]   ;;  %v2046_v22 = vld [vmem:[%s2344_s3 + $0x180] ss:$8 sps:$4 sm:$0xff]   ;;  %v2058_v24 = vld [vmem:[%s2344_s3 + $0x374] ss:$8 sps:$4 sm:$0xff]  }
  0x45   : > { %1354 = vmatpush1.bf16.msra.mxu1 %v1986_v44  ;;  %1302 = vmatprep.subr.bf16.mxu0 %v1987_v45  ;;  %v2047_v25 = vld [vmem:[%s2346_s4] ss:$36 sps:$4 sm:$0xff]   ;;  %v2050_v26 = vld [vmem:[%s2346_s4 + $0x8] ss:$36 sps:$4 sm:$0xff]  }
  0x46   : > { %1355 = vmatprep.subr.bf16.mxu1 %v1989_v46  ;;  %v2053_v27 = vld [vmem:[%s2344_s3 + $0x270] ss:$8 sps:$4 sm:$0xff]   ;;  %v2061_v29 = vld [vmem:[%s2344_s3 + $0x264] ss:$8 sps:$4 sm:$0xff]   ;;  %v2059_v31 = vld [vmem:[%s2344_s3 + $0x260] ss:$8 sps:$4 sm:$0xff]  }
  0x47   : > { %v2056_v28 = vld [vmem:[%s2344_s3 + $0x370] ss:$8 sps:$4 sm:$0xff]   ;;  %v2064_v30 = vld [vmem:[%s2344_s3 + $0x364] ss:$8 sps:$4 sm:$0xff]   ;;  %v2062_v32 = vld [vmem:[%s2344_s3 + $0x360] ss:$8 sps:$4 sm:$0xff]  }
  0x48   : > { %1303 = vmatpush1.bf16.msra.mxu0 %v1991_v47  ;;  %v2067_v33 = vld [vmem:[%s2344_s3 + $0x254] ss:$8 sps:$4 sm:$0xff]   ;;  %v2065_v35 = vld [vmem:[%s2344_s3 + $0x250] ss:$8 sps:$4 sm:$0xff]   ;;  %v2073_v37 = vld [vmem:[%s2344_s3 + $0x244] ss:$8 sps:$4 sm:$0xff]  }
  0x49   : > { %1356 = vmatpush1.bf16.msra.mxu1 %v1992_v48  ;;  %1304 = vmatprep.subr.bf16.mxu0 %v1993_v49  ;;  %v2070_v34 = vld [vmem:[%s2344_s3 + $0x354] ss:$8 sps:$4 sm:$0xff]   ;;  %v2068_v36 = vld [vmem:[%s2344_s3 + $0x350] ss:$8 sps:$4 sm:$0xff]   ;;  %v2076_v38 = vld [vmem:[%s2344_s3 + $0x344] ss:$8 sps:$4 sm:$0xff]  }
  0x4a   : > { %1357 = vmatprep.subr.bf16.mxu1 %v1995_v50  ;;  %v2071_v39 = vld [vmem:[%s2344_s3 + $0x240] ss:$8 sps:$4 sm:$0xff]   ;;  %v2079_v41 = vld [vmem:[%s2344_s3 + $0x234] ss:$8 sps:$4 sm:$0xff]   ;;  %v2077_v43 = vld [vmem:[%s2344_s3 + $0x230] ss:$8 sps:$4 sm:$0xff]  }
  0x4b   : > { %v2074_v40 = vld [vmem:[%s2344_s3 + $0x340] ss:$8 sps:$4 sm:$0xff]   ;;  %v2082_v42 = vld [vmem:[%s2344_s3 + $0x334] ss:$8 sps:$4 sm:$0xff]   ;;  %v2080_v44 = vld [vmem:[%s2344_s3 + $0x330] ss:$8 sps:$4 sm:$0xff]  }
  0x4c   : > { %1305 = vmatpush1.bf16.msra.mxu0 %v1997_v51  ;;  %v2085_v45 = vld [vmem:[%s2344_s3 + $0x224] ss:$8 sps:$4 sm:$0xff]   ;;  %v2083_v51 = vld [vmem:[%s2344_s3 + $0x220] ss:$8 sps:$4 sm:$0xff]   ;;  %v2118_v8 = vld [vmem:[%s2344_s3 + $0x3d4] ss:$8 sps:$4 sm:$0xff]  }
  0x4d   : > { %1358 = vmatpush1.bf16.msra.mxu1 %v1998_v52  ;;  %1306 = vmatprep.subr.bf16.mxu0 %v1999_v53  ;;  %v2088_v46 = vld [vmem:[%s2344_s3 + $0x324] ss:$8 sps:$4 sm:$0xff]   ;;  %v2086_v52 = vld [vmem:[%s2344_s3 + $0x320] ss:$8 sps:$4 sm:$0xff]   ;;  %v2091_v53 = vld [vmem:[%s2344_s3 + $0x214] ss:$8 sps:$4 sm:$0xff]  }
  0x4e   : > { %1359 = vmatprep.subr.bf16.mxu1 %v2001_v54  ;;  %v2131_v47 = vld [vmem:[%s2346_s4 + $0x4c] ss:$36 sps:$4 sm:$0xff]   ;;  %v2133_v48 = vld [vmem:[%s2346_s4 + $0x54] ss:$36 sps:$4 sm:$0xff]  }
  0x4f   : > { %v2135_v49 = vld [vmem:[%s2346_s4 + $0x48] ss:$36 sps:$4 sm:$0xff]   ;;  %v2136_v50 = vld [vmem:[%s2346_s4 + $0x50] ss:$36 sps:$4 sm:$0xff]  }
  0x50   : > { %1307 = vmatpush2.bf16.msra.mxu0 %v2003_v55  ;;  %v2094_v54 = vld [vmem:[%s2344_s3 + $0x314] ss:$8 sps:$4 sm:$0xff]   ;;  %v2089_v55 = vld [vmem:[%s2344_s3 + $0x210] ss:$8 sps:$4 sm:$0xff]   ;;  %v2110_v6 = vld [vmem:[%s2344_s3 + $0x3e0] ss:$8 sps:$4 sm:$0xff]  }
  0x51   : > { %1360 = vmatpush2.bf16.msra.mxu1 %v2004_v56  ;;  %1308 = vmatprep.subr.bf16.mxu0 %v2005_v57  ;;  %v2092_v56 = vld [vmem:[%s2344_s3 + $0x310] ss:$8 sps:$4 sm:$0xff]   ;;  %v2097_v57 = vld [vmem:[%s2344_s3 + $0x204] ss:$8 sps:$4 sm:$0xff]  }
  0x52   : > { %1361 = vmatprep.subr.bf16.mxu1 %v2007_v58  ;;  %v2100_v58 = vld [vmem:[%s2344_s3 + $0x304] ss:$8 sps:$4 sm:$0xff]  }
  0x54   : > { %1309 = vmatpush2.bf16.msra.mxu0 %v2009_v59  ;;  %v2095_v59 = vld [vmem:[%s2344_s3 + $0x200] ss:$8 sps:$4 sm:$0xff]  }
  0x55   : > { %1362 = vmatpush2.bf16.msra.mxu1 %v2010_v60  ;;  %1310 = vmatprep.subr.bf16.mxu0 %v2011_v61  ;;  %v2098_v60 = vld [vmem:[%s2344_s3 + $0x300] ss:$8 sps:$4 sm:$0xff]   ;;  %v2103_v61 = vld [vmem:[%s2344_s3 + $0x2f4] ss:$8 sps:$4 sm:$0xff]  }
  0x56   : > { %1363 = vmatprep.subr.bf16.mxu1 %v2013_v62  ;;  %v2157_v62 = vld [vmem:[%s2346_s4 + $0x14] ss:$36 sps:$4 sm:$0xff]  }
  0x58   : > { %1311 = vmatpush2.bf16.msra.mxu0 %v2015_v63  ;;  %v2106_v63 = vld [vmem:[%s2344_s3 + $0x3f4] ss:$8 sps:$4 sm:$0xff]  }
  0x59   : > { %1364 = vmatpush2.bf16.msra.mxu1 %v2016_v0  ;;  %1312 = vmatprep.subr.bf16.mxu0 %v2017_v1  ;;  %v2160_v0 = vld [vmem:[%s2346_s4 + $0x1c] ss:$36 sps:$4 sm:$0xff]  }
  0x5a   : > { %1365 = vmatprep.subr.bf16.mxu1 %v2019_v2  ;;  %v2101_v1 = vld [vmem:[%s2344_s3 + $0x2f0] ss:$8 sps:$4 sm:$0xff]  }
  0x5b   : > { %v2104_v2 = vld [vmem:[%s2344_s3 + $0x3f0] ss:$8 sps:$4 sm:$0xff]  }
  0x5c   : > { %1313 = vmatpush2.bf16.msra.mxu0 %v2021_v3  ;;  %v2109_v3 = vld [vmem:[%s2344_s3 + $0x2e4] ss:$8 sps:$4 sm:$0xff]  }
  0x5d   : > { %1366 = vmatpush2.bf16.msra.mxu1 %v2022_v4  ;;  %1314 = vmatprep.subr.bf16.mxu0 %v2023_v5  ;;  %v2112_v4 = vld [vmem:[%s2344_s3 + $0x3e4] ss:$8 sps:$4 sm:$0xff]   ;;  %v2107_v5 = vld [vmem:[%s2344_s3 + $0x2e0] ss:$8 sps:$4 sm:$0xff]  }
  0x5e   : > { %1367 = vmatprep.subr.bf16.mxu1 %v2025_v7  ;;  %v2115_v7 = vld [vmem:[%s2344_s3 + $0x2d4] ss:$8 sps:$4 sm:$0xff]  }
  0x60   : > { %1315 = vmatpush2.bf16.msra.mxu0 %v2027_v9  ;;  %v2113_v9 = vld [vmem:[%s2344_s3 + $0x2d0] ss:$8 sps:$4 sm:$0xff]  }
  0x61   : > { %1368 = vmatpush2.bf16.msra.mxu1 %v2028_v10  ;;  %1316 = vmatprep.subr.bf16.mxu0 %v2029_v11  ;;  %v2116_v10 = vld [vmem:[%s2344_s3 + $0x3d0] ss:$8 sps:$4 sm:$0xff]   ;;  %v2121_v11 = vld [vmem:[%s2344_s3 + $0x2c4] ss:$8 sps:$4 sm:$0xff]  }
  0x62   : > { %1369 = vmatprep.subr.bf16.mxu1 %v2031_v12  ;;  %v2124_v12 = vld [vmem:[%s2344_s3 + $0x3c4] ss:$8 sps:$4 sm:$0xff]  }
  0x64   : > { %1317 = vmatpush2.bf16.msra.mxu0 %v2033_v13  ;;  %v2119_v13 = vld [vmem:[%s2344_s3 + $0x2c0] ss:$8 sps:$4 sm:$0xff]  }
  0x65   : > { %1370 = vmatpush2.bf16.msra.mxu1 %v2034_v14  ;;  %1318 = vmatprep.subr.bf16.mxu0 %v2035_v15  ;;  %v2122_v14 = vld [vmem:[%s2344_s3 + $0x3c0] ss:$8 sps:$4 sm:$0xff]   ;;  %v2127_v15 = vld [vmem:[%s2344_s3 + $0x2b4] ss:$8 sps:$4 sm:$0xff]  }
  0x66   : > { %1371 = vmatprep.subr.bf16.mxu1 %v2037_v16  ;;  %v2130_v16 = vld [vmem:[%s2344_s3 + $0x3b4] ss:$8 sps:$4 sm:$0xff]  }
  0x68   : > { %1319 = vmatpush2.bf16.msra.mxu0 %v2039_v17  ;;  %v2125_v17 = vld [vmem:[%s2344_s3 + $0x2b0] ss:$8 sps:$4 sm:$0xff]  }
  0x69   : > { %1372 = vmatpush2.bf16.msra.mxu1 %v2040_v18  ;;  %1320 = vmatprep.subr.bf16.mxu0 %v2041_v19  ;;  %v2128_v18 = vld [vmem:[%s2344_s3 + $0x3b0] ss:$8 sps:$4 sm:$0xff]   ;;  %v2139_v19 = vld [vmem:[%s2344_s3 + $0x2a4] ss:$8 sps:$4 sm:$0xff]  }
  0x6a   : > { %1373 = vmatprep.subr.bf16.mxu1 %v2043_v20  ;;  %v2142_v20 = vld [vmem:[%s2344_s3 + $0x3a4] ss:$8 sps:$4 sm:$0xff]  }
  0x6c   : > { %1321 = vmatpush2.bf16.msra.mxu0 %v2045_v21  ;;  %v2137_v21 = vld [vmem:[%s2344_s3 + $0x2a0] ss:$8 sps:$4 sm:$0xff]  }
  0x6d   : > { %1374 = vmatpush2.bf16.msra.mxu1 %v2046_v22  ;;  %1396 = vmatprep.subr.bf16.mxu0 %v2055_v23  ;;  %v2140_v22 = vld [vmem:[%s2344_s3 + $0x3a0] ss:$8 sps:$4 sm:$0xff]   ;;  %v2145_v23 = vld [vmem:[%s2344_s3 + $0x294] ss:$8 sps:$4 sm:$0xff]  }
  0x6e   : > { %1449 = vmatprep.subr.bf16.mxu1 %v2058_v24  ;;  %v2148_v24 = vld [vmem:[%s2344_s3 + $0x394] ss:$8 sps:$4 sm:$0xff]  }
  0x6f   : > { %1323 = vmatmul.mubr.bf16.vlgmr.msra.gmra.mxu0 %v2047_v25  ;;  %v2143_v25 = vld [vmem:[%s2344_s3 + $0x290] ss:$8 sps:$4 sm:$0xff]  }
  0x70   : > { %1376 = vmatmul.mubr.bf16.vlgmr.msra.gmra.mxu1 %v2050_v26  ;;  %1397 = vmatpush1.bf16.msra.mxu0 %v2053_v27  ;;  %v2146_v26 = vld [vmem:[%s2344_s3 + $0x390] ss:$8 sps:$4 sm:$0xff]   ;;  %v2151_v27 = vld [vmem:[%s2344_s3 + $0x284] ss:$8 sps:$4 sm:$0xff]  }
  0x71   : > { %1450 = vmatpush1.bf16.msra.mxu1 %v2056_v28  ;;  %1398 = vmatprep.subr.bf16.mxu0 %v2061_v29  ;;  %v2154_v28 = vld [vmem:[%s2344_s3 + $0x384] ss:$8 sps:$4 sm:$0xff]   ;;  %v2149_v29 = vld [vmem:[%s2344_s3 + $0x280] ss:$8 sps:$4 sm:$0xff]  }
  0x72   : > { %1451 = vmatprep.subr.bf16.mxu1 %v2064_v30  ;;  %1332 = vmatprep.mubr.bf16.mxu0 %v2131_v47  ;;  %v2152_v30 = vld [vmem:[%s2344_s3 + $0x380] ss:$8 sps:$4 sm:$0xff]   ;;  %v2179_v47 = vld [vmem:[%s2344_s3 + $0x430] ss:$8 sps:$4 sm:$0xff]  }
  0x73   : > { %1385 = vmatprep.mubr.bf16.mxu1 %v2133_v48  ;;  %v2184_v48 = vld [vmem:[%s2344_s3 + $0x424] ss:$8 sps:$4 sm:$0xff]  }
  0x74   : > { %1399 = vmatpush1.bf16.msra.mxu0 %v2059_v31  ;;  %v2163_v31 = vld [vmem:[%s2344_s3 + $0x474] ss:$8 sps:$4 sm:$0xff]  }
  0x75   : > { %1452 = vmatpush1.bf16.msra.mxu1 %v2062_v32  ;;  %1400 = vmatprep.subr.bf16.mxu0 %v2067_v33  ;;  %v2155_v32 = vld [vmem:[%s2346_s4 + $0x10] ss:$36 sps:$4 sm:$0xff]   ;;  %v2158_v33 = vld [vmem:[%s2346_s4 + $0x18] ss:$36 sps:$4 sm:$0xff]  }
  0x76   : > { %1453 = vmatprep.subr.bf16.mxu1 %v2070_v34  ;;  %v2161_v34 = vld [vmem:[%s2344_s3 + $0x470] ss:$8 sps:$4 sm:$0xff]  }
  0x77   : > { %1333 = vmatmul.mubr.bf16.gmra.mxu0 %v2135_v49  ;;  %v2182_v49 = vld [vmem:[%s2344_s3 + $0x420] ss:$8 sps:$4 sm:$0xff]  }
  0x78   : > { %1401 = vmatpush1.bf16.msra.mxu0 %v2065_v35  ;;  %1386 = vmatmul.mubr.bf16.gmra.mxu1 %v2136_v50  ;;  %v2166_v35 = vld [vmem:[%s2344_s3 + $0x464] ss:$8 sps:$4 sm:$0xff]   ;;  %v2187_v50 = vld [vmem:[%s2344_s3 + $0x414] ss:$8 sps:$4 sm:$0xff]  }
  0x79   : > { %1454 = vmatpush1.bf16.msra.mxu1 %v2068_v36  ;;  %1402 = vmatprep.subr.bf16.mxu0 %v2073_v37  ;;  %v2167_v36 = vld [vmem:[%s2346_s4 + $0x5c] ss:$36 sps:$4 sm:$0xff]   ;;  %v2173_v37 = vld [vmem:[%s2346_s4 + $0x64] ss:$36 sps:$4 sm:$0xff]  }
  0x7a   : > { %1455 = vmatprep.subr.bf16.mxu1 %v2076_v38  ;;  %1428 = vmatprep.mubr.bf16.mxu0 %v2157_v62  ;;  %v2164_v38 = vld [vmem:[%s2344_s3 + $0x460] ss:$8 sps:$4 sm:$0xff]  }
  0x7b   : > { %1481 = vmatprep.mubr.bf16.mxu1 %v2160_v0 }
  0x7c   : > { %1403 = vmatpush1.bf16.msra.mxu0 %v2071_v39  ;;  %v2172_v39 = vld [vmem:[%s2344_s3 + $0x454] ss:$8 sps:$4 sm:$0xff]  }
  0x7d   : > { %1456 = vmatpush1.bf16.msra.mxu1 %v2074_v40  ;;  %1404 = vmatprep.subr.bf16.mxu0 %v2079_v41  ;;  %v2169_v40 = vld [vmem:[%s2346_s4 + $0x58] ss:$36 sps:$4 sm:$0xff]   ;;  %v2175_v41 = vld [vmem:[%s2346_s4 + $0x60] ss:$36 sps:$4 sm:$0xff]  }
  0x7e   : > { %1457 = vmatprep.subr.bf16.mxu1 %v2082_v42  ;;  %v2170_v42 = vld [vmem:[%s2344_s3 + $0x450] ss:$8 sps:$4 sm:$0xff]  }
  0x80   : > { %1405 = vmatpush1.bf16.msra.mxu0 %v2077_v43  ;;  %v2178_v43 = vld [vmem:[%s2344_s3 + $0x444] ss:$8 sps:$4 sm:$0xff]  }
  0x81   : > { %1458 = vmatpush1.bf16.msra.mxu1 %v2080_v44  ;;  %1406 = vmatprep.subr.bf16.mxu0 %v2085_v45  ;;  %v2176_v44 = vld [vmem:[%s2344_s3 + $0x440] ss:$8 sps:$4 sm:$0xff]   ;;  %v2181_v45 = vld [vmem:[%s2344_s3 + $0x434] ss:$8 sps:$4 sm:$0xff]  }
  0x82   : > { %1459 = vmatprep.subr.bf16.mxu1 %v2088_v46  ;;  %v2234_v46 = vmov 0  }
  0x84   : > { %1407 = vmatpush1.bf16.msra.mxu0 %v2083_v51  ;;  %v2185_v51 = vld [vmem:[%s2344_s3 + $0x410] ss:$8 sps:$4 sm:$0xff]  }
  0x85   : > { %1460 = vmatpush1.bf16.msra.mxu1 %v2086_v52  ;;  %1408 = vmatprep.subr.bf16.mxu0 %v2091_v53  ;;  %v2190_v52 = vld [vmem:[%s2344_s3 + $0x404] ss:$8 sps:$4 sm:$0xff]   ;;  %v2188_v53 = vld [vmem:[%s2344_s3 + $0x400] ss:$8 sps:$4 sm:$0xff]  }
  0x86   : > { %1461 = vmatprep.subr.bf16.mxu1 %v2094_v54  ;;  %v2191_v54 = vld [vmem:[%s2346_s4 + $0x20] ss:$36 sps:$4 sm:$0xff]  }
  0x88   : > { %1409 = vmatpush1.bf16.msra.mxu0 %v2089_v55  ;;  %v2192_v55 = vld [vmem:[%s2346_s4 + $0x68] ss:$36 sps:$4 sm:$0xff]  }
  0x89   : > { %1462 = vmatpush1.bf16.msra.mxu1 %v2092_v56  ;;  %1410 = vmatprep.subr.bf16.mxu0 %v2097_v57 }
  0x8a   : > { %1463 = vmatprep.subr.bf16.mxu1 %v2100_v58 }
  0x8c   : > { %1411 = vmatpush1.bf16.msra.mxu0 %v2095_v59 }
  0x8d   : > { %1464 = vmatpush1.bf16.msra.mxu1 %v2098_v60  ;;  %1412 = vmatprep.subr.bf16.mxu0 %v2103_v61 }
  0x8e   : > { %1465 = vmatprep.subr.bf16.mxu1 %v2106_v63 }
  0x90   : > { %1413 = vmatpush2.bf16.msra.mxu0 %v2101_v1 }
  0x91   : > { %1466 = vmatpush2.bf16.msra.mxu1 %v2104_v2  ;;  %1414 = vmatprep.subr.bf16.mxu0 %v2109_v3 }
  0x92   : > { %1467 = vmatprep.subr.bf16.mxu1 %v2112_v4 }
  0x94   : > { %1415 = vmatpush2.bf16.msra.mxu0 %v2107_v5 }
  0x95   : > { %1468 = vmatpush2.bf16.msra.mxu1 %v2110_v6  ;;  %1416 = vmatprep.subr.bf16.mxu0 %v2115_v7 }
  0x96   : > { %1469 = vmatprep.subr.bf16.mxu1 %v2118_v8 }
  0x98   : > { %1417 = vmatpush2.bf16.msra.mxu0 %v2113_v9 }
  0x99   : > { %1470 = vmatpush2.bf16.msra.mxu1 %v2116_v10  ;;  %1418 = vmatprep.subr.bf16.mxu0 %v2121_v11 }
  0x9a   : > { %1471 = vmatprep.subr.bf16.mxu1 %v2124_v12 }
  0x9c   : > { %1419 = vmatpush2.bf16.msra.mxu0 %v2119_v13 }
  0x9d   : > { %1472 = vmatpush2.bf16.msra.mxu1 %v2122_v14  ;;  %1420 = vmatprep.subr.bf16.mxu0 %v2127_v15 }
  0x9e   : > { %1473 = vmatprep.subr.bf16.mxu1 %v2130_v16 }
  0xa0   : > { %1421 = vmatpush2.bf16.msra.mxu0 %v2125_v17 }
  0xa1   : > { %1474 = vmatpush2.bf16.msra.mxu1 %v2128_v18  ;;  %1422 = vmatprep.subr.bf16.mxu0 %v2139_v19 }
  0xa2   : > { %1475 = vmatprep.subr.bf16.mxu1 %v2142_v20 }
  0xa4   : > { %1423 = vmatpush2.bf16.msra.mxu0 %v2137_v21 }
  0xa5   : > { %1476 = vmatpush2.bf16.msra.mxu1 %v2140_v22  ;;  %1424 = vmatprep.subr.bf16.mxu0 %v2145_v23 }
  0xa6   : > { %1477 = vmatprep.subr.bf16.mxu1 %v2148_v24 }
  0xa8   : > { %1425 = vmatpush2.bf16.msra.mxu0 %v2143_v25 }
  0xa9   : > { %1478 = vmatpush2.bf16.msra.mxu1 %v2146_v26  ;;  %1426 = vmatprep.subr.bf16.mxu0 %v2151_v27 }
  0xaa   : > { %1479 = vmatprep.subr.bf16.mxu1 %v2154_v28 }
  0xac   : > { %1427 = vmatpush2.bf16.msra.mxu0 %v2149_v29 }
  0xad   : > { %1480 = vmatpush2.bf16.msra.mxu1 %v2152_v30  ;;  %1502 = vmatprep.subr.bf16.mxu0 %v2163_v31 }
  0xae   : > { %1891 = vmatprep.subr.bf16.mxu1 %v2163_v31 }
  0xaf   : > { %1429 = vmatmul.mubr.bf16.vlgmr.msra.gmra.mxu0 %v2155_v32 }
  0xb0   : > { %1482 = vmatmul.mubr.bf16.vlgmr.msra.gmra.mxu1 %v2158_v33  ;;  %1503 = vmatpush1.bf16.msra.mxu0 %v2161_v34 }
  0xb1   : > { %1899 = vmatpush1.bf16.msra.mxu1 %v2161_v34  ;;  %1504 = vmatprep.subr.bf16.mxu0 %v2166_v35 }
  0xb2   : > { %1892 = vmatprep.subr.bf16.mxu1 %v2166_v35  ;;  %1438 = vmatprep.mubr.bf16.mxu0 %v2167_v36 }
  0xb3   : > { %1491 = vmatprep.mubr.bf16.mxu1 %v2173_v37 }
  0xb4   : > { %1505 = vmatpush1.bf16.msra.mxu0 %v2164_v38 }
  0xb5   : > { %1900 = vmatpush1.bf16.msra.mxu1 %v2164_v38  ;;  %1506 = vmatprep.subr.bf16.mxu0 %v2172_v39 }
  0xb6   : > { %1893 = vmatprep.subr.bf16.mxu1 %v2172_v39 }
  0xb7   : > { %1439 = vmatmul.mubr.bf16.gmra.mxu0 %v2169_v40 }
  0xb8   : > { %1492 = vmatmul.mubr.bf16.gmra.mxu1 %v2175_v41  ;;  %1507 = vmatpush1.bf16.msra.mxu0 %v2170_v42 }
  0xb9   : > { %1901 = vmatpush1.bf16.msra.mxu1 %v2170_v42  ;;  %1508 = vmatprep.subr.bf16.mxu0 %v2178_v43  ;;  %v306_v42 = vld [vmem:[#allocation2 + $0x30] sm:$0xff] }
  0xba   : > { %1894 = vmatprep.subr.bf16.mxu1 %v2178_v43  ;;  %1534 = vmatprep.mubr.bf16.mxu0 %v2234_v46 }
  0xbb   : > { %1544 = vmatprep.mubr.bf16.mxu1 %v2234_v46 }
  0xbc   : > { %1509 = vmatpush1.bf16.msra.mxu0 %v2176_v44 }
  0xbd   : > { %1902 = vmatpush1.bf16.msra.mxu1 %v2176_v44  ;;  %1510 = vmatprep.subr.bf16.mxu0 %v2181_v45  ;;  %v310_v44 = vld [vmem:[#allocation2 + $0x8] sm:$0xff] }
  0xbe   : > { %1895 = vmatprep.subr.bf16.mxu1 %v2181_v45 }
  0xc0   : > { %1511 = vmatpush1.bf16.msra.mxu0 %v2179_v47 }
  0xc1   : > { %1903 = vmatpush1.bf16.msra.mxu1 %v2179_v47  ;;  %1512 = vmatprep.subr.bf16.mxu0 %v2184_v48 }
  0xc2   : > { %1896 = vmatprep.subr.bf16.mxu1 %v2184_v48 }
  0xc4   : > { %1513 = vmatpush1.bf16.msra.mxu0 %v2182_v49 }
  0xc5   : > { %1904 = vmatpush1.bf16.msra.mxu1 %v2182_v49  ;;  %1514 = vmatprep.subr.bf16.mxu0 %v2187_v50 }
  0xc6   : > { %1897 = vmatprep.subr.bf16.mxu1 %v2187_v50 }
  0xc8   : > { %1515 = vmatpush1.bf16.msra.mxu0 %v2185_v51 }
  0xc9   : > { %1905 = vmatpush1.bf16.msra.mxu1 %v2185_v51  ;;  %1516 = vmatprep.subr.bf16.mxu0 %v2190_v52 }
  0xca   : > { %1898 = vmatprep.subr.bf16.mxu1 %v2190_v52  ;;  %v307_v52 = vld [vmem:[#allocation2] sm:$0xff] }
  0xcc   : > { %1517 = vmatpush1.bf16.msra.mxu0 %v2188_v53 }
  0xcd   : > { %1906 = vmatpush1.bf16.msra.mxu1 %v2188_v53 }
  0xcf   : > { %1535 = vmatmul.mubr.bf16.vlgmr.msra.gmra.mxu0 %v2191_v54  ;;  %v311_v54 = vld [vmem:[#allocation2 + $0x20] sm:$0xff] }
  0xd0   : > { %1545 = vmatmul.mubr.bf16.vlgmr.msra.gmra.mxu1 %v2192_v55 }
 0x12f   : > { %v1324_v56 = vpop.f32.mrf.mxu0 }
 0x130   : > { %v1377_v57 = vpop.f32.mrf.mxu1 }
 0x131   : > { %v1326_v58 = vpop.f32.mrf.mxu0  ;;  %v1378_v20 = vadd.f32 %v1377_v57, %v1324_v56 }
 0x132   : > { %v1379_v59 = vpop.f32.mrf.mxu1 }
 0x133   : > { %v1328_v60 = vpop.f32.mrf.mxu0  ;;  %v1380_v24 = vadd.f32 %v1379_v59, %v1326_v58 }
 0x134   : > { %v1381_v61 = vpop.f32.mrf.mxu1 }
 0x135   : > { %v1330_v62 = vpop.f32.mrf.mxu0  ;;  %v1382_v28 = vadd.f32 %v1381_v61, %v1328_v60 }
 0x136   : > { %v1383_v0 = vpop.f32.mrf.mxu1 }
 0x137   : > { %v1334_v63 = vpop.f32.mrf.mxu0  ;;  %v1384_v33 = vadd.f32 %v1383_v0, %v1330_v62  ;;  %v308_v62 = vld [vmem:[#allocation2 + $0x18] sm:$0xff]  ;;  %v312_v0 = vld [vmem:[#allocation2 + $0x28] sm:$0xff] }
 0x138   : > { %v1387_v1 = vpop.f32.mrf.mxu1 }
 0x139   : > { %v1336_v2 = vpop.f32.mrf.mxu0  ;;  %v1388_v21 = vadd.f32 %v1387_v1, %v1334_v63 }
 0x13a   : > { %v1389_v3 = vpop.f32.mrf.mxu1 }
 0x13b   : > { %v1338_v4 = vpop.f32.mrf.mxu0  ;;  %v1390_v25 = vadd.f32 %v1389_v3, %v1336_v2 }
 0x13c   : > { %v1391_v5 = vpop.f32.mrf.mxu1 }
 0x13d   : > { %v1340_v6 = vpop.f32.mrf.mxu0  ;;  %v1392_v29 = vadd.f32 %v1391_v5, %v1338_v4 }
 0x13e   : > { %v1393_v8 = vpop.f32.mrf.mxu1 }
 0x13f   : > { %v1394_v34 = vadd.f32 %v1393_v8, %v1340_v6  ;;  %v309_v6 = vld [vmem:[#allocation2 + $0x10] sm:$0xff]  ;;  %v313_v8 = vld [vmem:[#allocation2 + $0x38] sm:$0xff] }
 0x16f   : > { %v1430_v7 = vpop.f32.mrf.mxu0 }
 0x170   : > { %v1483_v9 = vpop.f32.mrf.mxu1  ;;  %v1431_v26 = vadd.f32 %v1430_v7, %v1378_v20 }
 0x171   : > { %v1432_v10 = vpop.f32.mrf.mxu0 }
 0x172   : > { %v1485_v11 = vpop.f32.mrf.mxu1  ;;  %v1433_v30 = vadd.f32 %v1432_v10, %v1380_v24  ;;  %v1484_v38 = vadd.f32 %v1483_v9, %v1431_v26 }
 0x173   : > { %v1434_v12 = vpop.f32.mrf.mxu0 }
 0x174   : > { %v1487_v13 = vpop.f32.mrf.mxu1  ;;  %v1435_v35 = vadd.f32 %v1434_v12, %v1382_v28  ;;  %v1486_v46 = vadd.f32 %v1485_v11, %v1433_v30 }
 0x175   : > { %v1436_v14 = vpop.f32.mrf.mxu0 }
 0x176   : > { %v1489_v15 = vpop.f32.mrf.mxu1  ;;  %v1437_v40 = vadd.f32 %v1436_v14, %v1384_v33  ;;  %v1488_v50 = vadd.f32 %v1487_v13, %v1435_v35 }
 0x177   : > { %v1440_v16 = vpop.f32.mrf.mxu0 }
 0x178   : > { %v1493_v17 = vpop.f32.mrf.mxu1  ;;  %v1441_v27 = vadd.f32 %v1440_v16, %v1388_v21  ;;  %v1490_v60 = vadd.f32 %v1489_v15, %v1437_v40 }
 0x179   : > { %v1442_v18 = vpop.f32.mrf.mxu0 }
 0x17a   : > { %v1495_v19 = vpop.f32.mrf.mxu1  ;;  %v1443_v31 = vadd.f32 %v1442_v18, %v1390_v25  ;;  %v1494_v39 = vadd.f32 %v1493_v17, %v1441_v27 }
 0x17b   : > { %v1444_v22 = vpop.f32.mrf.mxu0 }
 0x17c   : > { %v1497_v23 = vpop.f32.mrf.mxu1  ;;  %v1445_v36 = vadd.f32 %v1444_v22, %v1392_v29  ;;  %v1496_v47 = vadd.f32 %v1495_v19, %v1443_v31 }
 0x17d   : > { %v1446_v32 = vpop.f32.mrf.mxu0 }
 0x17e   : > { %v1499_v37 = vpop.f32.mrf.mxu1  ;;  %v1447_v41 = vadd.f32 %v1446_v32, %v1394_v34  ;;  %v1498_v51 = vadd.f32 %v1497_v23, %v1445_v36 }
 0x180   : > { %v1500_v61 = vadd.f32 %v1499_v37, %v1447_v41 }
 0x18f   : > { %v1536_v43 = vpop.f32.mrf.mxu0 }
 0x190   : > { %v1546_v45 = vpop.f32.mrf.mxu1  ;;  %v1537_v48 = vadd.f32 %v1536_v43, %v1484_v38 }
 0x191   : > { %v1547_v49 = vadd.f32 %v1546_v45, %v1494_v39  ;;  %v1538_v53 = vpop.f32.mrf.mxu0 }
 0x192   : > { %v1548_v55 = vpop.f32.mrf.mxu1  ;;  %v1555_v56 = vadd.f32 %v1537_v48, %v306_v42  ;;  %v1539_v58 = vadd.f32 %v1538_v53, %v1486_v46 }
 0x193   : > { %v1559_v57 = vadd.f32 %v1547_v49, %v310_v44  ;;  %v1549_v59 = vadd.f32 %v1548_v55, %v1496_v47  ;;  %v1540_v63 = vpop.f32.mrf.mxu0 }
 0x194   : > { %v1550_v1 = vpop.f32.mrf.mxu1  ;;  %1563 = vst [vmem:[#allocation2 + $0x30] sm:$0xff] %v1555_v56  ;;  %v1556_v2 = vadd.f32 %v1539_v58, %v307_v52  ;;  %v1541_v4 = vadd.f32 %v1540_v63, %v1488_v50 }
 0x195   : > { %1567 = vst [vmem:[#allocation2 + $0x8] sm:$0xff] %v1559_v57  ;;  %v1560_v3 = vadd.f32 %v1549_v59, %v311_v54  ;;  %v1551_v5 = vadd.f32 %v1550_v1, %v1498_v51  ;;  %v1542_v7 = vpop.f32.mrf.mxu0 }
 0x196   : > { %v1552_v9 = vpop.f32.mrf.mxu1  ;;  %1564 = vst [vmem:[#allocation2] sm:$0xff] %v1556_v2  ;;  %v1557_v10 = vadd.f32 %v1541_v4, %v308_v62  ;;  %v1543_v12 = vadd.f32 %v1542_v7, %v1490_v60 }
 0x197   : > { %1568 = vst [vmem:[#allocation2 + $0x20] sm:$0xff] %v1560_v3  ;;  %v1561_v11 = vadd.f32 %v1551_v5, %v312_v0  ;;  %v1553_v13 = vadd.f32 %v1552_v9, %v1500_v61  ;;  %1574 = sbr.rel (%p1884_p11) target bundleno = 420 (0x1a4), region = 62 }
 0x198   : > { %1565 = vst [vmem:[#allocation2 + $0x18] sm:$0xff] %v1557_v10  ;;  %v1558_v14 = vadd.f32 %v1543_v12, %v309_v6 }
 0x199   : > { %1569 = vst [vmem:[#allocation2 + $0x28] sm:$0xff] %v1561_v11  ;;  %v1562_v15 = vadd.f32 %v1553_v13, %v313_v8 }
 0x19a   : > { %1566 = vst [vmem:[#allocation2 + $0x10] sm:$0xff] %v1558_v14 }
 0x19b   : > { %1570 = vst [vmem:[#allocation2 + $0x38] sm:$0xff] %v1562_v15 }
 0x19c   : > { %v1575_v16 = vld [vmem:[#allocation2 + $0x30] sm:$0xff]  ;;  %v1579_v20 = vld [vmem:[#allocation2 + $0x8] sm:$0xff] }
 0x19d   : > { %v1576_v17 = vld [vmem:[#allocation2] sm:$0xff]  ;;  %1583 = vst [vmem:[%s2553_s2] sm:$0xff] %v1575_v16  ;;  %1587 = vst [vmem:[%s2553_s2 + $0x20] sm:$0xff] %v1579_v20 }
 0x19e   : > { %1584 = vst [vmem:[%s2553_s2 + $0x8] sm:$0xff] %v1576_v17  ;;  %v1580_v21 = vld [vmem:[#allocation2 + $0x20] sm:$0xff] }
 0x19f   : > { %v1577_v18 = vld [vmem:[#allocation2 + $0x18] sm:$0xff]  ;;  %1588 = vst [vmem:[%s2553_s2 + $0x28] sm:$0xff] %v1580_v21 }
 0x1a0   : > { %1585 = vst [vmem:[%s2553_s2 + $0x10] sm:$0xff] %v1577_v18  ;;  %v1581_v22 = vld [vmem:[#allocation2 + $0x28] sm:$0xff] }
 0x1a1   : > { %v1578_v19 = vld [vmem:[#allocation2 + $0x10] sm:$0xff]  ;;  %1589 = vst [vmem:[%s2553_s2 + $0x30] sm:$0xff] %v1581_v22 }
 0x1a2   : > { %1586 = vst [vmem:[%s2553_s2 + $0x18] sm:$0xff] %v1578_v19  ;;  %v1582_v23 = vld [vmem:[#allocation2 + $0x38] sm:$0xff] }
 0x1a3   : > { %1590 = vst [vmem:[%s2553_s2 + $0x38] sm:$0xff] %v1582_v23 }
 0x1a4 PF: > { %s12_s13 = sadd.s32 1, %s2231_s13   ;;  %s2554_s9 = smov %s2219_s10 }
 0x1a5   : > { %p9_p12 = scmp.ge.s32.totalorder %s12_s13, 4   ;;  %s2555_s10 = smov %s2285_s17 }
 0x1a6   : > { %s2556_s11 = smov %s2227_s12  ;;  %s2557_s12 = smov %s2559_s14 }
 0x1a7   :  { %11 = sbr.rel (!%p9_p12) target bundleno = 3 (0x3), region = 106 }

// kernel: generator_forward.95
= control target key start
LH: loop header
LB: loop body
LE: loop exit
PB: predicated region body
PF: predicated region fallthrough
CT: control target
= control target key end

     0   :  { %s421_s1 = inlined_call_operand.vmem [shape: bf16[256,128], index: 1, kind: input, shape index: {}]   ;;  %s422_s0 = inlined_call_operand.vmem [shape: bf16[32,256], index: 0, kind: input, shape index: {}]   ;;  %s423_s2 = inlined_call_operand.vmem [shape: f32[32,128], index: 2, kind: output, shape index: {}]  }
   0x1   :  { %v312_v0 = vld [vmem:[%s421_s1 + $0x78] sm:$0xff]   ;;  %v314_v2 = vld [vmem:[%s421_s1 + $0x70] sm:$0xff]   ;;  %v316_v4 = vld [vmem:[%s421_s1 + $0x68] sm:$0xff]  }
   0x2   :  { %v313_v1 = vld [vmem:[%s421_s1 + $0x38] sm:$0xff]   ;;  %268 = vmatprep.subr.bf16.mxu0 %v312_v0  ;;  %296 = vmatprep.subr.bf16.mxu1 %v312_v0  ;;  %v315_v3 = vld [vmem:[%s421_s1 + $0x30] sm:$0xff]   ;;  %v317_v5 = vld [vmem:[%s421_s1 + $0x28] sm:$0xff]  }
   0x3   :  { %269 = vmatpush3.bf16.msra.mxu0 %v313_v1  ;;  %304 = vmatpush3.bf16.msra.mxu1 %v313_v1  ;;  %v318_v6 = vld [vmem:[%s421_s1 + $0x60] sm:$0xff]   ;;  %v320_v8 = vld [vmem:[%s421_s1 + $0x58] sm:$0xff]   ;;  %v322_v10 = vld [vmem:[%s421_s1 + $0x50] sm:$0xff]  }
   0x4   :  { %270 = vmatprep.subr.bf16.mxu0 %v314_v2  ;;  %297 = vmatprep.subr.bf16.mxu1 %v314_v2  ;;  %v319_v7 = vld [vmem:[%s421_s1 + $0x20] sm:$0xff]   ;;  %v321_v9 = vld [vmem:[%s421_s1 + $0x18] sm:$0xff]   ;;  %v323_v13 = vld [vmem:[%s421_s1 + $0x10] sm:$0xff]  }
   0x5   :  { %v330_v11 = vld [vmem:[%s422_s0 + $0x4] ss:$8 sps:$4 sm:$0xff]   ;;  %v333_v12 = vld [vmem:[%s422_s0 + $0x14] ss:$8 sps:$4 sm:$0xff]   ;;  %v328_v18 = vld [vmem:[%s422_s0] ss:$8 sps:$4 sm:$0xff]  }
   0x6   :  { %v324_v14 = vld [vmem:[%s421_s1 + $0x48] sm:$0xff]   ;;  %208 = vmatprep.mubr.bf16.mxu0 %v330_v11  ;;  %216 = vmatprep.mubr.bf16.mxu1 %v333_v12  ;;  %v326_v16 = vld [vmem:[%s421_s1 + $0x40] sm:$0xff]   ;;  %v331_v19 = vld [vmem:[%s422_s0 + $0x10] ss:$8 sps:$4 sm:$0xff]  }
   0x7   :  { %271 = vmatpush3.bf16.msra.mxu0 %v315_v3  ;;  %305 = vmatpush3.bf16.msra.mxu1 %v315_v3  ;;  %v325_v15 = vld [vmem:[%s421_s1 + $0x8] sm:$0xff]   ;;  %v327_v17 = vld [vmem:[%s421_s1] sm:$0xff]  }
   0x8   :  { %272 = vmatprep.subr.bf16.mxu0 %v316_v4  ;;  %298 = vmatprep.subr.bf16.mxu1 %v316_v4 }
   0xb   :  { %273 = vmatpush3.bf16.msra.mxu0 %v317_v5  ;;  %306 = vmatpush3.bf16.msra.mxu1 %v317_v5 }
   0xc   :  { %274 = vmatprep.subr.bf16.mxu0 %v318_v6  ;;  %299 = vmatprep.subr.bf16.mxu1 %v318_v6 }
   0xf   :  { %275 = vmatpush3.bf16.msra.mxu0 %v319_v7  ;;  %307 = vmatpush3.bf16.msra.mxu1 %v319_v7 }
  0x10   :  { %276 = vmatprep.subr.bf16.mxu0 %v320_v8  ;;  %300 = vmatprep.subr.bf16.mxu1 %v320_v8 }
  0x13   :  { %277 = vmatpush3.bf16.msra.mxu0 %v321_v9  ;;  %308 = vmatpush3.bf16.msra.mxu1 %v321_v9 }
  0x14   :  { %278 = vmatprep.subr.bf16.mxu0 %v322_v10  ;;  %301 = vmatprep.subr.bf16.mxu1 %v322_v10 }
  0x17   :  { %279 = vmatpush3.bf16.msra.mxu0 %v323_v13  ;;  %309 = vmatpush3.bf16.msra.mxu1 %v323_v13 }
  0x18   :  { %280 = vmatprep.subr.bf16.mxu0 %v324_v14  ;;  %302 = vmatprep.subr.bf16.mxu1 %v324_v14 }
  0x1b   :  { %281 = vmatpush3.bf16.msra.mxu0 %v325_v15  ;;  %310 = vmatpush3.bf16.msra.mxu1 %v325_v15 }
  0x1c   :  { %282 = vmatprep.subr.bf16.mxu0 %v326_v16  ;;  %303 = vmatprep.subr.bf16.mxu1 %v326_v16 }
  0x1f   :  { %283 = vmatpush3.bf16.msra.mxu0 %v327_v17  ;;  %311 = vmatpush3.bf16.msra.mxu1 %v327_v17 }
  0x22   :  { %209 = vmatmul.mubr.bf16.vlgmr.msra.gmra.mxu0 %v328_v18  ;;  %217 = vmatmul.mubr.bf16.vlgmr.msra.gmra.mxu1 %v331_v19 }
  0xe2   :  { %v284_v20 = vpop.f32.mrf.mxu0  ;;  %v290_v21 = vpop.f32.mrf.mxu1 }
  0xe4   :  { %v285_v22 = vpop.f32.mrf.mxu0  ;;  %v291_v23 = vpop.f32.mrf.mxu1 }
  0xe5   :  { %v286_v24 = vadd.f32 %v285_v22, %v284_v20  ;;  %v292_v25 = vadd.f32 %v291_v23, %v290_v21 }
  0xe6   :  { %v287_v26 = vpop.f32.mrf.mxu0  ;;  %v293_v27 = vpop.f32.mrf.mxu1 }
  0xe7   :  { %240 = vst [vmem:[%s423_s2] sm:$0xff] %v286_v24  ;;  %242 = vst [vmem:[%s423_s2 + $0x10] sm:$0xff] %v292_v25 }
  0xe8   :  { %v288_v28 = vpop.f32.mrf.mxu0  ;;  %v294_v29 = vpop.f32.mrf.mxu1 }
  0xe9   :  { %v289_v30 = vadd.f32 %v288_v28, %v287_v26  ;;  %v295_v31 = vadd.f32 %v294_v29, %v293_v27 }
  0xeb   :  { %241 = vst [vmem:[%s423_s2 + $0x8] sm:$0xff] %v289_v30  ;;  %243 = vst [vmem:[%s423_s2 + $0x18] sm:$0xff] %v295_v31 }

// kernel: generator_forward.96
= control target key start
LH: loop header
LB: loop body
LE: loop exit
PB: predicated region body
PF: predicated region fallthrough
CT: control target
= control target key end

     0   :  { %s736_s1 = inlined_call_operand.vmem [shape: bf16[512,128], index: 1, kind: input, shape index: {}]   ;;  %s737_s0 = inlined_call_operand.vmem [shape: bf16[32,512], index: 0, kind: input, shape index: {}]   ;;  %s738_s2 = inlined_call_operand.vmem [shape: f32[32,128], index: 2, kind: output, shape index: {}]  }
   0x1   :  { %v545_v0 = vld [vmem:[%s736_s1 + $0x78] sm:$0xff]   ;;  %v549_v4 = vld [vmem:[%s736_s1 + $0x70] sm:$0xff]   ;;  %v553_v8 = vld [vmem:[%s736_s1 + $0x68] sm:$0xff]  }
   0x2   :  { %v546_v1 = vld [vmem:[%s736_s1 + $0xf8] sm:$0xff]   ;;  %489 = vmatprep.subr.bf16.mxu0 %v545_v0  ;;  %v550_v5 = vld [vmem:[%s736_s1 + $0xf0] sm:$0xff]   ;;  %v554_v9 = vld [vmem:[%s736_s1 + $0xe8] sm:$0xff]  }
   0x3   :  { %v547_v2 = vld [vmem:[%s736_s1 + $0x38] sm:$0xff]   ;;  %517 = vmatprep.subr.bf16.mxu1 %v546_v1  ;;  %v551_v6 = vld [vmem:[%s736_s1 + $0x30] sm:$0xff]   ;;  %v555_v10 = vld [vmem:[%s736_s1 + $0x28] sm:$0xff]  }
   0x4   :  { %v548_v3 = vld [vmem:[%s736_s1 + $0xb8] sm:$0xff]   ;;  %490 = vmatpush3.bf16.msra.mxu0 %v547_v2  ;;  %v552_v7 = vld [vmem:[%s736_s1 + $0xb0] sm:$0xff]   ;;  %v556_v11 = vld [vmem:[%s736_s1 + $0xa8] sm:$0xff]  }
   0x5   :  { %518 = vmatpush3.bf16.msra.mxu1 %v548_v3  ;;  %491 = vmatprep.subr.bf16.mxu0 %v549_v4  ;;  %v557_v12 = vld [vmem:[%s736_s1 + $0x60] sm:$0xff]   ;;  %v561_v16 = vld [vmem:[%s736_s1 + $0x58] sm:$0xff]   ;;  %v565_v20 = vld [vmem:[%s736_s1 + $0x50] sm:$0xff]  }
   0x6   :  { %519 = vmatprep.subr.bf16.mxu1 %v550_v5  ;;  %v558_v13 = vld [vmem:[%s736_s1 + $0xe0] sm:$0xff]   ;;  %v562_v17 = vld [vmem:[%s736_s1 + $0xd8] sm:$0xff]   ;;  %v566_v21 = vld [vmem:[%s736_s1 + $0xd0] sm:$0xff]  }
   0x7   :  { %v559_v14 = vld [vmem:[%s736_s1 + $0x20] sm:$0xff]   ;;  %v563_v18 = vld [vmem:[%s736_s1 + $0x18] sm:$0xff]   ;;  %v567_v22 = vld [vmem:[%s736_s1 + $0x10] sm:$0xff]  }
   0x8   :  { %492 = vmatpush3.bf16.msra.mxu0 %v551_v6  ;;  %v560_v15 = vld [vmem:[%s736_s1 + $0xa0] sm:$0xff]   ;;  %v564_v19 = vld [vmem:[%s736_s1 + $0x98] sm:$0xff]   ;;  %v568_v23 = vld [vmem:[%s736_s1 + $0x90] sm:$0xff]  }
   0x9   :  { %520 = vmatpush3.bf16.msra.mxu1 %v552_v7  ;;  %493 = vmatprep.subr.bf16.mxu0 %v553_v8  ;;  %v569_v24 = vld [vmem:[%s736_s1 + $0x48] sm:$0xff]   ;;  %v573_v28 = vld [vmem:[%s736_s1 + $0x40] sm:$0xff]  }
   0xa   :  { %521 = vmatprep.subr.bf16.mxu1 %v554_v9  ;;  %v570_v25 = vld [vmem:[%s736_s1 + $0xc8] sm:$0xff]   ;;  %v574_v29 = vld [vmem:[%s736_s1 + $0xc0] sm:$0xff]  }
   0xb   :  { %v571_v26 = vld [vmem:[%s736_s1 + $0x8] sm:$0xff]   ;;  %v575_v30 = vld [vmem:[%s736_s1] sm:$0xff]  }
   0xc   :  { %494 = vmatpush3.bf16.msra.mxu0 %v555_v10  ;;  %v572_v27 = vld [vmem:[%s736_s1 + $0x88] sm:$0xff]   ;;  %v576_v31 = vld [vmem:[%s736_s1 + $0x80] sm:$0xff]  }
   0xd   :  { %522 = vmatpush3.bf16.msra.mxu1 %v556_v11  ;;  %495 = vmatprep.subr.bf16.mxu0 %v557_v12  ;;  %v577_v32 = vld [vmem:[%s737_s0] ss:$16 sps:$4 sm:$0xff]   ;;  %v579_v33 = vld [vmem:[%s737_s0 + $0x4] ss:$16 sps:$4 sm:$0xff]   ;;  %v580_v34 = vld [vmem:[%s737_s0 + $0x8] ss:$16 sps:$4 sm:$0xff]  }
   0xe   :  { %523 = vmatprep.subr.bf16.mxu1 %v558_v13  ;;  %v582_v35 = vld [vmem:[%s737_s0 + $0xc] ss:$16 sps:$4 sm:$0xff]   ;;  %360 = vmatprep.mubr.bf16.mxu0 %v579_v33  ;;  %v583_v36 = vld [vmem:[%s737_s0 + $0x24] ss:$16 sps:$4 sm:$0xff]   ;;  %v587_v38 = vld [vmem:[%s737_s0 + $0x20] ss:$16 sps:$4 sm:$0xff]  }
   0xf   :  { %409 = vmatprep.mubr.bf16.mxu1 %v582_v35  ;;  %v585_v37 = vld [vmem:[%s737_s0 + $0x2c] ss:$16 sps:$4 sm:$0xff]   ;;  %v588_v39 = vld [vmem:[%s737_s0 + $0x28] ss:$16 sps:$4 sm:$0xff]  }
  0x10   :  { %496 = vmatpush3.bf16.msra.mxu0 %v559_v14 }
  0x11   :  { %524 = vmatpush3.bf16.msra.mxu1 %v560_v15  ;;  %497 = vmatprep.subr.bf16.mxu0 %v561_v16 }
  0x12   :  { %525 = vmatprep.subr.bf16.mxu1 %v562_v17 }
  0x14   :  { %498 = vmatpush3.bf16.msra.mxu0 %v563_v18 }
  0x15   :  { %526 = vmatpush3.bf16.msra.mxu1 %v564_v19  ;;  %499 = vmatprep.subr.bf16.mxu0 %v565_v20 }
  0x16   :  { %527 = vmatprep.subr.bf16.mxu1 %v566_v21 }
  0x18   :  { %500 = vmatpush3.bf16.msra.mxu0 %v567_v22 }
  0x19   :  { %528 = vmatpush3.bf16.msra.mxu1 %v568_v23  ;;  %501 = vmatprep.subr.bf16.mxu0 %v569_v24 }
  0x1a   :  { %529 = vmatprep.subr.bf16.mxu1 %v570_v25 }
  0x1c   :  { %502 = vmatpush3.bf16.msra.mxu0 %v571_v26 }
  0x1d   :  { %530 = vmatpush3.bf16.msra.mxu1 %v572_v27  ;;  %503 = vmatprep.subr.bf16.mxu0 %v573_v28 }
  0x1e   :  { %531 = vmatprep.subr.bf16.mxu1 %v574_v29 }
  0x20   :  { %504 = vmatpush3.bf16.msra.mxu0 %v575_v30 }
  0x21   :  { %532 = vmatpush3.bf16.msra.mxu1 %v576_v31 }
  0x23   :  { %361 = vmatmul.mubr.bf16.vlgmr.msra.gmra.mxu0 %v577_v32 }
  0x24   :  { %410 = vmatmul.mubr.bf16.vlgmr.msra.gmra.mxu1 %v580_v34  ;;  %368 = vmatprep.mubr.bf16.mxu0 %v583_v36 }
  0x25   :  { %417 = vmatprep.mubr.bf16.mxu1 %v585_v37 }
  0x2b   :  { %369 = vmatmul.mubr.bf16.gmra.mxu0 %v587_v38 }
  0x2c   :  { %418 = vmatmul.mubr.bf16.gmra.mxu1 %v588_v39 }
  0xe3   :  { %v505_v40 = vpop.f32.mrf.mxu0 }
  0xe4   :  { %v533_v41 = vpop.f32.mrf.mxu1 }
  0xe5   :  { %v506_v42 = vpop.f32.mrf.mxu0 }
  0xe6   :  { %v507_v43 = vadd.f32 %v506_v42, %v505_v40  ;;  %v534_v44 = vpop.f32.mrf.mxu1 }
  0xe7   :  { %v535_v45 = vadd.f32 %v534_v44, %v533_v41  ;;  %v508_v46 = vpop.f32.mrf.mxu0 }
  0xe8   :  { %v536_v47 = vpop.f32.mrf.mxu1 }
  0xe9   :  { %v412_v48 = vadd.f32 %v535_v45, %v507_v43  ;;  %v509_v49 = vpop.f32.mrf.mxu0 }
  0xea   :  { %v510_v50 = vadd.f32 %v509_v49, %v508_v46  ;;  %v537_v51 = vpop.f32.mrf.mxu1 }
  0xeb   :  { %441 = vst [vmem:[%s738_s2] sm:$0xff] %v412_v48  ;;  %v538_v52 = vadd.f32 %v537_v51, %v536_v47  ;;  %v511_v53 = vpop.f32.mrf.mxu0 }
  0xec   :  { %v539_v54 = vpop.f32.mrf.mxu1 }
  0xed   :  { %v415_v55 = vadd.f32 %v538_v52, %v510_v50  ;;  %v512_v56 = vpop.f32.mrf.mxu0 }
  0xee   :  { %v513_v57 = vadd.f32 %v512_v56, %v511_v53  ;;  %v540_v58 = vpop.f32.mrf.mxu1 }
  0xef   :  { %442 = vst [vmem:[%s738_s2 + $0x8] sm:$0xff] %v415_v55  ;;  %v541_v59 = vadd.f32 %v540_v58, %v539_v54  ;;  %v514_v60 = vpop.f32.mrf.mxu0 }
  0xf0   :  { %v542_v61 = vpop.f32.mrf.mxu1 }
  0xf1   :  { %v420_v62 = vadd.f32 %v541_v59, %v513_v57  ;;  %v515_v63 = vpop.f32.mrf.mxu0 }
  0xf2   :  { %v516_v0 = vadd.f32 %v515_v63, %v514_v60  ;;  %v543_v1 = vpop.f32.mrf.mxu1 }
  0xf3   :  { %443 = vst [vmem:[%s738_s2 + $0x10] sm:$0xff] %v420_v62  ;;  %v544_v2 = vadd.f32 %v543_v1, %v542_v61 }
  0xf5   :  { %v423_v3 = vadd.f32 %v544_v2, %v516_v0 }
  0xf7   :  { %444 = vst [vmem:[%s738_s2 + $0x18] sm:$0xff] %v423_v3 }

// kernel: generator_forward.98
= control target key start
LH: loop header
LB: loop body
LE: loop exit
PB: predicated region body
PF: predicated region fallthrough
CT: control target
= control target key end

     0   :  { %s1374_s1 = inlined_call_operand.vmem [shape: bf16[1024,128], index: 1, kind: input, shape index: {}]   ;;  %s1375_s0 = inlined_call_operand.vmem [shape: bf16[32,1024], index: 0, kind: input, shape index: {}]   ;;  %s1376_s2 = inlined_call_operand.vmem [shape: f32[32,128], index: 2, kind: output, shape index: {}]  }
   0x1   :  { %v1043_v0 = vld [vmem:[%s1374_s1 + $0x78] sm:$0xff]   ;;  %v1047_v4 = vld [vmem:[%s1374_s1 + $0x70] sm:$0xff]   ;;  %v1051_v8 = vld [vmem:[%s1374_s1 + $0x68] sm:$0xff]  }
   0x2   :  { %v1044_v1 = vld [vmem:[%s1374_s1 + $0xf8] sm:$0xff]   ;;  %931 = vmatprep.subr.bf16.mxu0 %v1043_v0  ;;  %v1048_v5 = vld [vmem:[%s1374_s1 + $0xf0] sm:$0xff]   ;;  %v1052_v9 = vld [vmem:[%s1374_s1 + $0xe8] sm:$0xff]  }
   0x3   :  { %v1045_v2 = vld [vmem:[%s1374_s1 + $0x38] sm:$0xff]   ;;  %959 = vmatprep.subr.bf16.mxu1 %v1044_v1  ;;  %v1049_v6 = vld [vmem:[%s1374_s1 + $0x30] sm:$0xff]   ;;  %v1053_v10 = vld [vmem:[%s1374_s1 + $0x28] sm:$0xff]  }
   0x4   :  { %v1046_v3 = vld [vmem:[%s1374_s1 + $0xb8] sm:$0xff]   ;;  %932 = vmatpush3.bf16.msra.mxu0 %v1045_v2  ;;  %v1050_v7 = vld [vmem:[%s1374_s1 + $0xb0] sm:$0xff]   ;;  %v1054_v11 = vld [vmem:[%s1374_s1 + $0xa8] sm:$0xff]  }
   0x5   :  { %960 = vmatpush3.bf16.msra.mxu1 %v1046_v3  ;;  %933 = vmatprep.subr.bf16.mxu0 %v1047_v4  ;;  %v1055_v12 = vld [vmem:[%s1374_s1 + $0x60] sm:$0xff]   ;;  %v1059_v16 = vld [vmem:[%s1374_s1 + $0x58] sm:$0xff]   ;;  %v1063_v20 = vld [vmem:[%s1374_s1 + $0x50] sm:$0xff]  }
   0x6   :  { %961 = vmatprep.subr.bf16.mxu1 %v1048_v5  ;;  %v1056_v13 = vld [vmem:[%s1374_s1 + $0xe0] sm:$0xff]   ;;  %v1060_v17 = vld [vmem:[%s1374_s1 + $0xd8] sm:$0xff]   ;;  %v1064_v21 = vld [vmem:[%s1374_s1 + $0xd0] sm:$0xff]  }
   0x7   :  { %v1057_v14 = vld [vmem:[%s1374_s1 + $0x20] sm:$0xff]   ;;  %v1061_v18 = vld [vmem:[%s1374_s1 + $0x18] sm:$0xff]   ;;  %v1065_v22 = vld [vmem:[%s1374_s1 + $0x10] sm:$0xff]  }
   0x8   :  { %934 = vmatpush3.bf16.msra.mxu0 %v1049_v6  ;;  %v1058_v15 = vld [vmem:[%s1374_s1 + $0xa0] sm:$0xff]   ;;  %v1062_v19 = vld [vmem:[%s1374_s1 + $0x98] sm:$0xff]   ;;  %v1066_v23 = vld [vmem:[%s1374_s1 + $0x90] sm:$0xff]  }
   0x9   :  { %962 = vmatpush3.bf16.msra.mxu1 %v1050_v7  ;;  %935 = vmatprep.subr.bf16.mxu0 %v1051_v8  ;;  %v1067_v24 = vld [vmem:[%s1374_s1 + $0x48] sm:$0xff]   ;;  %v1071_v28 = vld [vmem:[%s1374_s1 + $0x40] sm:$0xff]   ;;  %v1075_v40 = vld [vmem:[%s1374_s1 + $0x178] sm:$0xff]  }
   0xa   :  { %963 = vmatprep.subr.bf16.mxu1 %v1052_v9  ;;  %v1068_v25 = vld [vmem:[%s1374_s1 + $0xc8] sm:$0xff]   ;;  %v1072_v29 = vld [vmem:[%s1374_s1 + $0xc0] sm:$0xff]   ;;  %v1076_v41 = vld [vmem:[%s1374_s1 + $0x1f8] sm:$0xff]  }
   0xb   :  { %v1069_v26 = vld [vmem:[%s1374_s1 + $0x8] sm:$0xff]   ;;  %v1073_v30 = vld [vmem:[%s1374_s1] sm:$0xff]   ;;  %v1077_v42 = vld [vmem:[%s1374_s1 + $0x138] sm:$0xff]  }
   0xc   :  { %936 = vmatpush3.bf16.msra.mxu0 %v1053_v10  ;;  %v1070_v27 = vld [vmem:[%s1374_s1 + $0x88] sm:$0xff]   ;;  %v1074_v31 = vld [vmem:[%s1374_s1 + $0x80] sm:$0xff]   ;;  %v1078_v43 = vld [vmem:[%s1374_s1 + $0x1b8] sm:$0xff]  }
   0xd   :  { %964 = vmatpush3.bf16.msra.mxu1 %v1054_v11  ;;  %937 = vmatprep.subr.bf16.mxu0 %v1055_v12  ;;  %v24_v32 = vld [vmem:[%s1375_s0] sm:$0xff]  ;;  %v25_v34 = vld [vmem:[%s1375_s0 + $0x8] sm:$0xff]  ;;  %v1079_v44 = vld [vmem:[%s1374_s1 + $0x170] sm:$0xff]  }
   0xe   :  { %965 = vmatprep.subr.bf16.mxu1 %v1056_v13  ;;  %v28_v33 = vld [vmem:[%s1375_s0 + $0x20] sm:$0xff]  ;;  %v29_v37 = vld [vmem:[%s1375_s0 + $0x28] sm:$0xff]  ;;  %v1080_v45 = vld [vmem:[%s1374_s1 + $0x1f0] sm:$0xff]  }
   0xf   :  { %v851_v35 = vcombine.low %v24_v32, %v28_v33  ;;  %v852_v36 = vcombine.high %v24_v32, %v28_v33  ;;  %v853_v38 = vcombine.low %v25_v34, %v29_v37  ;;  %v854_v39 = vcombine.high %v25_v34, %v29_v37  ;;  %v1081_v46 = vld [vmem:[%s1374_s1 + $0x130] sm:$0xff]   ;;  %v1083_v48 = vld [vmem:[%s1374_s1 + $0x168] sm:$0xff]   ;;  %v1087_v52 = vld [vmem:[%s1374_s1 + $0x160] sm:$0xff]  }
  0x10   :  { %938 = vmatpush3.bf16.msra.mxu0 %v1057_v14  ;;  %v1082_v47 = vld [vmem:[%s1374_s1 + $0x1b0] sm:$0xff]   ;;  %v1084_v49 = vld [vmem:[%s1374_s1 + $0x1e8] sm:$0xff]   ;;  %v1088_v53 = vld [vmem:[%s1374_s1 + $0x1e0] sm:$0xff]  }
  0x11   :  { %966 = vmatpush3.bf16.msra.mxu1 %v1058_v15  ;;  %939 = vmatprep.subr.bf16.mxu0 %v1059_v16  ;;  %v1085_v50 = vld [vmem:[%s1374_s1 + $0x128] sm:$0xff]   ;;  %v1089_v54 = vld [vmem:[%s1374_s1 + $0x120] sm:$0xff]   ;;  %v1091_v56 = vld [vmem:[%s1374_s1 + $0x158] sm:$0xff]  }
  0x12   :  { %967 = vmatprep.subr.bf16.mxu1 %v1060_v17  ;;  %664 = vmatprep.mubr.bf16.mxu0 %v852_v36  ;;  %v1086_v51 = vld [vmem:[%s1374_s1 + $0x1a8] sm:$0xff]   ;;  %v1090_v55 = vld [vmem:[%s1374_s1 + $0x1a0] sm:$0xff]   ;;  %v1092_v57 = vld [vmem:[%s1374_s1 + $0x1d8] sm:$0xff]  }
  0x13   :  { %713 = vmatprep.mubr.bf16.mxu1 %v854_v39  ;;  %v32_v58 = vld [vmem:[%s1375_s0 + $0x40] sm:$0xff]  ;;  %v33_v61 = vld [vmem:[%s1375_s0 + $0x48] sm:$0xff]  ;;  %v1093_v1 = vld [vmem:[%s1374_s1 + $0x118] sm:$0xff]  }
  0x14   :  { %940 = vmatpush3.bf16.msra.mxu0 %v1061_v18  ;;  %v36_v59 = vld [vmem:[%s1375_s0 + $0x60] sm:$0xff]  ;;  %v37_v62 = vld [vmem:[%s1375_s0 + $0x68] sm:$0xff]  ;;  %v1094_v3 = vld [vmem:[%s1374_s1 + $0x198] sm:$0xff]  }
  0x15   :  { %968 = vmatpush3.bf16.msra.mxu1 %v1062_v19  ;;  %941 = vmatprep.subr.bf16.mxu0 %v1063_v20  ;;  %v860_v60 = vcombine.high %v32_v58, %v36_v59  ;;  %v859_v63 = vcombine.low %v32_v58, %v36_v59  ;;  %v862_v0 = vcombine.high %v33_v61, %v37_v62  ;;  %v1095_v4 = vld [vmem:[%s1374_s1 + $0x150] sm:$0xff]   ;;  %v1099_v8 = vld [vmem:[%s1374_s1 + $0x148] sm:$0xff]   ;;  %v1103_v12 = vld [vmem:[%s1374_s1 + $0x140] sm:$0xff]  }
  0x16   :  { %969 = vmatprep.subr.bf16.mxu1 %v1064_v21  ;;  %v861_v2 = vcombine.low %v33_v61, %v37_v62  ;;  %v1096_v5 = vld [vmem:[%s1374_s1 + $0x1d0] sm:$0xff]   ;;  %v1100_v9 = vld [vmem:[%s1374_s1 + $0x1c8] sm:$0xff]   ;;  %v1104_v13 = vld [vmem:[%s1374_s1 + $0x1c0] sm:$0xff]  }
  0x17   :  { %v1097_v6 = vld [vmem:[%s1374_s1 + $0x110] sm:$0xff]   ;;  %v1101_v10 = vld [vmem:[%s1374_s1 + $0x108] sm:$0xff]   ;;  %v1105_v14 = vld [vmem:[%s1374_s1 + $0x100] sm:$0xff]  }
  0x18   :  { %942 = vmatpush3.bf16.msra.mxu0 %v1065_v22  ;;  %v1098_v7 = vld [vmem:[%s1374_s1 + $0x190] sm:$0xff]   ;;  %v1102_v11 = vld [vmem:[%s1374_s1 + $0x188] sm:$0xff]   ;;  %v1106_v15 = vld [vmem:[%s1374_s1 + $0x180] sm:$0xff]  }
  0x19   :  { %970 = vmatpush3.bf16.msra.mxu1 %v1066_v23  ;;  %943 = vmatprep.subr.bf16.mxu0 %v1067_v24  ;;  %v26_v16 = vld [vmem:[%s1375_s0 + $0x10] sm:$0xff]  ;;  %v27_v18 = vld [vmem:[%s1375_s0 + $0x18] sm:$0xff] }
  0x1a   :  { %971 = vmatprep.subr.bf16.mxu1 %v1068_v25  ;;  %v30_v17 = vld [vmem:[%s1375_s0 + $0x30] sm:$0xff]  ;;  %v31_v19 = vld [vmem:[%s1375_s0 + $0x38] sm:$0xff] }
  0x1b   :  { %v855_v20 = vcombine.low %v26_v16, %v30_v17  ;;  %v856_v21 = vcombine.high %v26_v16, %v30_v17  ;;  %v857_v22 = vcombine.low %v27_v18, %v31_v19  ;;  %v858_v23 = vcombine.high %v27_v18, %v31_v19  ;;  %v34_v24 = vld [vmem:[%s1375_s0 + $0x50] sm:$0xff] }
  0x1c   :  { %944 = vmatpush3.bf16.msra.mxu0 %v1069_v26  ;;  %v38_v25 = vld [vmem:[%s1375_s0 + $0x70] sm:$0xff]  ;;  %v35_v26 = vld [vmem:[%s1375_s0 + $0x58] sm:$0xff] }
  0x1d   :  { %972 = vmatpush3.bf16.msra.mxu1 %v1070_v27  ;;  %945 = vmatprep.subr.bf16.mxu0 %v1071_v28  ;;  %v864_v27 = vcombine.high %v34_v24, %v38_v25  ;;  %v39_v28 = vld [vmem:[%s1375_s0 + $0x78] sm:$0xff] }
  0x1e   :  { %973 = vmatprep.subr.bf16.mxu1 %v1072_v29  ;;  %v866_v29 = vcombine.high %v35_v26, %v39_v28 }
  0x20   :  { %946 = vmatpush3.bf16.msra.mxu0 %v1073_v30  ;;  %v863_v30 = vcombine.low %v34_v24, %v38_v25 }
  0x21   :  { %974 = vmatpush3.bf16.msra.mxu1 %v1074_v31  ;;  %987 = vmatprep.subr.bf16.mxu0 %v1075_v40  ;;  %v865_v31 = vcombine.low %v35_v26, %v39_v28 }
  0x22   :  { %1015 = vmatprep.subr.bf16.mxu1 %v1076_v41 }
  0x23   :  { %665 = vmatmul.mubr.bf16.vlgmr.msra.gmra.mxu0 %v851_v35 }
  0x24   :  { %714 = vmatmul.mubr.bf16.vlgmr.msra.gmra.mxu1 %v853_v38  ;;  %988 = vmatpush3.bf16.msra.mxu0 %v1077_v42 }
  0x25   :  { %1016 = vmatpush3.bf16.msra.mxu1 %v1078_v43  ;;  %989 = vmatprep.subr.bf16.mxu0 %v1079_v44 }
  0x26   :  { %1017 = vmatprep.subr.bf16.mxu1 %v1080_v45  ;;  %672 = vmatprep.mubr.bf16.mxu0 %v860_v60 }
  0x27   :  { %721 = vmatprep.mubr.bf16.mxu1 %v862_v0 }
  0x28   :  { %990 = vmatpush3.bf16.msra.mxu0 %v1081_v46 }
  0x29   :  { %1018 = vmatpush3.bf16.msra.mxu1 %v1082_v47  ;;  %991 = vmatprep.subr.bf16.mxu0 %v1083_v48 }
  0x2a   :  { %1019 = vmatprep.subr.bf16.mxu1 %v1084_v49 }
  0x2b   :  { %673 = vmatmul.mubr.bf16.gmra.mxu0 %v859_v63 }
  0x2c   :  { %992 = vmatpush3.bf16.msra.mxu0 %v1085_v50  ;;  %722 = vmatmul.mubr.bf16.gmra.mxu1 %v861_v2 }
  0x2d   :  { %1020 = vmatpush3.bf16.msra.mxu1 %v1086_v51  ;;  %993 = vmatprep.subr.bf16.mxu0 %v1087_v52 }
  0x2e   :  { %1021 = vmatprep.subr.bf16.mxu1 %v1088_v53  ;;  %762 = vmatprep.mubr.bf16.mxu0 %v856_v21 }
  0x2f   :  { %811 = vmatprep.mubr.bf16.mxu1 %v858_v23 }
  0x30   :  { %994 = vmatpush3.bf16.msra.mxu0 %v1089_v54 }
  0x31   :  { %1022 = vmatpush3.bf16.msra.mxu1 %v1090_v55  ;;  %995 = vmatprep.subr.bf16.mxu0 %v1091_v56 }
  0x32   :  { %1023 = vmatprep.subr.bf16.mxu1 %v1092_v57 }
  0x34   :  { %996 = vmatpush3.bf16.msra.mxu0 %v1093_v1 }
  0x35   :  { %1024 = vmatpush3.bf16.msra.mxu1 %v1094_v3  ;;  %997 = vmatprep.subr.bf16.mxu0 %v1095_v4 }
  0x36   :  { %1025 = vmatprep.subr.bf16.mxu1 %v1096_v5 }
  0x38   :  { %998 = vmatpush3.bf16.msra.mxu0 %v1097_v6 }
  0x39   :  { %1026 = vmatpush3.bf16.msra.mxu1 %v1098_v7  ;;  %999 = vmatprep.subr.bf16.mxu0 %v1099_v8 }
  0x3a   :  { %1027 = vmatprep.subr.bf16.mxu1 %v1100_v9 }
  0x3c   :  { %1000 = vmatpush3.bf16.msra.mxu0 %v1101_v10 }
  0x3d   :  { %1028 = vmatpush3.bf16.msra.mxu1 %v1102_v11  ;;  %1001 = vmatprep.subr.bf16.mxu0 %v1103_v12 }
  0x3e   :  { %1029 = vmatprep.subr.bf16.mxu1 %v1104_v13 }
  0x40   :  { %1002 = vmatpush3.bf16.msra.mxu0 %v1105_v14 }
  0x41   :  { %1030 = vmatpush3.bf16.msra.mxu1 %v1106_v15 }
  0x43   :  { %763 = vmatmul.mubr.bf16.vlgmr.msra.gmra.mxu0 %v855_v20 }
  0x44   :  { %812 = vmatmul.mubr.bf16.vlgmr.msra.gmra.mxu1 %v857_v22  ;;  %770 = vmatprep.mubr.bf16.mxu0 %v864_v27 }
  0x45   :  { %819 = vmatprep.mubr.bf16.mxu1 %v866_v29 }
  0x4b   :  { %771 = vmatmul.mubr.bf16.gmra.mxu0 %v863_v30 }
  0x4c   :  { %820 = vmatmul.mubr.bf16.gmra.mxu1 %v865_v31 }
  0xe3   :  { %v947_v32 = vpop.f32.mrf.mxu0 }
  0xe4   :  { %v975_v33 = vpop.f32.mrf.mxu1 }
  0xe5   :  { %v948_v34 = vpop.f32.mrf.mxu0 }
  0xe6   :  { %v976_v35 = vpop.f32.mrf.mxu1  ;;  %v949_v48 = vadd.f32 %v948_v34, %v947_v32 }
  0xe7   :  { %v950_v36 = vpop.f32.mrf.mxu0  ;;  %v977_v49 = vadd.f32 %v976_v35, %v975_v33 }
  0xe8   :  { %v978_v37 = vpop.f32.mrf.mxu1 }
  0xe9   :  { %v951_v38 = vpop.f32.mrf.mxu0  ;;  %v716_v54 = vadd.f32 %v977_v49, %v949_v48 }
  0xea   :  { %v979_v39 = vpop.f32.mrf.mxu1  ;;  %v952_v55 = vadd.f32 %v951_v38, %v950_v36 }
  0xeb   :  { %v953_v40 = vpop.f32.mrf.mxu0  ;;  %v980_v56 = vadd.f32 %v979_v39, %v978_v37 }
  0xec   :  { %v981_v41 = vpop.f32.mrf.mxu1 }
  0xed   :  { %v954_v42 = vpop.f32.mrf.mxu0  ;;  %v719_v2 = vadd.f32 %v980_v56, %v952_v55 }
  0xee   :  { %v982_v43 = vpop.f32.mrf.mxu1  ;;  %v955_v62 = vadd.f32 %v954_v42, %v953_v40 }
  0xef   :  { %v956_v44 = vpop.f32.mrf.mxu0  ;;  %v983_v63 = vadd.f32 %v982_v43, %v981_v41 }
  0xf0   :  { %v984_v45 = vpop.f32.mrf.mxu1 }
  0xf1   :  { %v957_v46 = vpop.f32.mrf.mxu0  ;;  %v724_v9 = vadd.f32 %v983_v63, %v955_v62 }
  0xf2   :  { %v985_v47 = vpop.f32.mrf.mxu1  ;;  %v958_v12 = vadd.f32 %v957_v46, %v956_v44 }
  0xf3   :  { %v986_v13 = vadd.f32 %v985_v47, %v984_v45 }
  0xf5   :  { %v727_v22 = vadd.f32 %v986_v13, %v958_v12 }
 0x103   :  { %v1003_v50 = vpop.f32.mrf.mxu0 }
 0x104   :  { %v1031_v51 = vpop.f32.mrf.mxu1 }
 0x105   :  { %v1004_v52 = vpop.f32.mrf.mxu0 }
 0x106   :  { %v1032_v53 = vpop.f32.mrf.mxu1  ;;  %v1005_v57 = vadd.f32 %v1004_v52, %v1003_v50 }
 0x107   :  { %v1006_v58 = vpop.f32.mrf.mxu0  ;;  %v1033_v61 = vadd.f32 %v1032_v53, %v1031_v51 }
 0x108   :  { %v1034_v59 = vpop.f32.mrf.mxu1  ;;  %v765_v60 = vadd.f32 %v1005_v57, %v716_v54 }
 0x109   :  { %v1007_v0 = vpop.f32.mrf.mxu0 }
 0x10a   :  { %v1035_v1 = vpop.f32.mrf.mxu1  ;;  %v814_v3 = vadd.f32 %v1033_v61, %v765_v60  ;;  %v1008_v4 = vadd.f32 %v1007_v0, %v1006_v58 }
 0x10b   :  { %v1009_v5 = vpop.f32.mrf.mxu0  ;;  %v1036_v8 = vadd.f32 %v1035_v1, %v1034_v59 }
 0x10c   :  { %v1037_v6 = vpop.f32.mrf.mxu1  ;;  %843 = vst [vmem:[%s1376_s2] sm:$0xff] %v814_v3  ;;  %v768_v7 = vadd.f32 %v1008_v4, %v719_v2 }
 0x10d   :  { %v1010_v10 = vpop.f32.mrf.mxu0 }
 0x10e   :  { %v1038_v11 = vpop.f32.mrf.mxu1  ;;  %v817_v14 = vadd.f32 %v1036_v8, %v768_v7  ;;  %v1011_v15 = vadd.f32 %v1010_v10, %v1009_v5 }
 0x10f   :  { %v1012_v16 = vpop.f32.mrf.mxu0  ;;  %v1039_v19 = vadd.f32 %v1038_v11, %v1037_v6 }
 0x110   :  { %v1040_v17 = vpop.f32.mrf.mxu1  ;;  %844 = vst [vmem:[%s1376_s2 + $0x8] sm:$0xff] %v817_v14  ;;  %v773_v18 = vadd.f32 %v1011_v15, %v724_v9 }
 0x111   :  { %v1013_v20 = vpop.f32.mrf.mxu0 }
 0x112   :  { %v1041_v21 = vpop.f32.mrf.mxu1  ;;  %v822_v23 = vadd.f32 %v1039_v19, %v773_v18  ;;  %v1014_v24 = vadd.f32 %v1013_v20, %v1012_v16 }
 0x113   :  { %v1042_v26 = vadd.f32 %v1041_v21, %v1040_v17 }
 0x114   :  { %845 = vst [vmem:[%s1376_s2 + $0x10] sm:$0xff] %v822_v23  ;;  %v776_v25 = vadd.f32 %v1014_v24, %v727_v22 }
 0x116   :  { %v825_v27 = vadd.f32 %v1042_v26, %v776_v25 }
 0x118   :  { %846 = vst [vmem:[%s1376_s2 + $0x18] sm:$0xff] %v825_v27 }

// kernel: generator_forward.101
= control target key start
LH: loop header
LB: loop body
LE: loop exit
PB: predicated region body
PF: predicated region fallthrough
CT: control target
= control target key end

     0   :  { %s751_s1 = inlined_call_operand.vmem [shape: bf16[256,128], index: 1, kind: input, shape index: {}]   ;;  %s752_s0 = inlined_call_operand.vmem [shape: bf16[128,256], index: 0, kind: input, shape index: {}]   ;;  %s753_s2 = inlined_call_operand.vmem [shape: f32[128,128], index: 2, kind: output, shape index: {}]  }
   0x1   :  { %v552_v0 = vld [vmem:[%s751_s1 + $0x78] sm:$0xff]   ;;  %v554_v2 = vld [vmem:[%s751_s1 + $0x70] sm:$0xff]   ;;  %v556_v4 = vld [vmem:[%s751_s1 + $0x68] sm:$0xff]  }
   0x2   :  { %v553_v1 = vld [vmem:[%s751_s1 + $0x38] sm:$0xff]   ;;  %472 = vmatprep.subr.bf16.mxu0 %v552_v0  ;;  %536 = vmatprep.subr.bf16.mxu1 %v552_v0  ;;  %v555_v3 = vld [vmem:[%s751_s1 + $0x30] sm:$0xff]   ;;  %v557_v5 = vld [vmem:[%s751_s1 + $0x28] sm:$0xff]  }
   0x3   :  { %473 = vmatpush3.bf16.msra.mxu0 %v553_v1  ;;  %544 = vmatpush3.bf16.msra.mxu1 %v553_v1  ;;  %v558_v6 = vld [vmem:[%s751_s1 + $0x60] sm:$0xff]   ;;  %v560_v8 = vld [vmem:[%s751_s1 + $0x58] sm:$0xff]   ;;  %v562_v10 = vld [vmem:[%s751_s1 + $0x50] sm:$0xff]  }
   0x4   :  { %474 = vmatprep.subr.bf16.mxu0 %v554_v2  ;;  %537 = vmatprep.subr.bf16.mxu1 %v554_v2  ;;  %v559_v7 = vld [vmem:[%s751_s1 + $0x20] sm:$0xff]   ;;  %v561_v9 = vld [vmem:[%s751_s1 + $0x18] sm:$0xff]   ;;  %v563_v13 = vld [vmem:[%s751_s1 + $0x10] sm:$0xff]  }
   0x5   :  { %v570_v11 = vld [vmem:[%s752_s0 + $0x4] ss:$8 sps:$4 sm:$0xff]   ;;  %v568_v18 = vld [vmem:[%s752_s0] ss:$8 sps:$4 sm:$0xff]   ;;  %v574_v20 = vld [vmem:[%s752_s0 + $0x14] ss:$8 sps:$4 sm:$0xff]  }
   0x6   :  { %v573_v12 = vld [vmem:[%s752_s0 + $0x44] ss:$8 sps:$4 sm:$0xff]   ;;  %304 = vmatprep.mubr.bf16.mxu0 %v570_v11  ;;  %v571_v19 = vld [vmem:[%s752_s0 + $0x40] ss:$8 sps:$4 sm:$0xff]   ;;  %v576_v21 = vld [vmem:[%s752_s0 + $0x54] ss:$8 sps:$4 sm:$0xff]  }
   0x7   :  { %475 = vmatpush3.bf16.msra.mxu0 %v555_v3  ;;  %545 = vmatpush3.bf16.msra.mxu1 %v555_v3  ;;  %v564_v14 = vld [vmem:[%s751_s1 + $0x48] sm:$0xff]   ;;  %v566_v16 = vld [vmem:[%s751_s1 + $0x40] sm:$0xff]   ;;  %v578_v22 = vld [vmem:[%s752_s0 + $0x10] ss:$8 sps:$4 sm:$0xff]  }
   0x8   :  { %476 = vmatprep.subr.bf16.mxu0 %v556_v4  ;;  %538 = vmatprep.subr.bf16.mxu1 %v556_v4  ;;  %v565_v15 = vld [vmem:[%s751_s1 + $0x8] sm:$0xff]   ;;  %v567_v17 = vld [vmem:[%s751_s1] sm:$0xff]   ;;  %v579_v23 = vld [vmem:[%s752_s0 + $0x50] ss:$8 sps:$4 sm:$0xff]  }
   0x9   :  { %336 = vmatprep.mubr.bf16.mxu1 %v573_v12  ;;  %v580_v24 = vld [vmem:[%s752_s0 + $0x24] ss:$8 sps:$4 sm:$0xff]   ;;  %v584_v26 = vld [vmem:[%s752_s0 + $0x20] ss:$8 sps:$4 sm:$0xff]   ;;  %v586_v28 = vld [vmem:[%s752_s0 + $0x34] ss:$8 sps:$4 sm:$0xff]  }
   0xa   :  { %v582_v25 = vld [vmem:[%s752_s0 + $0x64] ss:$8 sps:$4 sm:$0xff]   ;;  %v585_v27 = vld [vmem:[%s752_s0 + $0x60] ss:$8 sps:$4 sm:$0xff]   ;;  %v588_v29 = vld [vmem:[%s752_s0 + $0x74] ss:$8 sps:$4 sm:$0xff]  }
   0xb   :  { %477 = vmatpush3.bf16.msra.mxu0 %v557_v5  ;;  %546 = vmatpush3.bf16.msra.mxu1 %v557_v5  ;;  %v590_v30 = vld [vmem:[%s752_s0 + $0x30] ss:$8 sps:$4 sm:$0xff]  }
   0xc   :  { %478 = vmatprep.subr.bf16.mxu0 %v558_v6  ;;  %539 = vmatprep.subr.bf16.mxu1 %v558_v6  ;;  %v591_v31 = vld [vmem:[%s752_s0 + $0x70] ss:$8 sps:$4 sm:$0xff]  }
   0xf   :  { %479 = vmatpush3.bf16.msra.mxu0 %v559_v7  ;;  %547 = vmatpush3.bf16.msra.mxu1 %v559_v7 }
  0x10   :  { %480 = vmatprep.subr.bf16.mxu0 %v560_v8  ;;  %540 = vmatprep.subr.bf16.mxu1 %v560_v8 }
  0x13   :  { %481 = vmatpush3.bf16.msra.mxu0 %v561_v9  ;;  %548 = vmatpush3.bf16.msra.mxu1 %v561_v9 }
  0x14   :  { %482 = vmatprep.subr.bf16.mxu0 %v562_v10  ;;  %541 = vmatprep.subr.bf16.mxu1 %v562_v10 }
  0x17   :  { %483 = vmatpush3.bf16.msra.mxu0 %v563_v13  ;;  %549 = vmatpush3.bf16.msra.mxu1 %v563_v13 }
  0x18   :  { %484 = vmatprep.subr.bf16.mxu0 %v564_v14  ;;  %542 = vmatprep.subr.bf16.mxu1 %v564_v14 }
  0x1b   :  { %485 = vmatpush3.bf16.msra.mxu0 %v565_v15  ;;  %550 = vmatpush3.bf16.msra.mxu1 %v565_v15 }
  0x1c   :  { %486 = vmatprep.subr.bf16.mxu0 %v566_v16  ;;  %543 = vmatprep.subr.bf16.mxu1 %v566_v16 }
  0x1f   :  { %487 = vmatpush3.bf16.msra.mxu0 %v567_v17  ;;  %551 = vmatpush3.bf16.msra.mxu1 %v567_v17 }
  0x22   :  { %305 = vmatmul.mubr.bf16.vlgmr.msra.gmra.mxu0 %v568_v18  ;;  %337 = vmatmul.mubr.bf16.vlgmr.msra.gmra.mxu1 %v571_v19 }
  0x23   :  { %312 = vmatprep.mubr.bf16.mxu0 %v574_v20  ;;  %344 = vmatprep.mubr.bf16.mxu1 %v576_v21 }
  0x2a   :  { %313 = vmatmul.mubr.bf16.gmra.mxu0 %v578_v22  ;;  %345 = vmatmul.mubr.bf16.gmra.mxu1 %v579_v23 }
  0x2b   :  { %320 = vmatprep.mubr.bf16.mxu0 %v580_v24  ;;  %352 = vmatprep.mubr.bf16.mxu1 %v582_v25 }
  0x32   :  { %321 = vmatmul.mubr.bf16.gmra.mxu0 %v584_v26  ;;  %353 = vmatmul.mubr.bf16.gmra.mxu1 %v585_v27 }
  0x33   :  { %328 = vmatprep.mubr.bf16.mxu0 %v586_v28  ;;  %360 = vmatprep.mubr.bf16.mxu1 %v588_v29 }
  0x3a   :  { %329 = vmatmul.mubr.bf16.gmra.mxu0 %v590_v30  ;;  %361 = vmatmul.mubr.bf16.gmra.mxu1 %v591_v31 }
  0xe2   :  { %v488_v32 = vpop.f32.mrf.mxu0  ;;  %v512_v33 = vpop.f32.mrf.mxu1 }
  0xe4   :  { %v489_v34 = vpop.f32.mrf.mxu0  ;;  %v513_v35 = vpop.f32.mrf.mxu1 }
  0xe5   :  { %v490_v36 = vadd.f32 %v489_v34, %v488_v32  ;;  %v514_v37 = vadd.f32 %v513_v35, %v512_v33 }
  0xe6   :  { %v491_v38 = vpop.f32.mrf.mxu0  ;;  %v515_v39 = vpop.f32.mrf.mxu1 }
  0xe7   :  { %420 = vst [vmem:[%s753_s2] sm:$0xff] %v490_v36  ;;  %428 = vst [vmem:[%s753_s2 + $0x40] sm:$0xff] %v514_v37 }
  0xe8   :  { %v492_v40 = vpop.f32.mrf.mxu0  ;;  %v516_v41 = vpop.f32.mrf.mxu1 }
  0xe9   :  { %v493_v42 = vadd.f32 %v492_v40, %v491_v38  ;;  %v517_v43 = vadd.f32 %v516_v41, %v515_v39 }
  0xea   :  { %v494_v44 = vpop.f32.mrf.mxu0  ;;  %v518_v45 = vpop.f32.mrf.mxu1 }
  0xeb   :  { %421 = vst [vmem:[%s753_s2 + $0x8] sm:$0xff] %v493_v42  ;;  %429 = vst [vmem:[%s753_s2 + $0x48] sm:$0xff] %v517_v43 }
  0xec   :  { %v495_v46 = vpop.f32.mrf.mxu0  ;;  %v519_v47 = vpop.f32.mrf.mxu1 }
  0xed   :  { %v496_v48 = vadd.f32 %v495_v46, %v494_v44  ;;  %v520_v49 = vadd.f32 %v519_v47, %v518_v45 }
  0xee   :  { %v497_v50 = vpop.f32.mrf.mxu0  ;;  %v521_v51 = vpop.f32.mrf.mxu1 }
  0xef   :  { %422 = vst [vmem:[%s753_s2 + $0x10] sm:$0xff] %v496_v48  ;;  %430 = vst [vmem:[%s753_s2 + $0x50] sm:$0xff] %v520_v49 }
  0xf0   :  { %v498_v52 = vpop.f32.mrf.mxu0  ;;  %v522_v53 = vpop.f32.mrf.mxu1 }
  0xf1   :  { %v499_v54 = vadd.f32 %v498_v52, %v497_v50  ;;  %v523_v55 = vadd.f32 %v522_v53, %v521_v51 }
  0xf2   :  { %v500_v56 = vpop.f32.mrf.mxu0  ;;  %v524_v57 = vpop.f32.mrf.mxu1 }
  0xf3   :  { %423 = vst [vmem:[%s753_s2 + $0x18] sm:$0xff] %v499_v54  ;;  %431 = vst [vmem:[%s753_s2 + $0x58] sm:$0xff] %v523_v55 }
  0xf4   :  { %v501_v58 = vpop.f32.mrf.mxu0  ;;  %v525_v59 = vpop.f32.mrf.mxu1 }
  0xf5   :  { %v502_v60 = vadd.f32 %v501_v58, %v500_v56  ;;  %v526_v61 = vadd.f32 %v525_v59, %v524_v57 }
  0xf6   :  { %v503_v62 = vpop.f32.mrf.mxu0  ;;  %v527_v63 = vpop.f32.mrf.mxu1 }
  0xf7   :  { %424 = vst [vmem:[%s753_s2 + $0x20] sm:$0xff] %v502_v60  ;;  %432 = vst [vmem:[%s753_s2 + $0x60] sm:$0xff] %v526_v61 }
  0xf8   :  { %v504_v0 = vpop.f32.mrf.mxu0  ;;  %v528_v1 = vpop.f32.mrf.mxu1 }
  0xf9   :  { %v505_v2 = vadd.f32 %v504_v0, %v503_v62  ;;  %v529_v3 = vadd.f32 %v528_v1, %v527_v63 }
  0xfa   :  { %v506_v4 = vpop.f32.mrf.mxu0  ;;  %v530_v5 = vpop.f32.mrf.mxu1 }
  0xfb   :  { %425 = vst [vmem:[%s753_s2 + $0x28] sm:$0xff] %v505_v2  ;;  %433 = vst [vmem:[%s753_s2 + $0x68] sm:$0xff] %v529_v3 }
  0xfc   :  { %v507_v6 = vpop.f32.mrf.mxu0  ;;  %v531_v7 = vpop.f32.mrf.mxu1 }
  0xfd   :  { %v508_v8 = vadd.f32 %v507_v6, %v506_v4  ;;  %v532_v9 = vadd.f32 %v531_v7, %v530_v5 }
  0xfe   :  { %v509_v10 = vpop.f32.mrf.mxu0  ;;  %v533_v11 = vpop.f32.mrf.mxu1 }
  0xff   :  { %426 = vst [vmem:[%s753_s2 + $0x30] sm:$0xff] %v508_v8  ;;  %434 = vst [vmem:[%s753_s2 + $0x70] sm:$0xff] %v532_v9 }
 0x100   :  { %v510_v12 = vpop.f32.mrf.mxu0  ;;  %v534_v13 = vpop.f32.mrf.mxu1 }
 0x101   :  { %v511_v14 = vadd.f32 %v510_v12, %v509_v10  ;;  %v535_v15 = vadd.f32 %v534_v13, %v533_v11 }
 0x103   :  { %427 = vst [vmem:[%s753_s2 + $0x38] sm:$0xff] %v511_v14  ;;  %435 = vst [vmem:[%s753_s2 + $0x78] sm:$0xff] %v535_v15 }

// kernel: generator_forward.100
= control target key start
LH: loop header
LB: loop body
LE: loop exit
PB: predicated region body
PF: predicated region fallthrough
CT: control target
= control target key end

     0   :  { %s551_s1 = inlined_call_operand.vmem [shape: bf16[128,128], index: 1, kind: input, shape index: {}]   ;;  %s552_s0 = inlined_call_operand.vmem [shape: bf16[128,128], index: 0, kind: input, shape index: {}]   ;;  %s553_s2 = inlined_call_operand.vmem [shape: f32[128,128], index: 2, kind: output, shape index: {}]  }
   0x1   :  { %v424_v0 = vld [vmem:[%s551_s1 + $0x38] sm:$0xff]   ;;  %v425_v1 = vld [vmem:[%s551_s1 + $0x30] sm:$0xff]   ;;  %v426_v2 = vld [vmem:[%s551_s1 + $0x28] sm:$0xff]  }
   0x2   :  { %376 = vmatprep.subr.bf16.mxu0 %v424_v0  ;;  %408 = vmatprep.subr.bf16.mxu1 %v424_v0  ;;  %v427_v3 = vld [vmem:[%s551_s1 + $0x20] sm:$0xff]   ;;  %v428_v6 = vld [vmem:[%s551_s1 + $0x18] sm:$0xff]   ;;  %v429_v7 = vld [vmem:[%s551_s1 + $0x10] sm:$0xff]  }
   0x3   :  { %377 = vmatpush3.bf16.msra.mxu0 %v424_v0  ;;  %416 = vmatpush3.bf16.msra.mxu1 %v424_v0  ;;  %v432_v4 = vld [vmem:[%s552_s0] sm:$0xff]   ;;  %v430_v8 = vld [vmem:[%s551_s1 + $0x8] sm:$0xff]   ;;  %v436_v12 = vld [vmem:[%s552_s0 + $0x10] sm:$0xff]  }
   0x4   :  { %378 = vmatprep.subr.bf16.mxu0 %v425_v1  ;;  %409 = vmatprep.subr.bf16.mxu1 %v425_v1  ;;  %v433_v5 = vld [vmem:[%s552_s0 + $0x20] sm:$0xff]   ;;  %v434_v10 = vld [vmem:[%s552_s0 + $0x8] sm:$0xff]   ;;  %v437_v13 = vld [vmem:[%s552_s0 + $0x30] sm:$0xff]  }
   0x5   :  { %392 = vmatprep.mubr.bf16.mxu0 %v432_v4  ;;  %400 = vmatprep.mubr.bf16.mxu1 %v433_v5  ;;  %v431_v9 = vld [vmem:[%s551_s1] sm:$0xff]   ;;  %v435_v11 = vld [vmem:[%s552_s0 + $0x28] sm:$0xff]   ;;  %v438_v14 = vld [vmem:[%s552_s0 + $0x18] sm:$0xff]  }
   0x6   :  { %v439_v15 = vld [vmem:[%s552_s0 + $0x38] sm:$0xff]  }
   0x7   :  { %379 = vmatpush3.bf16.msra.mxu0 %v425_v1  ;;  %417 = vmatpush3.bf16.msra.mxu1 %v425_v1 }
   0x8   :  { %380 = vmatprep.subr.bf16.mxu0 %v426_v2  ;;  %410 = vmatprep.subr.bf16.mxu1 %v426_v2 }
   0xb   :  { %381 = vmatpush3.bf16.msra.mxu0 %v426_v2  ;;  %418 = vmatpush3.bf16.msra.mxu1 %v426_v2 }
   0xc   :  { %382 = vmatprep.subr.bf16.mxu0 %v427_v3  ;;  %411 = vmatprep.subr.bf16.mxu1 %v427_v3 }
   0xf   :  { %383 = vmatpush3.bf16.msra.mxu0 %v427_v3  ;;  %419 = vmatpush3.bf16.msra.mxu1 %v427_v3 }
  0x10   :  { %384 = vmatprep.subr.bf16.mxu0 %v428_v6  ;;  %412 = vmatprep.subr.bf16.mxu1 %v428_v6 }
  0x13   :  { %385 = vmatpush3.bf16.msra.mxu0 %v428_v6  ;;  %420 = vmatpush3.bf16.msra.mxu1 %v428_v6 }
  0x14   :  { %386 = vmatprep.subr.bf16.mxu0 %v429_v7  ;;  %413 = vmatprep.subr.bf16.mxu1 %v429_v7 }
  0x17   :  { %387 = vmatpush3.bf16.msra.mxu0 %v429_v7  ;;  %421 = vmatpush3.bf16.msra.mxu1 %v429_v7 }
  0x18   :  { %388 = vmatprep.subr.bf16.mxu0 %v430_v8  ;;  %414 = vmatprep.subr.bf16.mxu1 %v430_v8 }
  0x1b   :  { %389 = vmatpush3.bf16.msra.mxu0 %v430_v8  ;;  %422 = vmatpush3.bf16.msra.mxu1 %v430_v8 }
  0x1c   :  { %390 = vmatprep.subr.bf16.mxu0 %v431_v9  ;;  %415 = vmatprep.subr.bf16.mxu1 %v431_v9 }
  0x1f   :  { %391 = vmatpush3.bf16.msra.mxu0 %v431_v9  ;;  %423 = vmatpush3.bf16.msra.mxu1 %v431_v9 }
  0x22   :  { %393 = vmatmul.mubr.bf16.vlgmr.msra.gmra.mxu0 %v434_v10  ;;  %401 = vmatmul.mubr.bf16.vlgmr.msra.gmra.mxu1 %v435_v11 }
  0x23   :  { %396 = vmatprep.mubr.bf16.mxu0 %v436_v12  ;;  %404 = vmatprep.mubr.bf16.mxu1 %v437_v13 }
  0x2a   :  { %397 = vmatmul.mubr.bf16.gmra.mxu0 %v438_v14  ;;  %405 = vmatmul.mubr.bf16.gmra.mxu1 %v439_v15 }
  0xe2   :  { %v394_v16 = vpop.f32.mrf.mxu0  ;;  %v402_v17 = vpop.f32.mrf.mxu1 }
  0xe3   :  { %326 = vst [vmem:[%s553_s2 + $0x10] sm:$0xff] %v394_v16  ;;  %334 = vst [vmem:[%s553_s2 + $0x50] sm:$0xff] %v402_v17 }
  0xe4   :  { %v210_v18 = vpop.f32.mrf.mxu0  ;;  %v242_v19 = vpop.f32.mrf.mxu1 }
  0xe5   :  { %324 = vst [vmem:[%s553_s2] sm:$0xff] %v210_v18  ;;  %332 = vst [vmem:[%s553_s2 + $0x40] sm:$0xff] %v242_v19 }
  0xe6   :  { %v395_v20 = vpop.f32.mrf.mxu0  ;;  %v403_v21 = vpop.f32.mrf.mxu1 }
  0xe7   :  { %327 = vst [vmem:[%s553_s2 + $0x18] sm:$0xff] %v395_v20  ;;  %335 = vst [vmem:[%s553_s2 + $0x58] sm:$0xff] %v403_v21 }
  0xe8   :  { %v213_v22 = vpop.f32.mrf.mxu0  ;;  %v245_v23 = vpop.f32.mrf.mxu1 }
  0xe9   :  { %325 = vst [vmem:[%s553_s2 + $0x8] sm:$0xff] %v213_v22  ;;  %333 = vst [vmem:[%s553_s2 + $0x48] sm:$0xff] %v245_v23 }
  0xea   :  { %v398_v24 = vpop.f32.mrf.mxu0  ;;  %v406_v25 = vpop.f32.mrf.mxu1 }
  0xeb   :  { %330 = vst [vmem:[%s553_s2 + $0x30] sm:$0xff] %v398_v24  ;;  %338 = vst [vmem:[%s553_s2 + $0x70] sm:$0xff] %v406_v25 }
  0xec   :  { %v226_v26 = vpop.f32.mrf.mxu0  ;;  %v258_v27 = vpop.f32.mrf.mxu1 }
  0xed   :  { %328 = vst [vmem:[%s553_s2 + $0x20] sm:$0xff] %v226_v26  ;;  %336 = vst [vmem:[%s553_s2 + $0x60] sm:$0xff] %v258_v27 }
  0xee   :  { %v399_v28 = vpop.f32.mrf.mxu0  ;;  %v407_v29 = vpop.f32.mrf.mxu1 }
  0xef   :  { %331 = vst [vmem:[%s553_s2 + $0x38] sm:$0xff] %v399_v28  ;;  %339 = vst [vmem:[%s553_s2 + $0x78] sm:$0xff] %v407_v29 }
  0xf0   :  { %v229_v30 = vpop.f32.mrf.mxu0  ;;  %v261_v31 = vpop.f32.mrf.mxu1 }
  0xf1   :  { %329 = vst [vmem:[%s553_s2 + $0x28] sm:$0xff] %v229_v30  ;;  %337 = vst [vmem:[%s553_s2 + $0x68] sm:$0xff] %v261_v31 }

// kernel: generator_forward.103
= control target key start
LH: loop header
LB: loop body
LE: loop exit
PB: predicated region body
PF: predicated region fallthrough
CT: control target
= control target key end

     0   :  { %s1288_s1 = inlined_call_operand.vmem [shape: bf16[512,128], index: 1, kind: input, shape index: {}]   ;;  %s1289_s0 = inlined_call_operand.vmem [shape: bf16[128,512], index: 0, kind: input, shape index: {}]   ;;  %s1290_s2 = inlined_call_operand.vmem [shape: f32[128,128], index: 2, kind: output, shape index: {}]  }
   0x1   :  { %v953_v0 = vld [vmem:[%s1288_s1 + $0x78] sm:$0xff]   ;;  %v957_v4 = vld [vmem:[%s1288_s1 + $0x70] sm:$0xff]   ;;  %v961_v8 = vld [vmem:[%s1288_s1 + $0x68] sm:$0xff]  }
   0x2   :  { %v954_v1 = vld [vmem:[%s1288_s1 + $0xf8] sm:$0xff]   ;;  %825 = vmatprep.subr.bf16.mxu0 %v953_v0  ;;  %v958_v5 = vld [vmem:[%s1288_s1 + $0xf0] sm:$0xff]   ;;  %v962_v9 = vld [vmem:[%s1288_s1 + $0xe8] sm:$0xff]  }
   0x3   :  { %v955_v2 = vld [vmem:[%s1288_s1 + $0x38] sm:$0xff]   ;;  %889 = vmatprep.subr.bf16.mxu1 %v954_v1  ;;  %v959_v6 = vld [vmem:[%s1288_s1 + $0x30] sm:$0xff]   ;;  %v963_v10 = vld [vmem:[%s1288_s1 + $0x28] sm:$0xff]  }
   0x4   :  { %v956_v3 = vld [vmem:[%s1288_s1 + $0xb8] sm:$0xff]   ;;  %826 = vmatpush3.bf16.msra.mxu0 %v955_v2  ;;  %v960_v7 = vld [vmem:[%s1288_s1 + $0xb0] sm:$0xff]   ;;  %v964_v11 = vld [vmem:[%s1288_s1 + $0xa8] sm:$0xff]  }
   0x5   :  { %890 = vmatpush3.bf16.msra.mxu1 %v956_v3  ;;  %827 = vmatprep.subr.bf16.mxu0 %v957_v4  ;;  %v965_v12 = vld [vmem:[%s1288_s1 + $0x60] sm:$0xff]   ;;  %v969_v16 = vld [vmem:[%s1288_s1 + $0x58] sm:$0xff]   ;;  %v973_v20 = vld [vmem:[%s1288_s1 + $0x50] sm:$0xff]  }
   0x6   :  { %891 = vmatprep.subr.bf16.mxu1 %v958_v5  ;;  %v966_v13 = vld [vmem:[%s1288_s1 + $0xe0] sm:$0xff]   ;;  %v970_v17 = vld [vmem:[%s1288_s1 + $0xd8] sm:$0xff]   ;;  %v974_v21 = vld [vmem:[%s1288_s1 + $0xd0] sm:$0xff]  }
   0x7   :  { %v967_v14 = vld [vmem:[%s1288_s1 + $0x20] sm:$0xff]   ;;  %v971_v18 = vld [vmem:[%s1288_s1 + $0x18] sm:$0xff]   ;;  %v975_v22 = vld [vmem:[%s1288_s1 + $0x10] sm:$0xff]  }
   0x8   :  { %828 = vmatpush3.bf16.msra.mxu0 %v959_v6  ;;  %v968_v15 = vld [vmem:[%s1288_s1 + $0xa0] sm:$0xff]   ;;  %v972_v19 = vld [vmem:[%s1288_s1 + $0x98] sm:$0xff]   ;;  %v976_v23 = vld [vmem:[%s1288_s1 + $0x90] sm:$0xff]  }
   0x9   :  { %892 = vmatpush3.bf16.msra.mxu1 %v960_v7  ;;  %829 = vmatprep.subr.bf16.mxu0 %v961_v8  ;;  %v977_v24 = vld [vmem:[%s1288_s1 + $0x48] sm:$0xff]   ;;  %v981_v28 = vld [vmem:[%s1288_s1 + $0x40] sm:$0xff]  }
   0xa   :  { %893 = vmatprep.subr.bf16.mxu1 %v962_v9  ;;  %v978_v25 = vld [vmem:[%s1288_s1 + $0xc8] sm:$0xff]   ;;  %v982_v29 = vld [vmem:[%s1288_s1 + $0xc0] sm:$0xff]  }
   0xb   :  { %v979_v26 = vld [vmem:[%s1288_s1 + $0x8] sm:$0xff]   ;;  %v983_v30 = vld [vmem:[%s1288_s1] sm:$0xff]  }
   0xc   :  { %830 = vmatpush3.bf16.msra.mxu0 %v963_v10  ;;  %v980_v27 = vld [vmem:[%s1288_s1 + $0x88] sm:$0xff]   ;;  %v984_v31 = vld [vmem:[%s1288_s1 + $0x80] sm:$0xff]  }
   0xd   :  { %894 = vmatpush3.bf16.msra.mxu1 %v964_v11  ;;  %831 = vmatprep.subr.bf16.mxu0 %v965_v12  ;;  %v985_v32 = vld [vmem:[%s1289_s0] ss:$16 sps:$4 sm:$0xff]   ;;  %v987_v33 = vld [vmem:[%s1289_s0 + $0x4] ss:$16 sps:$4 sm:$0xff]   ;;  %v988_v34 = vld [vmem:[%s1289_s0 + $0x8] ss:$16 sps:$4 sm:$0xff]  }
   0xe   :  { %895 = vmatprep.subr.bf16.mxu1 %v966_v13  ;;  %v990_v35 = vld [vmem:[%s1289_s0 + $0xc] ss:$16 sps:$4 sm:$0xff]   ;;  %528 = vmatprep.mubr.bf16.mxu0 %v987_v33  ;;  %v991_v36 = vld [vmem:[%s1289_s0 + $0x24] ss:$16 sps:$4 sm:$0xff]   ;;  %v995_v38 = vld [vmem:[%s1289_s0 + $0x20] ss:$16 sps:$4 sm:$0xff]  }
   0xf   :  { %625 = vmatprep.mubr.bf16.mxu1 %v990_v35  ;;  %v993_v37 = vld [vmem:[%s1289_s0 + $0x2c] ss:$16 sps:$4 sm:$0xff]   ;;  %v996_v39 = vld [vmem:[%s1289_s0 + $0x28] ss:$16 sps:$4 sm:$0xff]   ;;  %v997_v40 = vld [vmem:[%s1289_s0 + $0x44] ss:$16 sps:$4 sm:$0xff]  }
  0x10   :  { %832 = vmatpush3.bf16.msra.mxu0 %v967_v14  ;;  %v999_v41 = vld [vmem:[%s1289_s0 + $0x4c] ss:$16 sps:$4 sm:$0xff]   ;;  %v1001_v42 = vld [vmem:[%s1289_s0 + $0x40] ss:$16 sps:$4 sm:$0xff]   ;;  %v1002_v43 = vld [vmem:[%s1289_s0 + $0x48] ss:$16 sps:$4 sm:$0xff]  }
  0x11   :  { %896 = vmatpush3.bf16.msra.mxu1 %v968_v15  ;;  %833 = vmatprep.subr.bf16.mxu0 %v969_v16  ;;  %v1003_v44 = vld [vmem:[%s1289_s0 + $0x64] ss:$16 sps:$4 sm:$0xff]   ;;  %v1005_v45 = vld [vmem:[%s1289_s0 + $0x6c] ss:$16 sps:$4 sm:$0xff]   ;;  %v1007_v46 = vld [vmem:[%s1289_s0 + $0x60] ss:$16 sps:$4 sm:$0xff]  }
  0x12   :  { %897 = vmatprep.subr.bf16.mxu1 %v970_v17  ;;  %v1008_v47 = vld [vmem:[%s1289_s0 + $0x68] ss:$16 sps:$4 sm:$0xff]   ;;  %v1009_v48 = vld [vmem:[%s1289_s0 + $0x84] ss:$16 sps:$4 sm:$0xff]   ;;  %v1011_v49 = vld [vmem:[%s1289_s0 + $0x8c] ss:$16 sps:$4 sm:$0xff]  }
  0x13   :  { %v1013_v50 = vld [vmem:[%s1289_s0 + $0x80] ss:$16 sps:$4 sm:$0xff]   ;;  %v1014_v51 = vld [vmem:[%s1289_s0 + $0x88] ss:$16 sps:$4 sm:$0xff]   ;;  %v1015_v52 = vld [vmem:[%s1289_s0 + $0xa4] ss:$16 sps:$4 sm:$0xff]  }
  0x14   :  { %834 = vmatpush3.bf16.msra.mxu0 %v971_v18  ;;  %v1017_v53 = vld [vmem:[%s1289_s0 + $0xac] ss:$16 sps:$4 sm:$0xff]   ;;  %v1019_v54 = vld [vmem:[%s1289_s0 + $0xa0] ss:$16 sps:$4 sm:$0xff]   ;;  %v1020_v55 = vld [vmem:[%s1289_s0 + $0xa8] ss:$16 sps:$4 sm:$0xff]  }
  0x15   :  { %898 = vmatpush3.bf16.msra.mxu1 %v972_v19  ;;  %835 = vmatprep.subr.bf16.mxu0 %v973_v20  ;;  %v1021_v56 = vld [vmem:[%s1289_s0 + $0xc4] ss:$16 sps:$4 sm:$0xff]   ;;  %v1023_v57 = vld [vmem:[%s1289_s0 + $0xcc] ss:$16 sps:$4 sm:$0xff]   ;;  %v1025_v58 = vld [vmem:[%s1289_s0 + $0xc0] ss:$16 sps:$4 sm:$0xff]  }
  0x16   :  { %899 = vmatprep.subr.bf16.mxu1 %v974_v21  ;;  %v1026_v59 = vld [vmem:[%s1289_s0 + $0xc8] ss:$16 sps:$4 sm:$0xff]   ;;  %v1027_v60 = vld [vmem:[%s1289_s0 + $0xe4] ss:$16 sps:$4 sm:$0xff]   ;;  %v1029_v61 = vld [vmem:[%s1289_s0 + $0xec] ss:$16 sps:$4 sm:$0xff]  }
  0x17   :  { %v1031_v62 = vld [vmem:[%s1289_s0 + $0xe0] ss:$16 sps:$4 sm:$0xff]   ;;  %v1032_v63 = vld [vmem:[%s1289_s0 + $0xe8] ss:$16 sps:$4 sm:$0xff]  }
  0x18   :  { %836 = vmatpush3.bf16.msra.mxu0 %v975_v22 }
  0x19   :  { %900 = vmatpush3.bf16.msra.mxu1 %v976_v23  ;;  %837 = vmatprep.subr.bf16.mxu0 %v977_v24 }
  0x1a   :  { %901 = vmatprep.subr.bf16.mxu1 %v978_v25 }
  0x1c   :  { %838 = vmatpush3.bf16.msra.mxu0 %v979_v26 }
  0x1d   :  { %902 = vmatpush3.bf16.msra.mxu1 %v980_v27  ;;  %839 = vmatprep.subr.bf16.mxu0 %v981_v28 }
  0x1e   :  { %903 = vmatprep.subr.bf16.mxu1 %v982_v29 }
  0x20   :  { %840 = vmatpush3.bf16.msra.mxu0 %v983_v30 }
  0x21   :  { %904 = vmatpush3.bf16.msra.mxu1 %v984_v31 }
  0x23   :  { %529 = vmatmul.mubr.bf16.vlgmr.msra.gmra.mxu0 %v985_v32 }
  0x24   :  { %626 = vmatmul.mubr.bf16.vlgmr.msra.gmra.mxu1 %v988_v34  ;;  %536 = vmatprep.mubr.bf16.mxu0 %v991_v36 }
  0x25   :  { %633 = vmatprep.mubr.bf16.mxu1 %v993_v37 }
  0x2b   :  { %537 = vmatmul.mubr.bf16.gmra.mxu0 %v995_v38 }
  0x2c   :  { %634 = vmatmul.mubr.bf16.gmra.mxu1 %v996_v39  ;;  %544 = vmatprep.mubr.bf16.mxu0 %v997_v40 }
  0x2d   :  { %641 = vmatprep.mubr.bf16.mxu1 %v999_v41 }
  0x33   :  { %545 = vmatmul.mubr.bf16.gmra.mxu0 %v1001_v42 }
  0x34   :  { %642 = vmatmul.mubr.bf16.gmra.mxu1 %v1002_v43  ;;  %552 = vmatprep.mubr.bf16.mxu0 %v1003_v44 }
  0x35   :  { %649 = vmatprep.mubr.bf16.mxu1 %v1005_v45 }
  0x3b   :  { %553 = vmatmul.mubr.bf16.gmra.mxu0 %v1007_v46 }
  0x3c   :  { %650 = vmatmul.mubr.bf16.gmra.mxu1 %v1008_v47  ;;  %560 = vmatprep.mubr.bf16.mxu0 %v1009_v48 }
  0x3d   :  { %657 = vmatprep.mubr.bf16.mxu1 %v1011_v49 }
  0x43   :  { %561 = vmatmul.mubr.bf16.gmra.mxu0 %v1013_v50 }
  0x44   :  { %658 = vmatmul.mubr.bf16.gmra.mxu1 %v1014_v51  ;;  %568 = vmatprep.mubr.bf16.mxu0 %v1015_v52 }
  0x45   :  { %665 = vmatprep.mubr.bf16.mxu1 %v1017_v53 }
  0x4b   :  { %569 = vmatmul.mubr.bf16.gmra.mxu0 %v1019_v54 }
  0x4c   :  { %666 = vmatmul.mubr.bf16.gmra.mxu1 %v1020_v55  ;;  %576 = vmatprep.mubr.bf16.mxu0 %v1021_v56 }
  0x4d   :  { %673 = vmatprep.mubr.bf16.mxu1 %v1023_v57 }
  0x53   :  { %577 = vmatmul.mubr.bf16.gmra.mxu0 %v1025_v58 }
  0x54   :  { %674 = vmatmul.mubr.bf16.gmra.mxu1 %v1026_v59  ;;  %584 = vmatprep.mubr.bf16.mxu0 %v1027_v60 }
  0x55   :  { %681 = vmatprep.mubr.bf16.mxu1 %v1029_v61 }
  0x5b   :  { %585 = vmatmul.mubr.bf16.gmra.mxu0 %v1031_v62 }
  0x5c   :  { %682 = vmatmul.mubr.bf16.gmra.mxu1 %v1032_v63 }
  0xe3   :  { %v841_v0 = vpop.f32.mrf.mxu0 }
  0xe4   :  { %v905_v1 = vpop.f32.mrf.mxu1 }
  0xe5   :  { %v842_v2 = vpop.f32.mrf.mxu0 }
  0xe6   :  { %v843_v3 = vadd.f32 %v842_v2, %v841_v0  ;;  %v906_v4 = vpop.f32.mrf.mxu1 }
  0xe7   :  { %v907_v5 = vadd.f32 %v906_v4, %v905_v1  ;;  %v844_v6 = vpop.f32.mrf.mxu0 }
  0xe8   :  { %v908_v7 = vpop.f32.mrf.mxu1 }
  0xe9   :  { %v628_v8 = vadd.f32 %v907_v5, %v843_v3  ;;  %v845_v9 = vpop.f32.mrf.mxu0 }
  0xea   :  { %v846_v10 = vadd.f32 %v845_v9, %v844_v6  ;;  %v909_v11 = vpop.f32.mrf.mxu1 }
  0xeb   :  { %741 = vst [vmem:[%s1290_s2] sm:$0xff] %v628_v8  ;;  %v910_v12 = vadd.f32 %v909_v11, %v908_v7  ;;  %v847_v13 = vpop.f32.mrf.mxu0 }
  0xec   :  { %v911_v14 = vpop.f32.mrf.mxu1 }
  0xed   :  { %v631_v15 = vadd.f32 %v910_v12, %v846_v10  ;;  %v848_v16 = vpop.f32.mrf.mxu0 }
  0xee   :  { %v849_v17 = vadd.f32 %v848_v16, %v847_v13  ;;  %v912_v18 = vpop.f32.mrf.mxu1 }
  0xef   :  { %742 = vst [vmem:[%s1290_s2 + $0x8] sm:$0xff] %v631_v15  ;;  %v913_v19 = vadd.f32 %v912_v18, %v911_v14  ;;  %v850_v20 = vpop.f32.mrf.mxu0 }
  0xf0   :  { %v914_v21 = vpop.f32.mrf.mxu1 }
  0xf1   :  { %v636_v22 = vadd.f32 %v913_v19, %v849_v17  ;;  %v851_v23 = vpop.f32.mrf.mxu0 }
  0xf2   :  { %v852_v24 = vadd.f32 %v851_v23, %v850_v20  ;;  %v915_v25 = vpop.f32.mrf.mxu1 }
  0xf3   :  { %743 = vst [vmem:[%s1290_s2 + $0x10] sm:$0xff] %v636_v22  ;;  %v916_v26 = vadd.f32 %v915_v25, %v914_v21  ;;  %v853_v27 = vpop.f32.mrf.mxu0 }
  0xf4   :  { %v917_v28 = vpop.f32.mrf.mxu1 }
  0xf5   :  { %v639_v29 = vadd.f32 %v916_v26, %v852_v24  ;;  %v854_v30 = vpop.f32.mrf.mxu0 }
  0xf6   :  { %v855_v31 = vadd.f32 %v854_v30, %v853_v27  ;;  %v918_v32 = vpop.f32.mrf.mxu1 }
  0xf7   :  { %744 = vst [vmem:[%s1290_s2 + $0x18] sm:$0xff] %v639_v29  ;;  %v919_v33 = vadd.f32 %v918_v32, %v917_v28  ;;  %v856_v34 = vpop.f32.mrf.mxu0 }
  0xf8   :  { %v920_v35 = vpop.f32.mrf.mxu1 }
  0xf9   :  { %v644_v36 = vadd.f32 %v919_v33, %v855_v31  ;;  %v857_v37 = vpop.f32.mrf.mxu0 }
  0xfa   :  { %v858_v38 = vadd.f32 %v857_v37, %v856_v34  ;;  %v921_v39 = vpop.f32.mrf.mxu1 }
  0xfb   :  { %745 = vst [vmem:[%s1290_s2 + $0x20] sm:$0xff] %v644_v36  ;;  %v922_v40 = vadd.f32 %v921_v39, %v920_v35  ;;  %v859_v41 = vpop.f32.mrf.mxu0 }
  0xfc   :  { %v923_v42 = vpop.f32.mrf.mxu1 }
  0xfd   :  { %v647_v43 = vadd.f32 %v922_v40, %v858_v38  ;;  %v860_v44 = vpop.f32.mrf.mxu0 }
  0xfe   :  { %v861_v45 = vadd.f32 %v860_v44, %v859_v41  ;;  %v924_v46 = vpop.f32.mrf.mxu1 }
  0xff   :  { %746 = vst [vmem:[%s1290_s2 + $0x28] sm:$0xff] %v647_v43  ;;  %v925_v47 = vadd.f32 %v924_v46, %v923_v42  ;;  %v862_v48 = vpop.f32.mrf.mxu0 }
 0x100   :  { %v926_v49 = vpop.f32.mrf.mxu1 }
 0x101   :  { %v652_v50 = vadd.f32 %v925_v47, %v861_v45  ;;  %v863_v51 = vpop.f32.mrf.mxu0 }
 0x102   :  { %v864_v52 = vadd.f32 %v863_v51, %v862_v48  ;;  %v927_v53 = vpop.f32.mrf.mxu1 }
 0x103   :  { %747 = vst [vmem:[%s1290_s2 + $0x30] sm:$0xff] %v652_v50  ;;  %v928_v54 = vadd.f32 %v927_v53, %v926_v49  ;;  %v865_v55 = vpop.f32.mrf.mxu0 }
 0x104   :  { %v929_v56 = vpop.f32.mrf.mxu1 }
 0x105   :  { %v655_v57 = vadd.f32 %v928_v54, %v864_v52  ;;  %v866_v58 = vpop.f32.mrf.mxu0 }
 0x106   :  { %v867_v59 = vadd.f32 %v866_v58, %v865_v55  ;;  %v930_v60 = vpop.f32.mrf.mxu1 }
 0x107   :  { %748 = vst [vmem:[%s1290_s2 + $0x38] sm:$0xff] %v655_v57  ;;  %v931_v61 = vadd.f32 %v930_v60, %v929_v56  ;;  %v868_v62 = vpop.f32.mrf.mxu0 }
 0x108   :  { %v932_v63 = vpop.f32.mrf.mxu1 }
 0x109   :  { %v660_v0 = vadd.f32 %v931_v61, %v867_v59  ;;  %v869_v1 = vpop.f32.mrf.mxu0 }
 0x10a   :  { %v870_v2 = vadd.f32 %v869_v1, %v868_v62  ;;  %v933_v3 = vpop.f32.mrf.mxu1 }
 0x10b   :  { %749 = vst [vmem:[%s1290_s2 + $0x40] sm:$0xff] %v660_v0  ;;  %v934_v4 = vadd.f32 %v933_v3, %v932_v63  ;;  %v871_v5 = vpop.f32.mrf.mxu0 }
 0x10c   :  { %v935_v6 = vpop.f32.mrf.mxu1 }
 0x10d   :  { %v663_v7 = vadd.f32 %v934_v4, %v870_v2  ;;  %v872_v8 = vpop.f32.mrf.mxu0 }
 0x10e   :  { %v873_v9 = vadd.f32 %v872_v8, %v871_v5  ;;  %v936_v10 = vpop.f32.mrf.mxu1 }
 0x10f   :  { %750 = vst [vmem:[%s1290_s2 + $0x48] sm:$0xff] %v663_v7  ;;  %v937_v11 = vadd.f32 %v936_v10, %v935_v6  ;;  %v874_v12 = vpop.f32.mrf.mxu0 }
 0x110   :  { %v938_v13 = vpop.f32.mrf.mxu1 }
 0x111   :  { %v668_v14 = vadd.f32 %v937_v11, %v873_v9  ;;  %v875_v15 = vpop.f32.mrf.mxu0 }
 0x112   :  { %v876_v16 = vadd.f32 %v875_v15, %v874_v12  ;;  %v939_v17 = vpop.f32.mrf.mxu1 }
 0x113   :  { %751 = vst [vmem:[%s1290_s2 + $0x50] sm:$0xff] %v668_v14  ;;  %v940_v18 = vadd.f32 %v939_v17, %v938_v13  ;;  %v877_v19 = vpop.f32.mrf.mxu0 }
 0x114   :  { %v941_v20 = vpop.f32.mrf.mxu1 }
 0x115   :  { %v671_v21 = vadd.f32 %v940_v18, %v876_v16  ;;  %v878_v22 = vpop.f32.mrf.mxu0 }
 0x116   :  { %v879_v23 = vadd.f32 %v878_v22, %v877_v19  ;;  %v942_v24 = vpop.f32.mrf.mxu1 }
 0x117   :  { %752 = vst [vmem:[%s1290_s2 + $0x58] sm:$0xff] %v671_v21  ;;  %v943_v25 = vadd.f32 %v942_v24, %v941_v20  ;;  %v880_v26 = vpop.f32.mrf.mxu0 }
 0x118   :  { %v944_v27 = vpop.f32.mrf.mxu1 }
 0x119   :  { %v676_v28 = vadd.f32 %v943_v25, %v879_v23  ;;  %v881_v29 = vpop.f32.mrf.mxu0 }
 0x11a   :  { %v882_v30 = vadd.f32 %v881_v29, %v880_v26  ;;  %v945_v31 = vpop.f32.mrf.mxu1 }
 0x11b   :  { %753 = vst [vmem:[%s1290_s2 + $0x60] sm:$0xff] %v676_v28  ;;  %v946_v32 = vadd.f32 %v945_v31, %v944_v27  ;;  %v883_v33 = vpop.f32.mrf.mxu0 }
 0x11c   :  { %v947_v34 = vpop.f32.mrf.mxu1 }
 0x11d   :  { %v679_v35 = vadd.f32 %v946_v32, %v882_v30  ;;  %v884_v36 = vpop.f32.mrf.mxu0 }
 0x11e   :  { %v885_v37 = vadd.f32 %v884_v36, %v883_v33  ;;  %v948_v38 = vpop.f32.mrf.mxu1 }
 0x11f   :  { %754 = vst [vmem:[%s1290_s2 + $0x68] sm:$0xff] %v679_v35  ;;  %v949_v39 = vadd.f32 %v948_v38, %v947_v34  ;;  %v886_v40 = vpop.f32.mrf.mxu0 }
 0x120   :  { %v950_v41 = vpop.f32.mrf.mxu1 }
 0x121   :  { %v684_v42 = vadd.f32 %v949_v39, %v885_v37  ;;  %v887_v43 = vpop.f32.mrf.mxu0 }
 0x122   :  { %v888_v44 = vadd.f32 %v887_v43, %v886_v40  ;;  %v951_v45 = vpop.f32.mrf.mxu1 }
 0x123   :  { %755 = vst [vmem:[%s1290_s2 + $0x70] sm:$0xff] %v684_v42  ;;  %v952_v46 = vadd.f32 %v951_v45, %v950_v41 }
 0x125   :  { %v687_v47 = vadd.f32 %v952_v46, %v888_v44 }
 0x127   :  { %756 = vst [vmem:[%s1290_s2 + $0x78] sm:$0xff] %v687_v47 }

// kernel: generator_forward.105
= control target key start
LH: loop header
LB: loop body
LE: loop exit
PB: predicated region body
PF: predicated region fallthrough
CT: control target
= control target key end

     0   :  { %s7266_s12 = smov 0   ;;  %s7268_s13 = smov 0   ;;  %s9488_s0 = inlined_call_operand.vmem [shape: bf16[512,3456], index: 0, kind: input, shape index: {}]   ;;  %s9489_s1 = inlined_call_operand.vmem [shape: bf16[3456,128], index: 1, kind: input, shape index: {}]   ;;  %s9490_s2 = inlined_call_operand.vmem [shape: f32[1,128], index: 2, kind: input, shape index: {}]   ;;  %s9491_s3 = inlined_call_operand.vmem [shape: f32[512,128], index: 3, kind: output, shape index: {}]  }
   0x1   :  { %s7270_s14 = smov 0   ;;  %s7272_s15 = smov 0  }
   0x2   :  { %s7274_s16 = smov 0  }
   0x3 LB: > { %s25_s17 = sadd.s32 1, %s7238_s15  ;;  %p48_p1 = scmp.ne.s32.totalorder %s7230_s13, %s7226_s12  ;;  %s7242_s16 = sphi %s7274_s16, %s13_s16   ;;  %s7238_s15 = sphi %s7272_s15, %s9593_s15   ;;  %s7234_s14 = sphi %s7270_s14, %s9592_s14   ;;  %s7230_s13 = sphi %s7268_s13, %s9591_s13   ;;  %s7226_s12 = sphi %s7266_s12, %s9590_s12  }
   0x4   : > { %p26_p0 = scmp.ge.s32.totalorder %s25_s17, 3  ;;  %p49_p2 = scmp.eq.s32.totalorder %s7242_s16, 0 }
   0x5   : > { %s41_s19 = sadd.s32 1, %s7230_s13  ;;  %p5700_p5 = scmp.ge.s32.totalorder %s7242_s16, 3 }
   0x6   : > { %s9595_s17 = smov (%p26_p0, %s25_s17), 0  ;;  %p50_p3 = por %p49_p2, %p48_p1 }
   0x7   : > { %s37_s18 = ssub.s32 %s7238_s15, %s9595_s17  ;;  %162 = sbr.rel (%p5700_p5) target bundleno = 187 (0xbb), region = 20 }
   0x8   : > { %p39_p4 = scmp.eq.s32.totalorder %s37_s18, 0 }
   0xa   : > { %s7301_s20 = scalar_select %p39_p4, %s7230_s13, %s41_s19  }
   0xc   : > { %165 = sbr.rel (!%p50_p3) target bundleno = 187 (0xbb), region = 24  ;;  %s167_s21 = sand.u32 (%p50_p3), 1, %s7230_s13  }
   0xd   : > { %s6263_s22 = smul.u32 (%p50_p3), 36, %s7238_s15 }
   0xe   : > { %s6416_s23 = smul.u32 (%p50_p3), 2304, %s167_s21 }
   0xf   : > { %s7309_s26 = scalar_lea.vmem (%p50_p3), %s9488_s0, %s6263_s22 }
  0x10   : > { %v190_v0 = vld [vmem:[%s7309_s26] sm:$0xff] (%p50_p3)  ;;  %v192_v1 = vld [vmem:[%s7309_s26 + $0x8] sm:$0xff] (%p50_p3)  ;;  %v194_v2 = vld [vmem:[%s7309_s26 + $0x10] sm:$0xff] (%p50_p3)  ;;  %s7314_s27 = scalar_lea.vmem (%p50_p3), [#allocation3], %s6416_s23 }
  0x11   : > { %191 = vst [vmem:[%s7314_s27] sm:$0xff] %v190_v0  ;;  %193 = vst [vmem:[%s7314_s27 + $0x8] sm:$0xff] %v192_v1  ;;  %v196_v3 = vld [vmem:[%s7309_s26 + $0x18] sm:$0xff]  ;;  %v198_v4 = vld [vmem:[%s7309_s26 + $0x6c] sm:$0xff] }
  0x12   : > { %195 = vst [vmem:[%s7314_s27 + $0x10] sm:$0xff] %v194_v2  ;;  %v200_v5 = vld [vmem:[%s7309_s26 + $0x74] sm:$0xff]  ;;  %197 = vst [vmem:[%s7314_s27 + $0x18] sm:$0xff] %v196_v3  ;;  %v202_v6 = vld [vmem:[%s7309_s26 + $0x7c] sm:$0xff] }
  0x13   : > { %199 = vst [vmem:[%s7314_s27 + $0x24] sm:$0xff] %v198_v4  ;;  %201 = vst [vmem:[%s7314_s27 + $0x2c] sm:$0xff] %v200_v5  ;;  %v204_v7 = vld [vmem:[%s7309_s26 + $0x84] sm:$0xff]  ;;  %v206_v8 = vld [vmem:[%s7309_s26 + $0xd8] sm:$0xff] }
  0x14   : > { %203 = vst [vmem:[%s7314_s27 + $0x34] sm:$0xff] %v202_v6  ;;  %205 = vst [vmem:[%s7314_s27 + $0x3c] sm:$0xff] %v204_v7  ;;  %v208_v9 = vld [vmem:[%s7309_s26 + $0xe0] sm:$0xff]  ;;  %v210_v10 = vld [vmem:[%s7309_s26 + $0xe8] sm:$0xff] }
  0x15   : > { %207 = vst [vmem:[%s7314_s27 + $0x48] sm:$0xff] %v206_v8  ;;  %v212_v11 = vld [vmem:[%s7309_s26 + $0xf0] sm:$0xff]  ;;  %209 = vst [vmem:[%s7314_s27 + $0x50] sm:$0xff] %v208_v9  ;;  %v214_v12 = vld [vmem:[%s7309_s26 + $0x144] sm:$0xff] }
  0x16   : > { %211 = vst [vmem:[%s7314_s27 + $0x58] sm:$0xff] %v210_v10  ;;  %213 = vst [vmem:[%s7314_s27 + $0x60] sm:$0xff] %v212_v11  ;;  %v216_v13 = vld [vmem:[%s7309_s26 + $0x14c] sm:$0xff]  ;;  %v218_v14 = vld [vmem:[%s7309_s26 + $0x154] sm:$0xff] }
  0x17   : > { %215 = vst [vmem:[%s7314_s27 + $0x6c] sm:$0xff] %v214_v12  ;;  %217 = vst [vmem:[%s7314_s27 + $0x74] sm:$0xff] %v216_v13  ;;  %v220_v15 = vld [vmem:[%s7309_s26 + $0x15c] sm:$0xff]  ;;  %v222_v16 = vld [vmem:[%s7309_s26 + $0x1b0] sm:$0xff] }
  0x18   : > { %219 = vst [vmem:[%s7314_s27 + $0x7c] sm:$0xff] %v218_v14  ;;  %v224_v17 = vld [vmem:[%s7309_s26 + $0x1b8] sm:$0xff]  ;;  %221 = vst [vmem:[%s7314_s27 + $0x84] sm:$0xff] %v220_v15  ;;  %v226_v18 = vld [vmem:[%s7309_s26 + $0x1c0] sm:$0xff] }
  0x19   : > { %223 = vst [vmem:[%s7314_s27 + $0x90] sm:$0xff] %v222_v16  ;;  %225 = vst [vmem:[%s7314_s27 + $0x98] sm:$0xff] %v224_v17  ;;  %v228_v19 = vld [vmem:[%s7309_s26 + $0x1c8] sm:$0xff]  ;;  %v230_v20 = vld [vmem:[%s7309_s26 + $0x21c] sm:$0xff] }
  0x1a   : > { %227 = vst [vmem:[%s7314_s27 + $0xa0] sm:$0xff] %v226_v18  ;;  %229 = vst [vmem:[%s7314_s27 + $0xa8] sm:$0xff] %v228_v19  ;;  %v232_v21 = vld [vmem:[%s7309_s26 + $0x224] sm:$0xff]  ;;  %v234_v22 = vld [vmem:[%s7309_s26 + $0x22c] sm:$0xff] }
  0x1b   : > { %231 = vst [vmem:[%s7314_s27 + $0xb4] sm:$0xff] %v230_v20  ;;  %v236_v23 = vld [vmem:[%s7309_s26 + $0x234] sm:$0xff]  ;;  %233 = vst [vmem:[%s7314_s27 + $0xbc] sm:$0xff] %v232_v21  ;;  %v238_v24 = vld [vmem:[%s7309_s26 + $0x288] sm:$0xff] }
  0x1c   : > { %235 = vst [vmem:[%s7314_s27 + $0xc4] sm:$0xff] %v234_v22  ;;  %237 = vst [vmem:[%s7314_s27 + $0xcc] sm:$0xff] %v236_v23  ;;  %v240_v25 = vld [vmem:[%s7309_s26 + $0x290] sm:$0xff]  ;;  %v242_v26 = vld [vmem:[%s7309_s26 + $0x298] sm:$0xff] }
  0x1d   : > { %239 = vst [vmem:[%s7314_s27 + $0xd8] sm:$0xff] %v238_v24  ;;  %241 = vst [vmem:[%s7314_s27 + $0xe0] sm:$0xff] %v240_v25  ;;  %v244_v27 = vld [vmem:[%s7309_s26 + $0x2a0] sm:$0xff]  ;;  %v246_v28 = vld [vmem:[%s7309_s26 + $0x2f4] sm:$0xff] }
  0x1e   : > { %243 = vst [vmem:[%s7314_s27 + $0xe8] sm:$0xff] %v242_v26  ;;  %v248_v29 = vld [vmem:[%s7309_s26 + $0x2fc] sm:$0xff]  ;;  %245 = vst [vmem:[%s7314_s27 + $0xf0] sm:$0xff] %v244_v27  ;;  %v250_v30 = vld [vmem:[%s7309_s26 + $0x304] sm:$0xff] }
  0x1f   : > { %247 = vst [vmem:[%s7314_s27 + $0xfc] sm:$0xff] %v246_v28  ;;  %249 = vst [vmem:[%s7314_s27 + $0x104] sm:$0xff] %v248_v29  ;;  %v252_v31 = vld [vmem:[%s7309_s26 + $0x30c] sm:$0xff]  ;;  %v254_v32 = vld [vmem:[%s7309_s26 + $0x360] sm:$0xff] }
  0x20   : > { %251 = vst [vmem:[%s7314_s27 + $0x10c] sm:$0xff] %v250_v30  ;;  %253 = vst [vmem:[%s7314_s27 + $0x114] sm:$0xff] %v252_v31  ;;  %v256_v33 = vld [vmem:[%s7309_s26 + $0x368] sm:$0xff]  ;;  %v258_v34 = vld [vmem:[%s7309_s26 + $0x370] sm:$0xff] }
  0x21   : > { %255 = vst [vmem:[%s7314_s27 + $0x120] sm:$0xff] %v254_v32  ;;  %v260_v35 = vld [vmem:[%s7309_s26 + $0x378] sm:$0xff]  ;;  %257 = vst [vmem:[%s7314_s27 + $0x128] sm:$0xff] %v256_v33  ;;  %v262_v36 = vld [vmem:[%s7309_s26 + $0x3cc] sm:$0xff] }
  0x22   : > { %259 = vst [vmem:[%s7314_s27 + $0x130] sm:$0xff] %v258_v34  ;;  %261 = vst [vmem:[%s7314_s27 + $0x138] sm:$0xff] %v260_v35  ;;  %v264_v37 = vld [vmem:[%s7309_s26 + $0x3d4] sm:$0xff]  ;;  %v266_v38 = vld [vmem:[%s7309_s26 + $0x3dc] sm:$0xff] }
  0x23   : > { %263 = vst [vmem:[%s7314_s27 + $0x144] sm:$0xff] %v262_v36  ;;  %265 = vst [vmem:[%s7314_s27 + $0x14c] sm:$0xff] %v264_v37  ;;  %v268_v39 = vld [vmem:[%s7309_s26 + $0x3e4] sm:$0xff]  ;;  %v270_v40 = vld [vmem:[%s7309_s26 + $0x438] sm:$0xff] }
  0x24   : > { %267 = vst [vmem:[%s7314_s27 + $0x154] sm:$0xff] %v266_v38  ;;  %v272_v41 = vld [vmem:[%s7309_s26 + $0x440] sm:$0xff]  ;;  %269 = vst [vmem:[%s7314_s27 + $0x15c] sm:$0xff] %v268_v39  ;;  %v274_v42 = vld [vmem:[%s7309_s26 + $0x448] sm:$0xff] }
  0x25   : > { %271 = vst [vmem:[%s7314_s27 + $0x168] sm:$0xff] %v270_v40  ;;  %273 = vst [vmem:[%s7314_s27 + $0x170] sm:$0xff] %v272_v41  ;;  %v276_v43 = vld [vmem:[%s7309_s26 + $0x450] sm:$0xff]  ;;  %v278_v44 = vld [vmem:[%s7309_s26 + $0x4a4] sm:$0xff] }
  0x26   : > { %275 = vst [vmem:[%s7314_s27 + $0x178] sm:$0xff] %v274_v42  ;;  %277 = vst [vmem:[%s7314_s27 + $0x180] sm:$0xff] %v276_v43  ;;  %v280_v45 = vld [vmem:[%s7309_s26 + $0x4ac] sm:$0xff]  ;;  %v282_v46 = vld [vmem:[%s7309_s26 + $0x4b4] sm:$0xff] }
  0x27   : > { %279 = vst [vmem:[%s7314_s27 + $0x18c] sm:$0xff] %v278_v44  ;;  %v284_v47 = vld [vmem:[%s7309_s26 + $0x4bc] sm:$0xff]  ;;  %281 = vst [vmem:[%s7314_s27 + $0x194] sm:$0xff] %v280_v45  ;;  %v286_v48 = vld [vmem:[%s7309_s26 + $0x510] sm:$0xff] }
  0x28   : > { %283 = vst [vmem:[%s7314_s27 + $0x19c] sm:$0xff] %v282_v46  ;;  %285 = vst [vmem:[%s7314_s27 + $0x1a4] sm:$0xff] %v284_v47  ;;  %v288_v49 = vld [vmem:[%s7309_s26 + $0x518] sm:$0xff]  ;;  %v290_v50 = vld [vmem:[%s7309_s26 + $0x520] sm:$0xff] }
  0x29   : > { %287 = vst [vmem:[%s7314_s27 + $0x1b0] sm:$0xff] %v286_v48  ;;  %289 = vst [vmem:[%s7314_s27 + $0x1b8] sm:$0xff] %v288_v49  ;;  %v292_v51 = vld [vmem:[%s7309_s26 + $0x528] sm:$0xff]  ;;  %v294_v52 = vld [vmem:[%s7309_s26 + $0x57c] sm:$0xff] }
  0x2a   : > { %291 = vst [vmem:[%s7314_s27 + $0x1c0] sm:$0xff] %v290_v50  ;;  %v296_v53 = vld [vmem:[%s7309_s26 + $0x584] sm:$0xff]  ;;  %293 = vst [vmem:[%s7314_s27 + $0x1c8] sm:$0xff] %v292_v51  ;;  %v298_v54 = vld [vmem:[%s7309_s26 + $0x58c] sm:$0xff] }
  0x2b   : > { %295 = vst [vmem:[%s7314_s27 + $0x1d4] sm:$0xff] %v294_v52  ;;  %297 = vst [vmem:[%s7314_s27 + $0x1dc] sm:$0xff] %v296_v53  ;;  %v300_v55 = vld [vmem:[%s7309_s26 + $0x594] sm:$0xff]  ;;  %v302_v56 = vld [vmem:[%s7309_s26 + $0x5e8] sm:$0xff] }
  0x2c   : > { %299 = vst [vmem:[%s7314_s27 + $0x1e4] sm:$0xff] %v298_v54  ;;  %301 = vst [vmem:[%s7314_s27 + $0x1ec] sm:$0xff] %v300_v55  ;;  %v304_v57 = vld [vmem:[%s7309_s26 + $0x5f0] sm:$0xff]  ;;  %v306_v58 = vld [vmem:[%s7309_s26 + $0x5f8] sm:$0xff] }
  0x2d   : > { %303 = vst [vmem:[%s7314_s27 + $0x1f8] sm:$0xff] %v302_v56  ;;  %v308_v59 = vld [vmem:[%s7309_s26 + $0x600] sm:$0xff]  ;;  %305 = vst [vmem:[%s7314_s27 + $0x200] sm:$0xff] %v304_v57  ;;  %v310_v60 = vld [vmem:[%s7309_s26 + $0x654] sm:$0xff] }
  0x2e   : > { %307 = vst [vmem:[%s7314_s27 + $0x208] sm:$0xff] %v306_v58  ;;  %309 = vst [vmem:[%s7314_s27 + $0x210] sm:$0xff] %v308_v59  ;;  %v312_v61 = vld [vmem:[%s7309_s26 + $0x65c] sm:$0xff]  ;;  %v314_v62 = vld [vmem:[%s7309_s26 + $0x664] sm:$0xff] }
  0x2f   : > { %311 = vst [vmem:[%s7314_s27 + $0x21c] sm:$0xff] %v310_v60  ;;  %313 = vst [vmem:[%s7314_s27 + $0x224] sm:$0xff] %v312_v61  ;;  %v316_v63 = vld [vmem:[%s7309_s26 + $0x66c] sm:$0xff]  ;;  %v318_v0 = vld [vmem:[%s7309_s26 + $0x6c0] sm:$0xff] }
  0x30   : > { %315 = vst [vmem:[%s7314_s27 + $0x22c] sm:$0xff] %v314_v62  ;;  %v320_v1 = vld [vmem:[%s7309_s26 + $0x6c8] sm:$0xff]  ;;  %317 = vst [vmem:[%s7314_s27 + $0x234] sm:$0xff] %v316_v63  ;;  %v322_v2 = vld [vmem:[%s7309_s26 + $0x6d0] sm:$0xff] }
  0x31   : > { %319 = vst [vmem:[%s7314_s27 + $0x240] sm:$0xff] %v318_v0  ;;  %321 = vst [vmem:[%s7314_s27 + $0x248] sm:$0xff] %v320_v1  ;;  %v324_v3 = vld [vmem:[%s7309_s26 + $0x6d8] sm:$0xff]  ;;  %v326_v4 = vld [vmem:[%s7309_s26 + $0x72c] sm:$0xff] }
  0x32   : > { %323 = vst [vmem:[%s7314_s27 + $0x250] sm:$0xff] %v322_v2  ;;  %325 = vst [vmem:[%s7314_s27 + $0x258] sm:$0xff] %v324_v3  ;;  %v328_v5 = vld [vmem:[%s7309_s26 + $0x734] sm:$0xff]  ;;  %v330_v6 = vld [vmem:[%s7309_s26 + $0x73c] sm:$0xff] }
  0x33   : > { %327 = vst [vmem:[%s7314_s27 + $0x264] sm:$0xff] %v326_v4  ;;  %v332_v7 = vld [vmem:[%s7309_s26 + $0x744] sm:$0xff]  ;;  %329 = vst [vmem:[%s7314_s27 + $0x26c] sm:$0xff] %v328_v5  ;;  %v334_v8 = vld [vmem:[%s7309_s26 + $0x798] sm:$0xff] }
  0x34   : > { %331 = vst [vmem:[%s7314_s27 + $0x274] sm:$0xff] %v330_v6  ;;  %333 = vst [vmem:[%s7314_s27 + $0x27c] sm:$0xff] %v332_v7  ;;  %v336_v9 = vld [vmem:[%s7309_s26 + $0x7a0] sm:$0xff]  ;;  %v338_v10 = vld [vmem:[%s7309_s26 + $0x7a8] sm:$0xff] }
  0x35   : > { %335 = vst [vmem:[%s7314_s27 + $0x288] sm:$0xff] %v334_v8  ;;  %337 = vst [vmem:[%s7314_s27 + $0x290] sm:$0xff] %v336_v9  ;;  %v340_v11 = vld [vmem:[%s7309_s26 + $0x7b0] sm:$0xff]  ;;  %v342_v12 = vld [vmem:[%s7309_s26 + $0x804] sm:$0xff] }
  0x36   : > { %339 = vst [vmem:[%s7314_s27 + $0x298] sm:$0xff] %v338_v10  ;;  %v344_v13 = vld [vmem:[%s7309_s26 + $0x80c] sm:$0xff]  ;;  %341 = vst [vmem:[%s7314_s27 + $0x2a0] sm:$0xff] %v340_v11  ;;  %v346_v14 = vld [vmem:[%s7309_s26 + $0x814] sm:$0xff] }
  0x37   : > { %343 = vst [vmem:[%s7314_s27 + $0x2ac] sm:$0xff] %v342_v12  ;;  %345 = vst [vmem:[%s7314_s27 + $0x2b4] sm:$0xff] %v344_v13  ;;  %v348_v15 = vld [vmem:[%s7309_s26 + $0x81c] sm:$0xff]  ;;  %v350_v16 = vld [vmem:[%s7309_s26 + $0x870] sm:$0xff] }
  0x38   : > { %347 = vst [vmem:[%s7314_s27 + $0x2bc] sm:$0xff] %v346_v14  ;;  %349 = vst [vmem:[%s7314_s27 + $0x2c4] sm:$0xff] %v348_v15  ;;  %v352_v17 = vld [vmem:[%s7309_s26 + $0x878] sm:$0xff]  ;;  %v354_v18 = vld [vmem:[%s7309_s26 + $0x880] sm:$0xff] }
  0x39   : > { %351 = vst [vmem:[%s7314_s27 + $0x2d0] sm:$0xff] %v350_v16  ;;  %v356_v19 = vld [vmem:[%s7309_s26 + $0x888] sm:$0xff]  ;;  %353 = vst [vmem:[%s7314_s27 + $0x2d8] sm:$0xff] %v352_v17  ;;  %v358_v20 = vld [vmem:[%s7309_s26 + $0x8dc] sm:$0xff] }
  0x3a   : > { %355 = vst [vmem:[%s7314_s27 + $0x2e0] sm:$0xff] %v354_v18  ;;  %357 = vst [vmem:[%s7314_s27 + $0x2e8] sm:$0xff] %v356_v19  ;;  %v360_v21 = vld [vmem:[%s7309_s26 + $0x8e4] sm:$0xff]  ;;  %v362_v22 = vld [vmem:[%s7309_s26 + $0x8ec] sm:$0xff] }
  0x3b   : > { %359 = vst [vmem:[%s7314_s27 + $0x2f4] sm:$0xff] %v358_v20  ;;  %361 = vst [vmem:[%s7314_s27 + $0x2fc] sm:$0xff] %v360_v21  ;;  %v364_v23 = vld [vmem:[%s7309_s26 + $0x8f4] sm:$0xff]  ;;  %v366_v24 = vld [vmem:[%s7309_s26 + $0x948] sm:$0xff] }
  0x3c   : > { %363 = vst [vmem:[%s7314_s27 + $0x304] sm:$0xff] %v362_v22  ;;  %v368_v25 = vld [vmem:[%s7309_s26 + $0x950] sm:$0xff]  ;;  %365 = vst [vmem:[%s7314_s27 + $0x30c] sm:$0xff] %v364_v23  ;;  %v370_v26 = vld [vmem:[%s7309_s26 + $0x958] sm:$0xff] }
  0x3d   : > { %367 = vst [vmem:[%s7314_s27 + $0x318] sm:$0xff] %v366_v24  ;;  %369 = vst [vmem:[%s7314_s27 + $0x320] sm:$0xff] %v368_v25  ;;  %v372_v27 = vld [vmem:[%s7309_s26 + $0x960] sm:$0xff]  ;;  %v374_v28 = vld [vmem:[%s7309_s26 + $0x9b4] sm:$0xff] }
  0x3e   : > { %371 = vst [vmem:[%s7314_s27 + $0x328] sm:$0xff] %v370_v26  ;;  %373 = vst [vmem:[%s7314_s27 + $0x330] sm:$0xff] %v372_v27  ;;  %v376_v29 = vld [vmem:[%s7309_s26 + $0x9bc] sm:$0xff]  ;;  %v378_v30 = vld [vmem:[%s7309_s26 + $0x9c4] sm:$0xff] }
  0x3f   : > { %375 = vst [vmem:[%s7314_s27 + $0x33c] sm:$0xff] %v374_v28  ;;  %v380_v31 = vld [vmem:[%s7309_s26 + $0x9cc] sm:$0xff]  ;;  %377 = vst [vmem:[%s7314_s27 + $0x344] sm:$0xff] %v376_v29  ;;  %v382_v32 = vld [vmem:[%s7309_s26 + $0xa20] sm:$0xff] }
  0x40   : > { %379 = vst [vmem:[%s7314_s27 + $0x34c] sm:$0xff] %v378_v30  ;;  %381 = vst [vmem:[%s7314_s27 + $0x354] sm:$0xff] %v380_v31  ;;  %v384_v33 = vld [vmem:[%s7309_s26 + $0xa28] sm:$0xff]  ;;  %v386_v34 = vld [vmem:[%s7309_s26 + $0xa30] sm:$0xff] }
  0x41   : > { %383 = vst [vmem:[%s7314_s27 + $0x360] sm:$0xff] %v382_v32  ;;  %385 = vst [vmem:[%s7314_s27 + $0x368] sm:$0xff] %v384_v33  ;;  %v388_v35 = vld [vmem:[%s7309_s26 + $0xa38] sm:$0xff]  ;;  %v390_v36 = vld [vmem:[%s7309_s26 + $0xa8c] sm:$0xff] }
  0x42   : > { %387 = vst [vmem:[%s7314_s27 + $0x370] sm:$0xff] %v386_v34  ;;  %v392_v37 = vld [vmem:[%s7309_s26 + $0xa94] sm:$0xff]  ;;  %389 = vst [vmem:[%s7314_s27 + $0x378] sm:$0xff] %v388_v35  ;;  %v394_v38 = vld [vmem:[%s7309_s26 + $0xa9c] sm:$0xff] }
  0x43   : > { %391 = vst [vmem:[%s7314_s27 + $0x384] sm:$0xff] %v390_v36  ;;  %393 = vst [vmem:[%s7314_s27 + $0x38c] sm:$0xff] %v392_v37  ;;  %v396_v39 = vld [vmem:[%s7309_s26 + $0xaa4] sm:$0xff]  ;;  %v398_v40 = vld [vmem:[%s7309_s26 + $0xaf8] sm:$0xff] }
  0x44   : > { %395 = vst [vmem:[%s7314_s27 + $0x394] sm:$0xff] %v394_v38  ;;  %397 = vst [vmem:[%s7314_s27 + $0x39c] sm:$0xff] %v396_v39  ;;  %v400_v41 = vld [vmem:[%s7309_s26 + $0xb00] sm:$0xff]  ;;  %v402_v42 = vld [vmem:[%s7309_s26 + $0xb08] sm:$0xff] }
  0x45   : > { %399 = vst [vmem:[%s7314_s27 + $0x3a8] sm:$0xff] %v398_v40  ;;  %v404_v43 = vld [vmem:[%s7309_s26 + $0xb10] sm:$0xff]  ;;  %401 = vst [vmem:[%s7314_s27 + $0x3b0] sm:$0xff] %v400_v41  ;;  %v406_v44 = vld [vmem:[%s7309_s26 + $0xb64] sm:$0xff] }
  0x46   : > { %403 = vst [vmem:[%s7314_s27 + $0x3b8] sm:$0xff] %v402_v42  ;;  %405 = vst [vmem:[%s7314_s27 + $0x3c0] sm:$0xff] %v404_v43  ;;  %v408_v45 = vld [vmem:[%s7309_s26 + $0xb6c] sm:$0xff]  ;;  %v410_v46 = vld [vmem:[%s7309_s26 + $0xb74] sm:$0xff] }
  0x47   : > { %407 = vst [vmem:[%s7314_s27 + $0x3cc] sm:$0xff] %v406_v44  ;;  %409 = vst [vmem:[%s7314_s27 + $0x3d4] sm:$0xff] %v408_v45  ;;  %v412_v47 = vld [vmem:[%s7309_s26 + $0xb7c] sm:$0xff]  ;;  %v414_v48 = vld [vmem:[%s7309_s26 + $0xbd0] sm:$0xff] }
  0x48   : > { %411 = vst [vmem:[%s7314_s27 + $0x3dc] sm:$0xff] %v410_v46  ;;  %v416_v49 = vld [vmem:[%s7309_s26 + $0xbd8] sm:$0xff]  ;;  %413 = vst [vmem:[%s7314_s27 + $0x3e4] sm:$0xff] %v412_v47  ;;  %v418_v50 = vld [vmem:[%s7309_s26 + $0xbe0] sm:$0xff] }
  0x49   : > { %415 = vst [vmem:[%s7314_s27 + $0x3f0] sm:$0xff] %v414_v48  ;;  %417 = vst [vmem:[%s7314_s27 + $0x3f8] sm:$0xff] %v416_v49  ;;  %v420_v51 = vld [vmem:[%s7309_s26 + $0xbe8] sm:$0xff]  ;;  %v422_v52 = vld [vmem:[%s7309_s26 + $0xc3c] sm:$0xff] }
  0x4a   : > { %419 = vst [vmem:[%s7314_s27 + $0x400] sm:$0xff] %v418_v50  ;;  %421 = vst [vmem:[%s7314_s27 + $0x408] sm:$0xff] %v420_v51  ;;  %v424_v53 = vld [vmem:[%s7309_s26 + $0xc44] sm:$0xff]  ;;  %v426_v54 = vld [vmem:[%s7309_s26 + $0xc4c] sm:$0xff] }
  0x4b   : > { %423 = vst [vmem:[%s7314_s27 + $0x414] sm:$0xff] %v422_v52  ;;  %v428_v55 = vld [vmem:[%s7309_s26 + $0xc54] sm:$0xff]  ;;  %425 = vst [vmem:[%s7314_s27 + $0x41c] sm:$0xff] %v424_v53  ;;  %v430_v56 = vld [vmem:[%s7309_s26 + $0xca8] sm:$0xff] }
  0x4c   : > { %427 = vst [vmem:[%s7314_s27 + $0x424] sm:$0xff] %v426_v54  ;;  %429 = vst [vmem:[%s7314_s27 + $0x42c] sm:$0xff] %v428_v55  ;;  %v432_v57 = vld [vmem:[%s7309_s26 + $0xcb0] sm:$0xff]  ;;  %v434_v58 = vld [vmem:[%s7309_s26 + $0xcb8] sm:$0xff] }
  0x4d   : > { %431 = vst [vmem:[%s7314_s27 + $0x438] sm:$0xff] %v430_v56  ;;  %433 = vst [vmem:[%s7314_s27 + $0x440] sm:$0xff] %v432_v57  ;;  %v436_v59 = vld [vmem:[%s7309_s26 + $0xcc0] sm:$0xff]  ;;  %v438_v60 = vld [vmem:[%s7309_s26 + $0xd14] sm:$0xff] }
  0x4e   : > { %435 = vst [vmem:[%s7314_s27 + $0x448] sm:$0xff] %v434_v58  ;;  %v440_v61 = vld [vmem:[%s7309_s26 + $0xd1c] sm:$0xff]  ;;  %437 = vst [vmem:[%s7314_s27 + $0x450] sm:$0xff] %v436_v59  ;;  %v442_v62 = vld [vmem:[%s7309_s26 + $0xd24] sm:$0xff] }
  0x4f   : > { %439 = vst [vmem:[%s7314_s27 + $0x45c] sm:$0xff] %v438_v60  ;;  %441 = vst [vmem:[%s7314_s27 + $0x464] sm:$0xff] %v440_v61  ;;  %v444_v63 = vld [vmem:[%s7309_s26 + $0xd2c] sm:$0xff]  ;;  %v446_v0 = vld [vmem:[%s7309_s26 + $0xd80] sm:$0xff] }
  0x50   : > { %443 = vst [vmem:[%s7314_s27 + $0x46c] sm:$0xff] %v442_v62  ;;  %445 = vst [vmem:[%s7314_s27 + $0x474] sm:$0xff] %v444_v63  ;;  %v448_v1 = vld [vmem:[%s7309_s26 + $0xd88] sm:$0xff]  ;;  %v450_v2 = vld [vmem:[%s7309_s26 + $0xd90] sm:$0xff] }
  0x51   : > { %447 = vst [vmem:[%s7314_s27 + $0x480] sm:$0xff] %v446_v0  ;;  %v452_v3 = vld [vmem:[%s7309_s26 + $0xd98] sm:$0xff]  ;;  %449 = vst [vmem:[%s7314_s27 + $0x488] sm:$0xff] %v448_v1  ;;  %v454_v4 = vld [vmem:[%s7309_s26 + $0xdec] sm:$0xff] }
  0x52   : > { %451 = vst [vmem:[%s7314_s27 + $0x490] sm:$0xff] %v450_v2  ;;  %453 = vst [vmem:[%s7314_s27 + $0x498] sm:$0xff] %v452_v3  ;;  %v456_v5 = vld [vmem:[%s7309_s26 + $0xdf4] sm:$0xff]  ;;  %v458_v6 = vld [vmem:[%s7309_s26 + $0xdfc] sm:$0xff] }
  0x53   : > { %455 = vst [vmem:[%s7314_s27 + $0x4a4] sm:$0xff] %v454_v4  ;;  %457 = vst [vmem:[%s7314_s27 + $0x4ac] sm:$0xff] %v456_v5  ;;  %v460_v7 = vld [vmem:[%s7309_s26 + $0xe04] sm:$0xff]  ;;  %v462_v8 = vld [vmem:[%s7309_s26 + $0xe58] sm:$0xff] }
  0x54   : > { %459 = vst [vmem:[%s7314_s27 + $0x4b4] sm:$0xff] %v458_v6  ;;  %v464_v9 = vld [vmem:[%s7309_s26 + $0xe60] sm:$0xff]  ;;  %461 = vst [vmem:[%s7314_s27 + $0x4bc] sm:$0xff] %v460_v7  ;;  %v466_v10 = vld [vmem:[%s7309_s26 + $0xe68] sm:$0xff] }
  0x55   : > { %463 = vst [vmem:[%s7314_s27 + $0x4c8] sm:$0xff] %v462_v8  ;;  %465 = vst [vmem:[%s7314_s27 + $0x4d0] sm:$0xff] %v464_v9  ;;  %v468_v11 = vld [vmem:[%s7309_s26 + $0xe70] sm:$0xff]  ;;  %v470_v12 = vld [vmem:[%s7309_s26 + $0xec4] sm:$0xff] }
  0x56   : > { %467 = vst [vmem:[%s7314_s27 + $0x4d8] sm:$0xff] %v466_v10  ;;  %469 = vst [vmem:[%s7314_s27 + $0x4e0] sm:$0xff] %v468_v11  ;;  %v472_v13 = vld [vmem:[%s7309_s26 + $0xecc] sm:$0xff]  ;;  %v474_v14 = vld [vmem:[%s7309_s26 + $0xed4] sm:$0xff] }
  0x57   : > { %471 = vst [vmem:[%s7314_s27 + $0x4ec] sm:$0xff] %v470_v12  ;;  %v476_v15 = vld [vmem:[%s7309_s26 + $0xedc] sm:$0xff]  ;;  %473 = vst [vmem:[%s7314_s27 + $0x4f4] sm:$0xff] %v472_v13  ;;  %v478_v16 = vld [vmem:[%s7309_s26 + $0xf30] sm:$0xff] }
  0x58   : > { %475 = vst [vmem:[%s7314_s27 + $0x4fc] sm:$0xff] %v474_v14  ;;  %477 = vst [vmem:[%s7314_s27 + $0x504] sm:$0xff] %v476_v15  ;;  %v480_v17 = vld [vmem:[%s7309_s26 + $0xf38] sm:$0xff]  ;;  %v482_v18 = vld [vmem:[%s7309_s26 + $0xf40] sm:$0xff] }
  0x59   : > { %479 = vst [vmem:[%s7314_s27 + $0x510] sm:$0xff] %v478_v16  ;;  %481 = vst [vmem:[%s7314_s27 + $0x518] sm:$0xff] %v480_v17  ;;  %v484_v19 = vld [vmem:[%s7309_s26 + $0xf48] sm:$0xff]  ;;  %v486_v20 = vld [vmem:[%s7309_s26 + $0xf9c] sm:$0xff] }
  0x5a   : > { %483 = vst [vmem:[%s7314_s27 + $0x520] sm:$0xff] %v482_v18  ;;  %v488_v21 = vld [vmem:[%s7309_s26 + $0xfa4] sm:$0xff]  ;;  %485 = vst [vmem:[%s7314_s27 + $0x528] sm:$0xff] %v484_v19  ;;  %v490_v22 = vld [vmem:[%s7309_s26 + $0xfac] sm:$0xff] }
  0x5b   : > { %487 = vst [vmem:[%s7314_s27 + $0x534] sm:$0xff] %v486_v20  ;;  %489 = vst [vmem:[%s7314_s27 + $0x53c] sm:$0xff] %v488_v21  ;;  %v492_v23 = vld [vmem:[%s7309_s26 + $0xfb4] sm:$0xff]  ;;  %v494_v24 = vld [vmem:[%s7309_s26 + $0x1008] sm:$0xff] }
  0x5c   : > { %491 = vst [vmem:[%s7314_s27 + $0x544] sm:$0xff] %v490_v22  ;;  %493 = vst [vmem:[%s7314_s27 + $0x54c] sm:$0xff] %v492_v23  ;;  %v496_v25 = vld [vmem:[%s7309_s26 + $0x1010] sm:$0xff]  ;;  %v498_v26 = vld [vmem:[%s7309_s26 + $0x1018] sm:$0xff] }
  0x5d   : > { %495 = vst [vmem:[%s7314_s27 + $0x558] sm:$0xff] %v494_v24  ;;  %v500_v27 = vld [vmem:[%s7309_s26 + $0x1020] sm:$0xff]  ;;  %497 = vst [vmem:[%s7314_s27 + $0x560] sm:$0xff] %v496_v25  ;;  %v502_v28 = vld [vmem:[%s7309_s26 + $0x1074] sm:$0xff] }
  0x5e   : > { %499 = vst [vmem:[%s7314_s27 + $0x568] sm:$0xff] %v498_v26  ;;  %501 = vst [vmem:[%s7314_s27 + $0x570] sm:$0xff] %v500_v27  ;;  %v504_v29 = vld [vmem:[%s7309_s26 + $0x107c] sm:$0xff]  ;;  %v506_v30 = vld [vmem:[%s7309_s26 + $0x1084] sm:$0xff] }
  0x5f   : > { %503 = vst [vmem:[%s7314_s27 + $0x57c] sm:$0xff] %v502_v28  ;;  %505 = vst [vmem:[%s7314_s27 + $0x584] sm:$0xff] %v504_v29  ;;  %v508_v31 = vld [vmem:[%s7309_s26 + $0x108c] sm:$0xff]  ;;  %v510_v32 = vld [vmem:[%s7309_s26 + $0x10e0] sm:$0xff] }
  0x60   : > { %507 = vst [vmem:[%s7314_s27 + $0x58c] sm:$0xff] %v506_v30  ;;  %v512_v33 = vld [vmem:[%s7309_s26 + $0x10e8] sm:$0xff]  ;;  %509 = vst [vmem:[%s7314_s27 + $0x594] sm:$0xff] %v508_v31  ;;  %v514_v34 = vld [vmem:[%s7309_s26 + $0x10f0] sm:$0xff] }
  0x61   : > { %511 = vst [vmem:[%s7314_s27 + $0x5a0] sm:$0xff] %v510_v32  ;;  %513 = vst [vmem:[%s7314_s27 + $0x5a8] sm:$0xff] %v512_v33  ;;  %v516_v35 = vld [vmem:[%s7309_s26 + $0x10f8] sm:$0xff]  ;;  %v518_v36 = vld [vmem:[%s7309_s26 + $0x114c] sm:$0xff] }
  0x62   : > { %515 = vst [vmem:[%s7314_s27 + $0x5b0] sm:$0xff] %v514_v34  ;;  %517 = vst [vmem:[%s7314_s27 + $0x5b8] sm:$0xff] %v516_v35  ;;  %v520_v37 = vld [vmem:[%s7309_s26 + $0x1154] sm:$0xff]  ;;  %v522_v38 = vld [vmem:[%s7309_s26 + $0x115c] sm:$0xff] }
  0x63   : > { %519 = vst [vmem:[%s7314_s27 + $0x5c4] sm:$0xff] %v518_v36  ;;  %v524_v39 = vld [vmem:[%s7309_s26 + $0x1164] sm:$0xff]  ;;  %521 = vst [vmem:[%s7314_s27 + $0x5cc] sm:$0xff] %v520_v37  ;;  %v526_v40 = vld [vmem:[%s7309_s26 + $0x11b8] sm:$0xff] }
  0x64   : > { %523 = vst [vmem:[%s7314_s27 + $0x5d4] sm:$0xff] %v522_v38  ;;  %525 = vst [vmem:[%s7314_s27 + $0x5dc] sm:$0xff] %v524_v39  ;;  %v528_v41 = vld [vmem:[%s7309_s26 + $0x11c0] sm:$0xff]  ;;  %v530_v42 = vld [vmem:[%s7309_s26 + $0x11c8] sm:$0xff] }
  0x65   : > { %527 = vst [vmem:[%s7314_s27 + $0x5e8] sm:$0xff] %v526_v40  ;;  %529 = vst [vmem:[%s7314_s27 + $0x5f0] sm:$0xff] %v528_v41  ;;  %v532_v43 = vld [vmem:[%s7309_s26 + $0x11d0] sm:$0xff]  ;;  %v534_v44 = vld [vmem:[%s7309_s26 + $0x1224] sm:$0xff] }
  0x66   : > { %531 = vst [vmem:[%s7314_s27 + $0x5f8] sm:$0xff] %v530_v42  ;;  %v536_v45 = vld [vmem:[%s7309_s26 + $0x122c] sm:$0xff]  ;;  %533 = vst [vmem:[%s7314_s27 + $0x600] sm:$0xff] %v532_v43  ;;  %v538_v46 = vld [vmem:[%s7309_s26 + $0x1234] sm:$0xff] }
  0x67   : > { %535 = vst [vmem:[%s7314_s27 + $0x60c] sm:$0xff] %v534_v44  ;;  %537 = vst [vmem:[%s7314_s27 + $0x614] sm:$0xff] %v536_v45  ;;  %v540_v47 = vld [vmem:[%s7309_s26 + $0x123c] sm:$0xff]  ;;  %v542_v48 = vld [vmem:[%s7309_s26 + $0x1290] sm:$0xff] }
  0x68   : > { %539 = vst [vmem:[%s7314_s27 + $0x61c] sm:$0xff] %v538_v46  ;;  %541 = vst [vmem:[%s7314_s27 + $0x624] sm:$0xff] %v540_v47  ;;  %v544_v49 = vld [vmem:[%s7309_s26 + $0x1298] sm:$0xff]  ;;  %v546_v50 = vld [vmem:[%s7309_s26 + $0x12a0] sm:$0xff] }
  0x69   : > { %543 = vst [vmem:[%s7314_s27 + $0x630] sm:$0xff] %v542_v48  ;;  %v548_v51 = vld [vmem:[%s7309_s26 + $0x12a8] sm:$0xff]  ;;  %545 = vst [vmem:[%s7314_s27 + $0x638] sm:$0xff] %v544_v49  ;;  %v550_v52 = vld [vmem:[%s7309_s26 + $0x12fc] sm:$0xff] }
  0x6a   : > { %547 = vst [vmem:[%s7314_s27 + $0x640] sm:$0xff] %v546_v50  ;;  %549 = vst [vmem:[%s7314_s27 + $0x648] sm:$0xff] %v548_v51  ;;  %v552_v53 = vld [vmem:[%s7309_s26 + $0x1304] sm:$0xff]  ;;  %v554_v54 = vld [vmem:[%s7309_s26 + $0x130c] sm:$0xff] }
  0x6b   : > { %551 = vst [vmem:[%s7314_s27 + $0x654] sm:$0xff] %v550_v52  ;;  %553 = vst [vmem:[%s7314_s27 + $0x65c] sm:$0xff] %v552_v53  ;;  %v556_v55 = vld [vmem:[%s7309_s26 + $0x1314] sm:$0xff]  ;;  %v558_v56 = vld [vmem:[%s7309_s26 + $0x1368] sm:$0xff] }
  0x6c   : > { %555 = vst [vmem:[%s7314_s27 + $0x664] sm:$0xff] %v554_v54  ;;  %v560_v57 = vld [vmem:[%s7309_s26 + $0x1370] sm:$0xff]  ;;  %557 = vst [vmem:[%s7314_s27 + $0x66c] sm:$0xff] %v556_v55  ;;  %v562_v58 = vld [vmem:[%s7309_s26 + $0x1378] sm:$0xff] }
  0x6d   : > { %559 = vst [vmem:[%s7314_s27 + $0x678] sm:$0xff] %v558_v56  ;;  %561 = vst [vmem:[%s7314_s27 + $0x680] sm:$0xff] %v560_v57  ;;  %v564_v59 = vld [vmem:[%s7309_s26 + $0x1380] sm:$0xff]  ;;  %v566_v60 = vld [vmem:[%s7309_s26 + $0x13d4] sm:$0xff] }
  0x6e   : > { %563 = vst [vmem:[%s7314_s27 + $0x688] sm:$0xff] %v562_v58  ;;  %565 = vst [vmem:[%s7314_s27 + $0x690] sm:$0xff] %v564_v59  ;;  %v568_v61 = vld [vmem:[%s7309_s26 + $0x13dc] sm:$0xff]  ;;  %v570_v62 = vld [vmem:[%s7309_s26 + $0x13e4] sm:$0xff] }
  0x6f   : > { %567 = vst [vmem:[%s7314_s27 + $0x69c] sm:$0xff] %v566_v60  ;;  %v572_v63 = vld [vmem:[%s7309_s26 + $0x13ec] sm:$0xff]  ;;  %569 = vst [vmem:[%s7314_s27 + $0x6a4] sm:$0xff] %v568_v61  ;;  %v574_v0 = vld [vmem:[%s7309_s26 + $0x1440] sm:$0xff] }
  0x70   : > { %571 = vst [vmem:[%s7314_s27 + $0x6ac] sm:$0xff] %v570_v62  ;;  %573 = vst [vmem:[%s7314_s27 + $0x6b4] sm:$0xff] %v572_v63  ;;  %v576_v1 = vld [vmem:[%s7309_s26 + $0x1448] sm:$0xff]  ;;  %v578_v2 = vld [vmem:[%s7309_s26 + $0x1450] sm:$0xff] }
  0x71   : > { %575 = vst [vmem:[%s7314_s27 + $0x6c0] sm:$0xff] %v574_v0  ;;  %577 = vst [vmem:[%s7314_s27 + $0x6c8] sm:$0xff] %v576_v1  ;;  %v580_v3 = vld [vmem:[%s7309_s26 + $0x1458] sm:$0xff]  ;;  %v582_v4 = vld [vmem:[%s7309_s26 + $0x14ac] sm:$0xff] }
  0x72   : > { %579 = vst [vmem:[%s7314_s27 + $0x6d0] sm:$0xff] %v578_v2  ;;  %v584_v5 = vld [vmem:[%s7309_s26 + $0x14b4] sm:$0xff]  ;;  %581 = vst [vmem:[%s7314_s27 + $0x6d8] sm:$0xff] %v580_v3  ;;  %v586_v6 = vld [vmem:[%s7309_s26 + $0x14bc] sm:$0xff] }
  0x73   : > { %583 = vst [vmem:[%s7314_s27 + $0x6e4] sm:$0xff] %v582_v4  ;;  %585 = vst [vmem:[%s7314_s27 + $0x6ec] sm:$0xff] %v584_v5  ;;  %v588_v7 = vld [vmem:[%s7309_s26 + $0x14c4] sm:$0xff]  ;;  %v590_v8 = vld [vmem:[%s7309_s26 + $0x1518] sm:$0xff] }
  0x74   : > { %587 = vst [vmem:[%s7314_s27 + $0x6f4] sm:$0xff] %v586_v6  ;;  %589 = vst [vmem:[%s7314_s27 + $0x6fc] sm:$0xff] %v588_v7  ;;  %v592_v9 = vld [vmem:[%s7309_s26 + $0x1520] sm:$0xff]  ;;  %v594_v10 = vld [vmem:[%s7309_s26 + $0x1528] sm:$0xff] }
  0x75   : > { %591 = vst [vmem:[%s7314_s27 + $0x708] sm:$0xff] %v590_v8  ;;  %v596_v11 = vld [vmem:[%s7309_s26 + $0x1530] sm:$0xff]  ;;  %593 = vst [vmem:[%s7314_s27 + $0x710] sm:$0xff] %v592_v9  ;;  %v598_v12 = vld [vmem:[%s7309_s26 + $0x1584] sm:$0xff] }
  0x76   : > { %595 = vst [vmem:[%s7314_s27 + $0x718] sm:$0xff] %v594_v10  ;;  %597 = vst [vmem:[%s7314_s27 + $0x720] sm:$0xff] %v596_v11  ;;  %v600_v13 = vld [vmem:[%s7309_s26 + $0x158c] sm:$0xff]  ;;  %v602_v14 = vld [vmem:[%s7309_s26 + $0x1594] sm:$0xff] }
  0x77   : > { %599 = vst [vmem:[%s7314_s27 + $0x72c] sm:$0xff] %v598_v12  ;;  %601 = vst [vmem:[%s7314_s27 + $0x734] sm:$0xff] %v600_v13  ;;  %v604_v15 = vld [vmem:[%s7309_s26 + $0x159c] sm:$0xff]  ;;  %v606_v16 = vld [vmem:[%s7309_s26 + $0x15f0] sm:$0xff] }
  0x78   : > { %603 = vst [vmem:[%s7314_s27 + $0x73c] sm:$0xff] %v602_v14  ;;  %v608_v17 = vld [vmem:[%s7309_s26 + $0x15f8] sm:$0xff]  ;;  %605 = vst [vmem:[%s7314_s27 + $0x744] sm:$0xff] %v604_v15  ;;  %v610_v18 = vld [vmem:[%s7309_s26 + $0x1600] sm:$0xff] }
  0x79   : > { %607 = vst [vmem:[%s7314_s27 + $0x750] sm:$0xff] %v606_v16  ;;  %609 = vst [vmem:[%s7314_s27 + $0x758] sm:$0xff] %v608_v17  ;;  %v612_v19 = vld [vmem:[%s7309_s26 + $0x1608] sm:$0xff]  ;;  %v614_v20 = vld [vmem:[%s7309_s26 + $0x165c] sm:$0xff] }
  0x7a   : > { %611 = vst [vmem:[%s7314_s27 + $0x760] sm:$0xff] %v610_v18  ;;  %613 = vst [vmem:[%s7314_s27 + $0x768] sm:$0xff] %v612_v19  ;;  %v616_v21 = vld [vmem:[%s7309_s26 + $0x1664] sm:$0xff]  ;;  %v618_v22 = vld [vmem:[%s7309_s26 + $0x166c] sm:$0xff] }
  0x7b   : > { %615 = vst [vmem:[%s7314_s27 + $0x774] sm:$0xff] %v614_v20  ;;  %v620_v23 = vld [vmem:[%s7309_s26 + $0x1674] sm:$0xff]  ;;  %617 = vst [vmem:[%s7314_s27 + $0x77c] sm:$0xff] %v616_v21  ;;  %v622_v24 = vld [vmem:[%s7309_s26 + $0x16c8] sm:$0xff] }
  0x7c   : > { %619 = vst [vmem:[%s7314_s27 + $0x784] sm:$0xff] %v618_v22  ;;  %621 = vst [vmem:[%s7314_s27 + $0x78c] sm:$0xff] %v620_v23  ;;  %v624_v25 = vld [vmem:[%s7309_s26 + $0x16d0] sm:$0xff]  ;;  %v626_v26 = vld [vmem:[%s7309_s26 + $0x16d8] sm:$0xff] }
  0x7d   : > { %623 = vst [vmem:[%s7314_s27 + $0x798] sm:$0xff] %v622_v24  ;;  %625 = vst [vmem:[%s7314_s27 + $0x7a0] sm:$0xff] %v624_v25  ;;  %v628_v27 = vld [vmem:[%s7309_s26 + $0x16e0] sm:$0xff]  ;;  %v630_v28 = vld [vmem:[%s7309_s26 + $0x1734] sm:$0xff] }
  0x7e   : > { %627 = vst [vmem:[%s7314_s27 + $0x7a8] sm:$0xff] %v626_v26  ;;  %v632_v29 = vld [vmem:[%s7309_s26 + $0x173c] sm:$0xff]  ;;  %629 = vst [vmem:[%s7314_s27 + $0x7b0] sm:$0xff] %v628_v27  ;;  %v634_v30 = vld [vmem:[%s7309_s26 + $0x1744] sm:$0xff] }
  0x7f   : > { %631 = vst [vmem:[%s7314_s27 + $0x7bc] sm:$0xff] %v630_v28  ;;  %633 = vst [vmem:[%s7314_s27 + $0x7c4] sm:$0xff] %v632_v29  ;;  %v636_v31 = vld [vmem:[%s7309_s26 + $0x174c] sm:$0xff]  ;;  %v638_v32 = vld [vmem:[%s7309_s26 + $0x17a0] sm:$0xff] }
  0x80   : > { %635 = vst [vmem:[%s7314_s27 + $0x7cc] sm:$0xff] %v634_v30  ;;  %637 = vst [vmem:[%s7314_s27 + $0x7d4] sm:$0xff] %v636_v31  ;;  %v640_v33 = vld [vmem:[%s7309_s26 + $0x17a8] sm:$0xff]  ;;  %v642_v34 = vld [vmem:[%s7309_s26 + $0x17b0] sm:$0xff] }
  0x81   : > { %639 = vst [vmem:[%s7314_s27 + $0x7e0] sm:$0xff] %v638_v32  ;;  %v644_v35 = vld [vmem:[%s7309_s26 + $0x17b8] sm:$0xff]  ;;  %641 = vst [vmem:[%s7314_s27 + $0x7e8] sm:$0xff] %v640_v33  ;;  %v646_v36 = vld [vmem:[%s7309_s26 + $0x180c] sm:$0xff] }
  0x82   : > { %643 = vst [vmem:[%s7314_s27 + $0x7f0] sm:$0xff] %v642_v34  ;;  %645 = vst [vmem:[%s7314_s27 + $0x7f8] sm:$0xff] %v644_v35  ;;  %v648_v37 = vld [vmem:[%s7309_s26 + $0x1814] sm:$0xff]  ;;  %v650_v38 = vld [vmem:[%s7309_s26 + $0x181c] sm:$0xff] }
  0x83   : > { %647 = vst [vmem:[%s7314_s27 + $0x804] sm:$0xff] %v646_v36  ;;  %649 = vst [vmem:[%s7314_s27 + $0x80c] sm:$0xff] %v648_v37  ;;  %v652_v39 = vld [vmem:[%s7309_s26 + $0x1824] sm:$0xff]  ;;  %v654_v40 = vld [vmem:[%s7309_s26 + $0x1878] sm:$0xff] }
  0x84   : > { %651 = vst [vmem:[%s7314_s27 + $0x814] sm:$0xff] %v650_v38  ;;  %v656_v41 = vld [vmem:[%s7309_s26 + $0x1880] sm:$0xff]  ;;  %653 = vst [vmem:[%s7314_s27 + $0x81c] sm:$0xff] %v652_v39  ;;  %v658_v42 = vld [vmem:[%s7309_s26 + $0x1888] sm:$0xff] }
  0x85   : > { %655 = vst [vmem:[%s7314_s27 + $0x828] sm:$0xff] %v654_v40  ;;  %657 = vst [vmem:[%s7314_s27 + $0x830] sm:$0xff] %v656_v41  ;;  %v660_v43 = vld [vmem:[%s7309_s26 + $0x1890] sm:$0xff]  ;;  %v662_v44 = vld [vmem:[%s7309_s26 + $0x18e4] sm:$0xff] }
  0x86   : > { %659 = vst [vmem:[%s7314_s27 + $0x838] sm:$0xff] %v658_v42  ;;  %661 = vst [vmem:[%s7314_s27 + $0x840] sm:$0xff] %v660_v43  ;;  %v664_v45 = vld [vmem:[%s7309_s26 + $0x18ec] sm:$0xff]  ;;  %v666_v46 = vld [vmem:[%s7309_s26 + $0x18f4] sm:$0xff] }
  0x87   : > { %663 = vst [vmem:[%s7314_s27 + $0x84c] sm:$0xff] %v662_v44  ;;  %v668_v47 = vld [vmem:[%s7309_s26 + $0x18fc] sm:$0xff]  ;;  %665 = vst [vmem:[%s7314_s27 + $0x854] sm:$0xff] %v664_v45  ;;  %v670_v48 = vld [vmem:[%s7309_s26 + $0x1950] sm:$0xff] }
  0x88   : > { %667 = vst [vmem:[%s7314_s27 + $0x85c] sm:$0xff] %v666_v46  ;;  %669 = vst [vmem:[%s7314_s27 + $0x864] sm:$0xff] %v668_v47  ;;  %v672_v49 = vld [vmem:[%s7309_s26 + $0x1958] sm:$0xff]  ;;  %v674_v50 = vld [vmem:[%s7309_s26 + $0x1960] sm:$0xff] }
  0x89   : > { %671 = vst [vmem:[%s7314_s27 + $0x870] sm:$0xff] %v670_v48  ;;  %673 = vst [vmem:[%s7314_s27 + $0x878] sm:$0xff] %v672_v49  ;;  %v676_v51 = vld [vmem:[%s7309_s26 + $0x1968] sm:$0xff]  ;;  %v678_v52 = vld [vmem:[%s7309_s26 + $0x19bc] sm:$0xff] }
  0x8a   : > { %675 = vst [vmem:[%s7314_s27 + $0x880] sm:$0xff] %v674_v50  ;;  %v680_v53 = vld [vmem:[%s7309_s26 + $0x19c4] sm:$0xff]  ;;  %677 = vst [vmem:[%s7314_s27 + $0x888] sm:$0xff] %v676_v51  ;;  %v682_v54 = vld [vmem:[%s7309_s26 + $0x19cc] sm:$0xff] }
  0x8b   : > { %679 = vst [vmem:[%s7314_s27 + $0x894] sm:$0xff] %v678_v52  ;;  %681 = vst [vmem:[%s7314_s27 + $0x89c] sm:$0xff] %v680_v53  ;;  %v684_v55 = vld [vmem:[%s7309_s26 + $0x19d4] sm:$0xff]  ;;  %v686_v56 = vld [vmem:[%s7309_s26 + $0x1a28] sm:$0xff] }
  0x8c   : > { %683 = vst [vmem:[%s7314_s27 + $0x8a4] sm:$0xff] %v682_v54  ;;  %685 = vst [vmem:[%s7314_s27 + $0x8ac] sm:$0xff] %v684_v55  ;;  %v688_v57 = vld [vmem:[%s7309_s26 + $0x1a30] sm:$0xff]  ;;  %v690_v58 = vld [vmem:[%s7309_s26 + $0x1a38] sm:$0xff] }
  0x8d   : > { %687 = vst [vmem:[%s7314_s27 + $0x8b8] sm:$0xff] %v686_v56  ;;  %v692_v59 = vld [vmem:[%s7309_s26 + $0x1a40] sm:$0xff]  ;;  %689 = vst [vmem:[%s7314_s27 + $0x8c0] sm:$0xff] %v688_v57  ;;  %v694_v60 = vld [vmem:[%s7309_s26 + $0x1a94] sm:$0xff] }
  0x8e   : > { %691 = vst [vmem:[%s7314_s27 + $0x8c8] sm:$0xff] %v690_v58  ;;  %693 = vst [vmem:[%s7314_s27 + $0x8d0] sm:$0xff] %v692_v59  ;;  %v696_v61 = vld [vmem:[%s7309_s26 + $0x1a9c] sm:$0xff]  ;;  %v698_v62 = vld [vmem:[%s7309_s26 + $0x1aa4] sm:$0xff] }
  0x8f   : > { %695 = vst [vmem:[%s7314_s27 + $0x8dc] sm:$0xff] %v694_v60  ;;  %697 = vst [vmem:[%s7314_s27 + $0x8e4] sm:$0xff] %v696_v61  ;;  %v700_v63 = vld [vmem:[%s7309_s26 + $0x1aac] sm:$0xff]  ;;  %v5702_v0 = vld [vmem:[%s7309_s26 + $0x20] sm:$0xf] }
  0x90   : > { %699 = vst [vmem:[%s7314_s27 + $0x8ec] sm:$0xff] %v698_v62  ;;  %v5704_v1 = vld [vmem:[%s7309_s26 + $0x8c] sm:$0xf]  ;;  %701 = vst [vmem:[%s7314_s27 + $0x8f4] sm:$0xff] %v700_v63  ;;  %v5706_v2 = vld [vmem:[%s7309_s26 + $0xf8] sm:$0xf] }
  0x91   : > { %5703 = vst [vmem:[%s7314_s27 + $0x20] sm:$0xf] %v5702_v0  ;;  %5705 = vst [vmem:[%s7314_s27 + $0x44] sm:$0xf] %v5704_v1  ;;  %v5708_v3 = vld [vmem:[%s7309_s26 + $0x164] sm:$0xf] }
  0x92   : > { %v5710_v4 = vld [vmem:[%s7309_s26 + $0x1d0] sm:$0xf]  ;;  %5707 = vst [vmem:[%s7314_s27 + $0x68] sm:$0xf] %v5706_v2  ;;  %5709 = vst [vmem:[%s7314_s27 + $0x8c] sm:$0xf] %v5708_v3 }
  0x93   : > { %5711 = vst [vmem:[%s7314_s27 + $0xb0] sm:$0xf] %v5710_v4  ;;  %v5712_v5 = vld [vmem:[%s7309_s26 + $0x23c] sm:$0xf]  ;;  %v5714_v6 = vld [vmem:[%s7309_s26 + $0x2a8] sm:$0xf] }
  0x94   : > { %v5716_v7 = vld [vmem:[%s7309_s26 + $0x314] sm:$0xf]  ;;  %5713 = vst [vmem:[%s7314_s27 + $0xd4] sm:$0xf] %v5712_v5  ;;  %5715 = vst [vmem:[%s7314_s27 + $0xf8] sm:$0xf] %v5714_v6 }
  0x95   : > { %5717 = vst [vmem:[%s7314_s27 + $0x11c] sm:$0xf] %v5716_v7  ;;  %v5718_v8 = vld [vmem:[%s7309_s26 + $0x380] sm:$0xf]  ;;  %v5720_v9 = vld [vmem:[%s7309_s26 + $0x3ec] sm:$0xf] }
  0x96   : > { %v5722_v10 = vld [vmem:[%s7309_s26 + $0x458] sm:$0xf]  ;;  %5719 = vst [vmem:[%s7314_s27 + $0x140] sm:$0xf] %v5718_v8  ;;  %5721 = vst [vmem:[%s7314_s27 + $0x164] sm:$0xf] %v5720_v9 }
  0x97   : > { %5723 = vst [vmem:[%s7314_s27 + $0x188] sm:$0xf] %v5722_v10  ;;  %v5724_v11 = vld [vmem:[%s7309_s26 + $0x4c4] sm:$0xf]  ;;  %v5726_v12 = vld [vmem:[%s7309_s26 + $0x530] sm:$0xf] }
  0x98   : > { %v5728_v13 = vld [vmem:[%s7309_s26 + $0x59c] sm:$0xf]  ;;  %5725 = vst [vmem:[%s7314_s27 + $0x1ac] sm:$0xf] %v5724_v11  ;;  %5727 = vst [vmem:[%s7314_s27 + $0x1d0] sm:$0xf] %v5726_v12 }
  0x99   : > { %5729 = vst [vmem:[%s7314_s27 + $0x1f4] sm:$0xf] %v5728_v13  ;;  %v5730_v14 = vld [vmem:[%s7309_s26 + $0x608] sm:$0xf]  ;;  %v5732_v15 = vld [vmem:[%s7309_s26 + $0x674] sm:$0xf] }
  0x9a   : > { %v5734_v16 = vld [vmem:[%s7309_s26 + $0x6e0] sm:$0xf]  ;;  %5731 = vst [vmem:[%s7314_s27 + $0x218] sm:$0xf] %v5730_v14  ;;  %5733 = vst [vmem:[%s7314_s27 + $0x23c] sm:$0xf] %v5732_v15 }
  0x9b   : > { %5735 = vst [vmem:[%s7314_s27 + $0x260] sm:$0xf] %v5734_v16  ;;  %v5736_v17 = vld [vmem:[%s7309_s26 + $0x74c] sm:$0xf]  ;;  %v5738_v18 = vld [vmem:[%s7309_s26 + $0x7b8] sm:$0xf] }
  0x9c   : > { %v5740_v19 = vld [vmem:[%s7309_s26 + $0x824] sm:$0xf]  ;;  %5737 = vst [vmem:[%s7314_s27 + $0x284] sm:$0xf] %v5736_v17  ;;  %5739 = vst [vmem:[%s7314_s27 + $0x2a8] sm:$0xf] %v5738_v18 }
  0x9d   : > { %5741 = vst [vmem:[%s7314_s27 + $0x2cc] sm:$0xf] %v5740_v19  ;;  %v5742_v20 = vld [vmem:[%s7309_s26 + $0x890] sm:$0xf]  ;;  %v5744_v21 = vld [vmem:[%s7309_s26 + $0x8fc] sm:$0xf] }
  0x9e   : > { %v5746_v22 = vld [vmem:[%s7309_s26 + $0x968] sm:$0xf]  ;;  %5743 = vst [vmem:[%s7314_s27 + $0x2f0] sm:$0xf] %v5742_v20  ;;  %5745 = vst [vmem:[%s7314_s27 + $0x314] sm:$0xf] %v5744_v21 }
  0x9f   : > { %5747 = vst [vmem:[%s7314_s27 + $0x338] sm:$0xf] %v5746_v22  ;;  %v5748_v23 = vld [vmem:[%s7309_s26 + $0x9d4] sm:$0xf]  ;;  %v5750_v24 = vld [vmem:[%s7309_s26 + $0xa40] sm:$0xf] }
  0xa0   : > { %v5752_v25 = vld [vmem:[%s7309_s26 + $0xaac] sm:$0xf]  ;;  %5749 = vst [vmem:[%s7314_s27 + $0x35c] sm:$0xf] %v5748_v23  ;;  %5751 = vst [vmem:[%s7314_s27 + $0x380] sm:$0xf] %v5750_v24 }
  0xa1   : > { %5753 = vst [vmem:[%s7314_s27 + $0x3a4] sm:$0xf] %v5752_v25  ;;  %v5754_v26 = vld [vmem:[%s7309_s26 + $0xb18] sm:$0xf]  ;;  %v5756_v27 = vld [vmem:[%s7309_s26 + $0xb84] sm:$0xf] }
  0xa2   : > { %v5758_v28 = vld [vmem:[%s7309_s26 + $0xbf0] sm:$0xf]  ;;  %5755 = vst [vmem:[%s7314_s27 + $0x3c8] sm:$0xf] %v5754_v26  ;;  %5757 = vst [vmem:[%s7314_s27 + $0x3ec] sm:$0xf] %v5756_v27 }
  0xa3   : > { %5759 = vst [vmem:[%s7314_s27 + $0x410] sm:$0xf] %v5758_v28  ;;  %v5760_v29 = vld [vmem:[%s7309_s26 + $0xc5c] sm:$0xf]  ;;  %v5762_v30 = vld [vmem:[%s7309_s26 + $0xcc8] sm:$0xf] }
  0xa4   : > { %v5764_v31 = vld [vmem:[%s7309_s26 + $0xd34] sm:$0xf]  ;;  %5761 = vst [vmem:[%s7314_s27 + $0x434] sm:$0xf] %v5760_v29  ;;  %5763 = vst [vmem:[%s7314_s27 + $0x458] sm:$0xf] %v5762_v30 }
  0xa5   : > { %5765 = vst [vmem:[%s7314_s27 + $0x47c] sm:$0xf] %v5764_v31  ;;  %v5766_v32 = vld [vmem:[%s7309_s26 + $0xda0] sm:$0xf]  ;;  %v5768_v33 = vld [vmem:[%s7309_s26 + $0xe0c] sm:$0xf] }
  0xa6   : > { %v5770_v34 = vld [vmem:[%s7309_s26 + $0xe78] sm:$0xf]  ;;  %5767 = vst [vmem:[%s7314_s27 + $0x4a0] sm:$0xf] %v5766_v32  ;;  %5769 = vst [vmem:[%s7314_s27 + $0x4c4] sm:$0xf] %v5768_v33 }
  0xa7   : > { %5771 = vst [vmem:[%s7314_s27 + $0x4e8] sm:$0xf] %v5770_v34  ;;  %v5772_v35 = vld [vmem:[%s7309_s26 + $0xee4] sm:$0xf]  ;;  %v5774_v36 = vld [vmem:[%s7309_s26 + $0xf50] sm:$0xf] }
  0xa8   : > { %v5776_v37 = vld [vmem:[%s7309_s26 + $0xfbc] sm:$0xf]  ;;  %5773 = vst [vmem:[%s7314_s27 + $0x50c] sm:$0xf] %v5772_v35  ;;  %5775 = vst [vmem:[%s7314_s27 + $0x530] sm:$0xf] %v5774_v36 }
  0xa9   : > { %5777 = vst [vmem:[%s7314_s27 + $0x554] sm:$0xf] %v5776_v37  ;;  %v5778_v38 = vld [vmem:[%s7309_s26 + $0x1028] sm:$0xf]  ;;  %v5780_v39 = vld [vmem:[%s7309_s26 + $0x1094] sm:$0xf] }
  0xaa   : > { %v5782_v40 = vld [vmem:[%s7309_s26 + $0x1100] sm:$0xf]  ;;  %5779 = vst [vmem:[%s7314_s27 + $0x578] sm:$0xf] %v5778_v38  ;;  %5781 = vst [vmem:[%s7314_s27 + $0x59c] sm:$0xf] %v5780_v39 }
  0xab   : > { %5783 = vst [vmem:[%s7314_s27 + $0x5c0] sm:$0xf] %v5782_v40  ;;  %v5784_v41 = vld [vmem:[%s7309_s26 + $0x116c] sm:$0xf]  ;;  %v5786_v42 = vld [vmem:[%s7309_s26 + $0x11d8] sm:$0xf] }
  0xac   : > { %v5788_v43 = vld [vmem:[%s7309_s26 + $0x1244] sm:$0xf]  ;;  %5785 = vst [vmem:[%s7314_s27 + $0x5e4] sm:$0xf] %v5784_v41  ;;  %5787 = vst [vmem:[%s7314_s27 + $0x608] sm:$0xf] %v5786_v42 }
  0xad   : > { %5789 = vst [vmem:[%s7314_s27 + $0x62c] sm:$0xf] %v5788_v43  ;;  %v5790_v44 = vld [vmem:[%s7309_s26 + $0x12b0] sm:$0xf]  ;;  %v5792_v45 = vld [vmem:[%s7309_s26 + $0x131c] sm:$0xf] }
  0xae   : > { %v5794_v46 = vld [vmem:[%s7309_s26 + $0x1388] sm:$0xf]  ;;  %5791 = vst [vmem:[%s7314_s27 + $0x650] sm:$0xf] %v5790_v44  ;;  %5793 = vst [vmem:[%s7314_s27 + $0x674] sm:$0xf] %v5792_v45 }
  0xaf   : > { %5795 = vst [vmem:[%s7314_s27 + $0x698] sm:$0xf] %v5794_v46  ;;  %v5796_v47 = vld [vmem:[%s7309_s26 + $0x13f4] sm:$0xf]  ;;  %v5798_v48 = vld [vmem:[%s7309_s26 + $0x1460] sm:$0xf] }
  0xb0   : > { %v5800_v49 = vld [vmem:[%s7309_s26 + $0x14cc] sm:$0xf]  ;;  %5797 = vst [vmem:[%s7314_s27 + $0x6bc] sm:$0xf] %v5796_v47  ;;  %5799 = vst [vmem:[%s7314_s27 + $0x6e0] sm:$0xf] %v5798_v48 }
  0xb1   : > { %5801 = vst [vmem:[%s7314_s27 + $0x704] sm:$0xf] %v5800_v49  ;;  %v5802_v50 = vld [vmem:[%s7309_s26 + $0x1538] sm:$0xf]  ;;  %v5804_v51 = vld [vmem:[%s7309_s26 + $0x15a4] sm:$0xf] }
  0xb2   : > { %v5806_v52 = vld [vmem:[%s7309_s26 + $0x1610] sm:$0xf]  ;;  %5803 = vst [vmem:[%s7314_s27 + $0x728] sm:$0xf] %v5802_v50  ;;  %5805 = vst [vmem:[%s7314_s27 + $0x74c] sm:$0xf] %v5804_v51 }
  0xb3   : > { %5807 = vst [vmem:[%s7314_s27 + $0x770] sm:$0xf] %v5806_v52  ;;  %v5808_v53 = vld [vmem:[%s7309_s26 + $0x167c] sm:$0xf]  ;;  %v5810_v54 = vld [vmem:[%s7309_s26 + $0x16e8] sm:$0xf] }
  0xb4   : > { %v5812_v55 = vld [vmem:[%s7309_s26 + $0x1754] sm:$0xf]  ;;  %5809 = vst [vmem:[%s7314_s27 + $0x794] sm:$0xf] %v5808_v53  ;;  %5811 = vst [vmem:[%s7314_s27 + $0x7b8] sm:$0xf] %v5810_v54 }
  0xb5   : > { %5813 = vst [vmem:[%s7314_s27 + $0x7dc] sm:$0xf] %v5812_v55  ;;  %v5814_v56 = vld [vmem:[%s7309_s26 + $0x17c0] sm:$0xf]  ;;  %v5816_v57 = vld [vmem:[%s7309_s26 + $0x182c] sm:$0xf] }
  0xb6   : > { %v5818_v58 = vld [vmem:[%s7309_s26 + $0x1898] sm:$0xf]  ;;  %5815 = vst [vmem:[%s7314_s27 + $0x800] sm:$0xf] %v5814_v56  ;;  %5817 = vst [vmem:[%s7314_s27 + $0x824] sm:$0xf] %v5816_v57 }
  0xb7   : > { %5819 = vst [vmem:[%s7314_s27 + $0x848] sm:$0xf] %v5818_v58  ;;  %v5820_v59 = vld [vmem:[%s7309_s26 + $0x1904] sm:$0xf]  ;;  %v5822_v60 = vld [vmem:[%s7309_s26 + $0x1970] sm:$0xf] }
  0xb8   : > { %v5824_v61 = vld [vmem:[%s7309_s26 + $0x19dc] sm:$0xf]  ;;  %5821 = vst [vmem:[%s7314_s27 + $0x86c] sm:$0xf] %v5820_v59  ;;  %5823 = vst [vmem:[%s7314_s27 + $0x890] sm:$0xf] %v5822_v60 }
  0xb9   : > { %5825 = vst [vmem:[%s7314_s27 + $0x8b4] sm:$0xf] %v5824_v61  ;;  %v5826_v62 = vld [vmem:[%s7309_s26 + $0x1a48] sm:$0xf]  ;;  %v5828_v63 = vld [vmem:[%s7309_s26 + $0x1ab4] sm:$0xf] }
  0xba   : > { %5827 = vst [vmem:[%s7314_s27 + $0x8d8] sm:$0xf] %v5826_v62  ;;  %5829 = vst [vmem:[%s7314_s27 + $0x8fc] sm:$0xf] %v5828_v63 }
  0xbb PF: > { %p5830_p6 = scmp.ge.s32.totalorder %s7242_s16, 1  ;;  %p854_p7 = scmp.lt.s32.totalorder %s7242_s16, 4 }
  0xbd   : > { %p855_p8 = pnand %p5830_p6, %p854_p7 }
  0xbf   : > { %858 = sbr.rel (%p855_p8) target bundleno = 1221 (0x4c5), region = 54 }
  0xc4   : > { %s861_s28 = sand.u32 1, %s7226_s12   ;;  %s900_s29 = smul.u32 144, %s7234_s14 }
  0xc5   : > { %s6417_s30 = smul.u32 2304, %s861_s28  ;;  %p5832_p10 = scmp.ne.s32.totalorder %s7234_s14, 0 }
  0xc6   : > { %p901_p9 = scmp.lt.s32.totalorder %s900_s29, 431 }
  0xc7   : > { %s7962_s8 = scalar_lea.vmem [#allocation3], %s6417_s30  ;;  %925 = sbr.rel (%p5832_p10) target bundleno = 237 (0xed), region = 62 }
  0xc8   : > { %s9597_s29 = smov (!%p901_p9, %s900_s29), 431 }
  0xc9   : > { %s5831_s4 = sshll.u32 %s9597_s29, 2 }
  0xca   : > { %s7960_s7 = scalar_lea.vmem %s9489_s1, %s5831_s4 }
  0xcc   : > { %v7244_v0 = vmov 0.0  }
  0xcd   : > { %926 = vst [vmem:[#allocation2 + $0xb0] sm:$0xff] %v7244_v0  ;;  %927 = vst [vmem:[#allocation2 + $0x1b0] sm:$0xff] %v7244_v0 }
  0xce   : > { %928 = vst [vmem:[#allocation2 + $0xd8] sm:$0xff] %v7244_v0  ;;  %929 = vst [vmem:[#allocation2 + $0x18] sm:$0xff] %v7244_v0 }
  0xcf   : > { %930 = vst [vmem:[#allocation2 + $0x50] sm:$0xff] %v7244_v0  ;;  %931 = vst [vmem:[#allocation2 + $0x168] sm:$0xff] %v7244_v0 }
  0xd0   : > { %932 = vst [vmem:[#allocation2 + $0x130] sm:$0xff] %v7244_v0  ;;  %933 = vst [vmem:[#allocation2 + $0x48] sm:$0xff] %v7244_v0 }
  0xd1   : > { %934 = vst [vmem:[#allocation2 + $0x180] sm:$0xff] %v7244_v0  ;;  %935 = vst [vmem:[#allocation2 + $0x110] sm:$0xff] %v7244_v0 }
  0xd2   : > { %936 = vst [vmem:[#allocation2 + $0x118] sm:$0xff] %v7244_v0  ;;  %937 = vst [vmem:[#allocation2 + $0x98] sm:$0xff] %v7244_v0 }
  0xd3   : > { %938 = vst [vmem:[#allocation2 + $0x120] sm:$0xff] %v7244_v0  ;;  %939 = vst [vmem:[#allocation2 + $0x150] sm:$0xff] %v7244_v0 }
  0xd4   : > { %940 = vst [vmem:[#allocation2 + $0x108] sm:$0xff] %v7244_v0  ;;  %941 = vst [vmem:[#allocation2 + $0x60] sm:$0xff] %v7244_v0 }
  0xd5   : > { %942 = vst [vmem:[#allocation2 + $0xe0] sm:$0xff] %v7244_v0  ;;  %943 = vst [vmem:[#allocation2 + $0x188] sm:$0xff] %v7244_v0 }
  0xd6   : > { %944 = vst [vmem:[#allocation2 + $0x138] sm:$0xff] %v7244_v0  ;;  %945 = vst [vmem:[#allocation2 + $0x140] sm:$0xff] %v7244_v0 }
  0xd7   : > { %946 = vst [vmem:[#allocation2 + $0x80] sm:$0xff] %v7244_v0  ;;  %947 = vst [vmem:[#allocation2 + $0x1a8] sm:$0xff] %v7244_v0 }
  0xd8   : > { %948 = vst [vmem:[#allocation2 + $0x1b8] sm:$0xff] %v7244_v0  ;;  %949 = vst [vmem:[#allocation2 + $0x28] sm:$0xff] %v7244_v0 }
  0xd9   : > { %950 = vst [vmem:[#allocation2 + $0x1e8] sm:$0xff] %v7244_v0  ;;  %951 = vst [vmem:[#allocation2 + $0xf8] sm:$0xff] %v7244_v0 }
  0xda   : > { %952 = vst [vmem:[#allocation2 + $0x160] sm:$0xff] %v7244_v0  ;;  %953 = vst [vmem:[#allocation2 + $0x30] sm:$0xff] %v7244_v0 }
  0xdb   : > { %954 = vst [vmem:[#allocation2 + $0x1e0] sm:$0xff] %v7244_v0  ;;  %955 = vst [vmem:[#allocation2] sm:$0xff] %v7244_v0 }
  0xdc   : > { %956 = vst [vmem:[#allocation2 + $0xf0] sm:$0xff] %v7244_v0  ;;  %957 = vst [vmem:[#allocation2 + $0x8] sm:$0xff] %v7244_v0 }
  0xdd   : > { %958 = vst [vmem:[#allocation2 + $0x148] sm:$0xff] %v7244_v0  ;;  %959 = vst [vmem:[#allocation2 + $0x1d0] sm:$0xff] %v7244_v0 }
  0xde   : > { %960 = vst [vmem:[#allocation2 + $0x100] sm:$0xff] %v7244_v0  ;;  %961 = vst [vmem:[#allocation2 + $0xc8] sm:$0xff] %v7244_v0 }
  0xdf   : > { %962 = vst [vmem:[#allocation2 + $0x40] sm:$0xff] %v7244_v0  ;;  %963 = vst [vmem:[#allocation2 + $0x1f8] sm:$0xff] %v7244_v0 }
  0xe0   : > { %964 = vst [vmem:[#allocation2 + $0x20] sm:$0xff] %v7244_v0  ;;  %965 = vst [vmem:[#allocation2 + $0x128] sm:$0xff] %v7244_v0 }
  0xe1   : > { %966 = vst [vmem:[#allocation2 + $0x1a0] sm:$0xff] %v7244_v0  ;;  %967 = vst [vmem:[#allocation2 + $0x1f0] sm:$0xff] %v7244_v0 }
  0xe2   : > { %968 = vst [vmem:[#allocation2 + $0xe8] sm:$0xff] %v7244_v0  ;;  %969 = vst [vmem:[#allocation2 + $0x78] sm:$0xff] %v7244_v0 }
  0xe3   : > { %970 = vst [vmem:[#allocation2 + $0x70] sm:$0xff] %v7244_v0  ;;  %971 = vst [vmem:[#allocation2 + $0x90] sm:$0xff] %v7244_v0 }
  0xe4   : > { %972 = vst [vmem:[#allocation2 + $0x1d8] sm:$0xff] %v7244_v0  ;;  %973 = vst [vmem:[#allocation2 + $0xd0] sm:$0xff] %v7244_v0 }
  0xe5   : > { %974 = vst [vmem:[#allocation2 + $0xb8] sm:$0xff] %v7244_v0  ;;  %975 = vst [vmem:[#allocation2 + $0x88] sm:$0xff] %v7244_v0 }
  0xe6   : > { %976 = vst [vmem:[#allocation2 + $0xa8] sm:$0xff] %v7244_v0  ;;  %977 = vst [vmem:[#allocation2 + $0x1c8] sm:$0xff] %v7244_v0 }
  0xe7   : > { %978 = vst [vmem:[#allocation2 + $0x170] sm:$0xff] %v7244_v0  ;;  %979 = vst [vmem:[#allocation2 + $0x178] sm:$0xff] %v7244_v0 }
  0xe8   : > { %980 = vst [vmem:[#allocation2 + $0x68] sm:$0xff] %v7244_v0  ;;  %981 = vst [vmem:[#allocation2 + $0x190] sm:$0xff] %v7244_v0 }
  0xe9   : > { %982 = vst [vmem:[#allocation2 + $0x198] sm:$0xff] %v7244_v0  ;;  %983 = vst [vmem:[#allocation2 + $0x38] sm:$0xff] %v7244_v0 }
  0xea   : > { %984 = vst [vmem:[#allocation2 + $0xc0] sm:$0xff] %v7244_v0  ;;  %985 = vst [vmem:[#allocation2 + $0x1c0] sm:$0xff] %v7244_v0 }
  0xeb   : > { %986 = vst [vmem:[#allocation2 + $0x158] sm:$0xff] %v7244_v0  ;;  %987 = vst [vmem:[#allocation2 + $0x10] sm:$0xff] %v7244_v0 }
  0xec   : > { %988 = vst [vmem:[#allocation2 + $0x58] sm:$0xff] %v7244_v0  ;;  %989 = vst [vmem:[#allocation2 + $0xa0] sm:$0xff] %v7244_v0 }
  0xed PF: > { %v6460_v1 = vld [vmem:[%s7960_s7 + $0x38] sm:$0xff]   ;;  %v7245_v2 = vmov 0   ;;  %v6461_v3 = vld [vmem:[%s7960_s7 + $0x30] sm:$0xff]   ;;  %v6462_v4 = vld [vmem:[%s7960_s7 + $0x28] sm:$0xff]   ;;  %p6193_p11 = scmp.ne.s32.totalorder %s7234_s14, 2 }
  0xee   : > { %3422 = vmatprep.subr.bf16.mxu0 %v7245_v2  ;;  %6384 = vmatprep.subr.bf16.mxu1 %v7245_v2  ;;  %v6463_v5 = vld [vmem:[%s7960_s7 + $0x20] sm:$0xff]   ;;  %v6464_v6 = vld [vmem:[%s7960_s7 + $0x18] sm:$0xff]   ;;  %v6465_v8 = vld [vmem:[%s7960_s7 + $0x10] sm:$0xff]  }
  0xef   : > { %3423 = vmatpush1.bf16.msra.mxu0 %v6460_v1  ;;  %6400 = vmatpush1.bf16.msra.mxu1 %v6460_v1  ;;  %v6478_v7 = vld [vmem:[%s7962_s8 + $0x4] ss:$36 sps:$4 sm:$0xff]   ;;  %v6468_v12 = vld [vmem:[%s7960_s7 + $0x78] sm:$0xff]   ;;  %v6469_v13 = vld [vmem:[%s7960_s7 + $0x70] sm:$0xff]  }
  0xf0   : > { %3424 = vmatprep.subr.bf16.mxu0 %v7245_v2  ;;  %6385 = vmatprep.subr.bf16.mxu1 %v7245_v2  ;;  %v6481_v9 = vld [vmem:[%s7962_s8 + $0x6c4] ss:$36 sps:$4 sm:$0xff]   ;;  %v6472_v16 = vld [vmem:[%s7960_s7 + $0x58] sm:$0xff]   ;;  %v6473_v17 = vld [vmem:[%s7960_s7 + $0x50] sm:$0xff]  }
  0xf1   : > { %3454 = vmatprep.mubr.bf16.mxu0 %v6478_v7  ;;  %3646 = vmatprep.mubr.bf16.mxu1 %v6481_v9  ;;  %v6466_v10 = vld [vmem:[%s7960_s7 + $0x8] sm:$0xff]   ;;  %v6467_v11 = vld [vmem:[%s7960_s7] sm:$0xff]   ;;  %v6482_v22 = vld [vmem:[%s7960_s7 + $0xb8] sm:$0xff]  }
  0xf2   : > { %v6470_v14 = vld [vmem:[%s7960_s7 + $0x68] sm:$0xff]   ;;  %v6471_v15 = vld [vmem:[%s7960_s7 + $0x60] sm:$0xff]   ;;  %v6483_v23 = vld [vmem:[%s7960_s7 + $0x138] sm:$0xff]  }
  0xf3   : > { %3425 = vmatpush1.bf16.msra.mxu0 %v6461_v3  ;;  %6401 = vmatpush1.bf16.msra.mxu1 %v6461_v3  ;;  %v6474_v18 = vld [vmem:[%s7960_s7 + $0x48] sm:$0xff]   ;;  %v6475_v19 = vld [vmem:[%s7960_s7 + $0x40] sm:$0xff]   ;;  %v6484_v26 = vld [vmem:[%s7960_s7 + $0xb0] sm:$0xff]  }
  0xf4   : > { %3426 = vmatprep.subr.bf16.mxu0 %v7245_v2  ;;  %6386 = vmatprep.subr.bf16.mxu1 %v7245_v2  ;;  %v6476_v20 = vld [vmem:[%s7962_s8] ss:$36 sps:$4 sm:$0xff]   ;;  %v6485_v24 = vld [vmem:[%s7962_s8 + $0x4c] ss:$36 sps:$4 sm:$0xff]   ;;  %v6494_v31 = vld [vmem:[%s7962_s8 + $0x94] ss:$36 sps:$4 sm:$0xff]  }
  0xf5   : > { %v6479_v21 = vld [vmem:[%s7962_s8 + $0x6c0] ss:$36 sps:$4 sm:$0xff]   ;;  %v6487_v25 = vld [vmem:[%s7962_s8 + $0x70c] ss:$36 sps:$4 sm:$0xff]   ;;  %v6496_v32 = vld [vmem:[%s7962_s8 + $0x754] ss:$36 sps:$4 sm:$0xff]  }
  0xf6   : > { %v6493_v27 = vld [vmem:[%s7960_s7 + $0x130] sm:$0xff]   ;;  %v6489_v28 = vld [vmem:[%s7962_s8 + $0x48] ss:$36 sps:$4 sm:$0xff]   ;;  %v6492_v34 = vld [vmem:[%s7960_s7 + $0xa0] sm:$0xff]  }
  0xf7   : > { %3427 = vmatpush1.bf16.msra.mxu0 %v6462_v4  ;;  %6402 = vmatpush1.bf16.msra.mxu1 %v6462_v4  ;;  %v6490_v29 = vld [vmem:[%s7962_s8 + $0x708] ss:$36 sps:$4 sm:$0xff]   ;;  %v6498_v35 = vld [vmem:[%s7962_s8 + $0x90] ss:$36 sps:$4 sm:$0xff]   ;;  %v6519_v37 = vld [vmem:[%s7960_s7 + $0x120] sm:$0xff]  }
  0xf8   : > { %3428 = vmatprep.subr.bf16.mxu0 %v7245_v2  ;;  %6387 = vmatprep.subr.bf16.mxu1 %v7245_v2  ;;  %v6491_v30 = vld [vmem:[%s7960_s7 + $0xa8] sm:$0xff]   ;;  %v6499_v36 = vld [vmem:[%s7962_s8 + $0x750] ss:$36 sps:$4 sm:$0xff]   ;;  %v6500_v38 = vld [vmem:[%s7960_s7 + $0x98] sm:$0xff]  }
  0xf9   : > { %v6509_v33 = vld [vmem:[%s7960_s7 + $0x128] sm:$0xff]   ;;  %v6502_v39 = vld [vmem:[%s7962_s8 + $0xdc] ss:$36 sps:$4 sm:$0xff]   ;;  %v6501_v42 = vld [vmem:[%s7960_s7 + $0x90] sm:$0xff]  }
  0xfa   : > { %v6504_v40 = vld [vmem:[%s7962_s8 + $0x79c] ss:$36 sps:$4 sm:$0xff]   ;;  %v6508_v45 = vld [vmem:[%s7960_s7 + $0x88] sm:$0xff]   ;;  %v6545_v48 = vld [vmem:[%s7960_s7 + $0x110] sm:$0xff]  }
  0xfb   : > { %3429 = vmatpush1.bf16.msra.mxu0 %v6463_v5  ;;  %6403 = vmatpush1.bf16.msra.mxu1 %v6463_v5  ;;  %v6535_v41 = vld [vmem:[%s7960_s7 + $0x118] sm:$0xff]   ;;  %v6511_v46 = vld [vmem:[%s7962_s8 + $0x124] ss:$36 sps:$4 sm:$0xff]   ;;  %v6520_v54 = vld [vmem:[%s7962_s8 + $0x16c] ss:$36 sps:$4 sm:$0xff]  }
  0xfc   : > { %3430 = vmatprep.subr.bf16.mxu0 %v7245_v2  ;;  %6388 = vmatprep.subr.bf16.mxu1 %v7245_v2  ;;  %v6506_v43 = vld [vmem:[%s7962_s8 + $0xd8] ss:$36 sps:$4 sm:$0xff]   ;;  %v6513_v47 = vld [vmem:[%s7962_s8 + $0x7e4] ss:$36 sps:$4 sm:$0xff]   ;;  %v6522_v55 = vld [vmem:[%s7962_s8 + $0x82c] ss:$36 sps:$4 sm:$0xff]  }
  0xfd   : > { %v6507_v44 = vld [vmem:[%s7962_s8 + $0x798] ss:$36 sps:$4 sm:$0xff]   ;;  %v6510_v49 = vld [vmem:[%s7960_s7 + $0x80] sm:$0xff]   ;;  %v6559_v52 = vld [vmem:[%s7960_s7 + $0x108] sm:$0xff]  }
  0xfe   : > { %v6515_v50 = vld [vmem:[%s7962_s8 + $0x120] ss:$36 sps:$4 sm:$0xff]   ;;  %v6517_v53 = vld [vmem:[%s7960_s7 + $0xf8] sm:$0xff]   ;;  %v6518_v57 = vld [vmem:[%s7960_s7 + $0xf0] sm:$0xff]  }
  0xff   : > { %3431 = vmatpush1.bf16.msra.mxu0 %v6464_v6  ;;  %6404 = vmatpush1.bf16.msra.mxu1 %v6464_v6  ;;  %v6516_v51 = vld [vmem:[%s7962_s8 + $0x7e0] ss:$36 sps:$4 sm:$0xff]   ;;  %v6524_v58 = vld [vmem:[%s7962_s8 + $0x168] ss:$36 sps:$4 sm:$0xff]   ;;  %v6528_v61 = vld [vmem:[%s7962_s8 + $0x1b4] ss:$36 sps:$4 sm:$0xff]  }
 0x100   : > { %3432 = vmatprep.subr.bf16.mxu0 %v7245_v2  ;;  %6389 = vmatprep.subr.bf16.mxu1 %v7245_v2  ;;  %v6567_v56 = vld [vmem:[%s7960_s7 + $0x100] sm:$0xff]   ;;  %v6525_v59 = vld [vmem:[%s7962_s8 + $0x828] ss:$36 sps:$4 sm:$0xff]   ;;  %v6530_v62 = vld [vmem:[%s7962_s8 + $0x874] ss:$36 sps:$4 sm:$0xff]  }
 0x101   : > { %v6526_v60 = vld [vmem:[%s7960_s7 + $0xe8] sm:$0xff]   ;;  %v6580_v63 = vld [vmem:[%s7960_s7 + $0x178] sm:$0xff]   ;;  %v6527_v0 = vld [vmem:[%s7960_s7 + $0xe0] sm:$0xff]  }
 0x102   : > { %v6532_v1 = vld [vmem:[%s7962_s8 + $0x1b0] ss:$36 sps:$4 sm:$0xff]   ;;  %v6534_v5 = vld [vmem:[%s7960_s7 + $0xd8] sm:$0xff]  }
 0x103   : > { %3433 = vmatpush1.bf16.msra.mxu0 %v6465_v8  ;;  %6405 = vmatpush1.bf16.msra.mxu1 %v6465_v8  ;;  %v6533_v3 = vld [vmem:[%s7962_s8 + $0x870] ss:$36 sps:$4 sm:$0xff]   ;;  %v6537_v6 = vld [vmem:[%s7962_s8 + $0x1fc] ss:$36 sps:$4 sm:$0xff]   ;;  %v6602_v8 = vld [vmem:[%s7960_s7 + $0x168] sm:$0xff]  }
 0x104   : > { %3434 = vmatprep.subr.bf16.mxu0 %v7245_v2  ;;  %6390 = vmatprep.subr.bf16.mxu1 %v7245_v2  ;;  %v6588_v4 = vld [vmem:[%s7960_s7 + $0x170] sm:$0xff]   ;;  %v6539_v7 = vld [vmem:[%s7962_s8 + $0x8bc] ss:$36 sps:$4 sm:$0xff]  }
 0x105   : > { %v6536_v9 = vld [vmem:[%s7960_s7 + $0xd0] sm:$0xff]  }
 0x107   : > { %3435 = vmatpush1.bf16.msra.mxu0 %v6466_v10  ;;  %6406 = vmatpush1.bf16.msra.mxu1 %v6466_v10  ;;  %v6541_v10 = vld [vmem:[%s7962_s8 + $0x1f8] ss:$36 sps:$4 sm:$0xff]  }
 0x108   : > { %3436 = vmatprep.subr.bf16.mxu0 %v7245_v2  ;;  %6391 = vmatprep.subr.bf16.mxu1 %v7245_v2 }
 0x10b   : > { %3437 = vmatpush1.bf16.msra.mxu0 %v6467_v11  ;;  %6407 = vmatpush1.bf16.msra.mxu1 %v6467_v11  ;;  %v6542_v11 = vld [vmem:[%s7962_s8 + $0x8b8] ss:$36 sps:$4 sm:$0xff]  }
 0x10c   : > { %3438 = vmatprep.subr.bf16.mxu0 %v7245_v2  ;;  %6392 = vmatprep.subr.bf16.mxu1 %v7245_v2 }
 0x10f   : > { %3439 = vmatpush2.bf16.msra.mxu0 %v6468_v12  ;;  %6408 = vmatpush2.bf16.msra.mxu1 %v6468_v12  ;;  %v6543_v12 = vld [vmem:[%s7960_s7 + $0xc8] sm:$0xff]  }
 0x110   : > { %3440 = vmatprep.subr.bf16.mxu0 %v7245_v2  ;;  %6393 = vmatprep.subr.bf16.mxu1 %v7245_v2 }
 0x113   : > { %3441 = vmatpush2.bf16.msra.mxu0 %v6469_v13  ;;  %6409 = vmatpush2.bf16.msra.mxu1 %v6469_v13  ;;  %v6546_v13 = vld [vmem:[%s7962_s8 + $0x244] ss:$36 sps:$4 sm:$0xff]  }
 0x114   : > { %3442 = vmatprep.subr.bf16.mxu0 %v7245_v2  ;;  %6394 = vmatprep.subr.bf16.mxu1 %v7245_v2 }
 0x117   : > { %3443 = vmatpush2.bf16.msra.mxu0 %v6470_v14  ;;  %6410 = vmatpush2.bf16.msra.mxu1 %v6470_v14  ;;  %v6550_v14 = vld [vmem:[%s7962_s8 + $0xc] ss:$36 sps:$4 sm:$0xff]  }
 0x118   : > { %3444 = vmatprep.subr.bf16.mxu0 %v7245_v2  ;;  %6395 = vmatprep.subr.bf16.mxu1 %v7245_v2 }
 0x11b   : > { %3445 = vmatpush2.bf16.msra.mxu0 %v6471_v15  ;;  %6411 = vmatpush2.bf16.msra.mxu1 %v6471_v15  ;;  %v6610_v15 = vld [vmem:[%s7960_s7 + $0x160] sm:$0xff]  }
 0x11c   : > { %3446 = vmatprep.subr.bf16.mxu0 %v7245_v2  ;;  %6396 = vmatprep.subr.bf16.mxu1 %v7245_v2 }
 0x11f   : > { %3447 = vmatpush2.bf16.msra.mxu0 %v6472_v16  ;;  %6412 = vmatpush2.bf16.msra.mxu1 %v6472_v16  ;;  %v6544_v16 = vld [vmem:[%s7960_s7 + $0xc0] sm:$0xff]  }
 0x120   : > { %3448 = vmatprep.subr.bf16.mxu0 %v7245_v2  ;;  %6397 = vmatprep.subr.bf16.mxu1 %v7245_v2 }
 0x123   : > { %3449 = vmatpush2.bf16.msra.mxu0 %v6473_v17  ;;  %6413 = vmatpush2.bf16.msra.mxu1 %v6473_v17  ;;  %v6623_v17 = vld [vmem:[%s7960_s7 + $0x158] sm:$0xff]  }
 0x124   : > { %3450 = vmatprep.subr.bf16.mxu0 %v7245_v2  ;;  %6398 = vmatprep.subr.bf16.mxu1 %v7245_v2 }
 0x127   : > { %3451 = vmatpush2.bf16.msra.mxu0 %v6474_v18  ;;  %6414 = vmatpush2.bf16.msra.mxu1 %v6474_v18  ;;  %v6548_v18 = vld [vmem:[%s7962_s8 + $0x8] ss:$36 sps:$4 sm:$0xff]  }
 0x128   : > { %3452 = vmatprep.subr.bf16.mxu0 %v7245_v2  ;;  %6399 = vmatprep.subr.bf16.mxu1 %v7245_v2 }
 0x12b   : > { %3453 = vmatpush2.bf16.msra.mxu0 %v6475_v19  ;;  %6415 = vmatpush2.bf16.msra.mxu1 %v6475_v19  ;;  %v6551_v19 = vld [vmem:[%s7962_s8 + $0x240] ss:$36 sps:$4 sm:$0xff]  }
 0x12c   : > { %3711 = vmatprep.subr.bf16.mxu1 %v7245_v2  ;;  %4000 = vmatprep.subr.bf16.mxu0 %v7245_v2 }
 0x12e   : > { %3455 = vmatmul.mubr.bf16.vlgmr.msra.gmra.mxu0 %v6476_v20  ;;  %3647 = vmatmul.mubr.bf16.vlgmr.msra.gmra.mxu1 %v6479_v21  ;;  %v6552_v20 = vld [vmem:[%s7960_s7 + $0x1b8] sm:$0xff]   ;;  %v6553_v21 = vld [vmem:[%s7962_s8 + $0x28c] ss:$36 sps:$4 sm:$0xff]  }
 0x12f   : > { %3712 = vmatpush1.bf16.msra.mxu1 %v6482_v22  ;;  %4001 = vmatpush1.bf16.msra.mxu0 %v6483_v23  ;;  %v6555_v22 = vld [vmem:[%s7962_s8 + $0x54] ss:$36 sps:$4 sm:$0xff]  }
 0x130   : > { %3713 = vmatprep.subr.bf16.mxu1 %v7245_v2  ;;  %3462 = vmatprep.mubr.bf16.mxu0 %v6485_v24  ;;  %v6566_v23 = vld [vmem:[%s7960_s7 + $0x1b0] sm:$0xff]  }
 0x131   : > { %3654 = vmatprep.mubr.bf16.mxu1 %v6487_v25  ;;  %4002 = vmatprep.subr.bf16.mxu0 %v7245_v2  ;;  %v6631_v24 = vld [vmem:[%s7960_s7 + $0x150] sm:$0xff]   ;;  %v6557_v25 = vld [vmem:[%s7962_s8 + $0x288] ss:$36 sps:$4 sm:$0xff]  }
 0x133   : > { %3714 = vmatpush1.bf16.msra.mxu1 %v6484_v26  ;;  %4003 = vmatpush1.bf16.msra.mxu0 %v6493_v27  ;;  %v6558_v26 = vld [vmem:[%s7962_s8 + $0x50] ss:$36 sps:$4 sm:$0xff]  }
 0x134   : > { %3715 = vmatprep.subr.bf16.mxu1 %v7245_v2  ;;  %4004 = vmatprep.subr.bf16.mxu0 %v7245_v2  ;;  %v6560_v27 = vld [vmem:[%s7962_s8 + $0x2d4] ss:$36 sps:$4 sm:$0xff]  }
 0x136   : > { %3463 = vmatmul.mubr.bf16.gmra.mxu0 %v6489_v28  ;;  %3655 = vmatmul.mubr.bf16.gmra.mxu1 %v6490_v29  ;;  %v6562_v28 = vld [vmem:[%s7962_s8 + $0x9c] ss:$36 sps:$4 sm:$0xff]   ;;  %v6581_v29 = vld [vmem:[%s7960_s7 + $0x1a8] sm:$0xff]  }
 0x137   : > { %3716 = vmatpush1.bf16.msra.mxu1 %v6491_v30  ;;  %3470 = vmatprep.mubr.bf16.mxu0 %v6494_v31  ;;  %v6645_v30 = vld [vmem:[%s7960_s7 + $0x148] sm:$0xff]   ;;  %v6595_v31 = vld [vmem:[%s7960_s7 + $0x1a0] sm:$0xff]  }
 0x138   : > { %3717 = vmatprep.subr.bf16.mxu1 %v7245_v2  ;;  %3662 = vmatprep.mubr.bf16.mxu1 %v6496_v32  ;;  %v6653_v32 = vld [vmem:[%s7960_s7 + $0x140] sm:$0xff]  }
 0x139   : > { %4005 = vmatpush1.bf16.msra.mxu0 %v6509_v33  ;;  %v8190_v33 = vld [vmem:[%s7960_s7 + $0x238] sm:$0xff]  }
 0x13a   : > { %4006 = vmatprep.subr.bf16.mxu0 %v7245_v2 }
 0x13b   : > { %3718 = vmatpush1.bf16.msra.mxu1 %v6492_v34  ;;  %v6564_v34 = vld [vmem:[%s7962_s8 + $0x2d0] ss:$36 sps:$4 sm:$0xff]  }
 0x13c   : > { %3719 = vmatprep.subr.bf16.mxu1 %v7245_v2 }
 0x13d   : > { %4007 = vmatpush1.bf16.msra.mxu0 %v6519_v37  ;;  %v6570_v37 = vld [vmem:[%s7962_s8 + $0xe4] ss:$36 sps:$4 sm:$0xff]  }
 0x13e   : > { %3471 = vmatmul.mubr.bf16.gmra.mxu0 %v6498_v35  ;;  %3663 = vmatmul.mubr.bf16.gmra.mxu1 %v6499_v36  ;;  %v6565_v35 = vld [vmem:[%s7962_s8 + $0x98] ss:$36 sps:$4 sm:$0xff]  }
 0x13f   : > { %3720 = vmatpush1.bf16.msra.mxu1 %v6500_v38  ;;  %3478 = vmatprep.mubr.bf16.mxu0 %v6502_v39  ;;  %v6568_v36 = vld [vmem:[%s7962_s8 + $0x31c] ss:$36 sps:$4 sm:$0xff]   ;;  %v6624_v39 = vld [vmem:[%s7960_s7 + $0x190] sm:$0xff]  }
 0x140   : > { %3721 = vmatprep.subr.bf16.mxu1 %v7245_v2  ;;  %3670 = vmatprep.mubr.bf16.mxu1 %v6504_v40  ;;  %v6609_v38 = vld [vmem:[%s7960_s7 + $0x198] sm:$0xff]  }
 0x141   : > { %4008 = vmatprep.subr.bf16.mxu0 %v7245_v2  ;;  %v6572_v40 = vld [vmem:[%s7962_s8 + $0x318] ss:$36 sps:$4 sm:$0xff]  }
 0x142   : > { %4009 = vmatpush1.bf16.msra.mxu0 %v6535_v41  ;;  %v6573_v41 = vld [vmem:[%s7962_s8 + $0xe0] ss:$36 sps:$4 sm:$0xff]  }
 0x143   : > { %3722 = vmatpush1.bf16.msra.mxu1 %v6501_v42  ;;  %4010 = vmatprep.subr.bf16.mxu0 %v7245_v2  ;;  %v6574_v42 = vld [vmem:[%s7962_s8 + $0x364] ss:$36 sps:$4 sm:$0xff]  }
 0x144   : > { %3723 = vmatprep.subr.bf16.mxu1 %v7245_v2 }
 0x146   : > { %3479 = vmatmul.mubr.bf16.gmra.mxu0 %v6506_v43  ;;  %3671 = vmatmul.mubr.bf16.gmra.mxu1 %v6507_v44  ;;  %v6576_v43 = vld [vmem:[%s7962_s8 + $0x12c] ss:$36 sps:$4 sm:$0xff]  }
 0x147   : > { %3724 = vmatpush1.bf16.msra.mxu1 %v6508_v45  ;;  %3486 = vmatprep.mubr.bf16.mxu0 %v6511_v46  ;;  %v6638_v44 = vld [vmem:[%s7960_s7 + $0x188] sm:$0xff]   ;;  %v6652_v45 = vld [vmem:[%s7960_s7 + $0x180] sm:$0xff]  }
 0x148   : > { %3725 = vmatprep.subr.bf16.mxu1 %v7245_v2  ;;  %3678 = vmatprep.mubr.bf16.mxu1 %v6513_v47  ;;  %v6578_v46 = vld [vmem:[%s7962_s8 + $0x360] ss:$36 sps:$4 sm:$0xff]   ;;  %v6579_v47 = vld [vmem:[%s7962_s8 + $0x128] ss:$36 sps:$4 sm:$0xff]  }
 0x149   : > { %4011 = vmatpush1.bf16.msra.mxu0 %v6545_v48  ;;  %v6582_v48 = vld [vmem:[%s7962_s8 + $0x3ac] ss:$36 sps:$4 sm:$0xff]  }
 0x14a   : > { %4012 = vmatprep.subr.bf16.mxu0 %v7245_v2 }
 0x14b   : > { %3726 = vmatpush1.bf16.msra.mxu1 %v6510_v49  ;;  %v6584_v49 = vld [vmem:[%s7962_s8 + $0x174] ss:$36 sps:$4 sm:$0xff]  }
 0x14c   : > { %3727 = vmatprep.subr.bf16.mxu1 %v7245_v2 }
 0x14d   : > { %4013 = vmatpush1.bf16.msra.mxu0 %v6559_v52  ;;  %v6586_v52 = vld [vmem:[%s7962_s8 + $0x3a8] ss:$36 sps:$4 sm:$0xff]  }
 0x14e   : > { %3487 = vmatmul.mubr.bf16.gmra.mxu0 %v6515_v50  ;;  %3679 = vmatmul.mubr.bf16.gmra.mxu1 %v6516_v51  ;;  %v6667_v50 = vld [vmem:[%s7960_s7 + $0x1f8] sm:$0xff]   ;;  %v6680_v51 = vld [vmem:[%s7960_s7 + $0x1f0] sm:$0xff]  }
 0x14f   : > { %3728 = vmatpush2.bf16.msra.mxu1 %v6517_v53  ;;  %3494 = vmatprep.mubr.bf16.mxu0 %v6520_v54  ;;  %v6587_v53 = vld [vmem:[%s7962_s8 + $0x170] ss:$36 sps:$4 sm:$0xff]  }
 0x150   : > { %3729 = vmatprep.subr.bf16.mxu1 %v7245_v2  ;;  %3686 = vmatprep.mubr.bf16.mxu1 %v6522_v55  ;;  %v6589_v54 = vld [vmem:[%s7962_s8 + $0x3f4] ss:$36 sps:$4 sm:$0xff]   ;;  %v6591_v55 = vld [vmem:[%s7962_s8 + $0x1bc] ss:$36 sps:$4 sm:$0xff]  }
 0x151   : > { %4014 = vmatprep.subr.bf16.mxu0 %v7245_v2 }
 0x152   : > { %4015 = vmatpush1.bf16.msra.mxu0 %v6567_v56  ;;  %v6694_v56 = vld [vmem:[%s7960_s7 + $0x1e8] sm:$0xff]  }
 0x153   : > { %3730 = vmatpush2.bf16.msra.mxu1 %v6518_v57  ;;  %4016 = vmatprep.subr.bf16.mxu0 %v7245_v2  ;;  %v6593_v57 = vld [vmem:[%s7962_s8 + $0x3f0] ss:$36 sps:$4 sm:$0xff]  }
 0x154   : > { %3731 = vmatprep.subr.bf16.mxu1 %v7245_v2 }
 0x156   : > { %3495 = vmatmul.mubr.bf16.gmra.mxu0 %v6524_v58  ;;  %3687 = vmatmul.mubr.bf16.gmra.mxu1 %v6525_v59  ;;  %v6594_v58 = vld [vmem:[%s7962_s8 + $0x1b8] ss:$36 sps:$4 sm:$0xff]  }
 0x157   : > { %3732 = vmatpush2.bf16.msra.mxu1 %v6526_v60  ;;  %3502 = vmatprep.mubr.bf16.mxu0 %v6528_v61  ;;  %v6596_v59 = vld [vmem:[%s7962_s8 + $0x43c] ss:$36 sps:$4 sm:$0xff]   ;;  %v6598_v60 = vld [vmem:[%s7962_s8 + $0x204] ss:$36 sps:$4 sm:$0xff]  }
 0x158   : > { %3733 = vmatprep.subr.bf16.mxu1 %v7245_v2  ;;  %3694 = vmatprep.mubr.bf16.mxu1 %v6530_v62  ;;  %v6707_v61 = vld [vmem:[%s7960_s7 + $0x1e0] sm:$0xff]   ;;  %v6600_v62 = vld [vmem:[%s7962_s8 + $0x438] ss:$36 sps:$4 sm:$0xff]  }
 0x159   : > { %4017 = vmatpush2.bf16.msra.mxu0 %v6580_v63  ;;  %v6601_v63 = vld [vmem:[%s7962_s8 + $0x200] ss:$36 sps:$4 sm:$0xff]  }
 0x15a   : > { %4018 = vmatprep.subr.bf16.mxu0 %v7245_v2 }
 0x15b   : > { %3734 = vmatpush2.bf16.msra.mxu1 %v6527_v0  ;;  %v6603_v0 = vld [vmem:[%s7962_s8 + $0x484] ss:$36 sps:$4 sm:$0xff]  }
 0x15c   : > { %3735 = vmatprep.subr.bf16.mxu1 %v7245_v2 }
 0x15d   : > { %4019 = vmatpush2.bf16.msra.mxu0 %v6588_v4  ;;  %v6608_v4 = vld [vmem:[%s7962_s8 + $0x248] ss:$36 sps:$4 sm:$0xff]  }
 0x15e   : > { %3503 = vmatmul.mubr.bf16.gmra.mxu0 %v6532_v1  ;;  %3695 = vmatmul.mubr.bf16.gmra.mxu1 %v6533_v3  ;;  %v6605_v1 = vld [vmem:[%s7962_s8 + $0x24c] ss:$36 sps:$4 sm:$0xff]   ;;  %v6607_v3 = vld [vmem:[%s7962_s8 + $0x480] ss:$36 sps:$4 sm:$0xff]  }
 0x15f   : > { %3736 = vmatpush2.bf16.msra.mxu1 %v6534_v5  ;;  %3510 = vmatprep.mubr.bf16.mxu0 %v6537_v6  ;;  %v6611_v5 = vld [vmem:[%s7962_s8 + $0x4cc] ss:$36 sps:$4 sm:$0xff]   ;;  %v6613_v6 = vld [vmem:[%s7962_s8 + $0x294] ss:$36 sps:$4 sm:$0xff]  }
 0x160   : > { %3737 = vmatprep.subr.bf16.mxu1 %v7245_v2  ;;  %3702 = vmatprep.mubr.bf16.mxu1 %v6539_v7  ;;  %v6721_v7 = vld [vmem:[%s7960_s7 + $0x1d8] sm:$0xff]  }
 0x161   : > { %4020 = vmatprep.subr.bf16.mxu0 %v7245_v2 }
 0x162   : > { %4021 = vmatpush2.bf16.msra.mxu0 %v6602_v8  ;;  %v6615_v8 = vld [vmem:[%s7962_s8 + $0x4c8] ss:$36 sps:$4 sm:$0xff]  }
 0x163   : > { %3738 = vmatpush2.bf16.msra.mxu1 %v6536_v9  ;;  %4022 = vmatprep.subr.bf16.mxu0 %v7245_v2  ;;  %v6616_v9 = vld [vmem:[%s7962_s8 + $0x290] ss:$36 sps:$4 sm:$0xff]  }
 0x164   : > { %3739 = vmatprep.subr.bf16.mxu1 %v7245_v2 }
 0x166   : > { %3511 = vmatmul.mubr.bf16.gmra.mxu0 %v6541_v10  ;;  %3703 = vmatmul.mubr.bf16.gmra.mxu1 %v6542_v11  ;;  %v6617_v10 = vld [vmem:[%s7962_s8 + $0x514] ss:$36 sps:$4 sm:$0xff]   ;;  %v6619_v11 = vld [vmem:[%s7962_s8 + $0x2dc] ss:$36 sps:$4 sm:$0xff]  }
 0x167   : > { %3740 = vmatpush2.bf16.msra.mxu1 %v6543_v12  ;;  %3518 = vmatprep.mubr.bf16.mxu0 %v6546_v13  ;;  %v6621_v12 = vld [vmem:[%s7962_s8 + $0x510] ss:$36 sps:$4 sm:$0xff]   ;;  %v6622_v13 = vld [vmem:[%s7962_s8 + $0x2d8] ss:$36 sps:$4 sm:$0xff]  }
 0x168   : > { %3741 = vmatprep.subr.bf16.mxu1 %v7245_v2  ;;  %3743 = vmatprep.mubr.bf16.mxu1 %v6550_v14  ;;  %v6625_v14 = vld [vmem:[%s7962_s8 + $0x55c] ss:$36 sps:$4 sm:$0xff]  }
 0x169   : > { %4023 = vmatpush2.bf16.msra.mxu0 %v6610_v15  ;;  %v6627_v15 = vld [vmem:[%s7962_s8 + $0x324] ss:$36 sps:$4 sm:$0xff]  }
 0x16a   : > { %4024 = vmatprep.subr.bf16.mxu0 %v7245_v2 }
 0x16b   : > { %3742 = vmatpush2.bf16.msra.mxu1 %v6544_v16  ;;  %v6734_v16 = vld [vmem:[%s7960_s7 + $0x1d0] sm:$0xff]  }
 0x16c   : > { %4289 = vmatprep.subr.bf16.mxu1 %v7245_v2 }
 0x16d   : > { %4025 = vmatpush2.bf16.msra.mxu0 %v6623_v17  ;;  %v6629_v17 = vld [vmem:[%s7962_s8 + $0x558] ss:$36 sps:$4 sm:$0xff]  }
 0x16e   : > { %3519 = vmatmul.mubr.bf16.gmra.mxu0 %v6551_v19  ;;  %3744 = vmatmul.mubr.bf16.vlgmr.msra.gmra.mxu1 %v6548_v18  ;;  %v6630_v18 = vld [vmem:[%s7962_s8 + $0x320] ss:$36 sps:$4 sm:$0xff]  }
 0x16f   : > { %4290 = vmatpush1.bf16.msra.mxu1 %v6552_v20  ;;  %3526 = vmatprep.mubr.bf16.mxu0 %v6553_v21  ;;  %v6632_v19 = vld [vmem:[%s7962_s8 + $0x5a4] ss:$36 sps:$4 sm:$0xff]   ;;  %v6634_v20 = vld [vmem:[%s7962_s8 + $0x36c] ss:$36 sps:$4 sm:$0xff]  }
 0x170   : > { %3751 = vmatprep.mubr.bf16.mxu1 %v6555_v22  ;;  %4291 = vmatprep.subr.bf16.mxu1 %v7245_v2  ;;  %v6636_v21 = vld [vmem:[%s7962_s8 + $0x5a0] ss:$36 sps:$4 sm:$0xff]   ;;  %v6637_v22 = vld [vmem:[%s7962_s8 + $0x368] ss:$36 sps:$4 sm:$0xff]  }
 0x171   : > { %4026 = vmatprep.subr.bf16.mxu0 %v7245_v2 }
 0x172   : > { %4027 = vmatpush2.bf16.msra.mxu0 %v6631_v24  ;;  %v6641_v24 = vld [vmem:[%s7962_s8 + $0x3b4] ss:$36 sps:$4 sm:$0xff]  }
 0x173   : > { %4292 = vmatpush1.bf16.msra.mxu1 %v6566_v23  ;;  %4028 = vmatprep.subr.bf16.mxu0 %v7245_v2  ;;  %v6639_v23 = vld [vmem:[%s7962_s8 + $0x5ec] ss:$36 sps:$4 sm:$0xff]  }
 0x174   : > { %4293 = vmatprep.subr.bf16.mxu1 %v7245_v2 }
 0x176   : > { %3527 = vmatmul.mubr.bf16.gmra.mxu0 %v6557_v25  ;;  %3752 = vmatmul.mubr.bf16.gmra.mxu1 %v6558_v26  ;;  %v6748_v25 = vld [vmem:[%s7960_s7 + $0x1c8] sm:$0xff]  }
 0x177   : > { %3534 = vmatprep.mubr.bf16.mxu0 %v6560_v27  ;;  %3759 = vmatprep.mubr.bf16.mxu1 %v6562_v28  ;;  %v6643_v26 = vld [vmem:[%s7962_s8 + $0x5e8] ss:$36 sps:$4 sm:$0xff]   ;;  %v6644_v27 = vld [vmem:[%s7962_s8 + $0x3b0] ss:$36 sps:$4 sm:$0xff]  }
 0x178   : > { %4294 = vmatpush1.bf16.msra.mxu1 %v6581_v29  ;;  %4029 = vmatpush2.bf16.msra.mxu0 %v6645_v30  ;;  %v6646_v28 = vld [vmem:[%s7962_s8 + $0x634] ss:$36 sps:$4 sm:$0xff]   ;;  %v6648_v29 = vld [vmem:[%s7962_s8 + $0x3fc] ss:$36 sps:$4 sm:$0xff]  }
 0x179   : > { %4295 = vmatprep.subr.bf16.mxu1 %v7245_v2  ;;  %4030 = vmatprep.subr.bf16.mxu0 %v7245_v2  ;;  %v6650_v30 = vld [vmem:[%s7962_s8 + $0x630] ss:$36 sps:$4 sm:$0xff]  }
 0x17c   : > { %4296 = vmatpush1.bf16.msra.mxu1 %v6595_v31  ;;  %4031 = vmatpush2.bf16.msra.mxu0 %v6653_v32  ;;  %v6651_v31 = vld [vmem:[%s7962_s8 + $0x3f8] ss:$36 sps:$4 sm:$0xff]  }
 0x17d   : > { %4297 = vmatprep.subr.bf16.mxu1 %v7245_v2  ;;  %6304 = vmatprep.subr.bf16.mxu0 %v8190_v33  ;;  %v6654_v32 = vld [vmem:[%s7962_s8 + $0x67c] ss:$36 sps:$4 sm:$0xff]  }
 0x17e   : > { %3535 = vmatmul.mubr.bf16.gmra.mxu0 %v6564_v34  ;;  %3760 = vmatmul.mubr.bf16.gmra.mxu1 %v6565_v35  ;;  %v6656_v34 = vld [vmem:[%s7962_s8 + $0x444] ss:$36 sps:$4 sm:$0xff]   ;;  %v6658_v35 = vld [vmem:[%s7962_s8 + $0x678] ss:$36 sps:$4 sm:$0xff]  }
 0x17f   : > { %3542 = vmatprep.mubr.bf16.mxu0 %v6568_v36  ;;  %3767 = vmatprep.mubr.bf16.mxu1 %v6570_v37  ;;  %v6659_v36 = vld [vmem:[%s7962_s8 + $0x440] ss:$36 sps:$4 sm:$0xff]   ;;  %v6660_v37 = vld [vmem:[%s7962_s8 + $0x48c] ss:$36 sps:$4 sm:$0xff]  }
 0x180   : > { %4298 = vmatpush1.bf16.msra.mxu1 %v6609_v38  ;;  %v6664_v38 = vld [vmem:[%s7962_s8 + $0x14] ss:$36 sps:$4 sm:$0xff]  }
 0x181   : > { %4299 = vmatprep.subr.bf16.mxu1 %v7245_v2 }
 0x184   : > { %4300 = vmatpush1.bf16.msra.mxu1 %v6624_v39  ;;  %v6662_v39 = vld [vmem:[%s7962_s8 + $0x10] ss:$36 sps:$4 sm:$0xff]  }
 0x185   : > { %4301 = vmatprep.subr.bf16.mxu1 %v7245_v2 }
 0x186   : > { %3543 = vmatmul.mubr.bf16.gmra.mxu0 %v6572_v40  ;;  %3768 = vmatmul.mubr.bf16.gmra.mxu1 %v6573_v41  ;;  %v6665_v40 = vld [vmem:[%s7962_s8 + $0x488] ss:$36 sps:$4 sm:$0xff]   ;;  %v6668_v41 = vld [vmem:[%s7962_s8 + $0x4d4] ss:$36 sps:$4 sm:$0xff]  }
 0x187   : > { %3550 = vmatprep.mubr.bf16.mxu0 %v6574_v42  ;;  %3775 = vmatprep.mubr.bf16.mxu1 %v6576_v43  ;;  %v6670_v42 = vld [vmem:[%s7962_s8 + $0x5c] ss:$36 sps:$4 sm:$0xff]   ;;  %v6693_v43 = vld [vmem:[%s7960_s7 + $0x230] sm:$0xff]  }
 0x188   : > { %4302 = vmatpush1.bf16.msra.mxu1 %v6638_v44 }
 0x189   : > { %4303 = vmatprep.subr.bf16.mxu1 %v7245_v2 }
 0x18c   : > { %4304 = vmatpush1.bf16.msra.mxu1 %v6652_v45 }
 0x18d   : > { %4305 = vmatprep.subr.bf16.mxu1 %v7245_v2 }
 0x18e   : > { %3551 = vmatmul.mubr.bf16.gmra.mxu0 %v6578_v46  ;;  %3776 = vmatmul.mubr.bf16.gmra.mxu1 %v6579_v47 }
 0x18f   : > { %3558 = vmatprep.mubr.bf16.mxu0 %v6582_v48  ;;  %3783 = vmatprep.mubr.bf16.mxu1 %v6584_v49  ;;  %v6720_v48 = vld [vmem:[%s7960_s7 + $0x228] sm:$0xff]  }
 0x190   : > { %4306 = vmatpush2.bf16.msra.mxu1 %v6667_v50 }
 0x191   : > { %4307 = vmatprep.subr.bf16.mxu1 %v7245_v2 }
 0x194   : > { %4308 = vmatpush2.bf16.msra.mxu1 %v6680_v51  ;;  %v6672_v51 = vld [vmem:[%s7962_s8 + $0x4d0] ss:$36 sps:$4 sm:$0xff]  }
 0x195   : > { %4309 = vmatprep.subr.bf16.mxu1 %v7245_v2 }
 0x196   : > { %3559 = vmatmul.mubr.bf16.gmra.mxu0 %v6586_v52  ;;  %3784 = vmatmul.mubr.bf16.gmra.mxu1 %v6587_v53  ;;  %v6673_v52 = vld [vmem:[%s7962_s8 + $0x58] ss:$36 sps:$4 sm:$0xff]  }
 0x197   : > { %3566 = vmatprep.mubr.bf16.mxu0 %v6589_v54  ;;  %3791 = vmatprep.mubr.bf16.mxu1 %v6591_v55  ;;  %v6674_v53 = vld [vmem:[%s7962_s8 + $0x51c] ss:$36 sps:$4 sm:$0xff]   ;;  %v6676_v54 = vld [vmem:[%s7962_s8 + $0xa4] ss:$36 sps:$4 sm:$0xff]  }
 0x198   : > { %4310 = vmatpush2.bf16.msra.mxu1 %v6694_v56 }
 0x199   : > { %4311 = vmatprep.subr.bf16.mxu1 %v7245_v2 }
 0x19c   : > { %4312 = vmatpush2.bf16.msra.mxu1 %v6707_v61  ;;  %v6774_v61 = vld [vmem:[%s7960_s7 + $0x218] sm:$0xff]  }
 0x19d   : > { %4313 = vmatprep.subr.bf16.mxu1 %v7245_v2 }
 0x19e   : > { %3567 = vmatmul.mubr.bf16.gmra.mxu0 %v6593_v57  ;;  %3792 = vmatmul.mubr.bf16.gmra.mxu1 %v6594_v58 }
 0x19f   : > { %3574 = vmatprep.mubr.bf16.mxu0 %v6596_v59  ;;  %3799 = vmatprep.mubr.bf16.mxu1 %v6598_v60 }
 0x1a0   : > { %4314 = vmatpush2.bf16.msra.mxu1 %v6721_v7 }
 0x1a1   : > { %4315 = vmatprep.subr.bf16.mxu1 %v7245_v2 }
 0x1a4   : > { %4316 = vmatpush2.bf16.msra.mxu1 %v6734_v16  ;;  %v6692_v16 = vld [vmem:[%s7962_s8 + $0x134] ss:$36 sps:$4 sm:$0xff]  }
 0x1a5   : > { %4317 = vmatprep.subr.bf16.mxu1 %v7245_v2 }
 0x1a6   : > { %3575 = vmatmul.mubr.bf16.gmra.mxu0 %v6600_v62  ;;  %3800 = vmatmul.mubr.bf16.gmra.mxu1 %v6601_v63 }
 0x1a7   : > { %3582 = vmatprep.mubr.bf16.mxu0 %v6603_v0  ;;  %3807 = vmatprep.mubr.bf16.mxu1 %v6605_v1  ;;  %v6678_v0 = vld [vmem:[%s7962_s8 + $0x518] ss:$36 sps:$4 sm:$0xff]   ;;  %v6679_v1 = vld [vmem:[%s7962_s8 + $0xa0] ss:$36 sps:$4 sm:$0xff]  }
 0x1a8   : > { %4318 = vmatpush2.bf16.msra.mxu1 %v6748_v25  ;;  %v6687_v25 = vld [vmem:[%s7962_s8 + $0x5a8] ss:$36 sps:$4 sm:$0xff]  }
 0x1a9   : > { %4319 = vmatprep.subr.bf16.mxu1 %v7245_v2  ;;  %v6761_v2 = vld [vmem:[%s7960_s7 + $0x1c0] sm:$0xff]  }
 0x1ac   : > { %4320 = vmatpush2.bf16.msra.mxu1 %v6761_v2 }
 0x1ae   : > { %3583 = vmatmul.mubr.bf16.gmra.mxu0 %v6607_v3  ;;  %3808 = vmatmul.mubr.bf16.gmra.mxu1 %v6608_v4  ;;  %v6681_v3 = vld [vmem:[%s7962_s8 + $0x564] ss:$36 sps:$4 sm:$0xff]   ;;  %v6683_v4 = vld [vmem:[%s7962_s8 + $0xec] ss:$36 sps:$4 sm:$0xff]  }
 0x1af   : > { %3590 = vmatprep.mubr.bf16.mxu0 %v6611_v5  ;;  %3815 = vmatprep.mubr.bf16.mxu1 %v6613_v6 }
 0x1b6   : > { %3591 = vmatmul.mubr.bf16.gmra.mxu0 %v6615_v8  ;;  %3816 = vmatmul.mubr.bf16.gmra.mxu1 %v6616_v9 }
 0x1b7   : > { %3598 = vmatprep.mubr.bf16.mxu0 %v6617_v10  ;;  %3823 = vmatprep.mubr.bf16.mxu1 %v6619_v11 }
 0x1be   : > { %3599 = vmatmul.mubr.bf16.gmra.mxu0 %v6621_v12  ;;  %3824 = vmatmul.mubr.bf16.gmra.mxu1 %v6622_v13  ;;  %v6685_v13 = vld [vmem:[%s7962_s8 + $0x560] ss:$36 sps:$4 sm:$0xff]  }
 0x1bf   : > { %3606 = vmatprep.mubr.bf16.mxu0 %v6625_v14  ;;  %3831 = vmatprep.mubr.bf16.mxu1 %v6627_v15  ;;  %v6686_v14 = vld [vmem:[%s7962_s8 + $0xe8] ss:$36 sps:$4 sm:$0xff]  }
 0x1c0   : > { %v6689_v15 = vld [vmem:[%s7962_s8 + $0x5ac] ss:$36 sps:$4 sm:$0xff]  }
 0x1c6   : > { %3607 = vmatmul.mubr.bf16.gmra.mxu0 %v6629_v17  ;;  %3832 = vmatmul.mubr.bf16.gmra.mxu1 %v6630_v18 }
 0x1c7   : > { %3614 = vmatprep.mubr.bf16.mxu0 %v6632_v19  ;;  %3839 = vmatprep.mubr.bf16.mxu1 %v6634_v20 }
 0x1ce   : > { %3615 = vmatmul.mubr.bf16.gmra.mxu0 %v6636_v21  ;;  %3840 = vmatmul.mubr.bf16.gmra.mxu1 %v6637_v22 }
 0x1cf   : > { %3622 = vmatprep.mubr.bf16.mxu0 %v6639_v23  ;;  %3847 = vmatprep.mubr.bf16.mxu1 %v6641_v24 }
 0x1d6   : > { %3623 = vmatmul.mubr.bf16.gmra.mxu0 %v6643_v26  ;;  %3848 = vmatmul.mubr.bf16.gmra.mxu1 %v6644_v27  ;;  %v6690_v26 = vld [vmem:[%s7962_s8 + $0x130] ss:$36 sps:$4 sm:$0xff]  }
 0x1d7   : > { %3630 = vmatprep.mubr.bf16.mxu0 %v6646_v28  ;;  %3855 = vmatprep.mubr.bf16.mxu1 %v6648_v29  ;;  %v6697_v27 = vld [vmem:[%s7962_s8 + $0x5f4] ss:$36 sps:$4 sm:$0xff]   ;;  %v6700_v28 = vld [vmem:[%s7962_s8 + $0x17c] ss:$36 sps:$4 sm:$0xff]  }
 0x1de   : > { %3631 = vmatmul.mubr.bf16.gmra.mxu0 %v6650_v30  ;;  %3856 = vmatmul.mubr.bf16.gmra.mxu1 %v6651_v31 }
 0x1df   : > { %3638 = vmatprep.mubr.bf16.mxu0 %v6654_v32  ;;  %3863 = vmatprep.mubr.bf16.mxu1 %v6656_v34  ;;  %v6799_v34 = vld [vmem:[%s7960_s7 + $0x210] sm:$0xff]  }
 0x1e6   : > { %3639 = vmatmul.mubr.bf16.gmra.mxu0 %v6658_v35  ;;  %3864 = vmatmul.mubr.bf16.gmra.mxu1 %v6659_v36 }
 0x1e7   : > { %3871 = vmatprep.mubr.bf16.mxu1 %v6660_v37  ;;  %4032 = vmatprep.mubr.bf16.mxu0 %v6664_v38  ;;  %v6695_v38 = vld [vmem:[%s7962_s8 + $0x5f0] ss:$36 sps:$4 sm:$0xff]  }
 0x1ee   : > { %v8280_v44 = vpop.f32.mrf.mxu0  ;;  %v8282_v45 = vpop.f32.mrf.mxu1  ;;  %3872 = vmatmul.mubr.bf16.gmra.mxu1 %v6665_v40  ;;  %4033 = vmatmul.mubr.bf16.vlgmr.msra.gmra.mxu0 %v6662_v39  ;;  %v6698_v39 = vld [vmem:[%s7962_s8 + $0x178] ss:$36 sps:$4 sm:$0xff]  }
 0x1ef   : > { %6305 = vmatpush3.bf16.msra.mxu0 %v8190_v33  ;;  %3879 = vmatprep.mubr.bf16.mxu1 %v6668_v41  ;;  %v6747_v33 = vld [vmem:[%s7960_s7 + $0x220] sm:$0xff]  }
 0x1f0   : > { %v3458_v46 = vpop.f32.mrf.mxu0  ;;  %v3650_v47 = vpop.f32.mrf.mxu1  ;;  %4040 = vmatprep.mubr.bf16.mxu0 %v6670_v42  ;;  %6306 = vmatprep.subr.bf16.mxu0 %v6693_v43  ;;  %v6703_v40 = vld [vmem:[%s7962_s8 + $0x63c] ss:$36 sps:$4 sm:$0xff]   ;;  %v6706_v41 = vld [vmem:[%s7962_s8 + $0x1c4] ss:$36 sps:$4 sm:$0xff]  }
 0x1f2   : > { %v8286_v49 = vpop.f32.mrf.mxu0  ;;  %v8288_v50 = vpop.f32.mrf.mxu1 }
 0x1f3   : > { %9492 = vst [vmem:[#allocation4_spill] sm:$0xff] %v8288_v50  ;;  %6307 = vmatpush3.bf16.msra.mxu0 %v6693_v43 }
 0x1f4   : > { %v3461_v55 = vpop.f32.mrf.mxu0  ;;  %v3653_v56 = vpop.f32.mrf.mxu1  ;;  %6308 = vmatprep.subr.bf16.mxu0 %v6720_v48 }
 0x1f5   : > { %v6704_v55 = vld [vmem:[%s7962_s8 + $0x1c0] ss:$36 sps:$4 sm:$0xff]  }
 0x1f6   : > { %v8295_v57 = vpop.f32.mrf.mxu0  ;;  %v8297_v58 = vpop.f32.mrf.mxu1  ;;  %3880 = vmatmul.mubr.bf16.gmra.mxu1 %v6672_v51  ;;  %4041 = vmatmul.mubr.bf16.gmra.mxu0 %v6673_v52  ;;  %v6710_v56 = vld [vmem:[%s7962_s8 + $0x684] ss:$36 sps:$4 sm:$0xff]  }
 0x1f7   : > { %9493 = vst [vmem:[#allocation5_spill] sm:$0xff] %v8297_v58  ;;  %3887 = vmatprep.mubr.bf16.mxu1 %v6674_v53  ;;  %4048 = vmatprep.mubr.bf16.mxu0 %v6676_v54  ;;  %v6701_v54 = vld [vmem:[%s7962_s8 + $0x638] ss:$36 sps:$4 sm:$0xff]   ;;  %v6830_v58 = vld [vmem:[%s7962_s8 + $0x2a4] ss:$36 sps:$4 sm:$0xff]  }
 0x1f8   : > { %v3466_v59 = vpop.f32.mrf.mxu0  ;;  %v3658_v60 = vpop.f32.mrf.mxu1  ;;  %6309 = vmatpush3.bf16.msra.mxu0 %v6720_v48 }
 0x1f9   : > { %6310 = vmatprep.subr.bf16.mxu0 %v6747_v33 }
 0x1fa   : > { %v8300_v62 = vpop.f32.mrf.mxu0  ;;  %v8302_v63 = vpop.f32.mrf.mxu1 }
 0x1fb   : > { %9494 = vst [vmem:[#allocation6_spill] sm:$0xff] %v8302_v63  ;;  %v6827_v63 = vld [vmem:[%s7962_s8 + $0x71c] ss:$36 sps:$4 sm:$0xff]  }
 0x1fc   : > { %v3469_v5 = vpop.f32.mrf.mxu0  ;;  %v3661_v6 = vpop.f32.mrf.mxu1  ;;  %6311 = vmatpush3.bf16.msra.mxu0 %v6747_v33  ;;  %v6713_v33 = vld [vmem:[%s7962_s8 + $0x20c] ss:$36 sps:$4 sm:$0xff]  }
 0x1fd   : > { %6312 = vmatprep.subr.bf16.mxu0 %v6774_v61  ;;  %v6708_v6 = vld [vmem:[%s7962_s8 + $0x680] ss:$36 sps:$4 sm:$0xff]  }
 0x1fe   : > { %v8308_v7 = vpop.f32.mrf.mxu0  ;;  %v8310_v8 = vpop.f32.mrf.mxu1  ;;  %3888 = vmatmul.mubr.bf16.gmra.mxu1 %v6678_v0  ;;  %4049 = vmatmul.mubr.bf16.gmra.mxu0 %v6679_v1 }
 0x1ff   : > { %9495 = vst [vmem:[#allocation7_spill] sm:$0xff] %v8310_v8  ;;  %3895 = vmatprep.mubr.bf16.mxu1 %v6681_v3  ;;  %4056 = vmatprep.mubr.bf16.mxu0 %v6683_v4  ;;  %v6818_v8 = vld [vmem:[%s7962_s8 + $0x6d0] ss:$36 sps:$4 sm:$0xff]  }
 0x200   : > { %v3474_v9 = vpop.f32.mrf.mxu0  ;;  %v3666_v10 = vpop.f32.mrf.mxu1  ;;  %6313 = vmatpush3.bf16.msra.mxu0 %v6774_v61 }
 0x201   : > { %6314 = vmatprep.subr.bf16.mxu0 %v6799_v34  ;;  %v6711_v9 = vld [vmem:[%s7962_s8 + $0x208] ss:$36 sps:$4 sm:$0xff]  }
 0x202   : > { %v8312_v11 = vpop.f32.mrf.mxu0  ;;  %v8314_v12 = vpop.f32.mrf.mxu1  ;;  %v6716_v10 = vld [vmem:[%s7962_s8 + $0x6cc] ss:$36 sps:$4 sm:$0xff]  }
 0x203   : > { %9496 = vst [vmem:[#allocation8_spill] sm:$0xff] %v8314_v12  ;;  %v6820_v12 = vld [vmem:[%s7962_s8 + $0x6d4] ss:$36 sps:$4 sm:$0xff]  }
 0x204   : > { %v3477_v17 = vpop.f32.mrf.mxu0  ;;  %v3669_v18 = vpop.f32.mrf.mxu1  ;;  %6315 = vmatpush3.bf16.msra.mxu0 %v6799_v34 }
 0x206   : > { %v8320_v19 = vpop.f32.mrf.mxu0  ;;  %v8322_v20 = vpop.f32.mrf.mxu1  ;;  %3896 = vmatmul.mubr.bf16.gmra.mxu1 %v6685_v13  ;;  %4057 = vmatmul.mubr.bf16.gmra.mxu0 %v6686_v14  ;;  %v6719_v13 = vld [vmem:[%s7962_s8 + $0x254] ss:$36 sps:$4 sm:$0xff]  }
 0x207   : > { %9497 = vst [vmem:[#allocation9_spill] sm:$0xff] %v8322_v20  ;;  %3903 = vmatprep.mubr.bf16.mxu1 %v6689_v15  ;;  %4064 = vmatprep.mubr.bf16.mxu0 %v6692_v16  ;;  %v6812_v20 = vld [vmem:[%s7962_s8 + $0x688] ss:$36 sps:$4 sm:$0xff]  }
 0x208   : > { %v3482_v21 = vpop.f32.mrf.mxu0  ;;  %v3674_v22 = vpop.f32.mrf.mxu1 }
 0x20a   : > { %v8324_v23 = vpop.f32.mrf.mxu0  ;;  %v8326_v24 = vpop.f32.mrf.mxu1 }
 0x20b   : > { %9498 = vst [vmem:[#allocation10_spill] sm:$0xff] %v8326_v24  ;;  %v6814_v24 = vld [vmem:[%s7962_s8 + $0x68c] ss:$36 sps:$4 sm:$0xff]  }
 0x20c   : > { %v3485_v29 = vpop.f32.mrf.mxu0  ;;  %v3677_v30 = vpop.f32.mrf.mxu1 }
 0x20d   : > { %v6727_v29 = vld [vmem:[%s7962_s8 + $0x29c] ss:$36 sps:$4 sm:$0xff]  }
 0x20e   : > { %v8332_v31 = vpop.f32.mrf.mxu0  ;;  %v8334_v32 = vpop.f32.mrf.mxu1  ;;  %3904 = vmatmul.mubr.bf16.gmra.mxu1 %v6687_v25  ;;  %4065 = vmatmul.mubr.bf16.gmra.mxu0 %v6690_v26  ;;  %v6714_v26 = vld [vmem:[%s7962_s8 + $0x6c8] ss:$36 sps:$4 sm:$0xff]  }
 0x20f   : > { %9499 = vst [vmem:[#allocation11_spill] sm:$0xff] %v8334_v32  ;;  %3911 = vmatprep.mubr.bf16.mxu1 %v6697_v27  ;;  %4072 = vmatprep.mubr.bf16.mxu0 %v6700_v28  ;;  %v6717_v27 = vld [vmem:[%s7962_s8 + $0x250] ss:$36 sps:$4 sm:$0xff]   ;;  %v6806_v32 = vld [vmem:[%s7962_s8 + $0x640] ss:$36 sps:$4 sm:$0xff]  }
 0x210   : > { %v3490_v2 = vpop.f32.mrf.mxu0  ;;  %v3682_v35 = vpop.f32.mrf.mxu1  ;;  %v6724_v28 = vld [vmem:[%s7962_s8 + $0x714] ss:$36 sps:$4 sm:$0xff]  }
 0x212   : > { %v8337_v36 = vpop.f32.mrf.mxu0  ;;  %v8339_v37 = vpop.f32.mrf.mxu1 }
 0x213   : > { %9500 = vst [vmem:[#allocation12_spill] sm:$0xff] %v8339_v37  ;;  %v6808_v37 = vld [vmem:[%s7962_s8 + $0x644] ss:$36 sps:$4 sm:$0xff]  }
 0x214   : > { %v3493_v42 = vpop.f32.mrf.mxu0  ;;  %v3685_v43 = vpop.f32.mrf.mxu1 }
 0x216   : > { %v8345_v46 = vpop.f32.mrf.mxu0  ;;  %v8347_v47 = vpop.f32.mrf.mxu1  ;;  %3912 = vmatmul.mubr.bf16.gmra.mxu1 %v6695_v38  ;;  %4073 = vmatmul.mubr.bf16.gmra.mxu0 %v6698_v39  ;;  %v6824_v39 = vld [vmem:[%s7960_s7 + $0x208] sm:$0xff]  }
 0x217   : > { %9501 = vst [vmem:[#allocation13_spill] sm:$0xff] %v8347_v47  ;;  %3919 = vmatprep.mubr.bf16.mxu1 %v6703_v40  ;;  %4080 = vmatprep.mubr.bf16.mxu0 %v6706_v41  ;;  %v6800_v47 = vld [vmem:[%s7962_s8 + $0x5f8] ss:$36 sps:$4 sm:$0xff]  }
 0x218   : > { %v3498_v48 = vpop.f32.mrf.mxu0  ;;  %v3690_v51 = vpop.f32.mrf.mxu1  ;;  %6316 = vmatprep.subr.bf16.mxu0 %v6824_v39 }
 0x219   : > { %v6722_v48 = vld [vmem:[%s7962_s8 + $0x710] ss:$36 sps:$4 sm:$0xff]   ;;  %v6725_v51 = vld [vmem:[%s7962_s8 + $0x298] ss:$36 sps:$4 sm:$0xff]   ;;  %6317 = vmatpush3.bf16.msra.mxu0 %v6824_v39  ;;  %v6738_v39 = vld [vmem:[%s7962_s8 + $0x328] ss:$36 sps:$4 sm:$0xff]  }
 0x21a   : > { %v8349_v52 = vpop.f32.mrf.mxu0  ;;  %v8351_v53 = vpop.f32.mrf.mxu1 }
 0x21b   : > { %9502 = vst [vmem:[#allocation14_spill] sm:$0xff] %v8351_v53  ;;  %v6802_v53 = vld [vmem:[%s7962_s8 + $0x5fc] ss:$36 sps:$4 sm:$0xff]  }
 0x21c   : > { %v3501_v59 = vpop.f32.mrf.mxu0  ;;  %v3693_v60 = vpop.f32.mrf.mxu1 }
 0x21e   : > { %v8357_v61 = vpop.f32.mrf.mxu0  ;;  %v8359_v0 = vpop.f32.mrf.mxu1  ;;  %3920 = vmatmul.mubr.bf16.gmra.mxu1 %v6701_v54  ;;  %4081 = vmatmul.mubr.bf16.gmra.mxu0 %v6704_v55  ;;  %v6730_v55 = vld [vmem:[%s7962_s8 + $0x75c] ss:$36 sps:$4 sm:$0xff]  }
 0x21f   : > { %9503 = vst [vmem:[#allocation15_spill] sm:$0xff] %v8359_v0  ;;  %3927 = vmatprep.mubr.bf16.mxu1 %v6710_v56  ;;  %4088 = vmatprep.mubr.bf16.mxu0 %v6713_v33  ;;  %v6793_v0 = vld [vmem:[%s7962_s8 + $0x5b0] ss:$36 sps:$4 sm:$0xff]  }
 0x220   : > { %v3506_v1 = vpop.f32.mrf.mxu0  ;;  %v3698_v3 = vpop.f32.mrf.mxu1 }
 0x222   : > { %v8361_v4 = vpop.f32.mrf.mxu0  ;;  %v8363_v5 = vpop.f32.mrf.mxu1 }
 0x223   : > { %9504 = vst [vmem:[#allocation16_spill] sm:$0xff] %v8363_v5  ;;  %v6795_v5 = vld [vmem:[%s7962_s8 + $0x5b4] ss:$36 sps:$4 sm:$0xff]  }
 0x224   : > { %v3509_v14 = vpop.f32.mrf.mxu0  ;;  %v3701_v15 = vpop.f32.mrf.mxu1 }
 0x225   : > { %v6737_v15 = vld [vmem:[%s7962_s8 + $0x7a4] ss:$36 sps:$4 sm:$0xff]  }
 0x226   : > { %v8369_v16 = vpop.f32.mrf.mxu0  ;;  %v8371_v17 = vpop.f32.mrf.mxu1  ;;  %3928 = vmatmul.mubr.bf16.gmra.mxu1 %v6708_v6  ;;  %4089 = vmatmul.mubr.bf16.gmra.mxu0 %v6711_v9 }
 0x227   : > { %9505 = vst [vmem:[#allocation17_spill] sm:$0xff] %v8371_v17  ;;  %3935 = vmatprep.mubr.bf16.mxu1 %v6716_v10  ;;  %4096 = vmatprep.mubr.bf16.mxu0 %v6719_v13  ;;  %v6728_v10 = vld [vmem:[%s7962_s8 + $0x758] ss:$36 sps:$4 sm:$0xff]   ;;  %v6731_v13 = vld [vmem:[%s7962_s8 + $0x2e0] ss:$36 sps:$4 sm:$0xff]  }
 0x228   : > { %v3514_v18 = vpop.f32.mrf.mxu0  ;;  %v3706_v21 = vpop.f32.mrf.mxu1  ;;  %v6787_v17 = vld [vmem:[%s7962_s8 + $0x568] ss:$36 sps:$4 sm:$0xff]  }
 0x229   : > { %v6740_v18 = vld [vmem:[%s7962_s8 + $0x32c] ss:$36 sps:$4 sm:$0xff]  }
 0x22a   : > { %v8373_v22 = vpop.f32.mrf.mxu0  ;;  %v8375_v25 = vpop.f32.mrf.mxu1 }
 0x22b   : > { %9506 = vst [vmem:[#allocation18_spill] sm:$0xff] %v8375_v25  ;;  %v6789_v25 = vld [vmem:[%s7962_s8 + $0x56c] ss:$36 sps:$4 sm:$0xff]  }
 0x22c   : > { %v3517_v30 = vpop.f32.mrf.mxu0  ;;  %v3709_v34 = vpop.f32.mrf.mxu1 }
 0x22e   : > { %v8381_v2 = vpop.f32.mrf.mxu0  ;;  %v3745_v35 = vpop.f32.mrf.mxu1  ;;  %3936 = vmatmul.mubr.bf16.gmra.mxu1 %v6714_v26  ;;  %4097 = vmatmul.mubr.bf16.gmra.mxu0 %v6717_v27 }
 0x22f   : > { %v8384_v38 = vadd.f32 %v3745_v35, %v8280_v44  ;;  %3943 = vmatprep.mubr.bf16.mxu1 %v6724_v28  ;;  %4104 = vmatprep.mubr.bf16.mxu0 %v6727_v29  ;;  %v6733_v44 = vld [vmem:[%s7962_s8 + $0x2e4] ss:$36 sps:$4 sm:$0xff]  }
 0x230   : > { %v3522_v40 = vpop.f32.mrf.mxu0  ;;  %v3747_v41 = vpop.f32.mrf.mxu1  ;;  %v6735_v35 = vld [vmem:[%s7962_s8 + $0x7a0] ss:$36 sps:$4 sm:$0xff]  }
 0x231   : > { %v6743_v41 = vld [vmem:[%s7962_s8 + $0x7ec] ss:$36 sps:$4 sm:$0xff]  }
 0x232   : > { %v8387_v42 = vpop.f32.mrf.mxu0  ;;  %v3748_v43 = vpop.f32.mrf.mxu1 }
 0x233   : > { %v8392_v54 = vadd.f32 %v3748_v43, %v8286_v49  ;;  %v6746_v43 = vld [vmem:[%s7962_s8 + $0x374] ss:$36 sps:$4 sm:$0xff]  }
 0x234   : > { %v3525_v56 = vpop.f32.mrf.mxu0  ;;  %v3750_v33 = vpop.f32.mrf.mxu1 }
 0x236   : > { %v8396_v59 = vpop.f32.mrf.mxu0  ;;  %v3753_v60 = vpop.f32.mrf.mxu1  ;;  %3944 = vmatmul.mubr.bf16.gmra.mxu1 %v6722_v48  ;;  %4105 = vmatmul.mubr.bf16.gmra.mxu0 %v6725_v51 }
 0x237   : > { %v8399_v1 = vadd.f32 %v3753_v60, %v8295_v57  ;;  %3951 = vmatprep.mubr.bf16.mxu1 %v6730_v55  ;;  %4112 = vmatprep.mubr.bf16.mxu0 %v6733_v44 }
 0x238   : > { %v3530_v49 = vpop.f32.mrf.mxu0  ;;  %v3755_v3 = vpop.f32.mrf.mxu1 }
 0x239   : > { %v6741_v49 = vld [vmem:[%s7962_s8 + $0x7e8] ss:$36 sps:$4 sm:$0xff]   ;;  %v6744_v3 = vld [vmem:[%s7962_s8 + $0x370] ss:$36 sps:$4 sm:$0xff]  }
 0x23a   : > { %v8401_v6 = vpop.f32.mrf.mxu0  ;;  %v3756_v9 = vpop.f32.mrf.mxu1 }
 0x23b   : > { %v8406_v14 = vadd.f32 %v3756_v9, %v8300_v62 }
 0x23c   : > { %v3533_v21 = vpop.f32.mrf.mxu0  ;;  %v3758_v57 = vpop.f32.mrf.mxu1 }
 0x23e   : > { %v8410_v26 = vpop.f32.mrf.mxu0  ;;  %v3761_v27 = vpop.f32.mrf.mxu1  ;;  %3952 = vmatmul.mubr.bf16.gmra.mxu1 %v6728_v10  ;;  %4113 = vmatmul.mubr.bf16.gmra.mxu0 %v6731_v13  ;;  %v6751_v10 = vld [vmem:[%s7962_s8 + $0x834] ss:$36 sps:$4 sm:$0xff]   ;;  %v6754_v13 = vld [vmem:[%s7962_s8 + $0x3bc] ss:$36 sps:$4 sm:$0xff]  }
 0x23f   : > { %v8413_v28 = vadd.f32 %v3761_v27, %v8308_v7  ;;  %3959 = vmatprep.mubr.bf16.mxu1 %v6737_v15  ;;  %4120 = vmatprep.mubr.bf16.mxu0 %v6740_v18 }
 0x240   : > { %v3538_v62 = vpop.f32.mrf.mxu0  ;;  %v3763_v29 = vpop.f32.mrf.mxu1 }
 0x242   : > { %v8415_v30 = vpop.f32.mrf.mxu0  ;;  %v3764_v34 = vpop.f32.mrf.mxu1 }
 0x243   : > { %v8420_v40 = vadd.f32 %v3764_v34, %v8312_v11 }
 0x244   : > { %v3541_v48 = vpop.f32.mrf.mxu0  ;;  %v3766_v7 = vpop.f32.mrf.mxu1 }
 0x246   : > { %v8424_v51 = vpop.f32.mrf.mxu0  ;;  %v3769_v55 = vpop.f32.mrf.mxu1  ;;  %3960 = vmatmul.mubr.bf16.gmra.mxu1 %v6735_v35  ;;  %4121 = vmatmul.mubr.bf16.gmra.mxu0 %v6738_v39  ;;  %v6749_v35 = vld [vmem:[%s7962_s8 + $0x830] ss:$36 sps:$4 sm:$0xff]   ;;  %v6752_v39 = vld [vmem:[%s7962_s8 + $0x3b8] ss:$36 sps:$4 sm:$0xff]  }
 0x247   : > { %v8427_v44 = vadd.f32 %v3769_v55, %v8320_v19  ;;  %3967 = vmatprep.mubr.bf16.mxu1 %v6743_v41  ;;  %4128 = vmatprep.mubr.bf16.mxu0 %v6746_v43  ;;  %v6757_v43 = vld [vmem:[%s7962_s8 + $0x87c] ss:$36 sps:$4 sm:$0xff]  }
 0x248   : > { %v3546_v11 = vpop.f32.mrf.mxu0  ;;  %v3771_v56 = vpop.f32.mrf.mxu1 }
 0x24a   : > { %v8429_v33 = vpop.f32.mrf.mxu0  ;;  %v3772_v60 = vpop.f32.mrf.mxu1 }
 0x24b   : > { %v8434_v9 = vadd.f32 %v3772_v60, %v8324_v23  ;;  %v6849_v23 = vld [vmem:[%s7960_s7 + $0x200] sm:$0xff]  }
 0x24c   : > { %v3549_v15 = vpop.f32.mrf.mxu0  ;;  %v3774_v19 = vpop.f32.mrf.mxu1  ;;  %6318 = vmatprep.subr.bf16.mxu0 %v6849_v23 }
 0x24d   : > { %6319 = vmatpush3.bf16.msra.mxu0 %v6849_v23  ;;  %v6764_v19 = vld [vmem:[%s7962_s8 + $0x8c4] ss:$36 sps:$4 sm:$0xff]  }
 0x24e   : > { %v8438_v18 = vpop.f32.mrf.mxu0  ;;  %v3777_v21 = vpop.f32.mrf.mxu1  ;;  %3968 = vmatmul.mubr.bf16.gmra.mxu1 %v6741_v49  ;;  %4129 = vmatmul.mubr.bf16.gmra.mxu0 %v6744_v3 }
 0x24f   : > { %v8441_v57 = vadd.f32 %v3777_v21, %v8332_v31  ;;  %3975 = vmatprep.mubr.bf16.mxu1 %v6751_v10  ;;  %4136 = vmatprep.mubr.bf16.mxu0 %v6754_v13  ;;  %v6760_v31 = vld [vmem:[%s7962_s8 + $0x404] ss:$36 sps:$4 sm:$0xff]   ;;  %v6755_v10 = vld [vmem:[%s7962_s8 + $0x878] ss:$36 sps:$4 sm:$0xff]   ;;  %v6767_v21 = vld [vmem:[%s7962_s8 + $0x44c] ss:$36 sps:$4 sm:$0xff]  }
 0x250   : > { %v3554_v27 = vpop.f32.mrf.mxu0  ;;  %v3779_v62 = vpop.f32.mrf.mxu1  ;;  %v6758_v13 = vld [vmem:[%s7962_s8 + $0x400] ss:$36 sps:$4 sm:$0xff]  }
 0x252   : > { %v8444_v29 = vpop.f32.mrf.mxu0  ;;  %v3780_v34 = vpop.f32.mrf.mxu1 }
 0x253   : > { %v8449_v41 = vadd.f32 %v3780_v34, %v8337_v36 }
 0x254   : > { %v3557_v48 = vpop.f32.mrf.mxu0  ;;  %v3782_v7 = vpop.f32.mrf.mxu1 }
 0x255   : > { %v6765_v48 = vld [vmem:[%s7962_s8 + $0x448] ss:$36 sps:$4 sm:$0xff]  }
 0x256   : > { %v8453_v55 = vpop.f32.mrf.mxu0  ;;  %v3785_v11 = vpop.f32.mrf.mxu1  ;;  %3976 = vmatmul.mubr.bf16.gmra.mxu1 %v6749_v35  ;;  %4137 = vmatmul.mubr.bf16.gmra.mxu0 %v6752_v39 }
 0x257   : > { %v8456_v56 = vadd.f32 %v3785_v11, %v8345_v46  ;;  %3983 = vmatprep.mubr.bf16.mxu1 %v6757_v43  ;;  %4144 = vmatprep.mubr.bf16.mxu0 %v6760_v31  ;;  %v6762_v31 = vld [vmem:[%s7962_s8 + $0x8c0] ss:$36 sps:$4 sm:$0xff]   ;;  %v6770_v11 = vld [vmem:[%s7962_s8 + $0x494] ss:$36 sps:$4 sm:$0xff]  }
 0x258   : > { %v3562_v36 = vpop.f32.mrf.mxu0  ;;  %v3787_v60 = vpop.f32.mrf.mxu1 }
 0x259   : > { %v6773_v36 = vld [vmem:[%s7962_s8 + $0x1c] ss:$36 sps:$4 sm:$0xff]  }
 0x25a   : > { %v8458_v49 = vpop.f32.mrf.mxu0  ;;  %v3788_v3 = vpop.f32.mrf.mxu1 }
 0x25b   : > { %v8463_v15 = vadd.f32 %v3788_v3, %v8349_v52 }
 0x25c   : > { %v3565_v23 = vpop.f32.mrf.mxu0  ;;  %v3790_v46 = vpop.f32.mrf.mxu1 }
 0x25d   : > { %v6768_v46 = vld [vmem:[%s7962_s8 + $0x490] ss:$36 sps:$4 sm:$0xff]  }
 0x25e   : > { %v8467_v27 = vpop.f32.mrf.mxu0  ;;  %v3793_v62 = vpop.f32.mrf.mxu1  ;;  %3984 = vmatmul.mubr.bf16.gmra.mxu1 %v6755_v10  ;;  %4145 = vmatmul.mubr.bf16.gmra.mxu0 %v6758_v13 }
 0x25f   : > { %v8470_v34 = vadd.f32 %v3793_v62, %v8357_v61  ;;  %3991 = vmatprep.mubr.bf16.mxu1 %v6764_v19  ;;  %4152 = vmatprep.mubr.bf16.mxu0 %v6767_v21  ;;  %v6771_v62 = vld [vmem:[%s7962_s8 + $0x18] ss:$36 sps:$4 sm:$0xff]  }
 0x260   : > { %v3570_v52 = vpop.f32.mrf.mxu0  ;;  %v3795_v35 = vpop.f32.mrf.mxu1 }
 0x261   : > { %v6777_v35 = vld [vmem:[%s7962_s8 + $0x4dc] ss:$36 sps:$4 sm:$0xff]  }
 0x262   : > { %v8472_v39 = vpop.f32.mrf.mxu0  ;;  %v3796_v43 = vpop.f32.mrf.mxu1 }
 0x263   : > { %v8477_v7 = vadd.f32 %v3796_v43, %v8361_v4  ;;  %v6780_v43 = vld [vmem:[%s7962_s8 + $0x64] ss:$36 sps:$4 sm:$0xff]  }
 0x264   : > { %v3573_v60 = vpop.f32.mrf.mxu0  ;;  %v3798_v61 = vpop.f32.mrf.mxu1 }
 0x266   : > { %v8481_v3 = vpop.f32.mrf.mxu0  ;;  %v3801_v10 = vpop.f32.mrf.mxu1  ;;  %3992 = vmatmul.mubr.bf16.gmra.mxu1 %v6762_v31  ;;  %4153 = vmatmul.mubr.bf16.gmra.mxu0 %v6765_v48 }
 0x267   : > { %v8484_v13 = vadd.f32 %v3801_v10, %v8369_v16  ;;  %4160 = vmatprep.mubr.bf16.mxu0 %v6770_v11  ;;  %4321 = vmatprep.mubr.bf16.mxu1 %v6773_v36 }
 0x268   : > { %v3578_v4 = vpop.f32.mrf.mxu0  ;;  %v3803_v19 = vpop.f32.mrf.mxu1 }
 0x269   : > { %v6775_v4 = vld [vmem:[%s7962_s8 + $0x4d8] ss:$36 sps:$4 sm:$0xff]   ;;  %v6778_v19 = vld [vmem:[%s7962_s8 + $0x60] ss:$36 sps:$4 sm:$0xff]  }
 0x26a   : > { %v8486_v21 = vpop.f32.mrf.mxu0  ;;  %v3804_v23 = vpop.f32.mrf.mxu1 }
 0x26b   : > { %v8491_v52 = vadd.f32 %v3804_v23, %v8373_v22 }
 0x26c   : > { %v3581_v31 = vpop.f32.mrf.mxu0  ;;  %v3806_v16 = vpop.f32.mrf.mxu1 }
 0x26d   : > { %v6783_v31 = vld [vmem:[%s7962_s8 + $0x524] ss:$36 sps:$4 sm:$0xff]  }
 0x26e   : > { %v8495_v48 = vpop.f32.mrf.mxu0  ;;  %v3809_v11 = vpop.f32.mrf.mxu1  ;;  %4161 = vmatmul.mubr.bf16.gmra.mxu0 %v6768_v46  ;;  %4322 = vmatmul.mubr.bf16.vlgmr.msra.gmra.mxu1 %v6771_v62  ;;  %v6786_v46 = vld [vmem:[%s7962_s8 + $0xac] ss:$36 sps:$4 sm:$0xff]  }
 0x26f   : > { %v8498_v36 = vadd.f32 %v3809_v11, %v8381_v2  ;;  %4168 = vmatprep.mubr.bf16.mxu0 %v6777_v35  ;;  %4329 = vmatprep.mubr.bf16.mxu1 %v6780_v43 }
 0x270   : > { %v3586_v22 = vpop.f32.mrf.mxu0  ;;  %v3811_v60 = vpop.f32.mrf.mxu1 }
 0x272   : > { %v8500_v61 = vpop.f32.mrf.mxu0  ;;  %v3812_v10 = vpop.f32.mrf.mxu1 }
 0x273   : > { %v8505_v23 = vadd.f32 %v3812_v10, %v8387_v42  ;;  %v6781_v10 = vld [vmem:[%s7962_s8 + $0x520] ss:$36 sps:$4 sm:$0xff]  }
 0x274   : > { %v3589_v62 = vpop.f32.mrf.mxu0  ;;  %v3814_v2 = vpop.f32.mrf.mxu1 }
 0x275   : > { %v6784_v62 = vld [vmem:[%s7962_s8 + $0xa8] ss:$36 sps:$4 sm:$0xff]  }
 0x276   : > { %v8509_v35 = vpop.f32.mrf.mxu0  ;;  %v3817_v43 = vpop.f32.mrf.mxu1  ;;  %4169 = vmatmul.mubr.bf16.gmra.mxu0 %v6775_v4  ;;  %4330 = vmatmul.mubr.bf16.gmra.mxu1 %v6778_v19  ;;  %v6792_v4 = vld [vmem:[%s7962_s8 + $0xf4] ss:$36 sps:$4 sm:$0xff]  }
 0x277   : > { %v8512_v16 = vadd.f32 %v3817_v43, %v8396_v59  ;;  %4176 = vmatprep.mubr.bf16.mxu0 %v6783_v31  ;;  %4337 = vmatprep.mubr.bf16.mxu1 %v6786_v46 }
 0x278   : > { %v3594_v42 = vpop.f32.mrf.mxu0  ;;  %v3819_v11 = vpop.f32.mrf.mxu1 }
 0x27a   : > { %v8514_v22 = vpop.f32.mrf.mxu0  ;;  %v3820_v60 = vpop.f32.mrf.mxu1 }
 0x27b   : > { %v8519_v2 = vadd.f32 %v3820_v60, %v8401_v6 }
 0x27c   : > { %v3597_v19 = vpop.f32.mrf.mxu0  ;;  %v3822_v59 = vpop.f32.mrf.mxu1 }
 0x27d   : > { %v6790_v19 = vld [vmem:[%s7962_s8 + $0xf0] ss:$36 sps:$4 sm:$0xff]  }
 0x27e   : > { %v8523_v31 = vpop.f32.mrf.mxu0  ;;  %v3825_v46 = vpop.f32.mrf.mxu1  ;;  %4177 = vmatmul.mubr.bf16.gmra.mxu0 %v6781_v10  ;;  %4338 = vmatmul.mubr.bf16.gmra.mxu1 %v6784_v62  ;;  %v6798_v10 = vld [vmem:[%s7962_s8 + $0x13c] ss:$36 sps:$4 sm:$0xff]  }
 0x27f   : > { %v8526_v43 = vadd.f32 %v3825_v46, %v8410_v26  ;;  %4184 = vmatprep.mubr.bf16.mxu0 %v6789_v25  ;;  %4345 = vmatprep.mubr.bf16.mxu1 %v6792_v4 }
 0x280   : > { %v3602_v6 = vpop.f32.mrf.mxu0  ;;  %v3827_v42 = vpop.f32.mrf.mxu1 }
 0x282   : > { %v8528_v11 = vpop.f32.mrf.mxu0  ;;  %v3828_v60 = vpop.f32.mrf.mxu1 }
 0x283   : > { %v8533_v59 = vadd.f32 %v3828_v60, %v8415_v30 }
 0x284   : > { %v3605_v62 = vpop.f32.mrf.mxu0  ;;  %v3830_v26 = vpop.f32.mrf.mxu1 }
 0x285   : > { %v6796_v62 = vld [vmem:[%s7962_s8 + $0x138] ss:$36 sps:$4 sm:$0xff]  }
 0x286   : > { %v8537_v25 = vpop.f32.mrf.mxu0  ;;  %v3833_v4 = vpop.f32.mrf.mxu1  ;;  %4185 = vmatmul.mubr.bf16.gmra.mxu0 %v6787_v17  ;;  %4346 = vmatmul.mubr.bf16.gmra.mxu1 %v6790_v19  ;;  %v6805_v17 = vld [vmem:[%s7962_s8 + $0x184] ss:$36 sps:$4 sm:$0xff]  }
 0x287   : > { %v8540_v46 = vadd.f32 %v3833_v4, %v8424_v51  ;;  %4192 = vmatprep.mubr.bf16.mxu0 %v6795_v5  ;;  %4353 = vmatprep.mubr.bf16.mxu1 %v6798_v10 }
 0x288   : > { %v3610_v30 = vpop.f32.mrf.mxu0  ;;  %v3835_v6 = vpop.f32.mrf.mxu1 }
 0x28a   : > { %v8542_v42 = vpop.f32.mrf.mxu0  ;;  %v3836_v60 = vpop.f32.mrf.mxu1 }
 0x28b   : > { %v8547_v26 = vadd.f32 %v3836_v60, %v8429_v33 }
 0x28c   : > { %v3613_v19 = vpop.f32.mrf.mxu0  ;;  %v3838_v51 = vpop.f32.mrf.mxu1 }
 0x28d   : > { %v6803_v19 = vld [vmem:[%s7962_s8 + $0x180] ss:$36 sps:$4 sm:$0xff]  }
 0x28e   : > { %v8551_v5 = vpop.f32.mrf.mxu0  ;;  %v3841_v10 = vpop.f32.mrf.mxu1  ;;  %4193 = vmatmul.mubr.bf16.gmra.mxu0 %v6793_v0  ;;  %4354 = vmatmul.mubr.bf16.gmra.mxu1 %v6796_v62  ;;  %v6811_v0 = vld [vmem:[%s7962_s8 + $0x1cc] ss:$36 sps:$4 sm:$0xff]  }
 0x28f   : > { %v8554_v4 = vadd.f32 %v3841_v10, %v8438_v18  ;;  %4200 = vmatprep.mubr.bf16.mxu0 %v6802_v53  ;;  %4361 = vmatprep.mubr.bf16.mxu1 %v6805_v17 }
 0x290   : > { %v3618_v33 = vpop.f32.mrf.mxu0  ;;  %v3843_v30 = vpop.f32.mrf.mxu1 }
 0x292   : > { %v8556_v6 = vpop.f32.mrf.mxu0  ;;  %v3844_v60 = vpop.f32.mrf.mxu1 }
 0x293   : > { %v8561_v51 = vadd.f32 %v3844_v60, %v8444_v29 }
 0x294   : > { %v3621_v62 = vpop.f32.mrf.mxu0  ;;  %v3846_v18 = vpop.f32.mrf.mxu1 }
 0x295   : > { %v6809_v62 = vld [vmem:[%s7962_s8 + $0x1c8] ss:$36 sps:$4 sm:$0xff]  }
 0x296   : > { %v8565_v53 = vpop.f32.mrf.mxu0  ;;  %v3849_v17 = vpop.f32.mrf.mxu1  ;;  %4201 = vmatmul.mubr.bf16.gmra.mxu0 %v6800_v47  ;;  %4362 = vmatmul.mubr.bf16.gmra.mxu1 %v6803_v19  ;;  %v6817_v47 = vld [vmem:[%s7962_s8 + $0x214] ss:$36 sps:$4 sm:$0xff]  }
 0x297   : > { %v8568_v10 = vadd.f32 %v3849_v17, %v8453_v55  ;;  %4208 = vmatprep.mubr.bf16.mxu0 %v6808_v37  ;;  %4369 = vmatprep.mubr.bf16.mxu1 %v6811_v0 }
 0x298   : > { %v3626_v29 = vpop.f32.mrf.mxu0  ;;  %v3851_v33 = vpop.f32.mrf.mxu1 }
 0x29a   : > { %v8570_v30 = vpop.f32.mrf.mxu0  ;;  %v3852_v60 = vpop.f32.mrf.mxu1 }
 0x29b   : > { %v8575_v18 = vadd.f32 %v3852_v60, %v8458_v49 }
 0x29c   : > { %v3629_v19 = vpop.f32.mrf.mxu0  ;;  %v3854_v55 = vpop.f32.mrf.mxu1 }
 0x29d   : > { %v6815_v19 = vld [vmem:[%s7962_s8 + $0x210] ss:$36 sps:$4 sm:$0xff]  }
 0x29e   : > { %v8579_v37 = vpop.f32.mrf.mxu0  ;;  %v3857_v0 = vpop.f32.mrf.mxu1  ;;  %4209 = vmatmul.mubr.bf16.gmra.mxu0 %v6806_v32  ;;  %4370 = vmatmul.mubr.bf16.gmra.mxu1 %v6809_v62  ;;  %v6823_v32 = vld [vmem:[%s7962_s8 + $0x25c] ss:$36 sps:$4 sm:$0xff]  }
 0x29f   : > { %v8582_v17 = vadd.f32 %v3857_v0, %v8467_v27  ;;  %4216 = vmatprep.mubr.bf16.mxu0 %v6814_v24  ;;  %4377 = vmatprep.mubr.bf16.mxu1 %v6817_v47 }
 0x2a0   : > { %v3634_v49 = vpop.f32.mrf.mxu0  ;;  %v3859_v29 = vpop.f32.mrf.mxu1 }
 0x2a2   : > { %v8584_v33 = vpop.f32.mrf.mxu0  ;;  %v3860_v60 = vpop.f32.mrf.mxu1 }
 0x2a3   : > { %v8589_v55 = vadd.f32 %v3860_v60, %v8472_v39 }
 0x2a4   : > { %v3637_v62 = vpop.f32.mrf.mxu0  ;;  %v3862_v27 = vpop.f32.mrf.mxu1 }
 0x2a5   : > { %v6821_v62 = vld [vmem:[%s7962_s8 + $0x258] ss:$36 sps:$4 sm:$0xff]  }
 0x2a6   : > { %v8593_v24 = vpop.f32.mrf.mxu0  ;;  %v3865_v47 = vpop.f32.mrf.mxu1  ;;  %4217 = vmatmul.mubr.bf16.gmra.mxu0 %v6812_v20  ;;  %4378 = vmatmul.mubr.bf16.gmra.mxu1 %v6815_v19 }
 0x2a7   : > { %v8596_v0 = vadd.f32 %v3865_v47, %v8481_v3  ;;  %4224 = vmatprep.mubr.bf16.mxu0 %v6820_v12  ;;  %4385 = vmatprep.mubr.bf16.mxu1 %v6823_v32 }
 0x2a8   : > { %v3642_v39 = vpop.f32.mrf.mxu0  ;;  %v3867_v49 = vpop.f32.mrf.mxu1 }
 0x2aa   : > { %v8598_v29 = vpop.f32.mrf.mxu0  ;;  %v3868_v60 = vpop.f32.mrf.mxu1 }
 0x2ab   : > { %v8603_v27 = vadd.f32 %v3868_v60, %v8486_v21 }
 0x2ac   : > { %v3645_v20 = vpop.f32.mrf.mxu0  ;;  %v3870_v19 = vpop.f32.mrf.mxu1 }
 0x2ad   : > { %v6825_v20 = vld [vmem:[%s7962_s8 + $0x718] ss:$36 sps:$4 sm:$0xff]   ;;  %v6828_v19 = vld [vmem:[%s7962_s8 + $0x2a0] ss:$36 sps:$4 sm:$0xff]  }
 0x2ae   : > { %v3873_v3 = vpop.f32.mrf.mxu1  ;;  %v4034_v12 = vpop.f32.mrf.mxu0  ;;  %4225 = vmatmul.mubr.bf16.gmra.mxu0 %v6818_v8  ;;  %4386 = vmatmul.mubr.bf16.gmra.mxu1 %v6821_v62  ;;  %v6833_v62 = vld [vmem:[%s7962_s8 + $0x764] ss:$36 sps:$4 sm:$0xff]  }
 0x2af   : > { %v8608_v32 = vadd.f32 %v3873_v3, %v8495_v48  ;;  %v8611_v47 = vadd.f32 %v4034_v12, %v8384_v38  ;;  %4232 = vmatprep.mubr.bf16.mxu0 %v6827_v63  ;;  %4393 = vmatprep.mubr.bf16.mxu1 %v6830_v58  ;;  %v6836_v48 = vld [vmem:[%s7962_s8 + $0x2ec] ss:$36 sps:$4 sm:$0xff]  }
 0x2b0   : > { %v3875_v21 = vpop.f32.mrf.mxu1  ;;  %v4036_v39 = vpop.f32.mrf.mxu0 }
 0x2b2   : > { %v3876_v49 = vpop.f32.mrf.mxu1  ;;  %v4037_v60 = vpop.f32.mrf.mxu0 }
 0x2b3   : > { %v8616_v50 = vadd.f32 %v3876_v49, %v8500_v61  ;;  %v8619_v8 = vadd.f32 %v4037_v60, %v8392_v54  ;;  %v6831_v60 = vld [vmem:[%s7962_s8 + $0x760] ss:$36 sps:$4 sm:$0xff]  }
 0x2b4   : > { %v3878_v38 = vpop.f32.mrf.mxu1  ;;  %v4039_v3 = vpop.f32.mrf.mxu0 }
 0x2b5   : > { %v6834_v38 = vld [vmem:[%s7962_s8 + $0x2e8] ss:$36 sps:$4 sm:$0xff]  }
 0x2b6   : > { %v3881_v63 = vpop.f32.mrf.mxu1  ;;  %v4042_v58 = vpop.f32.mrf.mxu0  ;;  %4233 = vmatmul.mubr.bf16.gmra.mxu0 %v6825_v20  ;;  %4394 = vmatmul.mubr.bf16.gmra.mxu1 %v6828_v19  ;;  %v6839_v19 = vld [vmem:[%s7962_s8 + $0x7ac] ss:$36 sps:$4 sm:$0xff]  }
 0x2b7   : > { %v8624_v12 = vadd.f32 %v3881_v63, %v8509_v35  ;;  %v8627_v61 = vadd.f32 %v4042_v58, %v8399_v1  ;;  %4240 = vmatprep.mubr.bf16.mxu0 %v6833_v62  ;;  %4401 = vmatprep.mubr.bf16.mxu1 %v6836_v48  ;;  %v6842_v35 = vld [vmem:[%s7962_s8 + $0x334] ss:$36 sps:$4 sm:$0xff]  }
 0x2b8   : > { %v3883_v54 = vpop.f32.mrf.mxu1  ;;  %v4044_v21 = vpop.f32.mrf.mxu0 }
 0x2ba   : > { %v3884_v39 = vpop.f32.mrf.mxu1  ;;  %v4045_v49 = vpop.f32.mrf.mxu0 }
 0x2bb   : > { %v8632_v3 = vadd.f32 %v3884_v39, %v8514_v22  ;;  %v8635_v20 = vadd.f32 %v4045_v49, %v8406_v14  ;;  %v6837_v49 = vld [vmem:[%s7962_s8 + $0x7a8] ss:$36 sps:$4 sm:$0xff]  }
 0x2bc   : > { %v3886_v1 = vpop.f32.mrf.mxu1  ;;  %v4047_v63 = vpop.f32.mrf.mxu0 }
 0x2bd   : > { %v6840_v1 = vld [vmem:[%s7962_s8 + $0x330] ss:$36 sps:$4 sm:$0xff]  }
 0x2be   : > { %v3889_v62 = vpop.f32.mrf.mxu1  ;;  %v4050_v48 = vpop.f32.mrf.mxu0  ;;  %4241 = vmatmul.mubr.bf16.gmra.mxu0 %v6831_v60  ;;  %4402 = vmatmul.mubr.bf16.gmra.mxu1 %v6834_v38  ;;  %v6845_v38 = vld [vmem:[%s7962_s8 + $0x7f4] ss:$36 sps:$4 sm:$0xff]  }
 0x2bf   : > { %v8640_v58 = vadd.f32 %v3889_v62, %v8523_v31  ;;  %v8643_v22 = vadd.f32 %v4050_v48, %v8413_v28  ;;  %4248 = vmatprep.mubr.bf16.mxu0 %v6839_v19  ;;  %4409 = vmatprep.mubr.bf16.mxu1 %v6842_v35  ;;  %v6848_v31 = vld [vmem:[%s7962_s8 + $0x37c] ss:$36 sps:$4 sm:$0xff]  }
 0x2c0   : > { %v3891_v14 = vpop.f32.mrf.mxu1  ;;  %v4052_v54 = vpop.f32.mrf.mxu0 }
 0x2c2   : > { %v3892_v21 = vpop.f32.mrf.mxu1  ;;  %v4053_v39 = vpop.f32.mrf.mxu0 }
 0x2c3   : > { %v8648_v63 = vadd.f32 %v3892_v21, %v8528_v11  ;;  %v8651_v60 = vadd.f32 %v4053_v39, %v8420_v40  ;;  %v6843_v39 = vld [vmem:[%s7962_s8 + $0x7f0] ss:$36 sps:$4 sm:$0xff]  }
 0x2c4   : > { %v3894_v28 = vpop.f32.mrf.mxu1  ;;  %v4055_v62 = vpop.f32.mrf.mxu0 }
 0x2c5   : > { %v6846_v28 = vld [vmem:[%s7962_s8 + $0x378] ss:$36 sps:$4 sm:$0xff]  }
 0x2c6   : > { %v3897_v19 = vpop.f32.mrf.mxu1  ;;  %v4058_v35 = vpop.f32.mrf.mxu0  ;;  %4249 = vmatmul.mubr.bf16.gmra.mxu0 %v6837_v49  ;;  %4410 = vmatmul.mubr.bf16.gmra.mxu1 %v6840_v1  ;;  %v6852_v1 = vld [vmem:[%s7962_s8 + $0x83c] ss:$36 sps:$4 sm:$0xff]  }
 0x2c7   : > { %v8656_v48 = vadd.f32 %v3897_v19, %v8537_v25  ;;  %v8659_v11 = vadd.f32 %v4058_v35, %v8427_v44  ;;  %4256 = vmatprep.mubr.bf16.mxu0 %v6845_v38  ;;  %4417 = vmatprep.mubr.bf16.mxu1 %v6848_v31  ;;  %v6855_v25 = vld [vmem:[%s7962_s8 + $0x3c4] ss:$36 sps:$4 sm:$0xff]  }
 0x2c8   : > { %v3899_v40 = vpop.f32.mrf.mxu1  ;;  %v4060_v14 = vpop.f32.mrf.mxu0 }
 0x2ca   : > { %v3900_v54 = vpop.f32.mrf.mxu1  ;;  %v4061_v21 = vpop.f32.mrf.mxu0 }
 0x2cb   : > { %v8664_v62 = vadd.f32 %v3900_v54, %v8542_v42  ;;  %v8667_v49 = vadd.f32 %v4061_v21, %v8434_v9  ;;  %v6850_v21 = vld [vmem:[%s7962_s8 + $0x838] ss:$36 sps:$4 sm:$0xff]  }
 0x2cc   : > { %v3902_v44 = vpop.f32.mrf.mxu1  ;;  %v4063_v19 = vpop.f32.mrf.mxu0 }
 0x2cd   : > { %v6853_v44 = vld [vmem:[%s7962_s8 + $0x3c0] ss:$36 sps:$4 sm:$0xff]  }
 0x2ce   : > { %v3905_v38 = vpop.f32.mrf.mxu1  ;;  %v4066_v31 = vpop.f32.mrf.mxu0  ;;  %4257 = vmatmul.mubr.bf16.gmra.mxu0 %v6843_v39  ;;  %4418 = vmatmul.mubr.bf16.gmra.mxu1 %v6846_v28  ;;  %v6858_v28 = vld [vmem:[%s7962_s8 + $0x884] ss:$36 sps:$4 sm:$0xff]  }
 0x2cf   : > { %v8672_v35 = vadd.f32 %v3905_v38, %v8551_v5  ;;  %v8675_v42 = vadd.f32 %v4066_v31, %v8441_v57  ;;  %4264 = vmatprep.mubr.bf16.mxu0 %v6852_v1  ;;  %4425 = vmatprep.mubr.bf16.mxu1 %v6855_v25  ;;  %v6861_v5 = vld [vmem:[%s7962_s8 + $0x40c] ss:$36 sps:$4 sm:$0xff]  }
 0x2d0   : > { %v3907_v9 = vpop.f32.mrf.mxu1  ;;  %v4068_v40 = vpop.f32.mrf.mxu0 }
 0x2d2   : > { %v3908_v14 = vpop.f32.mrf.mxu1  ;;  %v4069_v54 = vpop.f32.mrf.mxu0 }
 0x2d3   : > { %v8680_v19 = vadd.f32 %v3908_v14, %v8556_v6  ;;  %v8683_v39 = vadd.f32 %v4069_v54, %v8449_v41  ;;  %v6856_v54 = vld [vmem:[%s7962_s8 + $0x880] ss:$36 sps:$4 sm:$0xff]  }
 0x2d4   : > { %v3910_v57 = vpop.f32.mrf.mxu1  ;;  %v4071_v38 = vpop.f32.mrf.mxu0 }
 0x2d5   : > { %v6859_v57 = vld [vmem:[%s7962_s8 + $0x408] ss:$36 sps:$4 sm:$0xff]  }
 0x2d6   : > { %v3913_v1 = vpop.f32.mrf.mxu1  ;;  %v4074_v25 = vpop.f32.mrf.mxu0  ;;  %4265 = vmatmul.mubr.bf16.gmra.mxu0 %v6850_v21  ;;  %4426 = vmatmul.mubr.bf16.gmra.mxu1 %v6853_v44  ;;  %v6864_v44 = vld [vmem:[%s7962_s8 + $0x8cc] ss:$36 sps:$4 sm:$0xff]  }
 0x2d7   : > { %v8688_v31 = vadd.f32 %v3913_v1, %v8565_v53  ;;  %v8691_v6 = vadd.f32 %v4074_v25, %v8456_v56  ;;  %4272 = vmatprep.mubr.bf16.mxu0 %v6858_v28  ;;  %4433 = vmatprep.mubr.bf16.mxu1 %v6861_v5  ;;  %v6867_v53 = vld [vmem:[%s7962_s8 + $0x454] ss:$36 sps:$4 sm:$0xff]  }
 0x2d8   : > { %v3915_v41 = vpop.f32.mrf.mxu1  ;;  %v4076_v9 = vpop.f32.mrf.mxu0 }
 0x2da   : > { %v3916_v40 = vpop.f32.mrf.mxu1  ;;  %v4077_v14 = vpop.f32.mrf.mxu0 }
 0x2db   : > { %v8696_v38 = vadd.f32 %v3916_v40, %v8570_v30  ;;  %v8699_v21 = vadd.f32 %v4077_v14, %v8463_v15  ;;  %v6862_v14 = vld [vmem:[%s7962_s8 + $0x8c8] ss:$36 sps:$4 sm:$0xff]  }
 0x2dc   : > { %v3918_v56 = vpop.f32.mrf.mxu1  ;;  %v4079_v1 = vpop.f32.mrf.mxu0 }
 0x2dd   : > { %v6865_v56 = vld [vmem:[%s7962_s8 + $0x450] ss:$36 sps:$4 sm:$0xff]  }
 0x2de   : > { %v3921_v28 = vpop.f32.mrf.mxu1  ;;  %v4082_v5 = vpop.f32.mrf.mxu0  ;;  %4273 = vmatmul.mubr.bf16.gmra.mxu0 %v6856_v54  ;;  %4434 = vmatmul.mubr.bf16.gmra.mxu1 %v6859_v57  ;;  %v6870_v57 = vld [vmem:[%s7962_s8 + $0x49c] ss:$36 sps:$4 sm:$0xff]  }
 0x2df   : > { %v8704_v25 = vadd.f32 %v3921_v28, %v8579_v37  ;;  %v8707_v30 = vadd.f32 %v4082_v5, %v8470_v34  ;;  %4280 = vmatprep.mubr.bf16.mxu0 %v6864_v44  ;;  %4441 = vmatprep.mubr.bf16.mxu1 %v6867_v53  ;;  %v6871_v37 = vld [vmem:[%s7962_s8 + $0x20] ss:$36 sps:$4 sm:$0xff]  }
 0x2e0   : > { %v3923_v15 = vpop.f32.mrf.mxu1  ;;  %v4084_v41 = vpop.f32.mrf.mxu0 }
 0x2e2   : > { %v3924_v9 = vpop.f32.mrf.mxu1  ;;  %v4085_v40 = vpop.f32.mrf.mxu0 }
 0x2e3   : > { %v8712_v1 = vadd.f32 %v3924_v9, %v8584_v33  ;;  %v8715_v54 = vadd.f32 %v4085_v40, %v8477_v7  ;;  %v6868_v40 = vld [vmem:[%s7962_s8 + $0x498] ss:$36 sps:$4 sm:$0xff]  }
 0x2e4   : > { %v3926_v34 = vpop.f32.mrf.mxu1  ;;  %v4087_v28 = vpop.f32.mrf.mxu0 }
 0x2e5   : > { %v6872_v34 = vld [vmem:[%s7962_s8 + $0x68] ss:$36 sps:$4 sm:$0xff]  }
 0x2e6   : > { %v3929_v44 = vpop.f32.mrf.mxu1  ;;  %v4090_v53 = vpop.f32.mrf.mxu0  ;;  %4281 = vmatmul.mubr.bf16.gmra.mxu0 %v6862_v14  ;;  %4442 = vmatmul.mubr.bf16.gmra.mxu1 %v6865_v56  ;;  %v6876_v56 = vld [vmem:[%s7962_s8 + $0xb0] ss:$36 sps:$4 sm:$0xff]  }
 0x2e7   : > { %v8720_v5 = vadd.f32 %v3929_v44, %v8593_v24  ;;  %v8723_v33 = vadd.f32 %v4090_v53, %v8484_v13  ;;  %4449 = vmatprep.mubr.bf16.mxu1 %v6870_v57  ;;  %6320 = vmatprep.mubr.bf16.mxu0 %v6871_v37  ;;  %v6875_v24 = vld [vmem:[%s7962_s8 + $0x4e4] ss:$36 sps:$4 sm:$0xff]  }
 0x2e8   : > { %v3931_v7 = vpop.f32.mrf.mxu1  ;;  %v4092_v15 = vpop.f32.mrf.mxu0 }
 0x2ea   : > { %v3932_v41 = vpop.f32.mrf.mxu1  ;;  %v4093_v9 = vpop.f32.mrf.mxu0 }
 0x2eb   : > { %v8728_v28 = vadd.f32 %v3932_v41, %v8598_v29  ;;  %v8731_v14 = vadd.f32 %v4093_v9, %v8491_v52  ;;  %v6873_v41 = vld [vmem:[%s7962_s8 + $0x4e0] ss:$36 sps:$4 sm:$0xff]   ;;  %v6877_v9 = vld [vmem:[%s7962_s8 + $0xf8] ss:$36 sps:$4 sm:$0xff]  }
 0x2ec   : > { %v3934_v13 = vpop.f32.mrf.mxu1  ;;  %v4095_v57 = vpop.f32.mrf.mxu0 }
 0x2ed   : > { %v6880_v57 = vld [vmem:[%s7962_s8 + $0x52c] ss:$36 sps:$4 sm:$0xff]  }
 0x2ee   : > { %v8735_v37 = vpop.f32.mrf.mxu1  ;;  %v4098_v44 = vpop.f32.mrf.mxu0  ;;  %4450 = vmatmul.mubr.bf16.gmra.mxu1 %v6868_v40  ;;  %6321 = vmatmul.mubr.bf16.vlgmr.msra.gmra.mxu0 %v6872_v34  ;;  %v6881_v40 = vld [vmem:[%s7962_s8 + $0x140] ss:$36 sps:$4 sm:$0xff]  }
 0x2ef   : > { %v8738_v53 = vadd.f32 %v4098_v44, %v8498_v36  ;;  %4457 = vmatprep.mubr.bf16.mxu1 %v6875_v24  ;;  %6324 = vmatprep.mubr.bf16.mxu0 %v6876_v56 }
 0x2f0   : > { %v3939_v52 = vpop.f32.mrf.mxu1  ;;  %v4100_v29 = vpop.f32.mrf.mxu0 }
 0x2f2   : > { %v8740_v7 = vpop.f32.mrf.mxu1  ;;  %v4101_v15 = vpop.f32.mrf.mxu0 }
 0x2f3   : > { %v8745_v13 = vadd.f32 %v4101_v15, %v8505_v23 }
 0x2f4   : > { %v3942_v34 = vpop.f32.mrf.mxu1  ;;  %v4103_v36 = vpop.f32.mrf.mxu0 }
 0x2f5   : > { %9507 = vst [vmem:[#allocation19_spill] sm:$0xff] %v8745_v13  ;;  %v6878_v13 = vld [vmem:[%s7962_s8 + $0x528] ss:$36 sps:$4 sm:$0xff]  }
 0x2f6   : > { %v8749_v24 = vpop.f32.mrf.mxu1  ;;  %v4106_v56 = vpop.f32.mrf.mxu0  ;;  %4458 = vmatmul.mubr.bf16.gmra.mxu1 %v6873_v41  ;;  %6325 = vmatmul.mubr.bf16.gmra.mxu0 %v6877_v9  ;;  %v6882_v34 = vld [vmem:[%s7962_s8 + $0x188] ss:$36 sps:$4 sm:$0xff]   ;;  %v6886_v41 = vld [vmem:[%s7962_s8 + $0x1d0] ss:$36 sps:$4 sm:$0xff]  }
 0x2f7   : > { %9508 = vst [vmem:[#allocation20_spill] sm:$0xff] %v8749_v24  ;;  %v8752_v44 = vadd.f32 %v4106_v56, %v8512_v16  ;;  %4465 = vmatprep.mubr.bf16.mxu1 %v6880_v57  ;;  %6328 = vmatprep.mubr.bf16.mxu0 %v6881_v40  ;;  %v6885_v24 = vld [vmem:[%s7962_s8 + $0x574] ss:$36 sps:$4 sm:$0xff]  }
 0x2f8   : > { %v3947_v23 = vpop.f32.mrf.mxu1  ;;  %v4108_v52 = vpop.f32.mrf.mxu0 }
 0x2fa   : > { %v8754_v29 = vpop.f32.mrf.mxu1  ;;  %v4109_v15 = vpop.f32.mrf.mxu0 }
 0x2fb   : > { %v8759_v36 = vadd.f32 %v4109_v15, %v8519_v2 }
 0x2fc   : > { %v3950_v9 = vpop.f32.mrf.mxu1  ;;  %v4111_v16 = vpop.f32.mrf.mxu0 }
 0x2fd   : > { %9509 = vst [vmem:[#allocation21_spill] sm:$0xff] %v8759_v36  ;;  %v6883_v36 = vld [vmem:[%s7962_s8 + $0x570] ss:$36 sps:$4 sm:$0xff]   ;;  %v6887_v9 = vld [vmem:[%s7962_s8 + $0x218] ss:$36 sps:$4 sm:$0xff]  }
 0x2fe   : > { %v8763_v57 = vpop.f32.mrf.mxu1  ;;  %v4114_v40 = vpop.f32.mrf.mxu0  ;;  %4466 = vmatmul.mubr.bf16.gmra.mxu1 %v6878_v13  ;;  %6329 = vmatmul.mubr.bf16.gmra.mxu0 %v6882_v34  ;;  %v6891_v13 = vld [vmem:[%s7962_s8 + $0x260] ss:$36 sps:$4 sm:$0xff]  }
 0x2ff   : > { %9510 = vst [vmem:[#allocation22_spill] sm:$0xff] %v8763_v57  ;;  %v8766_v56 = vadd.f32 %v4114_v40, %v8526_v43  ;;  %4473 = vmatprep.mubr.bf16.mxu1 %v6885_v24  ;;  %6332 = vmatprep.mubr.bf16.mxu0 %v6886_v41  ;;  %v6890_v57 = vld [vmem:[%s7962_s8 + $0x5bc] ss:$36 sps:$4 sm:$0xff]  }
 0x300   : > { %v3955_v2 = vpop.f32.mrf.mxu1  ;;  %v4116_v23 = vpop.f32.mrf.mxu0 }
 0x302   : > { %v8768_v52 = vpop.f32.mrf.mxu1  ;;  %v4117_v15 = vpop.f32.mrf.mxu0 }
 0x303   : > { %v8773_v16 = vadd.f32 %v4117_v15, %v8533_v59 }
 0x304   : > { %v3958_v34 = vpop.f32.mrf.mxu1  ;;  %v4119_v43 = vpop.f32.mrf.mxu0 }
 0x305   : > { %9511 = vst [vmem:[#allocation23_spill] sm:$0xff] %v8773_v16  ;;  %v6888_v16 = vld [vmem:[%s7962_s8 + $0x5b8] ss:$36 sps:$4 sm:$0xff]   ;;  %v6892_v34 = vld [vmem:[%s7962_s8 + $0x2a8] ss:$36 sps:$4 sm:$0xff]  }
 0x306   : > { %v8777_v24 = vpop.f32.mrf.mxu1  ;;  %v4122_v41 = vpop.f32.mrf.mxu0  ;;  %4474 = vmatmul.mubr.bf16.gmra.mxu1 %v6883_v36  ;;  %6333 = vmatmul.mubr.bf16.gmra.mxu0 %v6887_v9  ;;  %v6896_v36 = vld [vmem:[%s7962_s8 + $0x2f0] ss:$36 sps:$4 sm:$0xff]  }
 0x307   : > { %9512 = vst [vmem:[#allocation24_spill] sm:$0xff] %v8777_v24  ;;  %v8780_v40 = vadd.f32 %v4122_v41, %v8540_v46  ;;  %4481 = vmatprep.mubr.bf16.mxu1 %v6890_v57  ;;  %6336 = vmatprep.mubr.bf16.mxu0 %v6891_v13  ;;  %v6895_v24 = vld [vmem:[%s7962_s8 + $0x604] ss:$36 sps:$4 sm:$0xff]  }
 0x308   : > { %v3963_v59 = vpop.f32.mrf.mxu1  ;;  %v4124_v2 = vpop.f32.mrf.mxu0 }
 0x30a   : > { %v8782_v23 = vpop.f32.mrf.mxu1  ;;  %v4125_v15 = vpop.f32.mrf.mxu0 }
 0x30b   : > { %v8787_v43 = vadd.f32 %v4125_v15, %v8547_v26 }
 0x30c   : > { %v3966_v9 = vpop.f32.mrf.mxu1  ;;  %v4127_v46 = vpop.f32.mrf.mxu0 }
 0x30d   : > { %9513 = vst [vmem:[#allocation25_spill] sm:$0xff] %v8787_v43  ;;  %v6893_v43 = vld [vmem:[%s7962_s8 + $0x600] ss:$36 sps:$4 sm:$0xff]   ;;  %v6897_v9 = vld [vmem:[%s7962_s8 + $0x338] ss:$36 sps:$4 sm:$0xff]  }
 0x30e   : > { %v8791_v57 = vpop.f32.mrf.mxu1  ;;  %v4130_v13 = vpop.f32.mrf.mxu0  ;;  %4482 = vmatmul.mubr.bf16.gmra.mxu1 %v6888_v16  ;;  %6337 = vmatmul.mubr.bf16.gmra.mxu0 %v6892_v34  ;;  %v6901_v16 = vld [vmem:[%s7962_s8 + $0x380] ss:$36 sps:$4 sm:$0xff]  }
 0x30f   : > { %9514 = vst [vmem:[#allocation26_spill] sm:$0xff] %v8791_v57  ;;  %v8794_v41 = vadd.f32 %v4130_v13, %v8554_v4  ;;  %4489 = vmatprep.mubr.bf16.mxu1 %v6895_v24  ;;  %6340 = vmatprep.mubr.bf16.mxu0 %v6896_v36  ;;  %v6900_v57 = vld [vmem:[%s7962_s8 + $0x64c] ss:$36 sps:$4 sm:$0xff]  }
 0x310   : > { %v3971_v26 = vpop.f32.mrf.mxu1  ;;  %v4132_v59 = vpop.f32.mrf.mxu0 }
 0x312   : > { %v8796_v2 = vpop.f32.mrf.mxu1  ;;  %v4133_v15 = vpop.f32.mrf.mxu0 }
 0x313   : > { %v8801_v46 = vadd.f32 %v4133_v15, %v8561_v51 }
 0x314   : > { %v3974_v34 = vpop.f32.mrf.mxu1  ;;  %v4135_v4 = vpop.f32.mrf.mxu0 }
 0x315   : > { %9515 = vst [vmem:[#allocation27_spill] sm:$0xff] %v8801_v46  ;;  %v6898_v46 = vld [vmem:[%s7962_s8 + $0x648] ss:$36 sps:$4 sm:$0xff]  }
 0x316   : > { %v8805_v24 = vpop.f32.mrf.mxu1  ;;  %v4138_v36 = vpop.f32.mrf.mxu0  ;;  %4490 = vmatmul.mubr.bf16.gmra.mxu1 %v6893_v43  ;;  %6341 = vmatmul.mubr.bf16.gmra.mxu0 %v6897_v9  ;;  %v6902_v34 = vld [vmem:[%s7962_s8 + $0x3c8] ss:$36 sps:$4 sm:$0xff]   ;;  %v6906_v43 = vld [vmem:[%s7962_s8 + $0x410] ss:$36 sps:$4 sm:$0xff]  }
 0x317   : > { %9516 = vst [vmem:[#allocation28_spill] sm:$0xff] %v8805_v24  ;;  %v8808_v13 = vadd.f32 %v4138_v36, %v8568_v10  ;;  %4497 = vmatprep.mubr.bf16.mxu1 %v6900_v57  ;;  %6344 = vmatprep.mubr.bf16.mxu0 %v6901_v16  ;;  %v6905_v24 = vld [vmem:[%s7962_s8 + $0x694] ss:$36 sps:$4 sm:$0xff]  }
 0x318   : > { %v3979_v51 = vpop.f32.mrf.mxu1  ;;  %v4140_v26 = vpop.f32.mrf.mxu0 }
 0x31a   : > { %v8810_v59 = vpop.f32.mrf.mxu1  ;;  %v4141_v15 = vpop.f32.mrf.mxu0 }
 0x31b   : > { %v8815_v4 = vadd.f32 %v4141_v15, %v8575_v18 }
 0x31c   : > { %v3982_v9 = vpop.f32.mrf.mxu1  ;;  %v4143_v10 = vpop.f32.mrf.mxu0 }
 0x31d   : > { %9517 = vst [vmem:[#allocation29_spill] sm:$0xff] %v8815_v4  ;;  %v6903_v4 = vld [vmem:[%s7962_s8 + $0x690] ss:$36 sps:$4 sm:$0xff]   ;;  %v6907_v9 = vld [vmem:[%s7962_s8 + $0x458] ss:$36 sps:$4 sm:$0xff]  }
 0x31e   : > { %v8819_v57 = vpop.f32.mrf.mxu1  ;;  %v4146_v16 = vpop.f32.mrf.mxu0  ;;  %4498 = vmatmul.mubr.bf16.gmra.mxu1 %v6898_v46  ;;  %6345 = vmatmul.mubr.bf16.gmra.mxu0 %v6902_v34  ;;  %v6911_v46 = vld [vmem:[%s7962_s8 + $0x4a0] ss:$36 sps:$4 sm:$0xff]  }
 0x31f   : > { %9518 = vst [vmem:[#allocation30_spill] sm:$0xff] %v8819_v57  ;;  %v8822_v36 = vadd.f32 %v4146_v16, %v8582_v17  ;;  %4505 = vmatprep.mubr.bf16.mxu1 %v6905_v24  ;;  %6348 = vmatprep.mubr.bf16.mxu0 %v6906_v43  ;;  %v6910_v57 = vld [vmem:[%s7962_s8 + $0x6dc] ss:$36 sps:$4 sm:$0xff]  }
 0x320   : > { %v3987_v18 = vpop.f32.mrf.mxu1  ;;  %v4148_v51 = vpop.f32.mrf.mxu0 }
 0x322   : > { %v8824_v26 = vpop.f32.mrf.mxu1  ;;  %v4149_v15 = vpop.f32.mrf.mxu0 }
 0x323   : > { %9519 = vst [vmem:[#allocation31_spill] sm:$0xff] %v8824_v26  ;;  %v8829_v10 = vadd.f32 %v4149_v15, %v8589_v55  ;;  %v6915_v26 = vld [vmem:[%s7962_s8 + $0x724] ss:$36 sps:$4 sm:$0xff]  }
 0x324   : > { %v3990_v34 = vpop.f32.mrf.mxu1  ;;  %v4151_v17 = vpop.f32.mrf.mxu0 }
 0x325   : > { %9520 = vst [vmem:[#allocation32_spill] sm:$0xff] %v8829_v10  ;;  %v6908_v10 = vld [vmem:[%s7962_s8 + $0x6d8] ss:$36 sps:$4 sm:$0xff]   ;;  %v6912_v34 = vld [vmem:[%s7962_s8 + $0x4e8] ss:$36 sps:$4 sm:$0xff]  }
 0x326   : > { %v8833_v24 = vpop.f32.mrf.mxu1  ;;  %v4154_v43 = vpop.f32.mrf.mxu0  ;;  %4506 = vmatmul.mubr.bf16.gmra.mxu1 %v6903_v4  ;;  %6349 = vmatmul.mubr.bf16.gmra.mxu0 %v6907_v9 }
 0x327   : > { %9521 = vst [vmem:[#allocation33_spill] sm:$0xff] %v8833_v24  ;;  %v8836_v16 = vadd.f32 %v4154_v43, %v8596_v0  ;;  %4513 = vmatprep.mubr.bf16.mxu1 %v6910_v57  ;;  %6352 = vmatprep.mubr.bf16.mxu0 %v6911_v46  ;;  %v6916_v24 = vld [vmem:[%s7962_s8 + $0x530] ss:$36 sps:$4 sm:$0xff]  }
 0x328   : > { %v3995_v55 = vpop.f32.mrf.mxu1  ;;  %v4156_v18 = vpop.f32.mrf.mxu0 }
 0x32a   : > { %v8838_v51 = vpop.f32.mrf.mxu1  ;;  %v4157_v15 = vpop.f32.mrf.mxu0 }
 0x32b   : > { %v8843_v17 = vadd.f32 %v4157_v15, %v8603_v27 }
 0x32c   : > { %v3998_v4 = vpop.f32.mrf.mxu1  ;;  %v4159_v9 = vpop.f32.mrf.mxu0 }
 0x32d   : > { %9522 = vst [vmem:[#allocation34_spill] sm:$0xff] %v8843_v17  ;;  %v6913_v4 = vld [vmem:[%s7962_s8 + $0x720] ss:$36 sps:$4 sm:$0xff]   ;;  %v6917_v9 = vld [vmem:[%s7962_s8 + $0x578] ss:$36 sps:$4 sm:$0xff]  }
 0x32e   : > { %v4162_v0 = vpop.f32.mrf.mxu0  ;;  %v4323_v57 = vpop.f32.mrf.mxu1  ;;  %4514 = vmatmul.mubr.bf16.gmra.mxu1 %v6908_v10  ;;  %6353 = vmatmul.mubr.bf16.gmra.mxu0 %v6912_v34  ;;  %v6920_v34 = vld [vmem:[%s7962_s8 + $0x76c] ss:$36 sps:$4 sm:$0xff]  }
 0x32f   : > { %v8848_v46 = vadd.f32 %v4162_v0, %v8608_v32  ;;  %v8851_v43 = vadd.f32 %v4323_v57, %v8611_v47  ;;  %4521 = vmatprep.mubr.bf16.mxu1 %v6915_v26  ;;  %6356 = vmatprep.mubr.bf16.mxu0 %v6916_v24  ;;  %v6921_v32 = vld [vmem:[%s7962_s8 + $0x5c0] ss:$36 sps:$4 sm:$0xff]  }
 0x330   : > { %v4164_v27 = vpop.f32.mrf.mxu0  ;;  %v4325_v55 = vpop.f32.mrf.mxu1 }
 0x332   : > { %v4165_v18 = vpop.f32.mrf.mxu0  ;;  %v4326_v15 = vpop.f32.mrf.mxu1 }
 0x333   : > { %v8856_v17 = vadd.f32 %v4165_v18, %v8616_v50  ;;  %v8859_v10 = vadd.f32 %v4326_v15, %v8619_v8  ;;  %v6918_v15 = vld [vmem:[%s7962_s8 + $0x768] ss:$36 sps:$4 sm:$0xff]  }
 0x334   : > { %v4167_v47 = vpop.f32.mrf.mxu0  ;;  %v4328_v0 = vpop.f32.mrf.mxu1 }
 0x335   : > { %v6922_v47 = vld [vmem:[%s7962_s8 + $0x608] ss:$36 sps:$4 sm:$0xff]  }
 0x336   : > { %v4170_v26 = vpop.f32.mrf.mxu0  ;;  %v4331_v24 = vpop.f32.mrf.mxu1  ;;  %4522 = vmatmul.mubr.bf16.gmra.mxu1 %v6913_v4  ;;  %6357 = vmatmul.mubr.bf16.gmra.mxu0 %v6917_v9  ;;  %v6925_v9 = vld [vmem:[%s7962_s8 + $0x7b4] ss:$36 sps:$4 sm:$0xff]  }
 0x337   : > { %v8864_v57 = vadd.f32 %v4170_v26, %v8624_v12  ;;  %v8867_v50 = vadd.f32 %v4331_v24, %v8627_v61  ;;  %4529 = vmatprep.mubr.bf16.mxu1 %v6920_v34  ;;  %6360 = vmatprep.mubr.bf16.mxu0 %v6921_v32  ;;  %v6926_v12 = vld [vmem:[%s7962_s8 + $0x650] ss:$36 sps:$4 sm:$0xff]  }
 0x338   : > { %v4172_v8 = vpop.f32.mrf.mxu0  ;;  %v4333_v27 = vpop.f32.mrf.mxu1 }
 0x33a   : > { %v4173_v55 = vpop.f32.mrf.mxu0  ;;  %v4334_v18 = vpop.f32.mrf.mxu1 }
 0x33b   : > { %v8872_v0 = vadd.f32 %v4173_v55, %v8632_v3  ;;  %v8875_v4 = vadd.f32 %v4334_v18, %v8635_v20  ;;  %v6923_v18 = vld [vmem:[%s7962_s8 + $0x7b0] ss:$36 sps:$4 sm:$0xff]  }
 0x33c   : > { %v4175_v61 = vpop.f32.mrf.mxu0  ;;  %v4336_v26 = vpop.f32.mrf.mxu1 }
 0x33d   : > { %v6927_v61 = vld [vmem:[%s7962_s8 + $0x698] ss:$36 sps:$4 sm:$0xff]  }
 0x33e   : > { %v4178_v34 = vpop.f32.mrf.mxu0  ;;  %v4339_v32 = vpop.f32.mrf.mxu1  ;;  %4530 = vmatmul.mubr.bf16.gmra.mxu1 %v6918_v15  ;;  %6361 = vmatmul.mubr.bf16.gmra.mxu0 %v6922_v47  ;;  %v6930_v47 = vld [vmem:[%s7962_s8 + $0x7fc] ss:$36 sps:$4 sm:$0xff]  }
 0x33f   : > { %v8880_v24 = vadd.f32 %v4178_v34, %v8640_v58  ;;  %v8883_v3 = vadd.f32 %v4339_v32, %v8643_v22  ;;  %4537 = vmatprep.mubr.bf16.mxu1 %v6925_v9  ;;  %6364 = vmatprep.mubr.bf16.mxu0 %v6926_v12  ;;  %v6931_v58 = vld [vmem:[%s7962_s8 + $0x6e0] ss:$36 sps:$4 sm:$0xff]  }
 0x340   : > { %v4180_v20 = vpop.f32.mrf.mxu0  ;;  %v4341_v8 = vpop.f32.mrf.mxu1 }
 0x342   : > { %v4181_v27 = vpop.f32.mrf.mxu0  ;;  %v4342_v55 = vpop.f32.mrf.mxu1 }
 0x343   : > { %v8888_v26 = vadd.f32 %v4181_v27, %v8648_v63  ;;  %v8891_v15 = vadd.f32 %v4342_v55, %v8651_v60  ;;  %v6928_v55 = vld [vmem:[%s7962_s8 + $0x7f8] ss:$36 sps:$4 sm:$0xff]  }
 0x344   : > { %v4183_v22 = vpop.f32.mrf.mxu0  ;;  %v4344_v34 = vpop.f32.mrf.mxu1 }
 0x345   : > { %v6932_v22 = vld [vmem:[%s7962_s8 + $0x728] ss:$36 sps:$4 sm:$0xff]  }
 0x346   : > { %v4186_v9 = vpop.f32.mrf.mxu0  ;;  %v4347_v12 = vpop.f32.mrf.mxu1  ;;  %4538 = vmatmul.mubr.bf16.gmra.mxu1 %v6923_v18  ;;  %6365 = vmatmul.mubr.bf16.gmra.mxu0 %v6927_v61  ;;  %v6935_v61 = vld [vmem:[%s7962_s8 + $0x844] ss:$36 sps:$4 sm:$0xff]  }
 0x347   : > { %v8896_v32 = vadd.f32 %v4186_v9, %v8656_v48  ;;  %v8899_v63 = vadd.f32 %v4347_v12, %v8659_v11  ;;  %4545 = vmatprep.mubr.bf16.mxu1 %v6930_v47  ;;  %6368 = vmatprep.mubr.bf16.mxu0 %v6931_v58  ;;  %v6936_v48 = vld [vmem:[%s7962_s8 + $0x770] ss:$36 sps:$4 sm:$0xff]  }
 0x348   : > { %v4188_v60 = vpop.f32.mrf.mxu0  ;;  %v4349_v20 = vpop.f32.mrf.mxu1 }
 0x34a   : > { %v4189_v8 = vpop.f32.mrf.mxu0  ;;  %v4350_v27 = vpop.f32.mrf.mxu1 }
 0x34b   : > { %v8904_v34 = vadd.f32 %v4189_v8, %v8664_v62  ;;  %v8907_v18 = vadd.f32 %v4350_v27, %v8667_v49  ;;  %v6933_v27 = vld [vmem:[%s7962_s8 + $0x840] ss:$36 sps:$4 sm:$0xff]  }
 0x34c   : > { %v4191_v11 = vpop.f32.mrf.mxu0  ;;  %v4352_v9 = vpop.f32.mrf.mxu1 }
 0x34d   : > { %v6937_v11 = vld [vmem:[%s7962_s8 + $0x7b8] ss:$36 sps:$4 sm:$0xff]  }
 0x34e   : > { %v4194_v47 = vpop.f32.mrf.mxu0  ;;  %v4355_v58 = vpop.f32.mrf.mxu1  ;;  %4546 = vmatmul.mubr.bf16.gmra.mxu1 %v6928_v55  ;;  %6369 = vmatmul.mubr.bf16.gmra.mxu0 %v6932_v22  ;;  %v6940_v22 = vld [vmem:[%s7962_s8 + $0x88c] ss:$36 sps:$4 sm:$0xff]  }
 0x34f   : > { %v8912_v12 = vadd.f32 %v4194_v47, %v8672_v35  ;;  %v8915_v62 = vadd.f32 %v4355_v58, %v8675_v42  ;;  %4553 = vmatprep.mubr.bf16.mxu1 %v6935_v61  ;;  %6372 = vmatprep.mubr.bf16.mxu0 %v6936_v48  ;;  %v6941_v35 = vld [vmem:[%s7962_s8 + $0x800] ss:$36 sps:$4 sm:$0xff]  }
 0x350   : > { %v4196_v49 = vpop.f32.mrf.mxu0  ;;  %v4357_v60 = vpop.f32.mrf.mxu1 }
 0x352   : > { %v4197_v20 = vpop.f32.mrf.mxu0  ;;  %v4358_v8 = vpop.f32.mrf.mxu1 }
 0x353   : > { %v8920_v9 = vadd.f32 %v4197_v20, %v8680_v19  ;;  %v8923_v55 = vadd.f32 %v4358_v8, %v8683_v39  ;;  %v6938_v8 = vld [vmem:[%s7962_s8 + $0x888] ss:$36 sps:$4 sm:$0xff]  }
 0x354   : > { %v4199_v42 = vpop.f32.mrf.mxu0  ;;  %v4360_v47 = vpop.f32.mrf.mxu1 }
 0x355   : > { %9523 = vst [vmem:[#allocation35_spill] sm:$0xff] %v8920_v9  ;;  %v6942_v42 = vld [vmem:[%s7962_s8 + $0x848] ss:$36 sps:$4 sm:$0xff]   ;;  %v6947_v9 = vld [vmem:[%s7962_s8 + $0x8d8] ss:$36 sps:$4 sm:$0xff]  }
 0x356   : > { %v4202_v61 = vpop.f32.mrf.mxu0  ;;  %v4363_v48 = vpop.f32.mrf.mxu1  ;;  %4554 = vmatmul.mubr.bf16.gmra.mxu1 %v6933_v27  ;;  %6373 = vmatmul.mubr.bf16.gmra.mxu0 %v6937_v11  ;;  %v6945_v11 = vld [vmem:[%s7962_s8 + $0x8d4] ss:$36 sps:$4 sm:$0xff]  }
 0x357   : > { %v8928_v58 = vadd.f32 %v4202_v61, %v8688_v31  ;;  %v8931_v19 = vadd.f32 %v4363_v48, %v8691_v6  ;;  %4561 = vmatprep.mubr.bf16.mxu1 %v6940_v22  ;;  %6376 = vmatprep.mubr.bf16.mxu0 %v6941_v35  ;;  %v6946_v31 = vld [vmem:[%s7962_s8 + $0x890] ss:$36 sps:$4 sm:$0xff]  }
 0x358   : > { %v4204_v39 = vpop.f32.mrf.mxu0  ;;  %v4365_v49 = vpop.f32.mrf.mxu1 }
 0x35a   : > { %v4205_v60 = vpop.f32.mrf.mxu0  ;;  %v4366_v20 = vpop.f32.mrf.mxu1 }
 0x35b   : > { %v8936_v47 = vadd.f32 %v4205_v60, %v8696_v38  ;;  %v8939_v27 = vadd.f32 %v4366_v20, %v8699_v21  ;;  %v6943_v20 = vld [vmem:[%s7962_s8 + $0x8d0] ss:$36 sps:$4 sm:$0xff]  }
 0x35c   : > { %v4207_v6 = vpop.f32.mrf.mxu0  ;;  %v4368_v61 = vpop.f32.mrf.mxu1 }
 0x35e   : > { %v4210_v22 = vpop.f32.mrf.mxu0  ;;  %v4371_v35 = vpop.f32.mrf.mxu1  ;;  %4562 = vmatmul.mubr.bf16.gmra.mxu1 %v6938_v8  ;;  %6377 = vmatmul.mubr.bf16.gmra.mxu0 %v6942_v42 }
 0x35f   : > { %v8944_v48 = vadd.f32 %v4210_v22, %v8704_v25  ;;  %v8947_v39 = vadd.f32 %v4371_v35, %v8707_v30  ;;  %4569 = vmatprep.mubr.bf16.mxu1 %v6945_v11  ;;  %6380 = vmatprep.mubr.bf16.mxu0 %v6946_v31 }
 0x360   : > { %v4212_v38 = vpop.f32.mrf.mxu0  ;;  %v4373_v21 = vpop.f32.mrf.mxu1 }
 0x362   : > { %v4213_v49 = vpop.f32.mrf.mxu0  ;;  %v4374_v60 = vpop.f32.mrf.mxu1 }
 0x363   : > { %v8952_v6 = vadd.f32 %v4213_v49, %v8712_v1  ;;  %v8955_v8 = vadd.f32 %v4374_v60, %v8715_v54 }
 0x364   : > { %v4215_v42 = vpop.f32.mrf.mxu0  ;;  %v4376_v25 = vpop.f32.mrf.mxu1 }
 0x365   : > { %9524 = vst [vmem:[#allocation36_spill] sm:$0xff] %v8952_v6  ;;  %v993_v6 = vld [vmem:[#allocation2 + $0x18] sm:$0xff] }
 0x366   : > { %v4218_v61 = vpop.f32.mrf.mxu0  ;;  %v4379_v22 = vpop.f32.mrf.mxu1  ;;  %4570 = vmatmul.mubr.bf16.gmra.mxu1 %v6943_v20  ;;  %6381 = vmatmul.mubr.bf16.gmra.mxu0 %v6947_v9  ;;  %v3938_v9 = vadd.f32 %v8735_v37, %v8282_v45 }
 0x367   : > { %v8958_v30 = vadd.f32 %v4218_v61, %v8720_v5  ;;  %v8961_v11 = vadd.f32 %v4379_v22, %v8723_v33  ;;  %v9526_v22 = vld [vmem:[#allocation4_spill] sm:$0xff] }
 0x368   : > { %v4220_v31 = vpop.f32.mrf.mxu0  ;;  %v4381_v35 = vpop.f32.mrf.mxu1 }
 0x36a   : > { %v4221_v38 = vpop.f32.mrf.mxu0  ;;  %v4382_v1 = vpop.f32.mrf.mxu1 }
 0x36b   : > { %v8964_v21 = vadd.f32 %v4221_v38, %v8728_v28  ;;  %v8967_v54 = vadd.f32 %v4382_v1, %v8731_v14  ;;  %v3941_v28 = vadd.f32 %v8740_v7, %v9526_v22  ;;  %v9528_v38 = vld [vmem:[#allocation19_spill] sm:$0xff]  ;;  %v9532_v22 = vld [vmem:[#allocation6_spill] sm:$0xff] }
 0x36c   : > { %v4223_v49 = vpop.f32.mrf.mxu0  ;;  %v4384_v60 = vpop.f32.mrf.mxu1 }
 0x36d   : > { %v9529_v49 = vld [vmem:[#allocation5_spill] sm:$0xff]  ;;  %v9530_v60 = vld [vmem:[#allocation20_spill] sm:$0xff] }
 0x36e   : > { %v4226_v5 = vpop.f32.mrf.mxu0  ;;  %v4387_v20 = vpop.f32.mrf.mxu1 }
 0x36f   : > { %v8971_v42 = vadd.f32 %v4226_v5, %v3938_v9  ;;  %v8974_v33 = vadd.f32 %v4387_v20, %v8738_v53  ;;  %v3946_v9 = vadd.f32 %v9530_v60, %v9529_v49 }
 0x370   : > { %v4228_v25 = vpop.f32.mrf.mxu0  ;;  %v4389_v61 = vpop.f32.mrf.mxu1 }
 0x371   : > { %9525 = vst [vmem:[#allocation37_spill] sm:$0xff] %v8971_v42 }
 0x372   : > { %v4229_v31 = vpop.f32.mrf.mxu0  ;;  %v4390_v14 = vpop.f32.mrf.mxu1 }
 0x373   : > { %v8978_v35 = vadd.f32 %v4229_v31, %v3941_v28  ;;  %v8981_v1 = vadd.f32 %v4390_v14, %v9528_v38  ;;  %v3949_v28 = vadd.f32 %v8754_v29, %v9532_v22  ;;  %v9538_v22 = vld [vmem:[#allocation8_spill] sm:$0xff] }
 0x374   : > { %v4231_v45 = vpop.f32.mrf.mxu0  ;;  %v4392_v37 = vpop.f32.mrf.mxu1 }
 0x375   : > { %9527 = vst [vmem:[#allocation4_spill] sm:$0xff] %v8978_v35  ;;  %v9534_v45 = vld [vmem:[#allocation21_spill] sm:$0xff]  ;;  %v9535_v35 = vld [vmem:[#allocation7_spill] sm:$0xff] }
 0x376   : > { %v4234_v5 = vpop.f32.mrf.mxu0  ;;  %v4395_v53 = vpop.f32.mrf.mxu1 }
 0x377   : > { %v8985_v20 = vadd.f32 %v4234_v5, %v3946_v9  ;;  %v8988_v25 = vadd.f32 %v4395_v53, %v8752_v44  ;;  %v9536_v9 = vld [vmem:[#allocation22_spill] sm:$0xff] }
 0x378   : > { %v4236_v7 = vpop.f32.mrf.mxu0  ;;  %v4397_v61 = vpop.f32.mrf.mxu1  ;;  %v3954_v5 = vadd.f32 %v9536_v9, %v9535_v35 }
 0x379   : > { %9531 = vst [vmem:[#allocation19_spill] sm:$0xff] %v8985_v20  ;;  %v9566_v20 = vld [vmem:[#allocation17_spill] sm:$0xff] }
 0x37a   : > { %v4237_v31 = vpop.f32.mrf.mxu0  ;;  %v4398_v14 = vpop.f32.mrf.mxu1 }
 0x37b   : > { %v8992_v38 = vadd.f32 %v4237_v31, %v3949_v28  ;;  %v8995_v37 = vadd.f32 %v4398_v14, %v9534_v45  ;;  %v3957_v28 = vadd.f32 %v8768_v52, %v9538_v22  ;;  %v9544_v22 = vld [vmem:[#allocation10_spill] sm:$0xff] }
 0x37c   : > { %v4239_v49 = vpop.f32.mrf.mxu0  ;;  %v4400_v60 = vpop.f32.mrf.mxu1 }
 0x37d   : > { %9533 = vst [vmem:[#allocation5_spill] sm:$0xff] %v8992_v38  ;;  %v9540_v49 = vld [vmem:[#allocation23_spill] sm:$0xff]  ;;  %v9541_v38 = vld [vmem:[#allocation9_spill] sm:$0xff] }
 0x37e   : > { %v4242_v42 = vpop.f32.mrf.mxu0  ;;  %v4403_v44 = vpop.f32.mrf.mxu1 }
 0x37f   : > { %v8999_v53 = vadd.f32 %v4242_v42, %v3954_v5  ;;  %v9002_v7 = vadd.f32 %v4403_v44, %v8766_v56  ;;  %v9542_v42 = vld [vmem:[#allocation24_spill] sm:$0xff] }
 0x380   : > { %v4244_v29 = vpop.f32.mrf.mxu0  ;;  %v4405_v61 = vpop.f32.mrf.mxu1  ;;  %v3962_v5 = vadd.f32 %v9542_v42, %v9541_v38 }
 0x381   : > { %9537 = vst [vmem:[#allocation20_spill] sm:$0xff] %v8999_v53 }
 0x382   : > { %v4245_v31 = vpop.f32.mrf.mxu0  ;;  %v4406_v14 = vpop.f32.mrf.mxu1 }
 0x383   : > { %v9006_v45 = vadd.f32 %v4245_v31, %v3957_v28  ;;  %v9009_v60 = vadd.f32 %v4406_v14, %v9540_v49  ;;  %v3965_v28 = vadd.f32 %v8782_v23, %v9544_v22  ;;  %v9550_v22 = vld [vmem:[#allocation12_spill] sm:$0xff] }
 0x384   : > { %v4247_v35 = vpop.f32.mrf.mxu0  ;;  %v4408_v9 = vpop.f32.mrf.mxu1 }
 0x385   : > { %9539 = vst [vmem:[#allocation6_spill] sm:$0xff] %v9006_v45  ;;  %v9546_v35 = vld [vmem:[#allocation25_spill] sm:$0xff]  ;;  %v9547_v45 = vld [vmem:[#allocation11_spill] sm:$0xff] }
 0x386   : > { %v4250_v53 = vpop.f32.mrf.mxu0  ;;  %v4411_v56 = vpop.f32.mrf.mxu1 }
 0x387   : > { %v9013_v44 = vadd.f32 %v4250_v53, %v3962_v5  ;;  %v9016_v29 = vadd.f32 %v4411_v56, %v8780_v40  ;;  %v9548_v53 = vld [vmem:[#allocation26_spill] sm:$0xff] }
 0x388   : > { %v4252_v52 = vpop.f32.mrf.mxu0  ;;  %v4413_v61 = vpop.f32.mrf.mxu1  ;;  %v3970_v5 = vadd.f32 %v9548_v53, %v9547_v45 }
 0x389   : > { %9543 = vst [vmem:[#allocation21_spill] sm:$0xff] %v9013_v44 }
 0x38a   : > { %v4253_v31 = vpop.f32.mrf.mxu0  ;;  %v4414_v14 = vpop.f32.mrf.mxu1 }
 0x38b   : > { %v9020_v49 = vadd.f32 %v4253_v31, %v3965_v28  ;;  %v9023_v9 = vadd.f32 %v4414_v14, %v9546_v35  ;;  %v3973_v28 = vadd.f32 %v8796_v2, %v9550_v22  ;;  %v9556_v22 = vld [vmem:[#allocation14_spill] sm:$0xff] }
 0x38c   : > { %v4255_v38 = vpop.f32.mrf.mxu0  ;;  %v4416_v42 = vpop.f32.mrf.mxu1 }
 0x38d   : > { %9545 = vst [vmem:[#allocation7_spill] sm:$0xff] %v9020_v49  ;;  %v9552_v38 = vld [vmem:[#allocation27_spill] sm:$0xff]  ;;  %v9553_v49 = vld [vmem:[#allocation13_spill] sm:$0xff] }
 0x38e   : > { %v4258_v44 = vpop.f32.mrf.mxu0  ;;  %v4419_v40 = vpop.f32.mrf.mxu1 }
 0x38f   : > { %v9027_v56 = vadd.f32 %v4258_v44, %v3970_v5  ;;  %v9030_v52 = vadd.f32 %v4419_v40, %v8794_v41  ;;  %v9554_v44 = vld [vmem:[#allocation28_spill] sm:$0xff] }
 0x390   : > { %v4260_v23 = vpop.f32.mrf.mxu0  ;;  %v4421_v61 = vpop.f32.mrf.mxu1  ;;  %v3978_v5 = vadd.f32 %v9554_v44, %v9553_v49 }
 0x391   : > { %9549 = vst [vmem:[#allocation22_spill] sm:$0xff] %v9027_v56 }
 0x392   : > { %v4261_v31 = vpop.f32.mrf.mxu0  ;;  %v4422_v14 = vpop.f32.mrf.mxu1 }
 0x393   : > { %v9034_v35 = vadd.f32 %v4261_v31, %v3973_v28  ;;  %v9037_v42 = vadd.f32 %v4422_v14, %v9552_v38  ;;  %v3981_v28 = vadd.f32 %v8810_v59, %v9556_v22  ;;  %v9562_v22 = vld [vmem:[#allocation16_spill] sm:$0xff] }
 0x394   : > { %v4263_v45 = vpop.f32.mrf.mxu0  ;;  %v4424_v53 = vpop.f32.mrf.mxu1 }
 0x395   : > { %9551 = vst [vmem:[#allocation8_spill] sm:$0xff] %v9034_v35  ;;  %v9558_v45 = vld [vmem:[#allocation29_spill] sm:$0xff]  ;;  %v9559_v35 = vld [vmem:[#allocation15_spill] sm:$0xff] }
 0x396   : > { %v4266_v56 = vpop.f32.mrf.mxu0  ;;  %v4427_v41 = vpop.f32.mrf.mxu1 }
 0x397   : > { %v9041_v40 = vadd.f32 %v4266_v56, %v3978_v5  ;;  %v9044_v23 = vadd.f32 %v4427_v41, %v8808_v13  ;;  %v9560_v56 = vld [vmem:[#allocation30_spill] sm:$0xff] }
 0x398   : > { %v4268_v2 = vpop.f32.mrf.mxu0  ;;  %v4429_v61 = vpop.f32.mrf.mxu1  ;;  %v3986_v5 = vadd.f32 %v9560_v56, %v9559_v35 }
 0x399   : > { %9555 = vst [vmem:[#allocation23_spill] sm:$0xff] %v9041_v40 }
 0x39a   : > { %v4269_v31 = vpop.f32.mrf.mxu0  ;;  %v4430_v14 = vpop.f32.mrf.mxu1 }
 0x39b   : > { %v9048_v38 = vadd.f32 %v4269_v31, %v3981_v28  ;;  %v9051_v53 = vadd.f32 %v4430_v14, %v9558_v45  ;;  %v9563_v28 = vld [vmem:[#allocation31_spill] sm:$0xff] }
 0x39c   : > { %v4271_v49 = vpop.f32.mrf.mxu0  ;;  %v4432_v44 = vpop.f32.mrf.mxu1  ;;  %v3989_v31 = vadd.f32 %v9563_v28, %v9562_v22  ;;  %v9569_v22 = vld [vmem:[#allocation18_spill] sm:$0xff] }
 0x39d   : > { %9557 = vst [vmem:[#allocation9_spill] sm:$0xff] %v9048_v38  ;;  %v9565_v49 = vld [vmem:[#allocation32_spill] sm:$0xff]  ;;  %v3997_v28 = vadd.f32 %v8838_v51, %v9569_v22 }
 0x39e   : > { %v4274_v40 = vpop.f32.mrf.mxu0  ;;  %v4435_v13 = vpop.f32.mrf.mxu1 }
 0x39f   : > { %v9055_v41 = vadd.f32 %v4274_v40, %v3986_v5  ;;  %v9058_v2 = vadd.f32 %v4435_v13, %v8822_v36  ;;  %v9567_v40 = vld [vmem:[#allocation33_spill] sm:$0xff] }
 0x3a0   : > { %v4276_v59 = vpop.f32.mrf.mxu0  ;;  %v4437_v61 = vpop.f32.mrf.mxu1  ;;  %v3994_v5 = vadd.f32 %v9567_v40, %v9566_v20 }
 0x3a1   : > { %9561 = vst [vmem:[#allocation24_spill] sm:$0xff] %v9055_v41 }
 0x3a2   : > { %v4277_v38 = vpop.f32.mrf.mxu0  ;;  %v4438_v14 = vpop.f32.mrf.mxu1 }
 0x3a3   : > { %v9062_v45 = vadd.f32 %v4277_v38, %v3989_v31  ;;  %v9065_v44 = vadd.f32 %v4438_v14, %v9565_v49 }
 0x3a4   : > { %v4279_v35 = vpop.f32.mrf.mxu0  ;;  %v4440_v56 = vpop.f32.mrf.mxu1 }
 0x3a5   : > { %9564 = vst [vmem:[#allocation10_spill] sm:$0xff] %v9062_v45  ;;  %v992_v45 = vld [vmem:[#allocation2 + $0xd8] sm:$0xff] }
 0x3a6   : > { %v4282_v41 = vpop.f32.mrf.mxu0  ;;  %v9069_v36 = vpop.f32.mrf.mxu1 }
 0x3a7   : > { %v9071_v13 = vadd.f32 %v4282_v41, %v3994_v5 }
 0x3a8   : > { %v4284_v59 = vpop.f32.mrf.mxu0  ;;  %v4445_v61 = vpop.f32.mrf.mxu1 }
 0x3a9   : > { %9568 = vst [vmem:[#allocation25_spill] sm:$0xff] %v9071_v13  ;;  %v990_v59 = vld [vmem:[#allocation2 + $0xb0] sm:$0xff] }
 0x3aa   : > { %v4285_v38 = vpop.f32.mrf.mxu0  ;;  %v9075_v31 = vpop.f32.mrf.mxu1 }
 0x3ab   : > { %v9077_v14 = vadd.f32 %v4285_v38, %v3997_v28 }
 0x3ac   : > { %v4287_v49 = vpop.f32.mrf.mxu0  ;;  %v4448_v35 = vpop.f32.mrf.mxu1 }
 0x3ad   : > { %9570 = vst [vmem:[#allocation11_spill] sm:$0xff] %v9077_v14 }
 0x3ae   : > { %v4451_v56 = vpop.f32.mrf.mxu1  ;;  %v6322_v20 = vpop.f32.mrf.mxu0 }
 0x3af   : > { %v9080_v40 = vadd.f32 %v4451_v56, %v8848_v46  ;;  %v4621_v41 = vadd.f32 %v6322_v20, %v8867_v50  ;;  %v991_v56 = vld [vmem:[#allocation2 + $0x1b0] sm:$0xff] }
 0x3b0   : > { %v4453_v5 = vpop.f32.mrf.mxu1  ;;  %v4612_v61 = vpop.f32.mrf.mxu0 }
 0x3b1   : > { %v4869_v13 = vadd.f32 %v4621_v41, %v992_v45  ;;  %v4613_v51 = vadd.f32 %v4612_v61, %v8851_v43  ;;  %v996_v43 = vld [vmem:[#allocation2 + $0x130] sm:$0xff] }
 0x3b2   : > { %v4454_v22 = vpop.f32.mrf.mxu1  ;;  %v6323_v28 = vpop.f32.mrf.mxu0 }
 0x3b3   : > { %4933 = vst [vmem:[#allocation2 + $0xd8] sm:$0xff] %v4869_v13  ;;  %v4867_v38 = vadd.f32 %v4613_v51, %v990_v59  ;;  %v9085_v49 = vadd.f32 %v4454_v22, %v8856_v17  ;;  %v4624_v35 = vadd.f32 %v6323_v28, %v8875_v4  ;;  %v994_v17 = vld [vmem:[#allocation2 + $0x50] sm:$0xff] }
 0x3b4   : > { %v4456_v46 = vpop.f32.mrf.mxu1  ;;  %v4615_v14 = vpop.f32.mrf.mxu0 }
 0x3b5   : > { %4931 = vst [vmem:[#allocation2 + $0xb0] sm:$0xff] %v4867_v38  ;;  %v4870_v50 = vadd.f32 %v4624_v35, %v993_v6  ;;  %v4616_v20 = vadd.f32 %v4615_v14, %v8859_v10  ;;  %v997_v6 = vld [vmem:[#allocation2 + $0x48] sm:$0xff] }
 0x3b6   : > { %v9089_v45 = vpop.f32.mrf.mxu1  ;;  %v6326_v41 = vpop.f32.mrf.mxu0  ;;  %v995_v35 = vld [vmem:[#allocation2 + $0x168] sm:$0xff] }
 0x3b7   : > { %4934 = vst [vmem:[#allocation2 + $0x18] sm:$0xff] %v4870_v50  ;;  %v4868_v5 = vadd.f32 %v4616_v20, %v991_v56  ;;  %v4637_v13 = vadd.f32 %v6326_v41, %v8899_v63  ;;  %v1000_v20 = vld [vmem:[#allocation2 + $0x118] sm:$0xff] }
 0x3b8   : > { %v4461_v59 = vpop.f32.mrf.mxu1  ;;  %v4628_v61 = vpop.f32.mrf.mxu0 }
 0x3b9   : > { %4932 = vst [vmem:[#allocation2 + $0x1b0] sm:$0xff] %v4868_v5  ;;  %v4873_v4 = vadd.f32 %v4637_v13, %v996_v43  ;;  %v4629_v51 = vadd.f32 %v4628_v61, %v8883_v3  ;;  %v998_v13 = vld [vmem:[#allocation2 + $0x180] sm:$0xff] }
 0x3ba   : > { %v9093_v22 = vpop.f32.mrf.mxu1  ;;  %v6327_v28 = vpop.f32.mrf.mxu0 }
 0x3bb   : > { %4937 = vst [vmem:[#allocation2 + $0x130] sm:$0xff] %v4873_v4  ;;  %v4871_v10 = vadd.f32 %v4629_v51, %v994_v17  ;;  %v4640_v14 = vadd.f32 %v6327_v28, %v8907_v18  ;;  %v1001_v4 = vld [vmem:[#allocation2 + $0x98] sm:$0xff] }
 0x3bc   : > { %v4464_v38 = vpop.f32.mrf.mxu1  ;;  %v4631_v46 = vpop.f32.mrf.mxu0 }
 0x3bd   : > { %4935 = vst [vmem:[#allocation2 + $0x50] sm:$0xff] %v4871_v10  ;;  %v4874_v63 = vadd.f32 %v4640_v14, %v997_v6  ;;  %v4632_v56 = vadd.f32 %v4631_v46, %v8891_v15  ;;  %v999_v10 = vld [vmem:[#allocation2 + $0x110] sm:$0xff]  ;;  %v1004_v46 = vld [vmem:[#allocation2 + $0x108] sm:$0xff] }
 0x3be   : > { %v9097_v50 = vpop.f32.mrf.mxu1  ;;  %v6330_v43 = vpop.f32.mrf.mxu0 }
 0x3bf   : > { %4938 = vst [vmem:[#allocation2 + $0x48] sm:$0xff] %v4874_v63  ;;  %v4872_v3 = vadd.f32 %v4632_v56, %v995_v35  ;;  %v4653_v41 = vadd.f32 %v6330_v43, %v8931_v19  ;;  %v1002_v43 = vld [vmem:[#allocation2 + $0x120] sm:$0xff] }
 0x3c0   : > { %v4469_v5 = vpop.f32.mrf.mxu1  ;;  %v4644_v59 = vpop.f32.mrf.mxu0 }
 0x3c1   : > { %4936 = vst [vmem:[#allocation2 + $0x168] sm:$0xff] %v4872_v3  ;;  %v4877_v18 = vadd.f32 %v4653_v41, %v1000_v20  ;;  %v4645_v17 = vadd.f32 %v4644_v59, %v8915_v62 }
 0x3c2   : > { %v9101_v61 = vpop.f32.mrf.mxu1  ;;  %v6331_v51 = vpop.f32.mrf.mxu0 }
 0x3c3   : > { %4941 = vst [vmem:[#allocation2 + $0x118] sm:$0xff] %v4877_v18  ;;  %v4875_v15 = vadd.f32 %v4645_v17, %v998_v13  ;;  %v4656_v6 = vadd.f32 %v6331_v51, %v8939_v27  ;;  %v1005_v13 = vld [vmem:[#allocation2 + $0x60] sm:$0xff] }
 0x3c4   : > { %v4472_v28 = vpop.f32.mrf.mxu1  ;;  %v4647_v14 = vpop.f32.mrf.mxu0 }
 0x3c5   : > { %4939 = vst [vmem:[#allocation2 + $0x180] sm:$0xff] %v4875_v15  ;;  %v4878_v19 = vadd.f32 %v4656_v6, %v1001_v4  ;;  %v4648_v38 = vadd.f32 %v4647_v14, %v8923_v55  ;;  %v1003_v4 = vld [vmem:[#allocation2 + $0x150] sm:$0xff]  ;;  %v1008_v28 = vld [vmem:[#allocation2 + $0x138] sm:$0xff] }
 0x3c6   : > { %v9105_v35 = vpop.f32.mrf.mxu1  ;;  %v6334_v63 = vpop.f32.mrf.mxu0 }
 0x3c7   : > { %4942 = vst [vmem:[#allocation2 + $0x98] sm:$0xff] %v4878_v19  ;;  %v4876_v62 = vadd.f32 %v4648_v38, %v999_v10  ;;  %v4669_v56 = vadd.f32 %v6334_v63, %v8961_v11  ;;  %v1006_v38 = vld [vmem:[#allocation2 + $0xe0] sm:$0xff] }
 0x3c8   : > { %v4477_v20 = vpop.f32.mrf.mxu1  ;;  %v4660_v3 = vpop.f32.mrf.mxu0 }
 0x3c9   : > { %4940 = vst [vmem:[#allocation2 + $0x110] sm:$0xff] %v4876_v62  ;;  %v4881_v27 = vadd.f32 %v4669_v56, %v1004_v46  ;;  %v4661_v41 = vadd.f32 %v4660_v3, %v8947_v39  ;;  %v1009_v56 = vld [vmem:[#allocation2 + $0x140] sm:$0xff] }
 0x3ca   : > { %v9109_v5 = vpop.f32.mrf.mxu1  ;;  %v6335_v59 = vpop.f32.mrf.mxu0 }
 0x3cb   : > { %4945 = vst [vmem:[#allocation2 + $0x108] sm:$0xff] %v4881_v27  ;;  %v4879_v55 = vadd.f32 %v4661_v41, %v1002_v43  ;;  %v4672_v18 = vadd.f32 %v6335_v59, %v8967_v54  ;;  %v1007_v27 = vld [vmem:[#allocation2 + $0x188] sm:$0xff] }
 0x3cc   : > { %v4480_v17 = vpop.f32.mrf.mxu1  ;;  %v4663_v51 = vpop.f32.mrf.mxu0 }
 0x3cd   : > { %4943 = vst [vmem:[#allocation2 + $0x120] sm:$0xff] %v4879_v55  ;;  %v4882_v11 = vadd.f32 %v4672_v18, %v1005_v13  ;;  %v4664_v15 = vadd.f32 %v4663_v51, %v8955_v8  ;;  %v1012_v55 = vld [vmem:[#allocation2 + $0x1b8] sm:$0xff]  ;;  %v1010_v51 = vld [vmem:[#allocation2 + $0x80] sm:$0xff] }
 0x3ce   : > { %v9113_v6 = vpop.f32.mrf.mxu1  ;;  %v6338_v10 = vpop.f32.mrf.mxu0 }
 0x3cf   : > { %4946 = vst [vmem:[#allocation2 + $0x60] sm:$0xff] %v4882_v11  ;;  %v4880_v39 = vadd.f32 %v4664_v15, %v1003_v4  ;;  %v4685_v14 = vadd.f32 %v6338_v10, %v8988_v25  ;;  %v1013_v10 = vld [vmem:[#allocation2 + $0x28] sm:$0xff] }
 0x3d0   : > { %v4485_v19 = vpop.f32.mrf.mxu1  ;;  %v4676_v46 = vpop.f32.mrf.mxu0 }
 0x3d1   : > { %4944 = vst [vmem:[#allocation2 + $0x150] sm:$0xff] %v4880_v39  ;;  %v4885_v54 = vadd.f32 %v4685_v14, %v1008_v28  ;;  %v4677_v63 = vadd.f32 %v4676_v46, %v8974_v33 }
 0x3d2   : > { %v9117_v62 = vpop.f32.mrf.mxu1  ;;  %v6339_v20 = vpop.f32.mrf.mxu0 }
 0x3d3   : > { %4949 = vst [vmem:[#allocation2 + $0x138] sm:$0xff] %v4885_v54  ;;  %v4883_v8 = vadd.f32 %v4677_v63, %v1006_v38  ;;  %v4688_v43 = vadd.f32 %v6339_v20, %v8995_v37  ;;  %v1011_v38 = vld [vmem:[#allocation2 + $0x1a8] sm:$0xff] }
 0x3d4   : > { %v4488_v3 = vpop.f32.mrf.mxu1  ;;  %v4679_v41 = vpop.f32.mrf.mxu0 }
 0x3d5   : > { %4947 = vst [vmem:[#allocation2 + $0xe0] sm:$0xff] %v4883_v8  ;;  %v4886_v25 = vadd.f32 %v4688_v43, %v1009_v56  ;;  %v4680_v13 = vadd.f32 %v4679_v41, %v8981_v1  ;;  %v1016_v56 = vld [vmem:[#allocation2 + $0x160] sm:$0xff]  ;;  %v1014_v3 = vld [vmem:[#allocation2 + $0x1e8] sm:$0xff] }
 0x3d6   : > { %v9121_v59 = vpop.f32.mrf.mxu1  ;;  %v6342_v18 = vpop.f32.mrf.mxu0 }
 0x3d7   : > { %4950 = vst [vmem:[#allocation2 + $0x140] sm:$0xff] %v4886_v25  ;;  %v4884_v33 = vadd.f32 %v4680_v13, %v1007_v27  ;;  %v4701_v17 = vadd.f32 %v6342_v18, %v9016_v29  ;;  %v1017_v13 = vld [vmem:[#allocation2 + $0x30] sm:$0xff] }
 0x3d8   : > { %v4493_v4 = vpop.f32.mrf.mxu1  ;;  %v4692_v11 = vpop.f32.mrf.mxu0 }
 0x3d9   : > { %4948 = vst [vmem:[#allocation2 + $0x188] sm:$0xff] %v4884_v33  ;;  %v4889_v37 = vadd.f32 %v4701_v17, %v1012_v55  ;;  %v4693_v15 = vadd.f32 %v4692_v11, %v9002_v7  ;;  %v1015_v17 = vld [vmem:[#allocation2 + $0xf8] sm:$0xff] }
 0x3da   : > { %v9125_v28 = vpop.f32.mrf.mxu1  ;;  %v6343_v39 = vpop.f32.mrf.mxu0 }
 0x3db   : > { %4953 = vst [vmem:[#allocation2 + $0x1b8] sm:$0xff] %v4889_v37  ;;  %v4887_v1 = vadd.f32 %v4693_v15, %v1010_v51  ;;  %v4704_v14 = vadd.f32 %v6343_v39, %v9023_v9 }
 0x3dc   : > { %v4496_v19 = vpop.f32.mrf.mxu1  ;;  %v4695_v46 = vpop.f32.mrf.mxu0 }
 0x3dd   : > { %4951 = vst [vmem:[#allocation2 + $0x80] sm:$0xff] %v4887_v1  ;;  %v4890_v29 = vadd.f32 %v4704_v14, %v1013_v10  ;;  %v4696_v54 = vadd.f32 %v4695_v46, %v9009_v60  ;;  %v1018_v14 = vld [vmem:[#allocation2 + $0x1e0] sm:$0xff]  ;;  %v9571_v19 = vld [vmem:[#allocation34_spill] sm:$0xff] }
 0x3de   : > { %v9129_v63 = vpop.f32.mrf.mxu1  ;;  %v6346_v20 = vpop.f32.mrf.mxu0 }
 0x3df   : > { %4954 = vst [vmem:[#allocation2 + $0x28] sm:$0xff] %v4890_v29  ;;  %v4888_v7 = vadd.f32 %v4696_v54, %v1011_v38  ;;  %v4717_v8 = vadd.f32 %v6346_v20, %v9044_v23  ;;  %v4444_v23 = vadd.f32 %v9069_v36, %v8836_v16  ;;  %v4447_v38 = vadd.f32 %v9075_v31, %v9571_v19 }
 0x3e0   : > { %v4501_v43 = vpop.f32.mrf.mxu1  ;;  %v4708_v27 = vpop.f32.mrf.mxu0 }
 0x3e1   : > { %4952 = vst [vmem:[#allocation2 + $0x1a8] sm:$0xff] %v4888_v7  ;;  %v4893_v9 = vadd.f32 %v4717_v8, %v1016_v56  ;;  %v4709_v41 = vadd.f32 %v4708_v27, %v9030_v52  ;;  %v1020_v52 = vld [vmem:[#allocation2 + $0xf0] sm:$0xff]  ;;  %v1019_v7 = vld [vmem:[#allocation2] sm:$0xff]  ;;  %v4460_v43 = vadd.f32 %v9089_v45, %v8864_v57 }
 0x3e2   : > { %v9133_v25 = vpop.f32.mrf.mxu1  ;;  %v6347_v55 = vpop.f32.mrf.mxu0 }
 0x3e3   : > { %4957 = vst [vmem:[#allocation2 + $0x160] sm:$0xff] %v4893_v9  ;;  %v4891_v60 = vadd.f32 %v4709_v41, %v1014_v3  ;;  %v4720_v18 = vadd.f32 %v6347_v55, %v9051_v53 }
 0x3e4   : > { %v4504_v33 = vpop.f32.mrf.mxu1  ;;  %v4711_v4 = vpop.f32.mrf.mxu0 }
 0x3e5   : > { %4955 = vst [vmem:[#allocation2 + $0x1e8] sm:$0xff] %v4891_v60  ;;  %v4894_v51 = vadd.f32 %v4720_v18, %v1017_v13  ;;  %v4712_v11 = vadd.f32 %v4711_v4, %v9037_v42  ;;  %v1021_v42 = vld [vmem:[#allocation2 + $0x8] sm:$0xff]  ;;  %v4463_v33 = vadd.f32 %v9093_v22, %v8872_v0 }
 0x3e6   : > { %v9139_v37 = vpop.f32.mrf.mxu1  ;;  %v6350_v15 = vpop.f32.mrf.mxu0  ;;  %v1022_v60 = vld [vmem:[#allocation2 + $0x148] sm:$0xff] }
 0x3e7   : > { %4958 = vst [vmem:[#allocation2 + $0x30] sm:$0xff] %v4894_v51  ;;  %v4892_v10 = vadd.f32 %v4712_v11, %v1015_v17  ;;  %v4733_v39 = vadd.f32 %v6350_v15, %v4444_v23 }
 0x3e8   : > { %v4509_v1 = vpop.f32.mrf.mxu1  ;;  %v4724_v53 = vpop.f32.mrf.mxu0 }
 0x3e9   : > { %4956 = vst [vmem:[#allocation2 + $0xf8] sm:$0xff] %v4892_v10  ;;  %v4897_v46 = vadd.f32 %v4733_v39, %v1020_v52  ;;  %v4725_v16 = vadd.f32 %v4724_v53, %v9058_v2  ;;  %v1024_v2 = vld [vmem:[#allocation2 + $0x100] sm:$0xff]  ;;  %v1023_v52 = vld [vmem:[#allocation2 + $0x1d0] sm:$0xff]  ;;  %v4476_v10 = vadd.f32 %v9105_v35, %v8896_v32  ;;  %v4479_v32 = vadd.f32 %v9109_v5, %v8904_v34 }
 0x3ea   : > { %v9144_v36 = vpop.f32.mrf.mxu1  ;;  %v6351_v29 = vpop.f32.mrf.mxu0 }
 0x3eb   : > { %4961 = vst [vmem:[#allocation2 + $0xf0] sm:$0xff] %v4897_v46  ;;  %v4895_v54 = vadd.f32 %v4725_v16, %v1018_v14  ;;  %v4736_v56 = vadd.f32 %v6351_v29, %v4447_v38  ;;  %v4468_v14 = vadd.f32 %v9097_v50, %v8880_v24  ;;  %v1026_v46 = vld [vmem:[#allocation2 + $0x40] sm:$0xff]  ;;  %v1029_v29 = vld [vmem:[#allocation2 + $0x128] sm:$0xff] }
 0x3ec   : > { %v4512_v20 = vpop.f32.mrf.mxu1  ;;  %v4727_v8 = vpop.f32.mrf.mxu0 }
 0x3ed   : > { %4959 = vst [vmem:[#allocation2 + $0x1e0] sm:$0xff] %v4895_v54  ;;  %v4898_v3 = vadd.f32 %v4736_v56, %v1021_v42  ;;  %v4728_v31 = vadd.f32 %v4727_v8, %v9065_v44  ;;  %v1025_v44 = vld [vmem:[#allocation2 + $0xc8] sm:$0xff]  ;;  %v4471_v56 = vadd.f32 %v9101_v61, %v8888_v26 }
 0x3ee   : > { %v9149_v27 = vpop.f32.mrf.mxu1  ;;  %v6354_v9 = vpop.f32.mrf.mxu0 }
 0x3ef   : > { %4962 = vst [vmem:[#allocation2 + $0x8] sm:$0xff] %v4898_v3  ;;  %v4896_v41 = vadd.f32 %v4728_v31, %v1019_v7  ;;  %v4749_v13 = vadd.f32 %v6354_v9, %v4460_v43  ;;  %v1027_v7 = vld [vmem:[#allocation2 + $0x1f8] sm:$0xff]  ;;  %v4492_v43 = vadd.f32 %v9121_v59, %v8928_v58  ;;  %v1032_v31 = vld [vmem:[#allocation2 + $0xe8] sm:$0xff]  ;;  %v4484_v9 = vadd.f32 %v9113_v6, %v8912_v12 }
 0x3f0   : > { %v4517_v55 = vpop.f32.mrf.mxu1  ;;  %v4740_v18 = vpop.f32.mrf.mxu0 }
 0x3f1   : > { %4960 = vst [vmem:[#allocation2] sm:$0xff] %v4896_v41  ;;  %v4901_v17 = vadd.f32 %v4749_v13, %v1024_v2  ;;  %v4741_v57 = vadd.f32 %v4740_v18, %v9080_v40  ;;  %v1028_v40 = vld [vmem:[#allocation2 + $0x20] sm:$0xff] }
 0x3f2   : > { %v9154_v45 = vpop.f32.mrf.mxu1  ;;  %v6355_v4 = vpop.f32.mrf.mxu0  ;;  %v1030_v13 = vld [vmem:[#allocation2 + $0x1a0] sm:$0xff] }
 0x3f3   : > { %4965 = vst [vmem:[#allocation2 + $0x100] sm:$0xff] %v4901_v17  ;;  %v4899_v23 = vadd.f32 %v4741_v57, %v1022_v60  ;;  %v4752_v51 = vadd.f32 %v6355_v4, %v4463_v33  ;;  %v4495_v60 = vadd.f32 %v9125_v28, %v8936_v47  ;;  %v1033_v33 = vld [vmem:[#allocation2 + $0x78] sm:$0xff] }
 0x3f4   : > { %v4520_v11 = vpop.f32.mrf.mxu1  ;;  %v4743_v15 = vpop.f32.mrf.mxu0  ;;  %v9572_v57 = vld [vmem:[#allocation35_spill] sm:$0xff] }
 0x3f5   : > { %4963 = vst [vmem:[#allocation2 + $0x148] sm:$0xff] %v4899_v23  ;;  %v4902_v39 = vadd.f32 %v4752_v51, %v1025_v44  ;;  %v4744_v0 = vadd.f32 %v4743_v15, %v9085_v49  ;;  %v4487_v44 = vadd.f32 %v9117_v62, %v9572_v57  ;;  %v1031_v23 = vld [vmem:[#allocation2 + $0x1f0] sm:$0xff]  ;;  %v4508_v11 = vadd.f32 %v9139_v37, %v8958_v30  ;;  %v1036_v15 = vld [vmem:[#allocation2 + $0x1d8] sm:$0xff]  ;;  %v9578_v57 = vld [vmem:[#allocation21_spill] sm:$0xff] }
 0x3f6   : > { %v9159_v22 = vpop.f32.mrf.mxu1  ;;  %v6358_v1 = vpop.f32.mrf.mxu0 }
 0x3f7   : > { %4966 = vst [vmem:[#allocation2 + $0xc8] sm:$0xff] %v4902_v39  ;;  %v4900_v53 = vadd.f32 %v4744_v0, %v1023_v52  ;;  %v4765_v19 = vadd.f32 %v6358_v1, %v4476_v10  ;;  %v4500_v39 = vadd.f32 %v9129_v63, %v8944_v48  ;;  %v1034_v1 = vld [vmem:[#allocation2 + $0x70] sm:$0xff] }
 0x3f8   : > { %v4525_v38 = vpop.f32.mrf.mxu1  ;;  %v4756_v16 = vpop.f32.mrf.mxu0 }
 0x3f9   : > { %4964 = vst [vmem:[#allocation2 + $0x1d0] sm:$0xff] %v4900_v53  ;;  %v4905_v35 = vadd.f32 %v4765_v19, %v1028_v40  ;;  %v4757_v42 = vadd.f32 %v4756_v16, %v4468_v14  ;;  %v4511_v53 = vadd.f32 %v9144_v36, %v8964_v21  ;;  %v1037_v38 = vld [vmem:[#allocation2 + $0xd0] sm:$0xff]  ;;  %v9573_v16 = vld [vmem:[#allocation36_spill] sm:$0xff] }
 0x3fa   : > { %v9165_v49 = vpop.f32.mrf.mxu1  ;;  %v6359_v54 = vpop.f32.mrf.mxu0 }
 0x3fb   : > { %4969 = vst [vmem:[#allocation2 + $0x20] sm:$0xff] %v4905_v35  ;;  %v4903_v24 = vadd.f32 %v4757_v42, %v1026_v46  ;;  %v4768_v50 = vadd.f32 %v6359_v54, %v4479_v32  ;;  %v4503_v32 = vadd.f32 %v9133_v25, %v9573_v16  ;;  %v1035_v42 = vld [vmem:[#allocation2 + $0x90] sm:$0xff]  ;;  %v9574_v54 = vld [vmem:[#allocation19_spill] sm:$0xff] }
 0x3fc   : > { %v4528_v20 = vpop.f32.mrf.mxu1  ;;  %v4759_v8 = vpop.f32.mrf.mxu0 }
 0x3fd   : > { %4967 = vst [vmem:[#allocation2 + $0x40] sm:$0xff] %v4903_v24  ;;  %v4906_v34 = vadd.f32 %v4768_v50, %v1029_v29  ;;  %v4760_v5 = vadd.f32 %v4759_v8, %v4471_v56  ;;  %v4524_v56 = vadd.f32 %v9159_v22, %v9574_v54  ;;  %v1040_v50 = vld [vmem:[#allocation2 + $0xa8] sm:$0xff]  ;;  %v9583_v54 = vld [vmem:[#allocation22_spill] sm:$0xff] }
 0x3fe   : > { %v9171_v3 = vpop.f32.mrf.mxu1  ;;  %v6362_v2 = vpop.f32.mrf.mxu0 }
 0x3ff   : > { %4970 = vst [vmem:[#allocation2 + $0x128] sm:$0xff] %v4906_v34  ;;  %v4904_v26 = vadd.f32 %v4760_v5, %v1027_v7  ;;  %v4781_v61 = vadd.f32 %v6362_v2, %v4492_v43  ;;  %v9575_v7 = vld [vmem:[#allocation37_spill] sm:$0xff]  ;;  %v1038_v5 = vld [vmem:[#allocation2 + $0xb8] sm:$0xff] }
 0x400   : > { %v4533_v41 = vpop.f32.mrf.mxu1  ;;  %v4772_v55 = vpop.f32.mrf.mxu0  ;;  %v4516_v8 = vadd.f32 %v9149_v27, %v9575_v7  ;;  %v9576_v2 = vld [vmem:[#allocation5_spill] sm:$0xff] }
 0x401   : > { %4968 = vst [vmem:[#allocation2 + $0x1f8] sm:$0xff] %v4904_v26  ;;  %v4909_v58 = vadd.f32 %v4781_v61, %v1032_v31  ;;  %v4773_v59 = vadd.f32 %v4772_v55, %v4484_v9  ;;  %v4527_v9 = vadd.f32 %v9165_v49, %v9576_v2  ;;  %v1041_v41 = vld [vmem:[#allocation2 + $0x1c8] sm:$0xff]  ;;  %v9577_v55 = vld [vmem:[#allocation4_spill] sm:$0xff] }
 0x402   : > { %v9177_v18 = vpop.f32.mrf.mxu1  ;;  %v6363_v17 = vpop.f32.mrf.mxu0  ;;  %v9584_v7 = vld [vmem:[#allocation9_spill] sm:$0xff]  ;;  %v9585_v2 = vld [vmem:[#allocation8_spill] sm:$0xff] }
 0x403   : > { %4973 = vst [vmem:[#allocation2 + $0xe8] sm:$0xff] %v4909_v58  ;;  %v4907_v12 = vadd.f32 %v4773_v59, %v1030_v13  ;;  %v4784_v6 = vadd.f32 %v6363_v17, %v4495_v60  ;;  %v4519_v60 = vadd.f32 %v9154_v45, %v9577_v55 }
 0x404   : > { %v4536_v4 = vpop.f32.mrf.mxu1  ;;  %v4775_v51 = vpop.f32.mrf.mxu0 }
 0x405   : > { %4971 = vst [vmem:[#allocation2 + $0x1a0] sm:$0xff] %v4907_v12  ;;  %v4910_v47 = vadd.f32 %v4784_v6, %v1033_v33  ;;  %v4776_v28 = vadd.f32 %v4775_v51, %v4487_v44  ;;  %v1039_v33 = vld [vmem:[#allocation2 + $0x88] sm:$0xff]  ;;  %v9579_v51 = vld [vmem:[#allocation20_spill] sm:$0xff] }
 0x406   : > { %v4539_v52 = vpop.f32.mrf.mxu1  ;;  %v6366_v10 = vpop.f32.mrf.mxu0  ;;  %v1044_v4 = vld [vmem:[#allocation2 + $0x68] sm:$0xff] }
 0x407   : > { %4974 = vst [vmem:[#allocation2 + $0x78] sm:$0xff] %v4910_v47  ;;  %v4908_v62 = vadd.f32 %v4776_v28, %v1031_v23  ;;  %v4797_v0 = vadd.f32 %v6366_v10, %v4508_v11  ;;  %v4540_v44 = vadd.f32 %v4539_v52, %v9578_v57  ;;  %v4532_v11 = vadd.f32 %v9171_v3, %v9579_v51  ;;  %v9587_v57 = vld [vmem:[#allocation25_spill] sm:$0xff] }
 0x408   : > { %v4541_v40 = vpop.f32.mrf.mxu1  ;;  %v4788_v14 = vpop.f32.mrf.mxu0 }
 0x409   : > { %4972 = vst [vmem:[#allocation2 + $0x1f0] sm:$0xff] %v4908_v62  ;;  %v4913_v30 = vadd.f32 %v4797_v0, %v1036_v15  ;;  %v4789_v37 = vadd.f32 %v4788_v14, %v4500_v39  ;;  %v1042_v15 = vld [vmem:[#allocation2 + $0x170] sm:$0xff]  ;;  %v9580_v39 = vld [vmem:[#allocation7_spill] sm:$0xff] }
 0x40a   : > { %v4542_v19 = vpop.f32.mrf.mxu1  ;;  %v6367_v46 = vpop.f32.mrf.mxu0 }
 0x40b   : > { %4977 = vst [vmem:[#allocation2 + $0x1d8] sm:$0xff] %v4913_v30  ;;  %v4911_v48 = vadd.f32 %v4789_v37, %v1034_v1  ;;  %v4800_v63 = vadd.f32 %v6367_v46, %v4511_v53  ;;  %v4543_v62 = vadd.f32 %v4542_v19, %v9580_v39  ;;  %v1045_v1 = vld [vmem:[#allocation2 + $0x190] sm:$0xff]  ;;  %v1043_v46 = vld [vmem:[#allocation2 + $0x178] sm:$0xff] }
 0x40c   : > { %v4544_v35 = vpop.f32.mrf.mxu1  ;;  %v4791_v29 = vpop.f32.mrf.mxu0  ;;  %v9581_v53 = vld [vmem:[#allocation6_spill] sm:$0xff] }
 0x40d   : > { %4975 = vst [vmem:[#allocation2 + $0x70] sm:$0xff] %v4911_v48  ;;  %v4914_v21 = vadd.f32 %v4800_v63, %v1037_v38  ;;  %v4792_v36 = vadd.f32 %v4791_v29, %v4503_v32  ;;  %v4535_v30 = vadd.f32 %v9177_v18, %v9581_v53  ;;  %v9582_v32 = vld [vmem:[#allocation23_spill] sm:$0xff] }
 0x40e   : > { %v4547_v24 = vpop.f32.mrf.mxu1  ;;  %v6370_v20 = vpop.f32.mrf.mxu0 }
 0x40f   : > { %4978 = vst [vmem:[#allocation2 + $0xd0] sm:$0xff] %v4914_v21  ;;  %v4912_v25 = vadd.f32 %v4792_v36, %v1035_v42  ;;  %v4813_v43 = vadd.f32 %v6370_v20, %v4524_v56  ;;  %v1048_v42 = vld [vmem:[#allocation2 + $0xc0] sm:$0xff]  ;;  %v4548_v56 = vadd.f32 %v4547_v24, %v9583_v54 }
 0x410   : > { %v4549_v34 = vpop.f32.mrf.mxu1  ;;  %v4804_v31 = vpop.f32.mrf.mxu0 }
 0x411   : > { %4976 = vst [vmem:[#allocation2 + $0x90] sm:$0xff] %v4912_v25  ;;  %v4917_v22 = vadd.f32 %v4813_v43, %v1040_v50  ;;  %v4805_v26 = vadd.f32 %v4804_v31, %v4516_v8  ;;  %v1046_v50 = vld [vmem:[#allocation2 + $0x198] sm:$0xff] }
 0x412   : > { %v4550_v61 = vpop.f32.mrf.mxu1  ;;  %v6371_v13 = vpop.f32.mrf.mxu0 }
 0x413   : > { %4981 = vst [vmem:[#allocation2 + $0xa8] sm:$0xff] %v4917_v22  ;;  %v4915_v27 = vadd.f32 %v4805_v26, %v1038_v5  ;;  %v4816_v58 = vadd.f32 %v6371_v13, %v4527_v9  ;;  %v1049_v5 = vld [vmem:[#allocation2 + $0x1c0] sm:$0xff]  ;;  %v4551_v9 = vadd.f32 %v4550_v61, %v9585_v2  ;;  %v1050_v61 = vld [vmem:[#allocation2 + $0x158] sm:$0xff] }
 0x414   : > { %v4552_v59 = vpop.f32.mrf.mxu1  ;;  %v4807_v17 = vpop.f32.mrf.mxu0 }
 0x415   : > { %4979 = vst [vmem:[#allocation2 + $0xb8] sm:$0xff] %v4915_v27  ;;  %v4918_v12 = vadd.f32 %v4816_v58, %v1041_v41  ;;  %v4808_v49 = vadd.f32 %v4807_v17, %v4519_v60  ;;  %v1047_v41 = vld [vmem:[#allocation2 + $0x38] sm:$0xff]  ;;  %v9586_v59 = vld [vmem:[#allocation24_spill] sm:$0xff] }
 0x416   : > { %v4555_v6 = vpop.f32.mrf.mxu1  ;;  %v6374_v23 = vpop.f32.mrf.mxu0 }
 0x417   : > { %4982 = vst [vmem:[#allocation2 + $0x1c8] sm:$0xff] %v4918_v12  ;;  %v4916_v47 = vadd.f32 %v4808_v49, %v1039_v33  ;;  %v4829_v45 = vadd.f32 %v6374_v23, %v4540_v44  ;;  %v4556_v48 = vadd.f32 %v4555_v6, %v9582_v32  ;;  %v1052_v12 = vld [vmem:[#allocation2 + $0x58] sm:$0xff] }
 0x418   : > { %v4557_v28 = vpop.f32.mrf.mxu1  ;;  %v4820_v10 = vpop.f32.mrf.mxu0 }
 0x419   : > { %4980 = vst [vmem:[#allocation2 + $0x88] sm:$0xff] %v4916_v47  ;;  %v4921_v0 = vadd.f32 %v4829_v45, %v1044_v4  ;;  %v4821_v52 = vadd.f32 %v4820_v10, %v4532_v11  ;;  %v9588_v47 = vld [vmem:[#allocation10_spill] sm:$0xff]  ;;  %v9589_v10 = vld [vmem:[#allocation11_spill] sm:$0xff] }
 0x41a   : > { %v4558_v40 = vpop.f32.mrf.mxu1  ;;  %v6375_v14 = vpop.f32.mrf.mxu0 }
 0x41b   : > { %4985 = vst [vmem:[#allocation2 + $0x68] sm:$0xff] %v4921_v0  ;;  %v4919_v37 = vadd.f32 %v4821_v52, %v1042_v15  ;;  %v4832_v3 = vadd.f32 %v6375_v14, %v4543_v62  ;;  %v4559_v8 = vadd.f32 %v4558_v40, %v9584_v7  ;;  %v1053_v62 = vld [vmem:[#allocation2 + $0xa0] sm:$0xff]  ;;  %v1051_v52 = vld [vmem:[#allocation2 + $0x10] sm:$0xff] }
 0x41c   : > { %v4560_v38 = vpop.f32.mrf.mxu1  ;;  %v4823_v16 = vpop.f32.mrf.mxu0 }
 0x41d   : > { %4983 = vst [vmem:[#allocation2 + $0x170] sm:$0xff] %v4919_v37  ;;  %v4922_v63 = vadd.f32 %v4832_v3, %v1045_v1  ;;  %v4824_v19 = vadd.f32 %v4823_v16, %v4535_v30 }
 0x41e   : > { %v4563_v35 = vpop.f32.mrf.mxu1  ;;  %v6378_v29 = vpop.f32.mrf.mxu0 }
 0x41f   : > { %4986 = vst [vmem:[#allocation2 + $0x190] sm:$0xff] %v4922_v63  ;;  %v4920_v21 = vadd.f32 %v4824_v19, %v1043_v46  ;;  %v4845_v36 = vadd.f32 %v6378_v29, %v4556_v48  ;;  %v4564_v33 = vadd.f32 %v4563_v35, %v9586_v59 }
 0x420   : > { %v4565_v18 = vpop.f32.mrf.mxu1  ;;  %v4836_v20 = vpop.f32.mrf.mxu0 }
 0x421   : > { %4984 = vst [vmem:[#allocation2 + $0x178] sm:$0xff] %v4920_v21  ;;  %v4925_v25 = vadd.f32 %v4845_v36, %v1048_v42  ;;  %v4837_v43 = vadd.f32 %v4836_v20, %v4548_v56 }
 0x422   : > { %v4566_v34 = vpop.f32.mrf.mxu1  ;;  %v6379_v31 = vpop.f32.mrf.mxu0 }
 0x423   : > { %4989 = vst [vmem:[#allocation2 + $0xc0] sm:$0xff] %v4925_v25  ;;  %v4923_v22 = vadd.f32 %v4837_v43, %v1046_v50  ;;  %v4848_v26 = vadd.f32 %v6379_v31, %v4559_v8  ;;  %v4567_v45 = vadd.f32 %v4566_v34, %v9588_v47 }
 0x424   : > { %v4568_v24 = vpop.f32.mrf.mxu1  ;;  %v4839_v13 = vpop.f32.mrf.mxu0 }
 0x425   : > { %4987 = vst [vmem:[#allocation2 + $0x198] sm:$0xff] %v4923_v22  ;;  %v4926_v55 = vadd.f32 %v4848_v26, %v1049_v5  ;;  %v4840_v60 = vadd.f32 %v4839_v13, %v4551_v9 }
 0x426   : > { %v4571_v27 = vpop.f32.mrf.mxu1  ;;  %v6382_v58 = vpop.f32.mrf.mxu0 }
 0x427   : > { %4990 = vst [vmem:[#allocation2 + $0x1c0] sm:$0xff] %v4926_v55  ;;  %v4924_v17 = vadd.f32 %v4840_v60, %v1047_v41  ;;  %v4572_v44 = vadd.f32 %v4571_v27, %v9587_v57 }
 0x428   : > { %v4573_v49 = vpop.f32.mrf.mxu1  ;;  %v4852_v6 = vpop.f32.mrf.mxu0 }
 0x429   : > { %4988 = vst [vmem:[#allocation2 + $0x38] sm:$0xff] %v4924_v17  ;;  %v4861_v4 = vadd.f32 %v6382_v58, %v4572_v44  ;;  %v4853_v23 = vadd.f32 %v4852_v6, %v4564_v33 }
 0x42a   : > { %v4574_v51 = vpop.f32.mrf.mxu1  ;;  %v6383_v11 = vpop.f32.mrf.mxu0 }
 0x42b   : > { %v4929_v28 = vadd.f32 %v4861_v4, %v1052_v12  ;;  %v4927_v15 = vadd.f32 %v4853_v23, %v1050_v61  ;;  %v4575_v39 = vadd.f32 %v4574_v51, %v9589_v10 }
 0x42c   : > { %v4576_v0 = vpop.f32.mrf.mxu1  ;;  %v4855_v40 = vpop.f32.mrf.mxu0 }
 0x42d   : > { %4993 = vst [vmem:[#allocation2 + $0x58] sm:$0xff] %v4929_v28  ;;  %4991 = vst [vmem:[#allocation2 + $0x158] sm:$0xff] %v4927_v15  ;;  %v4864_v1 = vadd.f32 %v6383_v11, %v4575_v39  ;;  %v4856_v14 = vadd.f32 %v4855_v40, %v4567_v45  ;;  %4998 = sbr.rel (%p6193_p11) target bundleno = 1221 (0x4c5), region = 66 }
 0x42f   : > { %v4930_v53 = vadd.f32 %v4864_v1, %v1053_v62  ;;  %v4928_v30 = vadd.f32 %v4856_v14, %v1051_v52 }
 0x431   : > { %4994 = vst [vmem:[#allocation2 + $0xa0] sm:$0xff] %v4930_v53  ;;  %4992 = vst [vmem:[#allocation2 + $0x10] sm:$0xff] %v4928_v30 }
 0x432   : > { %v4999_v37 = vld [vmem:[#allocation2 + $0xb0] sm:$0xff]  ;;  %v9215_v3 = vld [vmem:[%s9490_s2] ss:$0 sm:$0xff]  ;;  %v5001_v32 = vld [vmem:[#allocation2 + $0xd8] sm:$0xff] }
 0x433   : > { %v5000_v38 = vld [vmem:[#allocation2 + $0x1b0] sm:$0xff]  ;;  %v5070_v46 = vadd.f32 %v9215_v3, %v4999_v37  ;;  %v5002_v48 = vld [vmem:[#allocation2 + $0x18] sm:$0xff]  ;;  %v5072_v19 = vadd.f32 %v9215_v3, %v5001_v32  ;;  %v5004_v29 = vld [vmem:[#allocation2 + $0x168] sm:$0xff] }
 0x434   : > { %v5071_v16 = vadd.f32 %v9215_v3, %v5000_v38  ;;  %v5003_v63 = vld [vmem:[#allocation2 + $0x50] sm:$0xff]  ;;  %v5073_v35 = vadd.f32 %v9215_v3, %v5002_v48  ;;  %v5006_v56 = vld [vmem:[#allocation2 + $0x48] sm:$0xff]  ;;  %v5075_v18 = vadd.f32 %v9215_v3, %v5004_v29  ;;  %v5007_v20 = vld [vmem:[#allocation2 + $0x180] sm:$0xff] }
 0x435   : > { %v5074_v42 = vadd.f32 %v9215_v3, %v5003_v63  ;;  %v5005_v54 = vld [vmem:[#allocation2 + $0x130] sm:$0xff]  ;;  %v6195_v21 = vmul.f32 -1.442695, %v5070_v46  ;;  %v6197_v8 = vmul.f32 -1.442695, %v5072_v19  ;;  %v5077_v43 = vadd.f32 %v9215_v3, %v5006_v56  ;;  %v5009_v31 = vld [vmem:[#allocation2 + $0x118] sm:$0xff] }
 0x436   : > { %v6196_v36 = vmul.f32 -1.442695, %v5071_v16  ;;  %v5076_v50 = vadd.f32 %v9215_v3, %v5005_v54  ;;  %v5008_v7 = vld [vmem:[#allocation2 + $0x110] sm:$0xff]  ;;  %v6198_v25 = vmul.f32 -1.442695, %v5073_v35  ;;  %v5078_v5 = vadd.f32 %v9215_v3, %v5007_v20  ;;  %v5010_v2 = vld [vmem:[#allocation2 + $0x98] sm:$0xff] }
 0x437   : > { %6948 = vpow2.f32 %v6195_v21  ;;  %v6199_v34 = vmul.f32 -1.442695, %v5074_v42  ;;  %v6200_v9 = vmul.f32 -1.442695, %v5075_v18  ;;  %v5079_v22 = vadd.f32 %v9215_v3, %v5008_v7  ;;  %v5011_v26 = vld [vmem:[#allocation2 + $0x120] sm:$0xff]  ;;  %v5012_v13 = vld [vmem:[#allocation2 + $0x150] sm:$0xff] }
 0x438   : > { %6950 = vpow2.f32 %v6196_v36  ;;  %v6201_v24 = vmul.f32 -1.442695, %v5076_v50  ;;  %v5080_v41 = vadd.f32 %v9215_v3, %v5009_v31  ;;  %v6202_v55 = vmul.f32 -1.442695, %v5077_v43  ;;  %v5013_v27 = vld [vmem:[#allocation2 + $0x108] sm:$0xff]  ;;  %v5014_v33 = vld [vmem:[#allocation2 + $0x60] sm:$0xff] }
 0x439   : > { %6952 = vpow2.f32 %v6197_v8  ;;  %v5081_v60 = vadd.f32 %v9215_v3, %v5010_v2  ;;  %v6203_v58 = vmul.f32 -1.442695, %v5078_v5  ;;  %v5082_v59 = vadd.f32 %v9215_v3, %v5011_v26  ;;  %v5015_v46 = vld [vmem:[#allocation2 + $0xe0] sm:$0xff]  ;;  %v5016_v48 = vld [vmem:[#allocation2 + $0x188] sm:$0xff]  ;;  %v5017_v35 = vld [vmem:[#allocation2 + $0x138] sm:$0xff] }
 0x43a   : > { %6954 = vpow2.f32 %v6198_v25  ;;  %v6204_v17 = vmul.f32 -1.442695, %v5079_v22  ;;  %v5083_v57 = vadd.f32 %v9215_v3, %v5012_v13  ;;  %v6205_v44 = vmul.f32 -1.442695, %v5080_v41  ;;  %v5018_v56 = vld [vmem:[#allocation2 + $0x140] sm:$0xff]  ;;  %v5020_v25 = vld [vmem:[#allocation2 + $0x1a8] sm:$0xff] }
 0x43b   : > { %6956 = vpow2.f32 %v6199_v34  ;;  %v5084_v12 = vadd.f32 %v9215_v3, %v5013_v27  ;;  %v6206_v49 = vmul.f32 -1.442695, %v5081_v60  ;;  %v5085_v61 = vadd.f32 %v9215_v3, %v5014_v33  ;;  %v5019_v50 = vld [vmem:[#allocation2 + $0x80] sm:$0xff]  ;;  %v5021_v31 = vld [vmem:[#allocation2 + $0x1b8] sm:$0xff]  ;;  %v5023_v27 = vld [vmem:[#allocation2 + $0x1e8] sm:$0xff] }
 0x43c   : > { %6958 = vpow2.f32 %v6200_v9  ;;  %v6207_v6 = vmul.f32 -1.442695, %v5082_v59  ;;  %v6208_v4 = vmul.f32 -1.442695, %v5083_v57  ;;  %v5086_v54 = vadd.f32 %v9215_v3, %v5015_v46 }
 0x43d   : > { %6960 = vpow2.f32 %v6201_v24  ;;  %v6209_v23 = vmul.f32 -1.442695, %v5084_v12  ;;  %v6210_v51 = vmul.f32 -1.442695, %v5085_v61  ;;  %v5087_v18 = vadd.f32 %v9215_v3, %v5016_v48  ;;  %v5022_v24 = vld [vmem:[#allocation2 + $0x28] sm:$0xff] }
 0x43e   : > { %6962 = vpow2.f32 %v6202_v55  ;;  %v5088_v8 = vadd.f32 %v9215_v3, %v5017_v35  ;;  %v5089_v5 = vadd.f32 %v9215_v3, %v5018_v56  ;;  %v6211_v22 = vmul.f32 -1.442695, %v5086_v54 }
 0x43f   : > { %6964 = vpow2.f32 %v6203_v58  ;;  %v5090_v26 = vadd.f32 %v9215_v3, %v5019_v50  ;;  %v6212_v55 = vmul.f32 -1.442695, %v5087_v18  ;;  %v5091_v60 = vadd.f32 %v9215_v3, %v5020_v25 }
 0x440   : > { %6966 = vpow2.f32 %v6204_v17  ;;  %v6213_v59 = vmul.f32 -1.442695, %v5088_v8  ;;  %v5092_v33 = vadd.f32 %v9215_v3, %v5021_v31  ;;  %v5024_v17 = vld [vmem:[#allocation2 + $0xf8] sm:$0xff]  ;;  %v5093_v12 = vadd.f32 %v9215_v3, %v5022_v24 }
 0x441   : > { %6968 = vpow2.f32 %v6205_v44  ;;  %v6214_v44 = vmul.f32 -1.442695, %v5089_v5 }
 0x442   : > { %6970 = vpow2.f32 %v6206_v49  ;;  %v5025_v49 = vld [vmem:[#allocation2 + $0x160] sm:$0xff] }
 0x443   : > { %6972 = vpow2.f32 %v6207_v6  ;;  %v6215_v6 = vmul.f32 -1.442695, %v5090_v26 }
 0x444   : > { %v6949_v11 = vpop.eup %6948  ;;  %6974 = vpow2.f32 %v6208_v4  ;;  %v5094_v4 = vadd.f32 %v9215_v3, %v5023_v27 }
 0x445   : > { %v6951_v47 = vpop.eup %6950  ;;  %v5326_v45 = vadd.f32 1.0, %v6949_v11  ;;  %6976 = vpow2.f32 %v6209_v23  ;;  %v5026_v23 = vld [vmem:[#allocation2 + $0x30] sm:$0xff]  ;;  %v6216_v11 = vmul.f32 -1.442695, %v5091_v60 }
 0x446   : > { %v6953_v28 = vpop.eup %6952  ;;  %v5327_v15 = vadd.f32 1.0, %v6951_v47  ;;  %6978 = vpow2.f32 %v6210_v51  ;;  %v5095_v47 = vadd.f32 %v9215_v3, %v5024_v17  ;;  %v5032_v17 = vld [vmem:[#allocation2 + $0x1d0] sm:$0xff] }
 0x447   : > { %v6955_v10 = vpop.eup %6954  ;;  %6980 = vrcp.f32 %v5326_v45  ;;  %v5328_v39 = vadd.f32 1.0, %v6953_v28  ;;  %v5027_v45 = vld [vmem:[#allocation2 + $0x1e0] sm:$0xff] }
 0x448   : > { %v6957_v62 = vpop.eup %6956  ;;  %6982 = vrcp.f32 %v5327_v15  ;;  %v5329_v0 = vadd.f32 1.0, %v6955_v10  ;;  %v6217_v15 = vmul.f32 -1.442695, %v5092_v33  ;;  %v5096_v10 = vadd.f32 %v9215_v3, %v5025_v49 }
 0x449   : > { %v6959_v52 = vpop.eup %6958  ;;  %6984 = vrcp.f32 %v5328_v39  ;;  %v5330_v40 = vadd.f32 1.0, %v6957_v62  ;;  %v5028_v39 = vld [vmem:[#allocation2] sm:$0xff] }
 0x44a   : > { %v6961_v1 = vpop.eup %6960  ;;  %6986 = vrcp.f32 %v5329_v0  ;;  %v5331_v14 = vadd.f32 1.0, %v6959_v52  ;;  %v6218_v0 = vmul.f32 -1.442695, %v5093_v12  ;;  %v5097_v52 = vadd.f32 %v9215_v3, %v5026_v23  ;;  %v5033_v12 = vld [vmem:[#allocation2 + $0x100] sm:$0xff] }
 0x44b   : > { %v6963_v53 = vpop.eup %6962  ;;  %6988 = vrcp.f32 %v5330_v40  ;;  %v5332_v30 = vadd.f32 1.0, %v6961_v1  ;;  %v5029_v40 = vld [vmem:[#allocation2 + $0xf0] sm:$0xff]  ;;  %v5099_v46 = vadd.f32 %v9215_v3, %v5028_v39 }
 0x44c   : > { %v6965_v37 = vpop.eup %6964  ;;  %6990 = vrcp.f32 %v5331_v14  ;;  %v5333_v38 = vadd.f32 1.0, %v6963_v53  ;;  %v6219_v14 = vmul.f32 -1.442695, %v5094_v4  ;;  %v5098_v53 = vadd.f32 %v9215_v3, %v5027_v45  ;;  %v5034_v4 = vld [vmem:[#allocation2 + $0xc8] sm:$0xff] }
 0x44d   : > { %v6967_v16 = vpop.eup %6966  ;;  %6992 = vrcp.f32 %v5332_v30  ;;  %v5334_v32 = vadd.f32 1.0, %v6965_v37  ;;  %v5030_v30 = vld [vmem:[#allocation2 + $0x8] sm:$0xff]  ;;  %v5100_v48 = vadd.f32 %v9215_v3, %v5029_v40  ;;  %v6224_v56 = vmul.f32 -1.442695, %v5099_v46 }
 0x44e   : > { %v6969_v63 = vpop.eup %6968  ;;  %6994 = vrcp.f32 %v5333_v38  ;;  %v5335_v19 = vadd.f32 1.0, %v6967_v16  ;;  %v6220_v38 = vmul.f32 -1.442695, %v5095_v47  ;;  %v5101_v35 = vadd.f32 %v9215_v3, %v5030_v30  ;;  %v5035_v47 = vld [vmem:[#allocation2 + $0x40] sm:$0xff]  ;;  %v5038_v30 = vld [vmem:[#allocation2 + $0x128] sm:$0xff] }
 0x44f   : > { %v6971_v42 = vpop.eup %6970  ;;  %6996 = vrcp.f32 %v5334_v32  ;;  %v5336_v29 = vadd.f32 1.0, %v6969_v63  ;;  %v6221_v32 = vmul.f32 -1.442695, %v5096_v10  ;;  %v5036_v10 = vld [vmem:[#allocation2 + $0x1f8] sm:$0xff] }
 0x450   : > { %v6973_v21 = vpop.eup %6972  ;;  %6998 = vrcp.f32 %v5335_v19  ;;  %v5337_v36 = vadd.f32 1.0, %v6971_v42  ;;  %v6222_v19 = vmul.f32 -1.442695, %v5097_v52  ;;  %v6226_v50 = vmul.f32 -1.442695, %v5101_v35  ;;  %v5037_v52 = vld [vmem:[#allocation2 + $0x20] sm:$0xff] }
 0x451   : > { %v6975_v20 = vpop.eup %6974  ;;  %7000 = vrcp.f32 %v5336_v29  ;;  %v5338_v7 = vadd.f32 1.0, %v6973_v21  ;;  %v6223_v29 = vmul.f32 -1.442695, %v5098_v53  ;;  %v5106_v53 = vadd.f32 %v9215_v3, %v5035_v47  ;;  %v5040_v35 = vld [vmem:[#allocation2 + $0x1f0] sm:$0xff] }
 0x452   : > { %v6977_v43 = vpop.eup %6976  ;;  %7002 = vrcp.f32 %v5337_v36  ;;  %v5339_v34 = vadd.f32 1.0, %v6975_v20  ;;  %v6225_v36 = vmul.f32 -1.442695, %v5100_v48 }
 0x453   : > { %v6979_v2 = vpop.eup %6978  ;;  %7004 = vrcp.f32 %v5338_v7  ;;  %v5340_v9 = vadd.f32 1.0, %v6977_v43 }
 0x454   : > { %v6981_v41 = vpop.eup %6980  ;;  %7006 = vrcp.f32 %v5339_v34  ;;  %v5341_v13 = vadd.f32 1.0, %v6979_v2 }
 0x455   : > { %v6983_v58 = vpop.eup %6982  ;;  %5518 = vst [vmem:[%s9491_s3] sm:$0xff] %v6981_v41  ;;  %7008 = vrcp.f32 %v5340_v9 }
 0x456   : > { %v6985_v57 = vpop.eup %6984  ;;  %5519 = vst [vmem:[%s9491_s3 + $0x8] sm:$0xff] %v6983_v58  ;;  %7010 = vrcp.f32 %v5341_v13  ;;  %v5031_v58 = vld [vmem:[#allocation2 + $0x148] sm:$0xff] }
 0x457   : > { %v6987_v61 = vpop.eup %6986  ;;  %5520 = vst [vmem:[%s9491_s3 + $0x10] sm:$0xff] %v6985_v57  ;;  %7012 = vpow2.f32 %v6211_v22 }
 0x458   : > { %v6989_v51 = vpop.eup %6988  ;;  %5521 = vst [vmem:[%s9491_s3 + $0x18] sm:$0xff] %v6987_v61  ;;  %7014 = vpow2.f32 %v6212_v55 }
 0x459   : > { %v6991_v28 = vpop.eup %6990  ;;  %5522 = vst [vmem:[%s9491_s3 + $0x20] sm:$0xff] %v6989_v51  ;;  %7016 = vpow2.f32 %v6213_v59 }
 0x45a   : > { %v6993_v62 = vpop.eup %6992  ;;  %5523 = vst [vmem:[%s9491_s3 + $0x28] sm:$0xff] %v6991_v28  ;;  %7018 = vpow2.f32 %v6214_v44 }
 0x45b   : > { %v6995_v1 = vpop.eup %6994  ;;  %5524 = vst [vmem:[%s9491_s3 + $0x30] sm:$0xff] %v6993_v62  ;;  %7020 = vpow2.f32 %v6215_v6  ;;  %v5102_v6 = vadd.f32 %v9215_v3, %v5031_v58 }
 0x45c   : > { %v6997_v37 = vpop.eup %6996  ;;  %5525 = vst [vmem:[%s9491_s3 + $0x38] sm:$0xff] %v6995_v1  ;;  %7022 = vpow2.f32 %v6216_v11  ;;  %v5103_v11 = vadd.f32 %v9215_v3, %v5032_v17 }
 0x45d   : > { %v6999_v16 = vpop.eup %6998  ;;  %5526 = vst [vmem:[%s9491_s3 + $0x40] sm:$0xff] %v6997_v37  ;;  %7024 = vpow2.f32 %v6217_v15  ;;  %v5104_v15 = vadd.f32 %v9215_v3, %v5033_v12 }
 0x45e   : > { %v7001_v63 = vpop.eup %7000  ;;  %5527 = vst [vmem:[%s9491_s3 + $0x48] sm:$0xff] %v6999_v16  ;;  %7026 = vpow2.f32 %v6218_v0  ;;  %v5105_v0 = vadd.f32 %v9215_v3, %v5034_v4  ;;  %v6228_v46 = vmul.f32 -1.442695, %v5103_v11  ;;  %v5107_v16 = vadd.f32 %v9215_v3, %v5036_v10 }
 0x45f   : > { %v7003_v42 = vpop.eup %7002  ;;  %5528 = vst [vmem:[%s9491_s3 + $0x50] sm:$0xff] %v7001_v63  ;;  %7028 = vpow2.f32 %v6219_v14  ;;  %v6227_v14 = vmul.f32 -1.442695, %v5102_v6  ;;  %v6229_v63 = vmul.f32 -1.442695, %v5104_v15 }
 0x460   : > { %v7005_v54 = vpop.eup %7004  ;;  %5529 = vst [vmem:[%s9491_s3 + $0x58] sm:$0xff] %v7003_v42  ;;  %7030 = vpow2.f32 %v6220_v38 }
 0x461   : > { %v7007_v21 = vpop.eup %7006  ;;  %5530 = vst [vmem:[%s9491_s3 + $0x60] sm:$0xff] %v7005_v54  ;;  %7032 = vpow2.f32 %v6221_v32  ;;  %v5039_v32 = vld [vmem:[#allocation2 + $0x1a0] sm:$0xff]  ;;  %v5109_v54 = vadd.f32 %v9215_v3, %v5038_v30 }
 0x462   : > { %v7009_v18 = vpop.eup %7008  ;;  %5531 = vst [vmem:[%s9491_s3 + $0x68] sm:$0xff] %v7007_v21  ;;  %7034 = vpow2.f32 %v6222_v19  ;;  %v5108_v19 = vadd.f32 %v9215_v3, %v5037_v52 }
 0x463   : > { %v7011_v20 = vpop.eup %7010  ;;  %5532 = vst [vmem:[%s9491_s3 + $0x70] sm:$0xff] %v7009_v18  ;;  %7036 = vpow2.f32 %v6223_v29  ;;  %v6230_v29 = vmul.f32 -1.442695, %v5105_v0  ;;  %v5110_v18 = vadd.f32 %v9215_v3, %v5039_v32 }
 0x464   : > { %v7013_v7 = vpop.eup %7012  ;;  %5533 = vst [vmem:[%s9491_s3 + $0x78] sm:$0xff] %v7011_v20  ;;  %7038 = vpow2.f32 %v6224_v56  ;;  %v5041_v56 = vld [vmem:[#allocation2 + $0xe8] sm:$0xff] }
 0x465   : > { %v7015_v8 = vpop.eup %7014  ;;  %v5342_v25 = vadd.f32 1.0, %v7013_v7  ;;  %7040 = vpow2.f32 %v6225_v36  ;;  %v6231_v36 = vmul.f32 -1.442695, %v5106_v53  ;;  %v6232_v7 = vmul.f32 -1.442695, %v5107_v16 }
 0x466   : > { %v7017_v43 = vpop.eup %7016  ;;  %v5343_v34 = vadd.f32 1.0, %v7015_v8  ;;  %7042 = vpow2.f32 %v6226_v50  ;;  %v5042_v50 = vld [vmem:[#allocation2 + $0x78] sm:$0xff]  ;;  %v5111_v8 = vadd.f32 %v9215_v3, %v5040_v35  ;;  %v5048_v35 = vld [vmem:[#allocation2 + $0x88] sm:$0xff] }
 0x467   : > { %v7019_v5 = vpop.eup %7018  ;;  %7044 = vrcp.f32 %v5342_v25  ;;  %v5344_v31 = vadd.f32 1.0, %v7017_v43  ;;  %v5043_v25 = vld [vmem:[#allocation2 + $0x70] sm:$0xff] }
 0x468   : > { %v7021_v2 = vpop.eup %7020  ;;  %7046 = vrcp.f32 %v5343_v34  ;;  %v5345_v9 = vadd.f32 1.0, %v7019_v5  ;;  %v6233_v34 = vmul.f32 -1.442695, %v5108_v19  ;;  %v5112_v5 = vadd.f32 %v9215_v3, %v5041_v56 }
 0x469   : > { %v7023_v22 = vpop.eup %7022  ;;  %7048 = vrcp.f32 %v5344_v31  ;;  %v5346_v26 = vadd.f32 1.0, %v7021_v2  ;;  %v5044_v31 = vld [vmem:[#allocation2 + $0x90] sm:$0xff] }
 0x46a   : > { %v7025_v24 = vpop.eup %7024  ;;  %7050 = vrcp.f32 %v5345_v9  ;;  %v5347_v41 = vadd.f32 1.0, %v7023_v22  ;;  %v6234_v9 = vmul.f32 -1.442695, %v5109_v54  ;;  %v5113_v22 = vadd.f32 %v9215_v3, %v5042_v50  ;;  %v5049_v54 = vld [vmem:[#allocation2 + $0xa8] sm:$0xff] }
 0x46b   : > { %v7027_v13 = vpop.eup %7026  ;;  %7052 = vrcp.f32 %v5346_v26  ;;  %v5348_v55 = vadd.f32 1.0, %v7025_v24  ;;  %v5045_v26 = vld [vmem:[#allocation2 + $0x1d8] sm:$0xff]  ;;  %v5115_v58 = vadd.f32 %v9215_v3, %v5044_v31 }
 0x46c   : > { %v7029_v60 = vpop.eup %7028  ;;  %7054 = vrcp.f32 %v5347_v41  ;;  %v5349_v27 = vadd.f32 1.0, %v7027_v13  ;;  %v6235_v41 = vmul.f32 -1.442695, %v5110_v18  ;;  %v5114_v13 = vadd.f32 %v9215_v3, %v5043_v25  ;;  %v5050_v18 = vld [vmem:[#allocation2 + $0x1c8] sm:$0xff] }
 0x46d   : > { %v7031_v59 = vpop.eup %7030  ;;  %7056 = vrcp.f32 %v5348_v55  ;;  %v5350_v33 = vadd.f32 1.0, %v7029_v60  ;;  %v5046_v55 = vld [vmem:[#allocation2 + $0xd0] sm:$0xff]  ;;  %v5116_v17 = vadd.f32 %v9215_v3, %v5045_v26  ;;  %v6240_v4 = vmul.f32 -1.442695, %v5115_v58 }
 0x46e   : > { %v7033_v57 = vpop.eup %7032  ;;  %7058 = vrcp.f32 %v5349_v27  ;;  %v5351_v44 = vadd.f32 1.0, %v7031_v59  ;;  %v6236_v27 = vmul.f32 -1.442695, %v5111_v8  ;;  %v5117_v12 = vadd.f32 %v9215_v3, %v5046_v55  ;;  %v5051_v8 = vld [vmem:[#allocation2 + $0x170] sm:$0xff] }
 0x46f   : > { %v7035_v49 = vpop.eup %7034  ;;  %7060 = vrcp.f32 %v5350_v33  ;;  %v5352_v61 = vadd.f32 1.0, %v7033_v57  ;;  %v6237_v33 = vmul.f32 -1.442695, %v5112_v5  ;;  %v5052_v5 = vld [vmem:[#allocation2 + $0x178] sm:$0xff]  ;;  %v5054_v55 = vld [vmem:[#allocation2 + $0x190] sm:$0xff] }
 0x470   : > { %v7037_v23 = vpop.eup %7036  ;;  %7062 = vrcp.f32 %v5351_v44  ;;  %v5353_v51 = vadd.f32 1.0, %v7035_v49  ;;  %v6238_v44 = vmul.f32 -1.442695, %v5113_v22  ;;  %v6242_v47 = vmul.f32 -1.442695, %v5117_v12  ;;  %v5053_v22 = vld [vmem:[#allocation2 + $0x68] sm:$0xff] }
 0x471   : > { %v7039_v45 = vpop.eup %7038  ;;  %7064 = vrcp.f32 %v5352_v61  ;;  %v5354_v28 = vadd.f32 1.0, %v7037_v23  ;;  %v6239_v61 = vmul.f32 -1.442695, %v5114_v13  ;;  %v5122_v13 = vadd.f32 %v9215_v3, %v5051_v8  ;;  %v5056_v12 = vld [vmem:[#allocation2 + $0x38] sm:$0xff] }
 0x472   : > { %v7041_v39 = vpop.eup %7040  ;;  %7066 = vrcp.f32 %v5353_v51  ;;  %v5355_v62 = vadd.f32 1.0, %v7039_v45  ;;  %v6241_v51 = vmul.f32 -1.442695, %v5116_v17 }
 0x473   : > { %v7043_v40 = vpop.eup %7042  ;;  %7068 = vrcp.f32 %v5354_v28  ;;  %v5356_v1 = vadd.f32 1.0, %v7041_v39 }
 0x474   : > { %v7045_v37 = vpop.eup %7044  ;;  %7070 = vrcp.f32 %v5355_v62  ;;  %v5357_v38 = vadd.f32 1.0, %v7043_v40 }
 0x475   : > { %v7047_v48 = vpop.eup %7046  ;;  %5534 = vst [vmem:[%s9491_s3 + $0x80] sm:$0xff] %v7045_v37  ;;  %7072 = vrcp.f32 %v5356_v1 }
 0x476   : > { %v7049_v42 = vpop.eup %7048  ;;  %5535 = vst [vmem:[%s9491_s3 + $0x88] sm:$0xff] %v7047_v48  ;;  %7074 = vrcp.f32 %v5357_v38  ;;  %v5047_v48 = vld [vmem:[#allocation2 + $0xb8] sm:$0xff] }
 0x477   : > { %v7051_v21 = vpop.eup %7050  ;;  %5536 = vst [vmem:[%s9491_s3 + $0x90] sm:$0xff] %v7049_v42  ;;  %7076 = vpow2.f32 %v6227_v14 }
 0x478   : > { %v7053_v20 = vpop.eup %7052  ;;  %5537 = vst [vmem:[%s9491_s3 + $0x98] sm:$0xff] %v7051_v21  ;;  %7078 = vpow2.f32 %v6228_v46 }
 0x479   : > { %v7055_v43 = vpop.eup %7054  ;;  %5538 = vst [vmem:[%s9491_s3 + $0xa0] sm:$0xff] %v7053_v20  ;;  %7080 = vpow2.f32 %v6229_v63 }
 0x47a   : > { %v7057_v2 = vpop.eup %7056  ;;  %5539 = vst [vmem:[%s9491_s3 + $0xa8] sm:$0xff] %v7055_v43  ;;  %7082 = vpow2.f32 %v6230_v29 }
 0x47b   : > { %v7059_v24 = vpop.eup %7058  ;;  %5540 = vst [vmem:[%s9491_s3 + $0xb0] sm:$0xff] %v7057_v2  ;;  %7084 = vpow2.f32 %v6231_v36  ;;  %v5118_v36 = vadd.f32 %v9215_v3, %v5047_v48 }
 0x47c   : > { %v7061_v60 = vpop.eup %7060  ;;  %5541 = vst [vmem:[%s9491_s3 + $0xb8] sm:$0xff] %v7059_v24  ;;  %7086 = vpow2.f32 %v6232_v7  ;;  %v5119_v7 = vadd.f32 %v9215_v3, %v5048_v35 }
 0x47d   : > { %v7063_v59 = vpop.eup %7062  ;;  %5542 = vst [vmem:[%s9491_s3 + $0xc0] sm:$0xff] %v7061_v60  ;;  %7088 = vpow2.f32 %v6233_v34  ;;  %v5120_v34 = vadd.f32 %v9215_v3, %v5049_v54 }
 0x47e   : > { %v7065_v57 = vpop.eup %7064  ;;  %5543 = vst [vmem:[%s9491_s3 + $0xc8] sm:$0xff] %v7063_v59  ;;  %7090 = vpow2.f32 %v6234_v9  ;;  %v5121_v9 = vadd.f32 %v9215_v3, %v5050_v18  ;;  %v6244_v58 = vmul.f32 -1.442695, %v5119_v7  ;;  %v5123_v59 = vadd.f32 %v9215_v3, %v5052_v5 }
 0x47f   : > { %v7067_v49 = vpop.eup %7066  ;;  %5544 = vst [vmem:[%s9491_s3 + $0xd0] sm:$0xff] %v7065_v57  ;;  %7092 = vpow2.f32 %v6235_v41  ;;  %v6243_v41 = vmul.f32 -1.442695, %v5118_v36  ;;  %v6245_v57 = vmul.f32 -1.442695, %v5120_v34 }
 0x480   : > { %v7069_v6 = vpop.eup %7068  ;;  %5545 = vst [vmem:[%s9491_s3 + $0xd8] sm:$0xff] %v7067_v49  ;;  %7094 = vpow2.f32 %v6236_v27 }
 0x481   : > { %v7071_v23 = vpop.eup %7070  ;;  %5546 = vst [vmem:[%s9491_s3 + $0xe0] sm:$0xff] %v7069_v6  ;;  %7096 = vpow2.f32 %v6237_v33  ;;  %v5055_v33 = vld [vmem:[#allocation2 + $0x198] sm:$0xff]  ;;  %v5125_v6 = vadd.f32 %v9215_v3, %v5054_v55 }
 0x482   : > { %v7073_v11 = vpop.eup %7072  ;;  %5547 = vst [vmem:[%s9491_s3 + $0xe8] sm:$0xff] %v7071_v23  ;;  %7098 = vpow2.f32 %v6238_v44  ;;  %v5124_v44 = vadd.f32 %v9215_v3, %v5053_v22 }
 0x483   : > { %v7075_v45 = vpop.eup %7074  ;;  %5548 = vst [vmem:[%s9491_s3 + $0xf0] sm:$0xff] %v7073_v11  ;;  %7100 = vpow2.f32 %v6239_v61  ;;  %v6246_v61 = vmul.f32 -1.442695, %v5121_v9  ;;  %v5126_v11 = vadd.f32 %v9215_v3, %v5055_v33 }
 0x484   : > { %v7077_v28 = vpop.eup %7076  ;;  %5549 = vst [vmem:[%s9491_s3 + $0xf8] sm:$0xff] %v7075_v45  ;;  %7102 = vpow2.f32 %v6240_v4  ;;  %v5057_v4 = vld [vmem:[#allocation2 + $0xc0] sm:$0xff] }
 0x485   : > { %v7079_v15 = vpop.eup %7078  ;;  %v5358_v10 = vadd.f32 1.0, %v7077_v28  ;;  %7104 = vpow2.f32 %v6241_v51  ;;  %v6247_v51 = vmul.f32 -1.442695, %v5122_v13  ;;  %v6248_v28 = vmul.f32 -1.442695, %v5123_v59 }
 0x486   : > { %v7081_v39 = vpop.eup %7080  ;;  %v5359_v62 = vadd.f32 1.0, %v7079_v15  ;;  %7106 = vpow2.f32 %v6242_v47  ;;  %v5058_v47 = vld [vmem:[#allocation2 + $0x1c0] sm:$0xff]  ;;  %v5127_v15 = vadd.f32 %v9215_v3, %v5056_v12 }
 0x487   : > { %v7083_v0 = vpop.eup %7082  ;;  %7108 = vrcp.f32 %v5358_v10  ;;  %v5360_v52 = vadd.f32 1.0, %v7081_v39  ;;  %v5059_v10 = vld [vmem:[#allocation2 + $0x158] sm:$0xff] }
 0x488   : > { %v7085_v40 = vpop.eup %7084  ;;  %7110 = vrcp.f32 %v5359_v62  ;;  %v5361_v1 = vadd.f32 1.0, %v7083_v0  ;;  %v6249_v62 = vmul.f32 -1.442695, %v5124_v44  ;;  %v5128_v0 = vadd.f32 %v9215_v3, %v5057_v4 }
 0x489   : > { %v7087_v14 = vpop.eup %7086  ;;  %7112 = vrcp.f32 %v5360_v52  ;;  %v5362_v53 = vadd.f32 1.0, %v7085_v40  ;;  %v5060_v52 = vld [vmem:[#allocation2 + $0x10] sm:$0xff] }
 0x48a   : > { %v7089_v30 = vpop.eup %7088  ;;  %7114 = vrcp.f32 %v5361_v1  ;;  %v5363_v37 = vadd.f32 1.0, %v7087_v14  ;;  %v6250_v1 = vmul.f32 -1.442695, %v5125_v6  ;;  %v5129_v14 = vadd.f32 %v9215_v3, %v5058_v47 }
 0x48b   : > { %v7091_v38 = vpop.eup %7090  ;;  %7116 = vrcp.f32 %v5362_v53  ;;  %v5364_v46 = vadd.f32 1.0, %v7089_v30  ;;  %v5061_v53 = vld [vmem:[#allocation2 + $0x58] sm:$0xff]  ;;  %v5131_v48 = vadd.f32 %v9215_v3, %v5060_v52 }
 0x48c   : > { %v7093_v16 = vpop.eup %7092  ;;  %7118 = vrcp.f32 %v5363_v37  ;;  %v5365_v32 = vadd.f32 1.0, %v7091_v38  ;;  %v6251_v37 = vmul.f32 -1.442695, %v5126_v11  ;;  %v5130_v38 = vadd.f32 %v9215_v3, %v5059_v10 }
 0x48d   : > { %v7095_v63 = vpop.eup %7094  ;;  %7120 = vrcp.f32 %v5364_v46  ;;  %v5366_v19 = vadd.f32 1.0, %v7093_v16  ;;  %v5062_v46 = vld [vmem:[#allocation2 + $0xa0] sm:$0xff]  ;;  %v5132_v35 = vadd.f32 %v9215_v3, %v5061_v53  ;;  %v6256_v18 = vmul.f32 -1.442695, %v5131_v48 }
 0x48e   : > { %v7097_v42 = vpop.eup %7096  ;;  %7122 = vrcp.f32 %v5365_v32  ;;  %v5367_v29 = vadd.f32 1.0, %v7095_v63  ;;  %v6252_v32 = vmul.f32 -1.442695, %v5127_v15  ;;  %v5133_v54 = vadd.f32 %v9215_v3, %v5062_v46 }
 0x48f   : > { %v7099_v56 = vpop.eup %7098  ;;  %7124 = vrcp.f32 %v5366_v19  ;;  %v5368_v21 = vadd.f32 1.0, %v7097_v42  ;;  %v6253_v19 = vmul.f32 -1.442695, %v5128_v0  ;;  %v6257_v3 = vmul.f32 -1.442695, %v5132_v35 }
 0x490   : > { %v7101_v50 = vpop.eup %7100  ;;  %7126 = vrcp.f32 %v5367_v29  ;;  %v5369_v20 = vadd.f32 1.0, %v7099_v56  ;;  %v6254_v29 = vmul.f32 -1.442695, %v5129_v14  ;;  %v6258_v7 = vmul.f32 -1.442695, %v5133_v54 }
 0x491   : > { %v7103_v25 = vpop.eup %7102  ;;  %7128 = vrcp.f32 %v5368_v21  ;;  %v5370_v43 = vadd.f32 1.0, %v7101_v50  ;;  %v6255_v21 = vmul.f32 -1.442695, %v5130_v38 }
 0x492   : > { %v7105_v31 = vpop.eup %7104  ;;  %7130 = vrcp.f32 %v5369_v20  ;;  %v5371_v2 = vadd.f32 1.0, %v7103_v25 }
 0x493   : > { %v7107_v26 = vpop.eup %7106  ;;  %7132 = vrcp.f32 %v5370_v43  ;;  %v5372_v24 = vadd.f32 1.0, %v7105_v31 }
 0x494   : > { %v7109_v60 = vpop.eup %7108  ;;  %7134 = vrcp.f32 %v5371_v2  ;;  %v5373_v27 = vadd.f32 1.0, %v7107_v26 }
 0x495   : > { %v7111_v17 = vpop.eup %7110  ;;  %5550 = vst [vmem:[%s9491_s3 + $0x100] sm:$0xff] %v7109_v60  ;;  %7136 = vrcp.f32 %v5372_v24 }
 0x496   : > { %v7113_v49 = vpop.eup %7112  ;;  %5551 = vst [vmem:[%s9491_s3 + $0x108] sm:$0xff] %v7111_v17  ;;  %7138 = vrcp.f32 %v5373_v27 }
 0x497   : > { %v7115_v23 = vpop.eup %7114  ;;  %5552 = vst [vmem:[%s9491_s3 + $0x110] sm:$0xff] %v7113_v49  ;;  %7140 = vpow2.f32 %v6243_v41 }
 0x498   : > { %v7117_v45 = vpop.eup %7116  ;;  %5553 = vst [vmem:[%s9491_s3 + $0x118] sm:$0xff] %v7115_v23  ;;  %7142 = vpow2.f32 %v6244_v58 }
 0x499   : > { %v7119_v39 = vpop.eup %7118  ;;  %5554 = vst [vmem:[%s9491_s3 + $0x120] sm:$0xff] %v7117_v45  ;;  %7144 = vpow2.f32 %v6245_v57 }
 0x49a   : > { %v7121_v40 = vpop.eup %7120  ;;  %5555 = vst [vmem:[%s9491_s3 + $0x128] sm:$0xff] %v7119_v39  ;;  %7146 = vpow2.f32 %v6246_v61 }
 0x49b   : > { %v7123_v30 = vpop.eup %7122  ;;  %5556 = vst [vmem:[%s9491_s3 + $0x130] sm:$0xff] %v7121_v40  ;;  %7148 = vpow2.f32 %v6247_v51 }
 0x49c   : > { %v7125_v16 = vpop.eup %7124  ;;  %5557 = vst [vmem:[%s9491_s3 + $0x138] sm:$0xff] %v7123_v30  ;;  %7150 = vpow2.f32 %v6248_v28 }
 0x49d   : > { %v7127_v63 = vpop.eup %7126  ;;  %5558 = vst [vmem:[%s9491_s3 + $0x140] sm:$0xff] %v7125_v16  ;;  %7152 = vpow2.f32 %v6249_v62 }
 0x49e   : > { %v7129_v42 = vpop.eup %7128  ;;  %5559 = vst [vmem:[%s9491_s3 + $0x148] sm:$0xff] %v7127_v63  ;;  %7154 = vpow2.f32 %v6250_v1 }
 0x49f   : > { %v7131_v56 = vpop.eup %7130  ;;  %5560 = vst [vmem:[%s9491_s3 + $0x150] sm:$0xff] %v7129_v42  ;;  %7156 = vpow2.f32 %v6251_v37 }
 0x4a0   : > { %v7133_v36 = vpop.eup %7132  ;;  %5561 = vst [vmem:[%s9491_s3 + $0x158] sm:$0xff] %v7131_v56  ;;  %7158 = vpow2.f32 %v6252_v32 }
 0x4a1   : > { %v7135_v50 = vpop.eup %7134  ;;  %5562 = vst [vmem:[%s9491_s3 + $0x160] sm:$0xff] %v7133_v36  ;;  %7160 = vpow2.f32 %v6253_v19 }
 0x4a2   : > { %v7137_v20 = vpop.eup %7136  ;;  %5563 = vst [vmem:[%s9491_s3 + $0x168] sm:$0xff] %v7135_v50  ;;  %7162 = vpow2.f32 %v6254_v29 }
 0x4a3   : > { %v7139_v8 = vpop.eup %7138  ;;  %5564 = vst [vmem:[%s9491_s3 + $0x170] sm:$0xff] %v7137_v20  ;;  %7164 = vpow2.f32 %v6255_v21 }
 0x4a4   : > { %v7141_v25 = vpop.eup %7140  ;;  %5565 = vst [vmem:[%s9491_s3 + $0x178] sm:$0xff] %v7139_v8  ;;  %7166 = vpow2.f32 %v6256_v18 }
 0x4a5   : > { %v7143_v43 = vpop.eup %7142  ;;  %v5374_v34 = vadd.f32 1.0, %v7141_v25  ;;  %7168 = vpow2.f32 %v6257_v3 }
 0x4a6   : > { %v7145_v5 = vpop.eup %7144  ;;  %v5375_v31 = vadd.f32 1.0, %v7143_v43  ;;  %7170 = vpow2.f32 %v6258_v7 }
 0x4a7   : > { %v7147_v2 = vpop.eup %7146  ;;  %7172 = vrcp.f32 %v5374_v34  ;;  %v5376_v9 = vadd.f32 1.0, %v7145_v5 }
 0x4a8   : > { %v7149_v22 = vpop.eup %7148  ;;  %7174 = vrcp.f32 %v5375_v31  ;;  %v5377_v26 = vadd.f32 1.0, %v7147_v2 }
 0x4a9   : > { %v7151_v24 = vpop.eup %7150  ;;  %7176 = vrcp.f32 %v5376_v9  ;;  %v5378_v41 = vadd.f32 1.0, %v7149_v22 }
 0x4aa   : > { %v7153_v13 = vpop.eup %7152  ;;  %7178 = vrcp.f32 %v5377_v26  ;;  %v5379_v55 = vadd.f32 1.0, %v7151_v24 }
 0x4ab   : > { %v7155_v60 = vpop.eup %7154  ;;  %7180 = vrcp.f32 %v5378_v41  ;;  %v5380_v27 = vadd.f32 1.0, %v7153_v13 }
 0x4ac   : > { %v7157_v58 = vpop.eup %7156  ;;  %7182 = vrcp.f32 %v5379_v55  ;;  %v5381_v59 = vadd.f32 1.0, %v7155_v60 }
 0x4ad   : > { %v7159_v33 = vpop.eup %7158  ;;  %7184 = vrcp.f32 %v5380_v27  ;;  %v5382_v17 = vadd.f32 1.0, %v7157_v58 }
 0x4ae   : > { %v7161_v57 = vpop.eup %7160  ;;  %7186 = vrcp.f32 %v5381_v59  ;;  %v5383_v44 = vadd.f32 1.0, %v7159_v33 }
 0x4af   : > { %v7163_v12 = vpop.eup %7162  ;;  %7188 = vrcp.f32 %v5382_v17  ;;  %v5384_v49 = vadd.f32 1.0, %v7161_v57 }
 0x4b0   : > { %v7165_v61 = vpop.eup %7164  ;;  %7190 = vrcp.f32 %v5383_v44  ;;  %v5385_v6 = vadd.f32 1.0, %v7163_v12 }
 0x4b1   : > { %v7167_v4 = vpop.eup %7166  ;;  %7192 = vrcp.f32 %v5384_v49  ;;  %v5386_v23 = vadd.f32 1.0, %v7165_v61 }
 0x4b2   : > { %v7169_v51 = vpop.eup %7168  ;;  %7194 = vrcp.f32 %v5385_v6  ;;  %v5387_v11 = vadd.f32 1.0, %v7167_v4 }
 0x4b3   : > { %v7171_v47 = vpop.eup %7170  ;;  %7196 = vrcp.f32 %v5386_v23  ;;  %v5388_v45 = vadd.f32 1.0, %v7169_v51 }
 0x4b4   : > { %v7173_v28 = vpop.eup %7172  ;;  %7198 = vrcp.f32 %v5387_v11  ;;  %v5389_v15 = vadd.f32 1.0, %v7171_v47 }
 0x4b5   : > { %v7175_v10 = vpop.eup %7174  ;;  %5566 = vst [vmem:[%s9491_s3 + $0x180] sm:$0xff] %v7173_v28  ;;  %7200 = vrcp.f32 %v5388_v45 }
 0x4b6   : > { %v7177_v39 = vpop.eup %7176  ;;  %5567 = vst [vmem:[%s9491_s3 + $0x188] sm:$0xff] %v7175_v10  ;;  %7202 = vrcp.f32 %v5389_v15 }
 0x4b7   : > { %v7179_v62 = vpop.eup %7178  ;;  %5568 = vst [vmem:[%s9491_s3 + $0x190] sm:$0xff] %v7177_v39 }
 0x4b8   : > { %v7181_v0 = vpop.eup %7180  ;;  %5569 = vst [vmem:[%s9491_s3 + $0x198] sm:$0xff] %v7179_v62 }
 0x4b9   : > { %v7183_v52 = vpop.eup %7182  ;;  %5570 = vst [vmem:[%s9491_s3 + $0x1a0] sm:$0xff] %v7181_v0 }
 0x4ba   : > { %v7185_v40 = vpop.eup %7184  ;;  %5571 = vst [vmem:[%s9491_s3 + $0x1a8] sm:$0xff] %v7183_v52 }
 0x4bb   : > { %v7187_v1 = vpop.eup %7186  ;;  %5572 = vst [vmem:[%s9491_s3 + $0x1b0] sm:$0xff] %v7185_v40 }
 0x4bc   : > { %v7189_v14 = vpop.eup %7188  ;;  %5573 = vst [vmem:[%s9491_s3 + $0x1b8] sm:$0xff] %v7187_v1 }
 0x4bd   : > { %v7191_v53 = vpop.eup %7190  ;;  %5574 = vst [vmem:[%s9491_s3 + $0x1c0] sm:$0xff] %v7189_v14 }
 0x4be   : > { %v7193_v30 = vpop.eup %7192  ;;  %5575 = vst [vmem:[%s9491_s3 + $0x1c8] sm:$0xff] %v7191_v53 }
 0x4bf   : > { %v7195_v37 = vpop.eup %7194  ;;  %5576 = vst [vmem:[%s9491_s3 + $0x1d0] sm:$0xff] %v7193_v30 }
 0x4c0   : > { %v7197_v38 = vpop.eup %7196  ;;  %5577 = vst [vmem:[%s9491_s3 + $0x1d8] sm:$0xff] %v7195_v37 }
 0x4c1   : > { %v7199_v46 = vpop.eup %7198  ;;  %5578 = vst [vmem:[%s9491_s3 + $0x1e0] sm:$0xff] %v7197_v38 }
 0x4c2   : > { %v7201_v16 = vpop.eup %7200  ;;  %5579 = vst [vmem:[%s9491_s3 + $0x1e8] sm:$0xff] %v7199_v46 }
 0x4c3   : > { %v7203_v32 = vpop.eup %7202  ;;  %5580 = vst [vmem:[%s9491_s3 + $0x1f0] sm:$0xff] %v7201_v16 }
 0x4c4   : > { %5581 = vst [vmem:[%s9491_s3 + $0x1f8] sm:$0xff] %v7203_v32 }
 0x4c5 PF: > { %s13_s16 = sadd.s32 1, %s7242_s16   ;;  %s9590_s12 = smov %s7230_s13 }
 0x4c6   : > { %p10_p12 = scmp.ge.s32.totalorder %s13_s16, 5   ;;  %s9591_s13 = smov %s7301_s20 }
 0x4c7   : > { %s9592_s14 = smov %s7238_s15  ;;  %s9593_s15 = smov %s9595_s17 }
 0x4c8   :  { %12 = sbr.rel (!%p10_p12) target bundleno = 3 (0x3), region = 113 }

</bundles_post_ra>
